<compile_context>
chip_gen: v7x
topology: tpu7x:2x2x1
jax: 0.10.0
libtpu: 0.0.40
codegen_flags: <defaults>
</compile_context>

<pallas_src>
import jax
import jax.numpy as jnp
from jax import lax
from jax.experimental import pallas as pl
from jax.experimental.pallas import tpu as pltpu


def _double_conv_kernel(x_ref, w1_ref, s1_ref, b1_ref, w2_ref, s2_ref, b2_ref,
                        o_ref, xpad_ref, mid_ref):
    """Fused (conv3x3 + BN + ReLU) x 2 for one batch item.

    x_ref   : (1, H, W, Cin)      bf16  unpadded NHWC input tile
    w1_ref  : (3, 3, Cin, Cmid)   bf16  conv1 weights (HWIO)
    s1_ref  : (1, Cmid)           f32   folded BN1 scale
    b1_ref  : (1, Cmid)           f32   folded BN1 bias (incl. conv1 bias)
    w2_ref  : (3, 3, Cmid, Cout)  bf16  conv2 weights (HWIO)
    s2_ref  : (Cout, 1)           f32   folded BN2 scale (sublane broadcast)
    b2_ref  : (Cout, 1)           f32   folded BN2 bias
    o_ref   : (1, Cout, H*W)      f32   lane-dense NCHW output tile
    xpad_ref: (H+2, W+2, Cin)     bf16  VMEM scratch (zero halo for conv1)
    mid_ref : (H+2, W+2, Cmid)    bf16  VMEM scratch (intermediate, zero halo)
    """
    H = x_ref.shape[1]
    W = x_ref.shape[2]
    Cin = x_ref.shape[3]
    Cmid = mid_ref.shape[2]
    Cout = o_ref.shape[1]

    def conv3x3(src_ref, cin, w_ref, cout):
        # 3x3 conv as 9 shifted (H*W, cin) x (cin, cout) bf16 matmuls with f32
        # accumulation.  Each patch is a ref-window load (already bf16), so no
        # per-patch casts and no full padded array kept live in vregs.  (A
        # single im2col matmul would need a lane-dim concatenate of
        # non-128-aligned tiles, which is a lowering risk; the 9 MXU pushes are
        # cheap relative to DMA/epilogue at these sizes.)
        acc = jnp.zeros((H * W, cout), dtype=jnp.float32)
        for kh in range(3):
            for kw in range(3):
                patch = src_ref[pl.ds(kh, H), pl.ds(kw, W), :]       # (H, W, cin) bf16
                acc = acc + jnp.dot(patch.reshape(H * W, cin), w_ref[kh, kw],
                                    preferred_element_type=jnp.float32)
        return acc

    # ---- Stage 1: pad input into VMEM, conv1 + BN1 + ReLU -------------------
    # Scratch is re-zeroed every grid step: with a "parallel" batch axis each
    # TensorCore owns its own scratch, so a program_id==0 one-shot init would
    # leave the other core's halo uninitialised.  The buffers are tiny (a few
    # KiB of bf16), so this is a handful of vector stores.
    xpad_ref[...] = jnp.zeros_like(xpad_ref)
    xpad_ref[1:H + 1, 1:W + 1, :] = x_ref[0]                         # already bf16
    y1 = conv3x3(xpad_ref, Cin, w1_ref, Cmid)                        # (H*W, Cmid) f32
    y1 = jnp.maximum(y1 * s1_ref[...] + b1_ref[...], 0.0)            # folded BN1 + ReLU

    # ---- Stage 2: intermediate stays in VMEM, in-kernel halo, conv2+BN2+ReLU
    mid_ref[...] = jnp.zeros_like(mid_ref)
    mid_ref[1:H + 1, 1:W + 1, :] = y1.reshape(H, W, Cmid).astype(jnp.bfloat16)
    y2 = conv3x3(mid_ref, Cmid, w2_ref, Cout)                        # (H*W, Cout) f32

    # Lane-dense NCHW epilogue: (Cout, H*W) puts spatial on the lane axis so
    # the folded BN2 + ReLU run on full 256-wide vregs and the store is
    # unmasked (no masked narrow vst).
    y2t = y2.T                                                       # (Cout, H*W)
    y2t = jnp.maximum(y2t * s2_ref[...] + b2_ref[...], 0.0)
    o_ref[0] = y2t.astype(o_ref.dtype)


def _fold_bn(conv_bias, gamma, beta, mean, var, eps=1e-5):
    scale = gamma / jnp.sqrt(var + eps)
    bias = beta - mean * scale + conv_bias * scale
    return scale, bias


@jax.jit
def double_conv(x_nchw, params):
    """Forward pass of DoubleConv. Input/output are NCHW like PyTorch."""
    N, Cin, H, W = x_nchw.shape
    Cmid = params["w1"].shape[-1]
    Cout = params["w2"].shape[-1]

    # One NCHW->NHWC transpose on the (small) input so channels sit on the MXU
    # contraction axis; the kernel writes NCHW directly (no output transpose).
    x = jnp.transpose(x_nchw, (0, 2, 3, 1)).astype(jnp.bfloat16)

    w1 = params["w1"].astype(jnp.bfloat16)
    w2 = params["w2"].astype(jnp.bfloat16)

    s1, b1 = _fold_bn(params["b1"], params["bn1_gamma"], params["bn1_beta"],
                      params["bn1_mean"], params["bn1_var"])
    s2, b2 = _fold_bn(params["b2"], params["bn2_gamma"], params["bn2_beta"],
                      params["bn2_mean"], params["bn2_var"])

    out = pl.pallas_call(
        _double_conv_kernel,
        out_shape=jax.ShapeDtypeStruct((N, Cout, H * W), jnp.float32),
        grid_spec=pltpu.PrefetchScalarGridSpec(
            num_scalar_prefetch=0,
            grid=(N,),
            in_specs=[
                pl.BlockSpec((1, H, W, Cin), lambda n: (n, 0, 0, 0)),
                pl.BlockSpec((3, 3, Cin, Cmid), lambda n: (0, 0, 0, 0)),
                pl.BlockSpec((1, Cmid), lambda n: (0, 0)),
                pl.BlockSpec((1, Cmid), lambda n: (0, 0)),
                pl.BlockSpec((3, 3, Cmid, Cout), lambda n: (0, 0, 0, 0)),
                pl.BlockSpec((Cout, 1), lambda n: (0, 0)),
                pl.BlockSpec((Cout, 1), lambda n: (0, 0)),
            ],
            out_specs=pl.BlockSpec((1, Cout, H * W), lambda n: (n, 0, 0)),
            scratch_shapes=[
                pltpu.VMEM((H + 2, W + 2, Cin), jnp.bfloat16),
                pltpu.VMEM((H + 2, W + 2, Cmid), jnp.bfloat16),
            ]),
        compiler_params=pltpu.CompilerParams(
            dimension_semantics=("parallel",),      # v7x: one batch item per TC
            vmem_limit_bytes=48 * 1024 * 1024),     # headroom beyond scoped default
    )(x, w1,
      s1.reshape(1, Cmid).astype(jnp.float32),
      b1.reshape(1, Cmid).astype(jnp.float32),
      w2,
      s2.reshape(Cout, 1).astype(jnp.float32),
      b2.reshape(Cout, 1).astype(jnp.float32))

    # (N, Cout, H*W) -> (N, Cout, H, W): splits the minor dim, effectively free.
    return out.reshape(N, Cout, H, W)


def make_double_conv_params(key, in_channels, out_channels, mid_channels=None):
    if not mid_channels:
        mid_channels = out_channels
    ks = jax.random.split(key, 8)

    def conv_w(k, cin, cout):
        # PyTorch layout (cout, cin, 3, 3); kernel wants HWIO (3, 3, cin, cout).
        w = jax.random.normal(k, (cout, cin, 3, 3), jnp.float32) * 0.1
        return jnp.transpose(w, (2, 3, 1, 0))

    p = {
        "w1": conv_w(ks[0], in_channels, mid_channels),
        "b1": jax.random.normal(ks[1], (mid_channels,), jnp.float32) * 0.1,
        "bn1_gamma": 1.0 + 0.1 * jax.random.normal(ks[2], (mid_channels,), jnp.float32),
        "bn1_beta": 0.1 * jax.random.normal(ks[3], (mid_channels,), jnp.float32),
        "bn1_mean": 0.05 * jnp.arange(mid_channels, dtype=jnp.float32),
        "bn1_var": 1.0 + 0.1 * jnp.arange(mid_channels, dtype=jnp.float32),
        "w2": conv_w(ks[4], mid_channels, out_channels),
        "b2": jax.random.normal(ks[5], (out_channels,), jnp.float32) * 0.1,
        "bn2_gamma": 1.0 + 0.1 * jax.random.normal(ks[6], (out_channels,), jnp.float32),
        "bn2_beta": 0.1 * jax.random.normal(ks[7], (out_channels,), jnp.float32),
        "bn2_mean": 0.02 * jnp.arange(out_channels, dtype=jnp.float32),
        "bn2_var": 1.0 + 0.05 * jnp.arange(out_channels, dtype=jnp.float32),
    }
    return p


def _reference(x_nchw, params):
    """Pure-JAX reference. Conv inputs are cast to bf16 with f32 accumulation,
    mirroring the kernel's MXU precision so the comparison stays tight."""
    def conv_bn_relu(x, w_hwio, bias, gamma, beta, mean, var):
        w_oihw = jnp.transpose(w_hwio, (3, 2, 0, 1)).astype(jnp.bfloat16)
        y = lax.conv_general_dilated(
            x.astype(jnp.bfloat16), w_oihw, window_strides=(1, 1),
            padding=((1, 1), (1, 1)),
            dimension_numbers=("NCHW", "OIHW", "NCHW"),
            preferred_element_type=jnp.float32)
        y = y + bias[None, :, None, None]
        y = (y - mean[None, :, None, None]) / jnp.sqrt(var[None, :, None, None] + 1e-5)
        y = y * gamma[None, :, None, None] + beta[None, :, None, None]
        return jnp.maximum(y, 0.0)

    y = conv_bn_relu(x_nchw, params["w1"], params["b1"], params["bn1_gamma"],
                     params["bn1_beta"], params["bn1_mean"], params["bn1_var"])
    y = conv_bn_relu(y, params["w2"], params["b2"], params["bn2_gamma"],
                     params["bn2_beta"], params["bn2_mean"], params["bn2_var"])
    return y


if __name__ == "__main__":
    key = jax.random.PRNGKey(0)
    k_x, k_p = jax.random.split(key)

    N, C_in, H, W = 2, 4, 16, 16
    C_out = 8

    x = jax.random.normal(k_x, (N, C_in, H, W), jnp.float32)
    params = make_double_conv_params(k_p, C_in, C_out)

    out = double_conv(x, params)
    out = jax.block_until_ready(out)

    ref = _reference(x, params)
    assert out.shape == (N, C_out, H, W), out.shape
    max_err = float(jnp.max(jnp.abs(out - ref)))
    assert jnp.allclose(out, ref, atol=2e-3, rtol=2e-3), max_err

    print("KERNEL_OK")
</pallas_src>

<mosaic_0001>
module attributes {stable_mosaic.version = 11 : i64} {
  func.func @_double_conv_kernel(%arg0: i32, %arg1: memref<1x16x16x4xbf16, #tpu.memory_space<vmem>>, %arg2: memref<3x3x4x8xbf16, #tpu.memory_space<vmem>>, %arg3: memref<1x8xf32, #tpu.memory_space<vmem>>, %arg4: memref<1x8xf32, #tpu.memory_space<vmem>>, %arg5: memref<3x3x8x8xbf16, #tpu.memory_space<vmem>>, %arg6: memref<8x1xf32, #tpu.memory_space<vmem>>, %arg7: memref<8x1xf32, #tpu.memory_space<vmem>>, %arg8: memref<1x8x256xf32, #tpu.memory_space<vmem>>, %arg9: memref<18x18x4xbf16, #tpu.memory_space<vmem>>, %arg10: memref<18x18x8xbf16, #tpu.memory_space<vmem>>) attributes {dimension_semantics = [#tpu.dimension_semantics<parallel>], iteration_bounds = array<i64: 2>, scalar_prefetch = 0 : i64, scratch_operands = 2 : i64, tpu.core_type = #tpu.core_type<tc>, window_params = [{transform_indices = @transform_0, window_bounds = array<i64: 1, 16, 16, 4>}, {pipeline_mode = #tpu.pipeline_mode<synchronous>, transform_indices = @transform_1, window_bounds = array<i64: 3, 3, 4, 8>}, {pipeline_mode = #tpu.pipeline_mode<synchronous>, transform_indices = @transform_2, window_bounds = array<i64: 1, 8>}, {pipeline_mode = #tpu.pipeline_mode<synchronous>, transform_indices = @transform_3, window_bounds = array<i64: 1, 8>}, {pipeline_mode = #tpu.pipeline_mode<synchronous>, transform_indices = @transform_4, window_bounds = array<i64: 3, 3, 8, 8>}, {pipeline_mode = #tpu.pipeline_mode<synchronous>, transform_indices = @transform_5, window_bounds = array<i64: 8, 1>}, {pipeline_mode = #tpu.pipeline_mode<synchronous>, transform_indices = @transform_6, window_bounds = array<i64: 8, 1>}, {transform_indices = @transform_7, window_bounds = array<i64: 1, 8, 256>}]} {
    %cst = arith.constant 0.000000e+00 : bf16
    %0 = vector.broadcast %cst : bf16 to vector<18x18x4xbf16>
    %c0 = arith.constant 0 : index
    %c0_0 = arith.constant 0 : index
    %c0_1 = arith.constant 0 : index
    %1 = vector.load %arg9[%c0, %c0_0, %c0_1] : memref<18x18x4xbf16, #tpu.memory_space<vmem>>, vector<18x18x4xbf16>
    tpu.vector_store %arg9[%c0, %c0_0, %c0_1], %0 {strides = array<i32>} : memref<18x18x4xbf16, #tpu.memory_space<vmem>>, vector<18x18x4xbf16>,
    %c0_2 = arith.constant 0 : index
    %c0_3 = arith.constant 0 : index
    %c0_4 = arith.constant 0 : index
    %c0_5 = arith.constant 0 : index
    %2 = vector.load %arg1[%c0_2, %c0_3, %c0_4, %c0_5] : memref<1x16x16x4xbf16, #tpu.memory_space<vmem>>, vector<1x16x16x4xbf16>
    %3 = vector.shape_cast %2 : vector<1x16x16x4xbf16> to vector<16x16x4xbf16>
    %c1 = arith.constant 1 : index
    %c1_6 = arith.constant 1 : index
    %c0_7 = arith.constant 0 : index
    %4 = vector.load %arg9[%c1, %c1_6, %c0_7] : memref<18x18x4xbf16, #tpu.memory_space<vmem>>, vector<16x16x4xbf16>
    tpu.vector_store %arg9[%c1, %c1_6, %c0_7], %3 {strides = array<i32>} : memref<18x18x4xbf16, #tpu.memory_space<vmem>>, vector<16x16x4xbf16>,
    %cst_8 = arith.constant 0.000000e+00 : f32
    %5 = vector.broadcast %cst_8 : f32 to vector<256x8xf32>
    %c0_9 = arith.constant 0 : index
    %c0_10 = arith.constant 0 : index
    %c0_11 = arith.constant 0 : index
    %6 = vector.load %arg9[%c0_9, %c0_10, %c0_11] : memref<18x18x4xbf16, #tpu.memory_space<vmem>>, vector<16x16x4xbf16>
    %7 = vector.shape_cast %6 : vector<16x16x4xbf16> to vector<256x4xbf16>
    %c0_12 = arith.constant 0 : index
    %c0_13 = arith.constant 0 : index
    %c0_14 = arith.constant 0 : index
    %c0_15 = arith.constant 0 : index
    %8 = vector.load %arg2[%c0_12, %c0_13, %c0_14, %c0_15] : memref<3x3x4x8xbf16, #tpu.memory_space<vmem>>, vector<1x1x4x8xbf16>
    %9 = vector.shape_cast %8 : vector<1x1x4x8xbf16> to vector<4x8xbf16>
    %cst_16 = arith.constant dense<0.000000e+00> : vector<256x8xf32>
    %10 = tpu.matmul %7, %9, %cst_16 {dimension_numbers = #tpu.dot_dimension_numbers<[1], [0], [0], [1], [0, 0, 1, 1], [], []>} : vector<256x4xbf16>, vector<4x8xbf16>, vector<256x8xf32> -> vector<256x8xf32>
    %11 = arith.addf %5, %10 : vector<256x8xf32>
    %c0_17 = arith.constant 0 : index
    %c1_18 = arith.constant 1 : index
    %c0_19 = arith.constant 0 : index
    %12 = vector.load %arg9[%c0_17, %c1_18, %c0_19] : memref<18x18x4xbf16, #tpu.memory_space<vmem>>, vector<16x16x4xbf16>
    %13 = vector.shape_cast %12 : vector<16x16x4xbf16> to vector<256x4xbf16>
    %c0_20 = arith.constant 0 : index
    %c1_21 = arith.constant 1 : index
    %c0_22 = arith.constant 0 : index
    %c0_23 = arith.constant 0 : index
    %14 = vector.load %arg2[%c0_20, %c1_21, %c0_22, %c0_23] : memref<3x3x4x8xbf16, #tpu.memory_space<vmem>>, vector<1x1x4x8xbf16>
    %15 = vector.shape_cast %14 : vector<1x1x4x8xbf16> to vector<4x8xbf16>
    %cst_24 = arith.constant dense<0.000000e+00> : vector<256x8xf32>
    %16 = tpu.matmul %13, %15, %cst_24 {dimension_numbers = #tpu.dot_dimension_numbers<[1], [0], [0], [1], [0, 0, 1, 1], [], []>} : vector<256x4xbf16>, vector<4x8xbf16>, vector<256x8xf32> -> vector<256x8xf32>
    %17 = arith.addf %11, %16 : vector<256x8xf32>
    %c0_25 = arith.constant 0 : index
    %c2 = arith.constant 2 : index
    %c0_26 = arith.constant 0 : index
    %18 = vector.load %arg9[%c0_25, %c2, %c0_26] : memref<18x18x4xbf16, #tpu.memory_space<vmem>>, vector<16x16x4xbf16>
    %19 = vector.shape_cast %18 : vector<16x16x4xbf16> to vector<256x4xbf16>
    %c0_27 = arith.constant 0 : index
    %c2_28 = arith.constant 2 : index
    %c0_29 = arith.constant 0 : index
    %c0_30 = arith.constant 0 : index
    %20 = vector.load %arg2[%c0_27, %c2_28, %c0_29, %c0_30] : memref<3x3x4x8xbf16, #tpu.memory_space<vmem>>, vector<1x1x4x8xbf16>
    %21 = vector.shape_cast %20 : vector<1x1x4x8xbf16> to vector<4x8xbf16>
    %cst_31 = arith.constant dense<0.000000e+00> : vector<256x8xf32>
    %22 = tpu.matmul %19, %21, %cst_31 {dimension_numbers = #tpu.dot_dimension_numbers<[1], [0], [0], [1], [0, 0, 1, 1], [], []>} : vector<256x4xbf16>, vector<4x8xbf16>, vector<256x8xf32> -> vector<256x8xf32>
    %23 = arith.addf %17, %22 : vector<256x8xf32>
    %c1_32 = arith.constant 1 : index
    %c0_33 = arith.constant 0 : index
    %c0_34 = arith.constant 0 : index
    %24 = vector.load %arg9[%c1_32, %c0_33, %c0_34] : memref<18x18x4xbf16, #tpu.memory_space<vmem>>, vector<16x16x4xbf16>
    %25 = vector.shape_cast %24 : vector<16x16x4xbf16> to vector<256x4xbf16>
    %c1_35 = arith.constant 1 : index
    %c0_36 = arith.constant 0 : index
    %c0_37 = arith.constant 0 : index
    %c0_38 = arith.constant 0 : index
    %26 = vector.load %arg2[%c1_35, %c0_36, %c0_37, %c0_38] : memref<3x3x4x8xbf16, #tpu.memory_space<vmem>>, vector<1x1x4x8xbf16>
    %27 = vector.shape_cast %26 : vector<1x1x4x8xbf16> to vector<4x8xbf16>
    %cst_39 = arith.constant dense<0.000000e+00> : vector<256x8xf32>
    %28 = tpu.matmul %25, %27, %cst_39 {dimension_numbers = #tpu.dot_dimension_numbers<[1], [0], [0], [1], [0, 0, 1, 1], [], []>} : vector<256x4xbf16>, vector<4x8xbf16>, vector<256x8xf32> -> vector<256x8xf32>
    %29 = arith.addf %23, %28 : vector<256x8xf32>
    %c1_40 = arith.constant 1 : index
    %c1_41 = arith.constant 1 : index
    %c0_42 = arith.constant 0 : index
    %30 = vector.load %arg9[%c1_40, %c1_41, %c0_42] : memref<18x18x4xbf16, #tpu.memory_space<vmem>>, vector<16x16x4xbf16>
    %31 = vector.shape_cast %30 : vector<16x16x4xbf16> to vector<256x4xbf16>
    %c1_43 = arith.constant 1 : index
    %c1_44 = arith.constant 1 : index
    %c0_45 = arith.constant 0 : index
    %c0_46 = arith.constant 0 : index
    %32 = vector.load %arg2[%c1_43, %c1_44, %c0_45, %c0_46] : memref<3x3x4x8xbf16, #tpu.memory_space<vmem>>, vector<1x1x4x8xbf16>
    %33 = vector.shape_cast %32 : vector<1x1x4x8xbf16> to vector<4x8xbf16>
    %cst_47 = arith.constant dense<0.000000e+00> : vector<256x8xf32>
    %34 = tpu.matmul %31, %33, %cst_47 {dimension_numbers = #tpu.dot_dimension_numbers<[1], [0], [0], [1], [0, 0, 1, 1], [], []>} : vector<256x4xbf16>, vector<4x8xbf16>, vector<256x8xf32> -> vector<256x8xf32>
    %35 = arith.addf %29, %34 : vector<256x8xf32>
    %c1_48 = arith.constant 1 : index
    %c2_49 = arith.constant 2 : index
    %c0_50 = arith.constant 0 : index
    %36 = vector.load %arg9[%c1_48, %c2_49, %c0_50] : memref<18x18x4xbf16, #tpu.memory_space<vmem>>, vector<16x16x4xbf16>
    %37 = vector.shape_cast %36 : vector<16x16x4xbf16> to vector<256x4xbf16>
    %c1_51 = arith.constant 1 : index
    %c2_52 = arith.constant 2 : index
    %c0_53 = arith.constant 0 : index
    %c0_54 = arith.constant 0 : index
    %38 = vector.load %arg2[%c1_51, %c2_52, %c0_53, %c0_54] : memref<3x3x4x8xbf16, #tpu.memory_space<vmem>>, vector<1x1x4x8xbf16>
    %39 = vector.shape_cast %38 : vector<1x1x4x8xbf16> to vector<4x8xbf16>
    %cst_55 = arith.constant dense<0.000000e+00> : vector<256x8xf32>
    %40 = tpu.matmul %37, %39, %cst_55 {dimension_numbers = #tpu.dot_dimension_numbers<[1], [0], [0], [1], [0, 0, 1, 1], [], []>} : vector<256x4xbf16>, vector<4x8xbf16>, vector<256x8xf32> -> vector<256x8xf32>
    %41 = arith.addf %35, %40 : vector<256x8xf32>
    %c2_56 = arith.constant 2 : index
    %c0_57 = arith.constant 0 : index
    %c0_58 = arith.constant 0 : index
    %42 = vector.load %arg9[%c2_56, %c0_57, %c0_58] : memref<18x18x4xbf16, #tpu.memory_space<vmem>>, vector<16x16x4xbf16>
    %43 = vector.shape_cast %42 : vector<16x16x4xbf16> to vector<256x4xbf16>
    %c2_59 = arith.constant 2 : index
    %c0_60 = arith.constant 0 : index
    %c0_61 = arith.constant 0 : index
    %c0_62 = arith.constant 0 : index
    %44 = vector.load %arg2[%c2_59, %c0_60, %c0_61, %c0_62] : memref<3x3x4x8xbf16, #tpu.memory_space<vmem>>, vector<1x1x4x8xbf16>
    %45 = vector.shape_cast %44 : vector<1x1x4x8xbf16> to vector<4x8xbf16>
    %cst_63 = arith.constant dense<0.000000e+00> : vector<256x8xf32>
    %46 = tpu.matmul %43, %45, %cst_63 {dimension_numbers = #tpu.dot_dimension_numbers<[1], [0], [0], [1], [0, 0, 1, 1], [], []>} : vector<256x4xbf16>, vector<4x8xbf16>, vector<256x8xf32> -> vector<256x8xf32>
    %47 = arith.addf %41, %46 : vector<256x8xf32>
    %c2_64 = arith.constant 2 : index
    %c1_65 = arith.constant 1 : index
    %c0_66 = arith.constant 0 : index
    %48 = vector.load %arg9[%c2_64, %c1_65, %c0_66] : memref<18x18x4xbf16, #tpu.memory_space<vmem>>, vector<16x16x4xbf16>
    %49 = vector.shape_cast %48 : vector<16x16x4xbf16> to vector<256x4xbf16>
    %c2_67 = arith.constant 2 : index
    %c1_68 = arith.constant 1 : index
    %c0_69 = arith.constant 0 : index
    %c0_70 = arith.constant 0 : index
    %50 = vector.load %arg2[%c2_67, %c1_68, %c0_69, %c0_70] : memref<3x3x4x8xbf16, #tpu.memory_space<vmem>>, vector<1x1x4x8xbf16>
    %51 = vector.shape_cast %50 : vector<1x1x4x8xbf16> to vector<4x8xbf16>
    %cst_71 = arith.constant dense<0.000000e+00> : vector<256x8xf32>
    %52 = tpu.matmul %49, %51, %cst_71 {dimension_numbers = #tpu.dot_dimension_numbers<[1], [0], [0], [1], [0, 0, 1, 1], [], []>} : vector<256x4xbf16>, vector<4x8xbf16>, vector<256x8xf32> -> vector<256x8xf32>
    %53 = arith.addf %47, %52 : vector<256x8xf32>
    %c2_72 = arith.constant 2 : index
    %c2_73 = arith.constant 2 : index
    %c0_74 = arith.constant 0 : index
    %54 = vector.load %arg9[%c2_72, %c2_73, %c0_74] : memref<18x18x4xbf16, #tpu.memory_space<vmem>>, vector<16x16x4xbf16>
    %55 = vector.shape_cast %54 : vector<16x16x4xbf16> to vector<256x4xbf16>
    %c2_75 = arith.constant 2 : index
    %c2_76 = arith.constant 2 : index
    %c0_77 = arith.constant 0 : index
    %c0_78 = arith.constant 0 : index
    %56 = vector.load %arg2[%c2_75, %c2_76, %c0_77, %c0_78] : memref<3x3x4x8xbf16, #tpu.memory_space<vmem>>, vector<1x1x4x8xbf16>
    %57 = vector.shape_cast %56 : vector<1x1x4x8xbf16> to vector<4x8xbf16>
    %cst_79 = arith.constant dense<0.000000e+00> : vector<256x8xf32>
    %58 = tpu.matmul %55, %57, %cst_79 {dimension_numbers = #tpu.dot_dimension_numbers<[1], [0], [0], [1], [0, 0, 1, 1], [], []>} : vector<256x4xbf16>, vector<4x8xbf16>, vector<256x8xf32> -> vector<256x8xf32>
    %59 = arith.addf %53, %58 : vector<256x8xf32>
    %c0_80 = arith.constant 0 : index
    %c0_81 = arith.constant 0 : index
    %60 = vector.load %arg3[%c0_80, %c0_81] : memref<1x8xf32, #tpu.memory_space<vmem>>, vector<1x8xf32>
    %61 = vector.broadcast %60 : vector<1x8xf32> to vector<256x8xf32>
    %62 = arith.mulf %59, %61 : vector<256x8xf32>
    %c0_82 = arith.constant 0 : index
    %c0_83 = arith.constant 0 : index
    %63 = vector.load %arg4[%c0_82, %c0_83] : memref<1x8xf32, #tpu.memory_space<vmem>>, vector<1x8xf32>
    %64 = vector.broadcast %63 : vector<1x8xf32> to vector<256x8xf32>
    %65 = arith.addf %62, %64 : vector<256x8xf32>
    %cst_84 = arith.constant 0.000000e+00 : f32
    %66 = vector.broadcast %cst_84 : f32 to vector<256x8xf32>
    %67 = arith.maximumf %65, %66 : vector<256x8xf32>
    %cst_85 = arith.constant 0.000000e+00 : bf16
    %68 = vector.broadcast %cst_85 : bf16 to vector<18x18x8xbf16>
    %c0_86 = arith.constant 0 : index
    %c0_87 = arith.constant 0 : index
    %c0_88 = arith.constant 0 : index
    %69 = vector.load %arg10[%c0_86, %c0_87, %c0_88] : memref<18x18x8xbf16, #tpu.memory_space<vmem>>, vector<18x18x8xbf16>
    tpu.vector_store %arg10[%c0_86, %c0_87, %c0_88], %68 {strides = array<i32>} : memref<18x18x8xbf16, #tpu.memory_space<vmem>>, vector<18x18x8xbf16>,
    %70 = vector.shape_cast %67 : vector<256x8xf32> to vector<16x16x8xf32>
    %71 = arith.truncf %70 : vector<16x16x8xf32> to vector<16x16x8xbf16>
    %c1_89 = arith.constant 1 : index
    %c1_90 = arith.constant 1 : index
    %c0_91 = arith.constant 0 : index
    %72 = vector.load %arg10[%c1_89, %c1_90, %c0_91] : memref<18x18x8xbf16, #tpu.memory_space<vmem>>, vector<16x16x8xbf16>
    tpu.vector_store %arg10[%c1_89, %c1_90, %c0_91], %71 {strides = array<i32>} : memref<18x18x8xbf16, #tpu.memory_space<vmem>>, vector<16x16x8xbf16>,
    %cst_92 = arith.constant 0.000000e+00 : f32
    %73 = vector.broadcast %cst_92 : f32 to vector<256x8xf32>
    %c0_93 = arith.constant 0 : index
    %c0_94 = arith.constant 0 : index
    %c0_95 = arith.constant 0 : index
    %74 = vector.load %arg10[%c0_93, %c0_94, %c0_95] : memref<18x18x8xbf16, #tpu.memory_space<vmem>>, vector<16x16x8xbf16>
    %75 = vector.shape_cast %74 : vector<16x16x8xbf16> to vector<256x8xbf16>
    %c0_96 = arith.constant 0 : index
    %c0_97 = arith.constant 0 : index
    %c0_98 = arith.constant 0 : index
    %c0_99 = arith.constant 0 : index
    %76 = vector.load %arg5[%c0_96, %c0_97, %c0_98, %c0_99] : memref<3x3x8x8xbf16, #tpu.memory_space<vmem>>, vector<1x1x8x8xbf16>
    %77 = vector.shape_cast %76 : vector<1x1x8x8xbf16> to vector<8x8xbf16>
    %cst_100 = arith.constant dense<0.000000e+00> : vector<256x8xf32>
    %78 = tpu.matmul %75, %77, %cst_100 {dimension_numbers = #tpu.dot_dimension_numbers<[1], [0], [0], [1], [0, 0, 1, 1], [], []>} : vector<256x8xbf16>, vector<8x8xbf16>, vector<256x8xf32> -> vector<256x8xf32>
    %79 = arith.addf %73, %78 : vector<256x8xf32>
    %c0_101 = arith.constant 0 : index
    %c1_102 = arith.constant 1 : index
    %c0_103 = arith.constant 0 : index
    %80 = vector.load %arg10[%c0_101, %c1_102, %c0_103] : memref<18x18x8xbf16, #tpu.memory_space<vmem>>, vector<16x16x8xbf16>
    %81 = vector.shape_cast %80 : vector<16x16x8xbf16> to vector<256x8xbf16>
    %c0_104 = arith.constant 0 : index
    %c1_105 = arith.constant 1 : index
    %c0_106 = arith.constant 0 : index
    %c0_107 = arith.constant 0 : index
    %82 = vector.load %arg5[%c0_104, %c1_105, %c0_106, %c0_107] : memref<3x3x8x8xbf16, #tpu.memory_space<vmem>>, vector<1x1x8x8xbf16>
    %83 = vector.shape_cast %82 : vector<1x1x8x8xbf16> to vector<8x8xbf16>
    %cst_108 = arith.constant dense<0.000000e+00> : vector<256x8xf32>
    %84 = tpu.matmul %81, %83, %cst_108 {dimension_numbers = #tpu.dot_dimension_numbers<[1], [0], [0], [1], [0, 0, 1, 1], [], []>} : vector<256x8xbf16>, vector<8x8xbf16>, vector<256x8xf32> -> vector<256x8xf32>
    %85 = arith.addf %79, %84 : vector<256x8xf32>
    %c0_109 = arith.constant 0 : index
    %c2_110 = arith.constant 2 : index
    %c0_111 = arith.constant 0 : index
    %86 = vector.load %arg10[%c0_109, %c2_110, %c0_111] : memref<18x18x8xbf16, #tpu.memory_space<vmem>>, vector<16x16x8xbf16>
    %87 = vector.shape_cast %86 : vector<16x16x8xbf16> to vector<256x8xbf16>
    %c0_112 = arith.constant 0 : index
    %c2_113 = arith.constant 2 : index
    %c0_114 = arith.constant 0 : index
    %c0_115 = arith.constant 0 : index
    %88 = vector.load %arg5[%c0_112, %c2_113, %c0_114, %c0_115] : memref<3x3x8x8xbf16, #tpu.memory_space<vmem>>, vector<1x1x8x8xbf16>
    %89 = vector.shape_cast %88 : vector<1x1x8x8xbf16> to vector<8x8xbf16>
    %cst_116 = arith.constant dense<0.000000e+00> : vector<256x8xf32>
    %90 = tpu.matmul %87, %89, %cst_116 {dimension_numbers = #tpu.dot_dimension_numbers<[1], [0], [0], [1], [0, 0, 1, 1], [], []>} : vector<256x8xbf16>, vector<8x8xbf16>, vector<256x8xf32> -> vector<256x8xf32>
    %91 = arith.addf %85, %90 : vector<256x8xf32>
    %c1_117 = arith.constant 1 : index
    %c0_118 = arith.constant 0 : index
    %c0_119 = arith.constant 0 : index
    %92 = vector.load %arg10[%c1_117, %c0_118, %c0_119] : memref<18x18x8xbf16, #tpu.memory_space<vmem>>, vector<16x16x8xbf16>
    %93 = vector.shape_cast %92 : vector<16x16x8xbf16> to vector<256x8xbf16>
    %c1_120 = arith.constant 1 : index
    %c0_121 = arith.constant 0 : index
    %c0_122 = arith.constant 0 : index
    %c0_123 = arith.constant 0 : index
    %94 = vector.load %arg5[%c1_120, %c0_121, %c0_122, %c0_123] : memref<3x3x8x8xbf16, #tpu.memory_space<vmem>>, vector<1x1x8x8xbf16>
    %95 = vector.shape_cast %94 : vector<1x1x8x8xbf16> to vector<8x8xbf16>
    %cst_124 = arith.constant dense<0.000000e+00> : vector<256x8xf32>
    %96 = tpu.matmul %93, %95, %cst_124 {dimension_numbers = #tpu.dot_dimension_numbers<[1], [0], [0], [1], [0, 0, 1, 1], [], []>} : vector<256x8xbf16>, vector<8x8xbf16>, vector<256x8xf32> -> vector<256x8xf32>
    %97 = arith.addf %91, %96 : vector<256x8xf32>
    %c1_125 = arith.constant 1 : index
    %c1_126 = arith.constant 1 : index
    %c0_127 = arith.constant 0 : index
    %98 = vector.load %arg10[%c1_125, %c1_126, %c0_127] : memref<18x18x8xbf16, #tpu.memory_space<vmem>>, vector<16x16x8xbf16>
    %99 = vector.shape_cast %98 : vector<16x16x8xbf16> to vector<256x8xbf16>
    %c1_128 = arith.constant 1 : index
    %c1_129 = arith.constant 1 : index
    %c0_130 = arith.constant 0 : index
    %c0_131 = arith.constant 0 : index
    %100 = vector.load %arg5[%c1_128, %c1_129, %c0_130, %c0_131] : memref<3x3x8x8xbf16, #tpu.memory_space<vmem>>, vector<1x1x8x8xbf16>
    %101 = vector.shape_cast %100 : vector<1x1x8x8xbf16> to vector<8x8xbf16>
    %cst_132 = arith.constant dense<0.000000e+00> : vector<256x8xf32>
    %102 = tpu.matmul %99, %101, %cst_132 {dimension_numbers = #tpu.dot_dimension_numbers<[1], [0], [0], [1], [0, 0, 1, 1], [], []>} : vector<256x8xbf16>, vector<8x8xbf16>, vector<256x8xf32> -> vector<256x8xf32>
    %103 = arith.addf %97, %102 : vector<256x8xf32>
    %c1_133 = arith.constant 1 : index
    %c2_134 = arith.constant 2 : index
    %c0_135 = arith.constant 0 : index
    %104 = vector.load %arg10[%c1_133, %c2_134, %c0_135] : memref<18x18x8xbf16, #tpu.memory_space<vmem>>, vector<16x16x8xbf16>
    %105 = vector.shape_cast %104 : vector<16x16x8xbf16> to vector<256x8xbf16>
    %c1_136 = arith.constant 1 : index
    %c2_137 = arith.constant 2 : index
    %c0_138 = arith.constant 0 : index
    %c0_139 = arith.constant 0 : index
    %106 = vector.load %arg5[%c1_136, %c2_137, %c0_138, %c0_139] : memref<3x3x8x8xbf16, #tpu.memory_space<vmem>>, vector<1x1x8x8xbf16>
    %107 = vector.shape_cast %106 : vector<1x1x8x8xbf16> to vector<8x8xbf16>
    %cst_140 = arith.constant dense<0.000000e+00> : vector<256x8xf32>
    %108 = tpu.matmul %105, %107, %cst_140 {dimension_numbers = #tpu.dot_dimension_numbers<[1], [0], [0], [1], [0, 0, 1, 1], [], []>} : vector<256x8xbf16>, vector<8x8xbf16>, vector<256x8xf32> -> vector<256x8xf32>
    %109 = arith.addf %103, %108 : vector<256x8xf32>
    %c2_141 = arith.constant 2 : index
    %c0_142 = arith.constant 0 : index
    %c0_143 = arith.constant 0 : index
    %110 = vector.load %arg10[%c2_141, %c0_142, %c0_143] : memref<18x18x8xbf16, #tpu.memory_space<vmem>>, vector<16x16x8xbf16>
    %111 = vector.shape_cast %110 : vector<16x16x8xbf16> to vector<256x8xbf16>
    %c2_144 = arith.constant 2 : index
    %c0_145 = arith.constant 0 : index
    %c0_146 = arith.constant 0 : index
    %c0_147 = arith.constant 0 : index
    %112 = vector.load %arg5[%c2_144, %c0_145, %c0_146, %c0_147] : memref<3x3x8x8xbf16, #tpu.memory_space<vmem>>, vector<1x1x8x8xbf16>
    %113 = vector.shape_cast %112 : vector<1x1x8x8xbf16> to vector<8x8xbf16>
    %cst_148 = arith.constant dense<0.000000e+00> : vector<256x8xf32>
    %114 = tpu.matmul %111, %113, %cst_148 {dimension_numbers = #tpu.dot_dimension_numbers<[1], [0], [0], [1], [0, 0, 1, 1], [], []>} : vector<256x8xbf16>, vector<8x8xbf16>, vector<256x8xf32> -> vector<256x8xf32>
    %115 = arith.addf %109, %114 : vector<256x8xf32>
    %c2_149 = arith.constant 2 : index
    %c1_150 = arith.constant 1 : index
    %c0_151 = arith.constant 0 : index
    %116 = vector.load %arg10[%c2_149, %c1_150, %c0_151] : memref<18x18x8xbf16, #tpu.memory_space<vmem>>, vector<16x16x8xbf16>
    %117 = vector.shape_cast %116 : vector<16x16x8xbf16> to vector<256x8xbf16>
    %c2_152 = arith.constant 2 : index
    %c1_153 = arith.constant 1 : index
    %c0_154 = arith.constant 0 : index
    %c0_155 = arith.constant 0 : index
    %118 = vector.load %arg5[%c2_152, %c1_153, %c0_154, %c0_155] : memref<3x3x8x8xbf16, #tpu.memory_space<vmem>>, vector<1x1x8x8xbf16>
    %119 = vector.shape_cast %118 : vector<1x1x8x8xbf16> to vector<8x8xbf16>
    %cst_156 = arith.constant dense<0.000000e+00> : vector<256x8xf32>
    %120 = tpu.matmul %117, %119, %cst_156 {dimension_numbers = #tpu.dot_dimension_numbers<[1], [0], [0], [1], [0, 0, 1, 1], [], []>} : vector<256x8xbf16>, vector<8x8xbf16>, vector<256x8xf32> -> vector<256x8xf32>
    %121 = arith.addf %115, %120 : vector<256x8xf32>
    %c2_157 = arith.constant 2 : index
    %c2_158 = arith.constant 2 : index
    %c0_159 = arith.constant 0 : index
    %122 = vector.load %arg10[%c2_157, %c2_158, %c0_159] : memref<18x18x8xbf16, #tpu.memory_space<vmem>>, vector<16x16x8xbf16>
    %123 = vector.shape_cast %122 : vector<16x16x8xbf16> to vector<256x8xbf16>
    %c2_160 = arith.constant 2 : index
    %c2_161 = arith.constant 2 : index
    %c0_162 = arith.constant 0 : index
    %c0_163 = arith.constant 0 : index
    %124 = vector.load %arg5[%c2_160, %c2_161, %c0_162, %c0_163] : memref<3x3x8x8xbf16, #tpu.memory_space<vmem>>, vector<1x1x8x8xbf16>
    %125 = vector.shape_cast %124 : vector<1x1x8x8xbf16> to vector<8x8xbf16>
    %cst_164 = arith.constant dense<0.000000e+00> : vector<256x8xf32>
    %126 = tpu.matmul %123, %125, %cst_164 {dimension_numbers = #tpu.dot_dimension_numbers<[1], [0], [0], [1], [0, 0, 1, 1], [], []>} : vector<256x8xbf16>, vector<8x8xbf16>, vector<256x8xf32> -> vector<256x8xf32>
    %127 = arith.addf %121, %126 : vector<256x8xf32>
    %128 = tpu.transpose %127, [1, 0] : vector<256x8xf32> -> vector<8x256xf32>
    %c0_165 = arith.constant 0 : index
    %c0_166 = arith.constant 0 : index
    %129 = vector.load %arg6[%c0_165, %c0_166] : memref<8x1xf32, #tpu.memory_space<vmem>>, vector<8x1xf32>
    %130 = vector.broadcast %129 : vector<8x1xf32> to vector<8x256xf32>
    %131 = arith.mulf %128, %130 : vector<8x256xf32>
    %c0_167 = arith.constant 0 : index
    %c0_168 = arith.constant 0 : index
    %132 = vector.load %arg7[%c0_167, %c0_168] : memref<8x1xf32, #tpu.memory_space<vmem>>, vector<8x1xf32>
    %133 = vector.broadcast %132 : vector<8x1xf32> to vector<8x256xf32>
    %134 = arith.addf %131, %133 : vector<8x256xf32>
    %cst_169 = arith.constant 0.000000e+00 : f32
    %135 = vector.broadcast %cst_169 : f32 to vector<8x256xf32>
    %136 = arith.maximumf %134, %135 : vector<8x256xf32>
    %c0_170 = arith.constant 0 : index
    %c0_171 = arith.constant 0 : index
    %c0_172 = arith.constant 0 : index
    %137 = vector.load %arg8[%c0_170, %c0_171, %c0_172] : memref<1x8x256xf32, #tpu.memory_space<vmem>>, vector<1x8x256xf32>
    %138 = vector.shape_cast %137 : vector<1x8x256xf32> to vector<8x256xf32>
    %139 = vector.shape_cast %136 : vector<8x256xf32> to vector<1x8x256xf32>
    tpu.vector_store %arg8[%c0_170, %c0_171, %c0_172], %139 {strides = array<i32>} : memref<1x8x256xf32, #tpu.memory_space<vmem>>, vector<1x8x256xf32>,
    return
  }
  func.func @transform_0(%arg0: i32) -> (i32, i32, i32, i32) {
    %c0_i32 = arith.constant 0 : i32
    %c0_i32_0 = arith.constant 0 : i32
    %c0_i32_1 = arith.constant 0 : i32
    %c0_i32_2 = arith.constant 0 : i32
    return %arg0, %c0_i32, %c0_i32_0, %c0_i32_1 : i32, i32, i32, i32
  }
  func.func @transform_1(%arg0: i32) -> (i32, i32, i32, i32) {
    %c0_i32 = arith.constant 0 : i32
    %c0_i32_0 = arith.constant 0 : i32
    %c0_i32_1 = arith.constant 0 : i32
    %c0_i32_2 = arith.constant 0 : i32
    %c0_i32_3 = arith.constant 0 : i32
    return %c0_i32, %c0_i32_0, %c0_i32_1, %c0_i32_2 : i32, i32, i32, i32
  }
  func.func @transform_2(%arg0: i32) -> (i32, i32) {
    %c0_i32 = arith.constant 0 : i32
    %c0_i32_0 = arith.constant 0 : i32
    %c0_i32_1 = arith.constant 0 : i32
    return %c0_i32, %c0_i32_0 : i32, i32
  }
  func.func @transform_3(%arg0: i32) -> (i32, i32) {
    %c0_i32 = arith.constant 0 : i32
    %c0_i32_0 = arith.constant 0 : i32
    %c0_i32_1 = arith.constant 0 : i32
    return %c0_i32, %c0_i32_0 : i32, i32
  }
  func.func @transform_4(%arg0: i32) -> (i32, i32, i32, i32) {
    %c0_i32 = arith.constant 0 : i32
    %c0_i32_0 = arith.constant 0 : i32
    %c0_i32_1 = arith.constant 0 : i32
    %c0_i32_2 = arith.constant 0 : i32
    %c0_i32_3 = arith.constant 0 : i32
    return %c0_i32, %c0_i32_0, %c0_i32_1, %c0_i32_2 : i32, i32, i32, i32
  }
  func.func @transform_5(%arg0: i32) -> (i32, i32) {
    %c0_i32 = arith.constant 0 : i32
    %c0_i32_0 = arith.constant 0 : i32
    %c0_i32_1 = arith.constant 0 : i32
    return %c0_i32, %c0_i32_0 : i32, i32
  }
  func.func @transform_6(%arg0: i32) -> (i32, i32) {
    %c0_i32 = arith.constant 0 : i32
    %c0_i32_0 = arith.constant 0 : i32
    %c0_i32_1 = arith.constant 0 : i32
    return %c0_i32, %c0_i32_0 : i32, i32
  }
  func.func @transform_7(%arg0: i32) -> (i32, i32, i32) {
    %c0_i32 = arith.constant 0 : i32
    %c0_i32_0 = arith.constant 0 : i32
    %c0_i32_1 = arith.constant 0 : i32
    return %arg0, %c0_i32, %c0_i32_0 : i32, i32, i32
  }
}

</mosaic_0001>

<bundles_post_ra>
// kernel: double_conv.1
= control target key start
LH: loop header
LB: loop body
LE: loop exit
PB: predicated region body
PF: predicated region fallthrough
CT: control target
= control target key end

     0   :  { %s13148_s24 = smov 0   ;;  %s16923_s0 = inlined_call_operand.vmem [shape: bf16[2,16,16,4], index: 0, kind: input, shape index: {}]   ;;  %s16924_s1 = inlined_call_operand.vmem [shape: bf16[3,3,4,8], index: 1, kind: input, shape index: {}]   ;;  %s16925_s2 = inlined_call_operand.vmem [shape: f32[1,8], index: 2, kind: input, shape index: {}]   ;;  %s16926_s3 = inlined_call_operand.vmem [shape: f32[1,8], index: 3, kind: input, shape index: {}]   ;;  %s16927_s4 = inlined_call_operand.vmem [shape: bf16[3,3,8,8], index: 4, kind: input, shape index: {}]   ;;  %s16928_s5 = inlined_call_operand.vmem [shape: f32[8,1], index: 5, kind: input, shape index: {}]   ;;  %s16929_s6 = inlined_call_operand.vmem [shape: f32[8,1], index: 6, kind: input, shape index: {}]   ;;  %s16930_s7 = inlined_call_operand.vmem [shape: f32[2,8,256], index: 7, kind: output, shape index: {}]  }
   0x1 LB: > { %s10757_s25 = sadd.s32 4294967295, %s13105_s24   ;;  %p10761_p0 = scmp.ge.s32.totalorder %s13105_s24, 1  ;;  %s13105_s24 = sphi %s13148_s24, %s17_s24  }
   0x2   : > { %p237_p1 = scmp.lt.s32.totalorder %s13105_s24, 3 }
   0x4   : > { %p238_p2 = pnand %p10761_p0, %p237_p1 }
   0x6   : > { %241 = sbr.rel (%p238_p2) target bundleno = 1830 (0x726), region = 48 }
   0xd   : > { %v10766_v0 = vld [vmem:[%s16924_s1 + $0x2] sm:$0x3]  ;;  %vm1344_vm0 = vcmask 1041408   ;;  %vm280_vm1 = vcmask 27648   ;;  %vm283_vm2 = vcmask 24576   ;;  %v16931_v2 = vmov 0  }
   0xe   : > { %12954 = vmatprep.subr.msk.bf16.mxu0 %vm1344_vm0, %v10766_v0  ;;  %v1346_v1 = vsel %vm1344_vm0, %v10766_v0, 0  ;;  %281 = vst.msk [vmem:[#allocation2] sm:$0xf] %vm280_vm1, %v16931_v2  ;;  %282 = vst.msk [vmem:[#allocation2 + $0x4] sm:$0xf] %vm280_vm1, %v16931_v2  ;;  %12981 = vset.pattern.permute.xlu1 %v16931_v2  ;;  %p269_p3 = scmp.lt.s32.totalorder %s10757_s25, 1 }
   0xf   : > { %284 = vst.msk [vmem:[#allocation2 + $0x8] sm:$0x1] %vm283_vm2, %v16931_v2  ;;  %287 = vst.msk [vmem:[#allocation2 + $0x14] sm:$0x1] %vm283_vm2, %v16931_v2  ;;  %11831 = vmatpush3.bf16.msra.mxu0 %v1346_v1  ;;  %v13273_v3 = vld [vmem:[%s16924_s1] sm:$0x3] }
  0x10   : > { %285 = vst.msk [vmem:[#allocation2 + $0xc] sm:$0xf] %vm280_vm1, %v16931_v2  ;;  %286 = vst.msk [vmem:[#allocation2 + $0x10] sm:$0xf] %vm280_vm1, %v16931_v2  ;;  %12955 = vmatprep.subr.msk.bf16.mxu0 %vm1344_vm0, %v13273_v3  ;;  %s17332_s25 = smov (!%p269_p3, %s10757_s25), 1  ;;  %vm1295_vm9 = vcmask 31744  }
  0x11   : > { %288 = vst.msk [vmem:[#allocation2 + $0x18] sm:$0xf] %vm280_vm1, %v16931_v2  ;;  %289 = vst.msk [vmem:[#allocation2 + $0x1c] sm:$0xf] %vm280_vm1, %v16931_v2  ;;  %vm858_vm3 = vsmask.f32 3328 }
  0x12   : > { %290 = vst.msk [vmem:[#allocation2 + $0x20] sm:$0x1] %vm283_vm2, %v16931_v2  ;;  %293 = vst.msk [vmem:[#allocation2 + $0x2c] sm:$0x1] %vm283_vm2, %v16931_v2  ;;  %vm859_vm4 = vsmask.f32 7440 }
  0x13   : > { %291 = vst.msk [vmem:[#allocation2 + $0x24] sm:$0xf] %vm280_vm1, %v16931_v2  ;;  %292 = vst.msk [vmem:[#allocation2 + $0x28] sm:$0xf] %vm280_vm1, %v16931_v2  ;;  %s11490_s30 = sshll.u32 %s17332_s25, 7  ;;  %v17051_v38 = vmov 0 }
  0x14   : > { %294 = vst.msk [vmem:[#allocation2 + $0x30] sm:$0xf] %vm280_vm1, %v16931_v2  ;;  %295 = vst.msk [vmem:[#allocation2 + $0x34] sm:$0xf] %vm280_vm1, %v16931_v2  ;;  %s13287_s10 = scalar_lea.vmem %s16923_s0, %s11490_s30  ;;  %vm368_vm5 = vsmask.f32 256 }
  0x15   : > { %296 = vst.msk [vmem:[#allocation2 + $0x38] sm:$0x1] %vm283_vm2, %v16931_v2  ;;  %299 = vst.msk [vmem:[#allocation2 + $0x44] sm:$0x1] %vm283_vm2, %v16931_v2  ;;  %vm369_vm6 = vsmask.f32 4368 }
  0x16   : > { %297 = vst.msk [vmem:[#allocation2 + $0x3c] sm:$0xf] %vm280_vm1, %v16931_v2  ;;  %298 = vst.msk [vmem:[#allocation2 + $0x40] sm:$0xf] %vm280_vm1, %v16931_v2  ;;  %vm693_vm7 = vsmask.f32 7938 }
  0x17   : > { %300 = vst.msk [vmem:[#allocation2 + $0x48] sm:$0xf] %vm280_vm1, %v16931_v2  ;;  %301 = vst.msk [vmem:[#allocation2 + $0x4c] sm:$0xf] %vm280_vm1, %v16931_v2  ;;  %v809_v4 = vld [vmem:[#allocation2] sm:$0xf] }
  0x18   : > { %302 = vst.msk [vmem:[#allocation2 + $0x50] sm:$0x1] %vm283_vm2, %v16931_v2  ;;  %305 = vst.msk [vmem:[#allocation2 + $0x5c] sm:$0x1] %vm283_vm2, %v16931_v2  ;;  %v810_v5 = vld [vmem:[#allocation2 + $0x4] sm:$0xf] }
  0x19   : > { %303 = vst.msk [vmem:[#allocation2 + $0x54] sm:$0xf] %vm280_vm1, %v16931_v2  ;;  %304 = vst.msk [vmem:[#allocation2 + $0x58] sm:$0xf] %vm280_vm1, %v16931_v2  ;;  %v842_v6 = vld [vmem:[#allocation2 + $0x8] sm:$0x1] }
  0x1a   : > { %306 = vst.msk [vmem:[#allocation2 + $0x60] sm:$0xf] %vm280_vm1, %v16931_v2  ;;  %307 = vst.msk [vmem:[#allocation2 + $0x64] sm:$0xf] %vm280_vm1, %v16931_v2  ;;  %v862_v7 = vshrl.u32 %v809_v4, 16  ;;  %v865_v8 = vshll.u32 %v809_v4, 16 }
  0x1b   : > { %308 = vst.msk [vmem:[#allocation2 + $0x68] sm:$0x1] %vm283_vm2, %v16931_v2  ;;  %311 = vst.msk [vmem:[#allocation2 + $0x74] sm:$0x1] %vm283_vm2, %v16931_v2  ;;  %v871_v9 = vshll.u32 %v810_v5, 16  ;;  %v875_v10 = vshrl.u32 %v810_v5, 16 }
  0x1c   : > { %309 = vst.msk [vmem:[#allocation2 + $0x6c] sm:$0xf] %vm280_vm1, %v16931_v2  ;;  %310 = vst.msk [vmem:[#allocation2 + $0x70] sm:$0xf] %vm280_vm1, %v16931_v2  ;;  %v336_v11 = vld [vmem:[%s13287_s10] sm:$0xf] }
  0x1d   : > { %312 = vst.msk [vmem:[#allocation2 + $0x78] sm:$0xf] %vm280_vm1, %v16931_v2  ;;  %313 = vst.msk [vmem:[#allocation2 + $0x7c] sm:$0xf] %vm280_vm1, %v16931_v2  ;;  %v881_v12 = vshll.u32 %v842_v6, 16  ;;  %v372_v14 = vshrl.u32 %v336_v11, 16 }
  0x1e   : > { %314 = vst.msk [vmem:[#allocation2 + $0x80] sm:$0x1] %vm283_vm2, %v16931_v2  ;;  %317 = vst.msk [vmem:[#allocation2 + $0x8c] sm:$0x1] %vm283_vm2, %v16931_v2  ;;  %v337_v13 = vld [vmem:[%s13287_s10 + $0x4] sm:$0xf] }
  0x1f   : > { %315 = vst.msk [vmem:[#allocation2 + $0x84] sm:$0xf] %vm280_vm1, %v16931_v2  ;;  %316 = vst.msk [vmem:[#allocation2 + $0x88] sm:$0xf] %vm280_vm1, %v16931_v2  ;;  %v375_v15 = vshll.u32 %v336_v11, 16  ;;  %v864_v16 = vrot.slane %v862_v7, 4 }
  0x20   : > { %318 = vst.msk [vmem:[#allocation2 + $0x90] sm:$0xf] %vm280_vm1, %v16931_v2  ;;  %319 = vst.msk [vmem:[#allocation2 + $0x94] sm:$0xf] %vm280_vm1, %v16931_v2  ;;  %v867_v17 = vrot.slane %v865_v8, 5  ;;  %v873_v18 = vrot.slane %v871_v9, 5 }
  0x21   : > { %320 = vst.msk [vmem:[#allocation2 + $0x98] sm:$0x1] %vm283_vm2, %v16931_v2  ;;  %323 = vst.msk [vmem:[#allocation2 + $0xa4] sm:$0x1] %vm283_vm2, %v16931_v2  ;;  %v877_v19 = vrot.slane %v875_v10, 4  ;;  %v374_v21 = vrot.slane %v372_v14, 7 }
  0x22   : > { %321 = vst.msk [vmem:[#allocation2 + $0x9c] sm:$0xf] %vm280_vm1, %v16931_v2  ;;  %322 = vst.msk [vmem:[#allocation2 + $0xa0] sm:$0xf] %vm280_vm1, %v16931_v2  ;;  %v380_v22 = vshrl.u32 %v337_v13, 16  ;;  %v383_v23 = vshll.u32 %v337_v13, 16  ;;  %v868_v25 = vor.u32 %v867_v17, %v864_v16 }
  0x23   : > { %324 = vst.msk [vmem:[#allocation2 + $0xa8] sm:$0xf] %vm280_vm1, %v16931_v2  ;;  %325 = vst.msk [vmem:[#allocation2 + $0xac] sm:$0xf] %vm280_vm1, %v16931_v2  ;;  %v695_v24 = vld [vmem:[#allocation2 + $0xc] sm:$0xf]  ;;  %v878_v26 = vor.u32 %v877_v19, %v873_v18  ;;  %v377_v31 = vor.u32 %v375_v15, %v374_v21 }
  0x24   : > { %326 = vst.msk [vmem:[#allocation2 + $0xb0] sm:$0x1] %vm283_vm2, %v16931_v2  ;;  %329 = vst.msk [vmem:[#allocation2 + $0xbc] sm:$0x1] %vm283_vm2, %v16931_v2  ;;  %v883_v27 = vrot.slane %v881_v12, 5  ;;  %v378_v32 = vrot.slane %v374_v21, 4 }
  0x25   : > { %327 = vst.msk [vmem:[#allocation2 + $0xb4] sm:$0xf] %vm280_vm1, %v16931_v2  ;;  %328 = vst.msk [vmem:[#allocation2 + $0xb8] sm:$0xf] %vm280_vm1, %v16931_v2  ;;  %v338_v29 = vld [vmem:[%s13287_s10 + $0x8] sm:$0xf] }
  0x26   : > { %330 = vst.msk [vmem:[#allocation2 + $0xc0] sm:$0xf] %vm280_vm1, %v16931_v2  ;;  %331 = vst.msk [vmem:[#allocation2 + $0xc4] sm:$0xf] %vm280_vm1, %v16931_v2  ;;  %v339_v30 = vld [vmem:[%s13287_s10 + $0xc] sm:$0xf] }
  0x27   : > { %332 = vst.msk [vmem:[#allocation2 + $0xc8] sm:$0x1] %vm283_vm2, %v16931_v2  ;;  %335 = vst.msk [vmem:[#allocation2 + $0xd4] sm:$0x1] %vm283_vm2, %v16931_v2  ;;  %v382_v33 = vrot.slane %v380_v22, 7  ;;  %v389_v35 = vshrl.u32 %v338_v29, 16 }
  0x28   : > { %333 = vst.msk [vmem:[#allocation2 + $0xcc] sm:$0xf] %vm280_vm1, %v16931_v2  ;;  %334 = vst.msk [vmem:[#allocation2 + $0xd0] sm:$0xf] %vm280_vm1, %v16931_v2  ;;  %v869_v36 = vrot.slane %v868_v25, 4  ;;  %v879_v37 = vrot.slane %v878_v26, 4 }
  0x29   : > { %vm13293_vm8 = vmor %vm858_vm3, %vm859_vm4  ;;  %v701_v39 = vld [vmem:[#allocation2 + $0x14] sm:$0x1]  ;;  %v392_v40 = vshll.u32 %v338_v29, 16  ;;  %v397_v41 = vshrl.u32 %v339_v30, 16  ;;  %v385_v42 = vor.u32 %v383_v23, %v382_v33  ;;  %v387_v43 = vrot.slane %v382_v33, 4  ;;  %s11491_s13 = sshll.u32 %s17332_s25, 4 }
  0x2a   : > { %vm13299_vm10 = vmand %vm280_vm1, %vm693_vm7  ;;  %v391_v45 = vrot.slane %v389_v35, 7  ;;  %v340_v46 = vld [vmem:[%s13287_s10 + $0x10] sm:$0xf]  ;;  %v874_v47 = vsel %vm13293_vm8, %v869_v36, %v873_v18  ;;  %v884_v48 = vsel %vm13293_vm8, %v879_v37, %v883_v27  ;;  %v400_v50 = vshll.u32 %v339_v30, 16  ;;  %v704_v51 = vld [vmem:[#allocation2 + $0x18] sm:$0xf]  ;;  %s278_s16 = scalar_lea.vmem %s16930_s7, %s11491_s13 }
  0x2b   : > { %vm13307_vm11 = vmand %vm283_vm2, %vm368_vm5  ;;  %v696_v44 = vsel %vm13299_vm10, %v377_v31, %v695_v24  ;;  %v399_v49 = vrot.slane %v397_v41, 7  ;;  %v341_v52 = vld [vmem:[%s13287_s10 + $0x14] sm:$0xf]  ;;  %v10767_v53 = vcombine.low %v874_v47, %v884_v48  ;;  %v708_v57 = vld [vmem:[#allocation2 + $0x20] sm:$0x1]  ;;  %v406_v62 = vshrl.u32 %v340_v46, 16 }
  0x2c   : > { %vm13313_vm12 = vmor %vm368_vm5, %vm369_vm6  ;;  %697 = vst [vmem:[#allocation2 + $0xc] sm:$0xf] %v696_v44  ;;  %v702_v55 = vsel %vm13307_vm11, %v387_v43, %v701_v39  ;;  %v394_v56 = vor.u32 %v392_v40, %v391_v45  ;;  %v342_v58 = vld [vmem:[%s13287_s10 + $0x18] sm:$0xf]  ;;  %v395_v59 = vrot.slane %v391_v45, 4  ;;  %v409_v1 = vshll.u32 %v340_v46, 16 }
  0x2d   : > { %v17052_v38 = vsel %vm13313_vm12, 4294967295, %v17051_v38  ;;  %v386_v54 = vsel %vm13313_vm12, %v378_v32, %v385_v42  ;;  %703 = vst [vmem:[#allocation2 + $0x14] sm:$0x1] %v702_v55  ;;  %v402_v60 = vor.u32 %v400_v50, %v399_v49  ;;  %v404_v61 = vrot.slane %v399_v49, 4  ;;  %v343_v63 = vld [vmem:[%s13287_s10 + $0x1c] sm:$0xf]  ;;  %11832 = vmatprep.mubr.msk.bf16.mxu0 %vm1295_vm9, %v10767_v53 }
  0x2e   : > { %17053 = vst [vmem:[#allocation4_spill] sm:$0xff] %v17052_v38  ;;  %698 = vst.msk [vmem:[#allocation2 + $0x10] sm:$0xf] %vm280_vm1, %v386_v54  ;;  %v705_v0 = vsel %vm13299_vm10, %v394_v56, %v704_v51  ;;  %v414_v4 = vshrl.u32 %v341_v52, 16  ;;  %v417_v5 = vshll.u32 %v341_v52, 16  ;;  %v408_v8 = vrot.slane %v406_v62, 7 }
  0x2f   : > { %v403_v6 = vsel %vm13313_vm12, %v395_v59, %v402_v60  ;;  %706 = vst [vmem:[#allocation2 + $0x18] sm:$0xf] %v705_v0  ;;  %v709_v7 = vsel %vm13307_vm11, %v404_v61, %v708_v57  ;;  %v423_v9 = vshrl.u32 %v342_v58, 16  ;;  %v711_v11 = vld [vmem:[#allocation2 + $0x24] sm:$0xf]  ;;  %v426_v12 = vshll.u32 %v342_v58, 16 }
  0x30   : > { %707 = vst.msk [vmem:[#allocation2 + $0x1c] sm:$0xf] %vm280_vm1, %v403_v6  ;;  %710 = vst [vmem:[#allocation2 + $0x20] sm:$0x1] %v709_v7  ;;  %v416_v10 = vrot.slane %v414_v4, 7  ;;  %v431_v13 = vshrl.u32 %v343_v63, 16  ;;  %v411_v15 = vor.u32 %v409_v1, %v408_v8 }
  0x31   : > { %v434_v14 = vshll.u32 %v343_v63, 16  ;;  %v412_v16 = vrot.slane %v408_v8, 4  ;;  %v715_v17 = vld [vmem:[#allocation2 + $0x2c] sm:$0x1]  ;;  %v425_v18 = vrot.slane %v423_v9, 7  ;;  %v13344_v21 = vsel %vm1344_vm0, %v13273_v3, 0 }
  0x32   : > { %v419_v22 = vor.u32 %v417_v5, %v416_v10  ;;  %v421_v23 = vrot.slane %v416_v10, 4  ;;  %v433_v24 = vrot.slane %v431_v13, 7  ;;  %v712_v27 = vsel %vm13299_vm10, %v411_v15, %v711_v11  ;;  %v718_v30 = vld [vmem:[#allocation2 + $0x30] sm:$0xf]  ;;  %v13351_v31 = vld [vmem:[%s13287_s10 + $0x20] sm:$0xf] }
  0x33   : > { %v13340_v19 = vld [vmem:[#allocation2 + $0xc] sm:$0xf]  ;;  %v428_v29 = vor.u32 %v426_v12, %v425_v18  ;;  %713 = vst [vmem:[#allocation2 + $0x24] sm:$0xf] %v712_v27  ;;  %v429_v36 = vrot.slane %v425_v18, 4  ;;  %v440_v46 = vshrl.u32 %v13351_v31, 16 }
  0x34   : > { %v886_v25 = vshrl.u32 %v13340_v19, 16  ;;  %v889_v26 = vshll.u32 %v13340_v19, 16  ;;  %v843_v33 = vld [vmem:[#allocation2 + $0x14] sm:$0x1]  ;;  %v420_v3 = vsel %vm13313_vm12, %v412_v16, %v419_v22  ;;  %v716_v35 = vsel %vm13307_vm11, %v421_v23, %v715_v17  ;;  %v722_v62 = vld [vmem:[#allocation2 + $0x38] sm:$0x1] }
  0x35   : > { %v13353_v32 = vld [vmem:[#allocation2 + $0x10] sm:$0xf]  ;;  %v436_v37 = vor.u32 %v434_v14, %v433_v24  ;;  %714 = vst.msk [vmem:[#allocation2 + $0x28] sm:$0xf] %vm280_vm1, %v420_v3  ;;  %717 = vst [vmem:[#allocation2 + $0x2c] sm:$0x1] %v716_v35  ;;  %v719_v53 = vsel %vm13299_vm10, %v428_v29, %v718_v30 }
  0x36   : > { %v888_v39 = vrot.slane %v886_v25, 4  ;;  %v891_v40 = vrot.slane %v889_v26, 5  ;;  %v895_v41 = vshll.u32 %v13353_v32, 16  ;;  %v899_v42 = vshrl.u32 %v13353_v32, 16  ;;  %v813_v44 = vld [vmem:[#allocation2 + $0x18] sm:$0xf] }
  0x37   : > { %v905_v43 = vshll.u32 %v843_v33, 16  ;;  %v437_v45 = vsel %vm13313_vm12, %v429_v36, %v436_v37  ;;  %v443_v47 = vshll.u32 %v13351_v31, 16  ;;  %v814_v51 = vld [vmem:[#allocation2 + $0x1c] sm:$0xf]  ;;  %v844_v52 = vld [vmem:[#allocation2 + $0x20] sm:$0x1] }
  0x38   : > { %v892_v48 = vor.u32 %v891_v40, %v888_v39  ;;  %v897_v49 = vrot.slane %v895_v41, 5  ;;  %v901_v50 = vrot.slane %v899_v42, 4  ;;  %721 = vst.msk [vmem:[#allocation2 + $0x34] sm:$0xf] %vm280_vm1, %v437_v45  ;;  %v910_v55 = vshrl.u32 %v813_v44, 16 }
  0x39   : > { %v907_v54 = vrot.slane %v905_v43, 5  ;;  %v913_v56 = vshll.u32 %v813_v44, 16  ;;  %v919_v57 = vshll.u32 %v814_v51, 16  ;;  %720 = vst [vmem:[#allocation2 + $0x30] sm:$0xf] %v719_v53  ;;  %v923_v60 = vshrl.u32 %v814_v51, 16 }
  0x3a   : > { %v893_v58 = vrot.slane %v892_v48, 4  ;;  %v902_v59 = vor.u32 %v901_v50, %v897_v49  ;;  %v929_v61 = vshll.u32 %v844_v52, 16  ;;  %v912_v63 = vrot.slane %v910_v55, 4  ;;  %v815_v9 = vld [vmem:[#allocation2 + $0x24] sm:$0xf] }
  0x3b   : > { %v915_v0 = vrot.slane %v913_v56, 5  ;;  %v921_v1 = vrot.slane %v919_v57, 5  ;;  %v438_v4 = vrot.slane %v433_v24, 4  ;;  %v925_v7 = vrot.slane %v923_v60, 4  ;;  %v345_v45 = vld [vmem:[%s13287_s10 + $0x24] sm:$0xf] }
  0x3c   : > { %v898_v5 = vsel %vm13293_vm8, %v893_v58, %v897_v49  ;;  %v903_v6 = vrot.slane %v902_v59, 4  ;;  %v931_v8 = vrot.slane %v929_v61, 5  ;;  %v816_v11 = vld [vmem:[#allocation2 + $0x28] sm:$0xf]  ;;  %v845_v12 = vld [vmem:[#allocation2 + $0x2c] sm:$0x1] }
  0x3d   : > { %v916_v10 = vor.u32 %v915_v0, %v912_v63  ;;  %v934_v13 = vshrl.u32 %v815_v9, 16  ;;  %v937_v14 = vshll.u32 %v815_v9, 16  ;;  %v723_v15 = vsel %vm13307_vm11, %v438_v4, %v722_v62  ;;  %v725_v56 = vld [vmem:[#allocation2 + $0x3c] sm:$0xf]  ;;  %v346_v61 = vld [vmem:[%s13287_s10 + $0x28] sm:$0xf] }
  0x3e   : > { %v908_v16 = vsel %vm13293_vm8, %v903_v6, %v907_v54  ;;  %v926_v17 = vor.u32 %v925_v7, %v921_v1  ;;  %v943_v18 = vshll.u32 %v816_v11, 16  ;;  %v947_v22 = vshrl.u32 %v816_v11, 16  ;;  %724 = vst [vmem:[#allocation2 + $0x38] sm:$0x1] %v723_v15  ;;  %v347_v7 = vld [vmem:[%s13287_s10 + $0x2c] sm:$0xf] }
  0x3f   : > { %v10768_v23 = vcombine.low %v898_v5, %v908_v16  ;;  %v917_v24 = vrot.slane %v916_v10, 4  ;;  %v936_v25 = vrot.slane %v934_v13, 4  ;;  %v939_v26 = vrot.slane %v937_v14, 5  ;;  %v818_v27 = vld [vmem:[#allocation2 + $0x34] sm:$0xf] }
  0x40   : > { %v927_v29 = vrot.slane %v926_v17, 4  ;;  %v945_v30 = vrot.slane %v943_v18, 5  ;;  %v949_v33 = vrot.slane %v947_v22, 4  ;;  %v953_v3 = vshll.u32 %v845_v12, 16  ;;  %v817_v35 = vld [vmem:[#allocation2 + $0x30] sm:$0xf] }
  0x41   : > { %11833 = vmatmul.mubr.msk.bf16.vlgmr.msra.gmra.mrb[0].mxu0 %vm1295_vm9, %v10768_v23  ;;  %v922_v36 = vsel %vm13293_vm8, %v917_v24, %v921_v1  ;;  %v940_v37 = vor.u32 %v939_v26, %v936_v25  ;;  %v958_v39 = vshrl.u32 %v817_v35, 16  ;;  %v961_v40 = vshll.u32 %v817_v35, 16  ;;  %v729_v11 = vld [vmem:[#allocation2 + $0x44] sm:$0x1]  ;;  %v348_v13 = vld [vmem:[%s13287_s10 + $0x30] sm:$0xf] }
  0x42   : > { %11865 = vmatpush3.bf16.msra.mxu0 %v13344_v21  ;;  %v932_v41 = vsel %vm13293_vm8, %v927_v29, %v931_v8  ;;  %v950_v42 = vor.u32 %v949_v33, %v945_v30  ;;  %v955_v43 = vrot.slane %v953_v3, 5  ;;  %v967_v44 = vshll.u32 %v818_v27, 16  ;;  %v349_v23 = vld [vmem:[%s13287_s10 + $0x34] sm:$0xf]  ;;  %v732_v26 = vld [vmem:[#allocation2 + $0x48] sm:$0xf] }
  0x43   : > { %v10769_v48 = vcombine.low %v922_v36, %v932_v41  ;;  %v941_v49 = vrot.slane %v940_v37, 4  ;;  %v960_v50 = vrot.slane %v958_v39, 4  ;;  %v963_v51 = vrot.slane %v961_v40, 5  ;;  %v736_v37 = vld [vmem:[#allocation2 + $0x50] sm:$0x1] }
  0x44   : > { %v951_v52 = vrot.slane %v950_v42, 4  ;;  %v969_v53 = vrot.slane %v967_v44, 5  ;;  %v971_v54 = vshrl.u32 %v818_v27, 16  ;;  %v442_v55 = vrot.slane %v440_v46, 7  ;;  %v13058_v2 = vld [vmem:[#allocation2 + $0x14] sm:$0x1] }
  0x45   : > { %11836 = vmatprep.mubr.msk.bf16.mxu0 %vm1295_vm9, %v10769_v48  ;;  %v946_v21 = vsel %vm13293_vm8, %v941_v49, %v945_v30  ;;  %v846_v57 = vld [vmem:[#allocation2 + $0x38] sm:$0x1]  ;;  %v964_v58 = vor.u32 %v963_v51, %v960_v50  ;;  %v448_v59 = vshrl.u32 %v345_v45, 16  ;;  %v451_v60 = vshll.u32 %v345_v45, 16  ;;  %v13966_v34 = vld [vmem:[#allocation2 + $0x34] sm:$0xf] }
  0x46   : > { %v956_v62 = vsel %vm13293_vm8, %v951_v52, %v955_v43  ;;  %v973_v63 = vrot.slane %v971_v54, 4  ;;  %v977_v0 = vshll.u32 %v846_v57, 16  ;;  %v445_v46 = vor.u32 %v443_v47, %v442_v55  ;;  %v350_v30 = vld [vmem:[%s13287_s10 + $0x38] sm:$0xf]  ;;  %v351_v43 = vld [vmem:[%s13287_s10 + $0x3c] sm:$0xf] }
  0x47   : > { %v10770_v1 = vcombine.low %v946_v21, %v956_v62  ;;  %v965_v4 = vrot.slane %v964_v58, 4  ;;  %v446_v5 = vrot.slane %v442_v55, 4  ;;  %v450_v6 = vrot.slane %v448_v59, 7  ;;  %v743_v57 = vld [vmem:[#allocation2 + $0x5c] sm:$0x1] }
  0x48   : > { %v974_v8 = vor.u32 %v973_v63, %v969_v53  ;;  %v979_v9 = vrot.slane %v977_v0, 5  ;;  %v726_v10 = vsel %vm13299_vm10, %v445_v46, %v725_v56  ;;  %v457_v12 = vshrl.u32 %v346_v61, 16 }
  0x49   : > { %11837 = vmatmul.mubr.msk.bf16.gmra.mrb[4].mxu0 %vm1295_vm9, %v10770_v1  ;;  %v970_v31 = vsel %vm13293_vm8, %v965_v4, %v969_v53  ;;  %v453_v47 = vor.u32 %v451_v60, %v450_v6  ;;  %v455_v14 = vrot.slane %v450_v6, 4  ;;  %727 = vst [vmem:[#allocation2 + $0x3c] sm:$0xf] %v726_v10  ;;  %v460_v15 = vshll.u32 %v346_v61, 16  ;;  %v739_v53 = vld [vmem:[#allocation2 + $0x54] sm:$0xf] }
  0x4a   : > { %v975_v16 = vrot.slane %v974_v8, 4  ;;  %v459_v17 = vrot.slane %v457_v12, 7  ;;  %v465_v18 = vshrl.u32 %v347_v7, 16  ;;  %v468_v22 = vshll.u32 %v347_v7, 16  ;;  %v352_v6 = vld [vmem:[%s13287_s10 + $0x40] sm:$0xf] }
  0x4b   : > { %v454_v24 = vsel %vm13313_vm12, %v446_v5, %v453_v47  ;;  %v730_v25 = vsel %vm13307_vm11, %v455_v14, %v729_v11  ;;  %v474_v27 = vshrl.u32 %v348_v13, 16  ;;  %v477_v29 = vshll.u32 %v348_v13, 16  ;;  %v746_v5 = vld [vmem:[#allocation2 + $0x60] sm:$0xf] }
  0x4c   : > { %v980_v33 = vsel %vm13293_vm8, %v975_v16, %v979_v9  ;;  %728 = vst.msk [vmem:[#allocation2 + $0x40] sm:$0xf] %vm280_vm1, %v454_v24  ;;  %731 = vst [vmem:[#allocation2 + $0x44] sm:$0x1] %v730_v25  ;;  %v462_v3 = vor.u32 %v460_v15, %v459_v17  ;;  %v463_v35 = vrot.slane %v459_v17, 4  ;;  %v467_v36 = vrot.slane %v465_v18, 7 }
  0x4d   : > { %v10771_v39 = vcombine.low %v970_v31, %v980_v33  ;;  %v476_v40 = vrot.slane %v474_v27, 7  ;;  %v482_v41 = vshrl.u32 %v349_v23, 16  ;;  %v485_v42 = vshll.u32 %v349_v23, 16  ;;  %v750_v15 = vld [vmem:[#allocation2 + $0x68] sm:$0x1] }
  0x4e   : > { %v470_v44 = vor.u32 %v468_v22, %v467_v36  ;;  %v472_v45 = vrot.slane %v467_v36, 4  ;;  %v733_v48 = vsel %vm13299_vm10, %v462_v3, %v732_v26  ;;  %v491_v49 = vshrl.u32 %v350_v30, 16 }
  0x4f   : > { %11840 = vmatprep.mubr.msk.bf16.mxu0 %vm1295_vm9, %v10771_v39  ;;  %734 = vst [vmem:[#allocation2 + $0x48] sm:$0xf] %v733_v48  ;;  %v479_v50 = vor.u32 %v477_v29, %v476_v40  ;;  %v480_v51 = vrot.slane %v476_v40, 4  ;;  %v484_v52 = vrot.slane %v482_v41, 7  ;;  %v494_v54 = vshll.u32 %v350_v30, 16 }
  0x50   : > { %v819_v55 = vld [vmem:[#allocation2 + $0x3c] sm:$0xf]  ;;  %v471_v56 = vsel %vm13313_vm12, %v463_v35, %v470_v44  ;;  %v737_v21 = vsel %vm13307_vm11, %v472_v45, %v736_v37  ;;  %v493_v58 = vrot.slane %v491_v49, 7  ;;  %v499_v59 = vshrl.u32 %v351_v43, 16  ;;  %v13436_v35 = vld [vmem:[%s16924_s1 + $0x4] sm:$0x3] }
  0x51   : > { %v982_v60 = vshrl.u32 %v819_v55, 16  ;;  %v985_v61 = vshll.u32 %v819_v55, 16  ;;  %735 = vst.msk [vmem:[#allocation2 + $0x4c] sm:$0xf] %vm280_vm1, %v471_v56  ;;  %738 = vst [vmem:[#allocation2 + $0x50] sm:$0x1] %v737_v21  ;;  %v487_v62 = vor.u32 %v485_v42, %v484_v52  ;;  %v740_v0 = vsel %vm13299_vm10, %v479_v50, %v739_v53  ;;  %12956 = vmatprep.subr.msk.bf16.mxu0 %vm1344_vm0, %v13436_v35 }
  0x52   : > { %v489_v63 = vrot.slane %v484_v52, 4  ;;  %v496_v46 = vor.u32 %v494_v54, %v493_v58  ;;  %v497_v1 = vrot.slane %v493_v58, 4  ;;  %v501_v4 = vrot.slane %v499_v59, 7  ;;  %741 = vst [vmem:[#allocation2 + $0x54] sm:$0xf] %v740_v0 }
  0x53   : > { %v820_v7 = vld [vmem:[#allocation2 + $0x40] sm:$0xf]  ;;  %v847_v8 = vld [vmem:[#allocation2 + $0x44] sm:$0x1]  ;;  %v984_v9 = vrot.slane %v982_v60, 4  ;;  %v987_v10 = vrot.slane %v985_v61, 5  ;;  %v488_v11 = vsel %vm13313_vm12, %v480_v51, %v487_v62  ;;  %v10800_v58 = vcombine.low %v13340_v19, %v13353_v32 }
  0x54   : > { %v744_v12 = vsel %vm13307_vm11, %v489_v63, %v743_v57  ;;  %v991_v13 = vshll.u32 %v820_v7, 16  ;;  %v995_v31 = vshrl.u32 %v820_v7, 16  ;;  %v1001_v47 = vshll.u32 %v847_v8, 16  ;;  %742 = vst.msk [vmem:[#allocation2 + $0x58] sm:$0xf] %vm280_vm1, %v488_v11 }
  0x55   : > { %745 = vst [vmem:[#allocation2 + $0x5c] sm:$0x1] %v744_v12  ;;  %v502_v14 = vshll.u32 %v351_v43, 16  ;;  %v988_v16 = vor.u32 %v987_v10, %v984_v9  ;;  %v506_v17 = vrot.slane %v501_v4, 4  ;;  %v747_v18 = vsel %vm13299_vm10, %v496_v46, %v746_v5 }
  0x56   : > { %v508_v22 = vshrl.u32 %v352_v6, 16  ;;  %v993_v23 = vrot.slane %v991_v13, 5  ;;  %v997_v24 = vrot.slane %v995_v31, 4  ;;  %v1003_v25 = vrot.slane %v1001_v47, 5  ;;  %v13427_v26 = vld [vmem:[#allocation2 + $0x48] sm:$0xf] }
  0x57   : > { %v504_v27 = vor.u32 %v502_v14, %v501_v4  ;;  %748 = vst [vmem:[#allocation2 + $0x60] sm:$0xf] %v747_v18  ;;  %v989_v29 = vrot.slane %v988_v16, 4  ;;  %v1006_v30 = vshrl.u32 %v13427_v26, 16  ;;  %v1009_v33 = vshll.u32 %v13427_v26, 16 }
  0x58   : > { %v751_v3 = vsel %vm13307_vm11, %v506_v17, %v750_v15  ;;  %v998_v36 = vor.u32 %v997_v24, %v993_v23  ;;  %v13438_v37 = vld [vmem:[#allocation2 + $0x4c] sm:$0xf]  ;;  %v848_v39 = vld [vmem:[#allocation2 + $0x50] sm:$0x1]  ;;  %v13442_v41 = vrot.slane %v508_v22, 7  ;;  %v511_v42 = vshll.u32 %v352_v6, 16 }
  0x59   : > { %v505_v40 = vsel %vm13313_vm12, %v497_v1, %v504_v27  ;;  %752 = vst [vmem:[#allocation2 + $0x68] sm:$0x1] %v751_v3  ;;  %v994_v43 = vsel %vm13293_vm8, %v989_v29, %v993_v23  ;;  %v1008_v44 = vrot.slane %v1006_v30, 4  ;;  %v1011_v45 = vrot.slane %v1009_v33, 5  ;;  %v13451_v52 = vld [vmem:[#allocation2 + $0x54] sm:$0xf] }
  0x5a   : > { %v1015_v48 = vshll.u32 %v13438_v37, 16  ;;  %749 = vst.msk [vmem:[#allocation2 + $0x64] sm:$0xf] %vm280_vm1, %v505_v40  ;;  %v999_v49 = vrot.slane %v998_v36, 4  ;;  %v1019_v50 = vshrl.u32 %v13438_v37, 16  ;;  %v1025_v51 = vshll.u32 %v848_v39, 16 }
  0x5b   : > { %v13454_v53 = vor.u32 %v511_v42, %v13442_v41  ;;  %v1012_v54 = vor.u32 %v1011_v45, %v1008_v44  ;;  %v13456_v56 = vld [vmem:[#allocation2 + $0x58] sm:$0xf]  ;;  %v1030_v57 = vshrl.u32 %v13451_v52, 16  ;;  %v1033_v62 = vshll.u32 %v13451_v52, 16  ;;  %v353_v17 = vld [vmem:[%s13287_s10 + $0x44] sm:$0xf] }
  0x5c   : > { %v1017_v55 = vrot.slane %v1015_v48, 5  ;;  %v849_v21 = vld [vmem:[#allocation2 + $0x5c] sm:$0x1]  ;;  %v1004_v59 = vsel %vm13293_vm8, %v999_v49, %v1003_v25  ;;  %v1021_v60 = vrot.slane %v1019_v50, 4  ;;  %v1027_v61 = vrot.slane %v1025_v51, 5 }
  0x5d   : > { %v10772_v63 = vcombine.low %v994_v43, %v1004_v59  ;;  %v1013_v0 = vrot.slane %v1012_v54, 4  ;;  %v1032_v46 = vrot.slane %v1030_v57, 4  ;;  %v1039_v1 = vshll.u32 %v13456_v56, 16  ;;  %v753_v25 = vld [vmem:[#allocation2 + $0x6c] sm:$0xf] }
  0x5e   : > { %v13465_v4 = vld [vmem:[#allocation2 + $0x60] sm:$0xf]  ;;  %v1022_v5 = vor.u32 %v1021_v60, %v1017_v55  ;;  %v1035_v6 = vrot.slane %v1033_v62, 5  ;;  %v1043_v7 = vshrl.u32 %v13456_v56, 16  ;;  %v1049_v8 = vshll.u32 %v849_v21, 16 }
  0x5f   : > { %11841 = vmatmul.mubr.msk.bf16.gmra.mrb[8].mxu0 %vm1295_vm9, %v10772_v63  ;;  %v1018_v9 = vsel %vm13293_vm8, %v1013_v0, %v1017_v55  ;;  %v1041_v10 = vrot.slane %v1039_v1, 5  ;;  %v1054_v12 = vshrl.u32 %v13465_v4, 16  ;;  %v1057_v13 = vshll.u32 %v13465_v4, 16  ;;  %v354_v27 = vld [vmem:[%s13287_s10 + $0x48] sm:$0xf] }
  0x60   : > { %v850_v11 = vld [vmem:[#allocation2 + $0x68] sm:$0x1]  ;;  %v1023_v31 = vrot.slane %v1022_v5, 4  ;;  %v1036_v47 = vor.u32 %v1035_v6, %v1032_v46  ;;  %v1045_v14 = vrot.slane %v1043_v7, 4  ;;  %v1051_v15 = vrot.slane %v1049_v8, 5 }
  0x61   : > { %v13473_v16 = vld [vmem:[#allocation2 + $0x64] sm:$0xf]  ;;  %v1056_v18 = vrot.slane %v1054_v12, 4  ;;  %v1059_v22 = vrot.slane %v1057_v13, 5  ;;  %v1073_v3 = vshll.u32 %v850_v11, 16  ;;  %v514_v49 = vrot.slane %v13442_v41, 4 }
  0x62   : > { %v1063_v23 = vshll.u32 %v13473_v16, 16  ;;  %v1067_v24 = vshrl.u32 %v13473_v16, 16  ;;  %v1028_v29 = vsel %vm13293_vm8, %v1023_v31, %v1027_v61  ;;  %v1037_v30 = vrot.slane %v1036_v47, 4  ;;  %v355_v43 = vld [vmem:[%s13287_s10 + $0x4c] sm:$0xf] }
  0x63   : > { %v1046_v33 = vor.u32 %v1045_v14, %v1041_v10  ;;  %v10773_v36 = vcombine.low %v1018_v9, %v1028_v29  ;;  %v1060_v39 = vor.u32 %v1059_v22, %v1056_v18  ;;  %v1075_v48 = vrot.slane %v1073_v3, 5  ;;  %v356_v21 = vld [vmem:[%s13287_s10 + $0x50] sm:$0xf]  ;;  %v757_v60 = vld [vmem:[#allocation2 + $0x74] sm:$0x1] }
  0x64   : > { %v1065_v40 = vrot.slane %v1063_v23, 5  ;;  %v1069_v42 = vrot.slane %v1067_v24, 4  ;;  %v1042_v44 = vsel %vm13293_vm8, %v1037_v30, %v1041_v10  ;;  %v516_v54 = vshrl.u32 %v353_v17, 16  ;;  %v357_v63 = vld [vmem:[%s13287_s10 + $0x54] sm:$0xf] }
  0x65   : > { %v1047_v45 = vrot.slane %v1046_v33, 4  ;;  %11844 = vmatprep.mubr.msk.bf16.mxu0 %vm1295_vm9, %v10773_v36  ;;  %v1061_v50 = vrot.slane %v1060_v39, 4  ;;  %v519_v55 = vshll.u32 %v353_v17, 16  ;;  %v754_v59 = vsel %vm13299_vm10, %v13454_v53, %v753_v25  ;;  %v760_v5 = vld [vmem:[#allocation2 + $0x78] sm:$0xf] }
  0x66   : > { %v1070_v51 = vor.u32 %v1069_v42, %v1065_v40  ;;  %v525_v61 = vshrl.u32 %v354_v27, 16  ;;  %v528_v62 = vshll.u32 %v354_v27, 16  ;;  %v518_v1 = vrot.slane %v516_v54, 7  ;;  %755 = vst [vmem:[#allocation2 + $0x6c] sm:$0xf] %v754_v59 }
  0x67   : > { %v1052_v57 = vsel %vm13293_vm8, %v1047_v45, %v1051_v15  ;;  %v1066_v0 = vsel %vm13293_vm8, %v1061_v50, %v1065_v40  ;;  %v533_v7 = vshrl.u32 %v355_v43, 16  ;;  %v536_v8 = vshll.u32 %v355_v43, 16  ;;  %v358_v10 = vld [vmem:[%s13287_s10 + $0x58] sm:$0xf]  ;;  %v764_v13 = vld [vmem:[#allocation2 + $0x80] sm:$0x1] }
  0x68   : > { %v10774_v41 = vcombine.low %v1042_v44, %v1052_v57  ;;  %v1071_v46 = vrot.slane %v1070_v51, 4  ;;  %v527_v6 = vrot.slane %v525_v61, 7  ;;  %v542_v9 = vshrl.u32 %v356_v21, 16  ;;  %v359_v47 = vld [vmem:[%s13287_s10 + $0x5c] sm:$0xf] }
  0x69   : > { %v521_v11 = vor.u32 %v519_v55, %v518_v1  ;;  %v523_v12 = vrot.slane %v518_v1, 4  ;;  %v545_v31 = vshll.u32 %v356_v21, 16  ;;  %v535_v18 = vrot.slane %v533_v7, 7  ;;  %v767_v27 = vld [vmem:[#allocation2 + $0x84] sm:$0xf] }
  0x6a   : > { %11845 = vmatmul.mubr.msk.bf16.gmra.mrb[12].mxu0 %vm1295_vm9, %v10774_v41  ;;  %v1076_v53 = vsel %vm13293_vm8, %v1071_v46, %v1075_v48  ;;  %v530_v15 = vor.u32 %v528_v62, %v527_v6  ;;  %v531_v17 = vrot.slane %v527_v6, 4  ;;  %v544_v24 = vrot.slane %v542_v9, 7  ;;  %v771_v48 = vld [vmem:[#allocation2 + $0x8c] sm:$0x1]  ;;  %v13518_v57 = vld [vmem:[%s13287_s10 + $0x60] sm:$0xf] }
  0x6b   : > { %v10775_v14 = vcombine.low %v1066_v0, %v1076_v53  ;;  %v522_v22 = vsel %vm13313_vm12, %v514_v49, %v521_v11  ;;  %v758_v23 = vsel %vm13307_vm11, %v523_v12, %v757_v60  ;;  %v550_v25 = vshrl.u32 %v357_v63, 16 }
  0x6c   : > { %756 = vst.msk [vmem:[#allocation2 + $0x70] sm:$0xf] %vm280_vm1, %v522_v22  ;;  %759 = vst [vmem:[#allocation2 + $0x74] sm:$0x1] %v758_v23  ;;  %v538_v29 = vor.u32 %v536_v8, %v535_v18  ;;  %v540_v30 = vrot.slane %v535_v18, 4  ;;  %v761_v33 = vsel %vm13299_vm10, %v530_v15, %v760_v5  ;;  %v553_v3 = vshll.u32 %v357_v63, 16 }
  0x6d   : > { %11848 = vmatprep.mubr.msk.bf16.mxu0 %vm1295_vm9, %v10775_v14  ;;  %762 = vst [vmem:[#allocation2 + $0x78] sm:$0xf] %v761_v33  ;;  %v547_v36 = vor.u32 %v545_v31, %v544_v24  ;;  %v548_v39 = vrot.slane %v544_v24, 4  ;;  %v552_v40 = vrot.slane %v550_v25, 7  ;;  %v559_v42 = vshrl.u32 %v358_v10, 16 }
  0x6e   : > { %v13508_v43 = vld [vmem:[#allocation2 + $0x6c] sm:$0xf]  ;;  %v539_v44 = vsel %vm13313_vm12, %v531_v17, %v538_v29  ;;  %v765_v45 = vsel %vm13307_vm11, %v540_v30, %v764_v13  ;;  %v562_v49 = vshll.u32 %v358_v10, 16  ;;  %v567_v50 = vshrl.u32 %v359_v47, 16  ;;  %v774_v63 = vld [vmem:[#allocation2 + $0x90] sm:$0xf] }
  0x6f   : > { %v1078_v51 = vshrl.u32 %v13508_v43, 16  ;;  %v1081_v54 = vshll.u32 %v13508_v43, 16  ;;  %763 = vst.msk [vmem:[#allocation2 + $0x7c] sm:$0xf] %vm280_vm1, %v539_v44  ;;  %766 = vst [vmem:[#allocation2 + $0x80] sm:$0x1] %v765_v45  ;;  %v555_v55 = vor.u32 %v553_v3, %v552_v40  ;;  %v768_v59 = vsel %vm13299_vm10, %v547_v36, %v767_v27 }
  0x70   : > { %v557_v21 = vrot.slane %v552_v40, 4  ;;  %v561_v60 = vrot.slane %v559_v42, 7  ;;  %v569_v61 = vrot.slane %v567_v50, 7  ;;  %v570_v62 = vshll.u32 %v359_v47, 16  ;;  %769 = vst [vmem:[#allocation2 + $0x84] sm:$0xf] %v768_v59 }
  0x71   : > { %v1080_v41 = vrot.slane %v1078_v51, 4  ;;  %v1083_v0 = vrot.slane %v1081_v54, 5  ;;  %v556_v46 = vsel %vm13313_vm12, %v548_v39, %v555_v55  ;;  %v778_v5 = vld [vmem:[#allocation2 + $0x98] sm:$0x1]  ;;  %v576_v12 = vshrl.u32 %v13518_v57, 16 }
  0x72   : > { %v772_v1 = vsel %vm13307_vm11, %v557_v21, %v771_v48  ;;  %770 = vst.msk [vmem:[#allocation2 + $0x88] sm:$0xf] %vm280_vm1, %v556_v46  ;;  %v564_v6 = vor.u32 %v562_v49, %v561_v60  ;;  %v565_v7 = vrot.slane %v561_v60, 4  ;;  %v572_v8 = vor.u32 %v570_v62, %v569_v61 }
  0x73   : > { %773 = vst [vmem:[#allocation2 + $0x8c] sm:$0x1] %v772_v1  ;;  %v574_v9 = vrot.slane %v569_v61, 4  ;;  %v13527_v10 = vld [vmem:[#allocation2 + $0x70] sm:$0xf]  ;;  %v1084_v11 = vor.u32 %v1083_v0, %v1080_v41  ;;  %v579_v30 = vshll.u32 %v13518_v57, 16 }
  0x74   : > { %v13529_v53 = vld [vmem:[#allocation2 + $0x74] sm:$0x1]  ;;  %v1087_v13 = vshll.u32 %v13527_v10, 16  ;;  %v1091_v31 = vshrl.u32 %v13527_v10, 16  ;;  %v13535_v14 = vld [vmem:[#allocation2 + $0x78] sm:$0xf]  ;;  %v573_v15 = vsel %vm13313_vm12, %v565_v7, %v572_v8  ;;  %v775_v23 = vsel %vm13299_vm10, %v564_v6, %v774_v63 }
  0x75   : > { %v1097_v47 = vshll.u32 %v13529_v53, 16  ;;  %v1085_v17 = vrot.slane %v1084_v11, 4  ;;  %v1102_v18 = vshrl.u32 %v13535_v14, 16  ;;  %v1105_v22 = vshll.u32 %v13535_v14, 16  ;;  %777 = vst.msk [vmem:[#allocation2 + $0x94] sm:$0xf] %vm280_vm1, %v573_v15 }
  0x76   : > { %v1089_v24 = vrot.slane %v1087_v13, 5  ;;  %v1093_v25 = vrot.slane %v1091_v31, 4  ;;  %v13544_v27 = vld [vmem:[#allocation2 + $0x7c] sm:$0xf]  ;;  %776 = vst [vmem:[#allocation2 + $0x90] sm:$0xf] %v775_v23  ;;  %v779_v29 = vsel %vm13307_vm11, %v574_v9, %v778_v5 }
  0x77   : > { %v13549_v33 = vld [vmem:[#allocation2 + $0x80] sm:$0x1]  ;;  %v1104_v3 = vrot.slane %v1102_v18, 4  ;;  %v1107_v36 = vrot.slane %v1105_v22, 5  ;;  %v1111_v39 = vshll.u32 %v13544_v27, 16  ;;  %v1115_v40 = vshrl.u32 %v13544_v27, 16 }
  0x78   : > { %780 = vst [vmem:[#allocation2 + $0x98] sm:$0x1] %v779_v29  ;;  %v1094_v42 = vor.u32 %v1093_v25, %v1089_v24  ;;  %v1099_v44 = vrot.slane %v1097_v47, 5  ;;  %v1121_v45 = vshll.u32 %v13549_v33, 16  ;;  %v13554_v48 = vld [vmem:[#allocation2 + $0x84] sm:$0xf]  ;;  %v1090_v50 = vsel %vm13293_vm8, %v1085_v17, %v1089_v24 }
  0x79   : > { %v13556_v49 = vrot.slane %v576_v12, 7  ;;  %v1108_v51 = vor.u32 %v1107_v36, %v1104_v3  ;;  %v1113_v54 = vrot.slane %v1111_v39, 5  ;;  %v1117_v55 = vrot.slane %v1115_v40, 4  ;;  %v13560_v21 = vld [vmem:[#allocation2 + $0x88] sm:$0xf] }
  0x7a   : > { %v13562_v57 = vld [vmem:[#allocation2 + $0x8c] sm:$0x1]  ;;  %v1095_v59 = vrot.slane %v1094_v42, 4  ;;  %v1123_v60 = vrot.slane %v1121_v45, 5  ;;  %v1126_v61 = vshrl.u32 %v13554_v48, 16  ;;  %v1129_v62 = vshll.u32 %v13554_v48, 16 }
  0x7b   : > { %v1109_v63 = vrot.slane %v1108_v51, 4  ;;  %v1118_v41 = vor.u32 %v1117_v55, %v1113_v54  ;;  %v1135_v0 = vshll.u32 %v13560_v21, 16  ;;  %v1139_v46 = vshrl.u32 %v13560_v21, 16  ;;  %v361_v23 = vld [vmem:[%s13287_s10 + $0x64] sm:$0xf] }
  0x7c   : > { %v1100_v1 = vsel %vm13293_vm8, %v1095_v59, %v1099_v44  ;;  %v1128_v5 = vrot.slane %v1126_v61, 4  ;;  %v1131_v6 = vrot.slane %v1129_v62, 5  ;;  %v1145_v7 = vshll.u32 %v13562_v57, 16  ;;  %v13571_v8 = vld [vmem:[#allocation2 + $0x94] sm:$0xf] }
  0x7d   : > { %v10776_v9 = vcombine.low %v1090_v50, %v1100_v1  ;;  %v1114_v11 = vsel %vm13293_vm8, %v1109_v63, %v1113_v54  ;;  %v1119_v12 = vrot.slane %v1118_v41, 4  ;;  %v1137_v13 = vrot.slane %v1135_v0, 5  ;;  %v13575_v31 = vld [vmem:[#allocation2 + $0x90] sm:$0xf]  ;;  %v781_v36 = vld [vmem:[#allocation2 + $0x9c] sm:$0xf] }
  0x7e   : > { %v1132_v47 = vor.u32 %v1131_v6, %v1128_v5  ;;  %v1141_v15 = vrot.slane %v1139_v46, 4  ;;  %v1147_v17 = vrot.slane %v1145_v7, 5  ;;  %v1150_v22 = vshrl.u32 %v13575_v31, 16  ;;  %v362_v39 = vld [vmem:[%s13287_s10 + $0x68] sm:$0xf] }
  0x7f   : > { %v13577_v18 = vld [vmem:[#allocation2 + $0x98] sm:$0x1]  ;;  %11849 = vmatmul.mubr.msk.bf16.gmra.mrb[16].mxu0 %vm1295_vm9, %v10776_v9  ;;  %v1124_v24 = vsel %vm13293_vm8, %v1119_v12, %v1123_v60  ;;  %v1153_v25 = vshll.u32 %v13575_v31, 16  ;;  %v1159_v29 = vshll.u32 %v13571_v8, 16  ;;  %v1163_v3 = vshrl.u32 %v13571_v8, 16 }
  0x80   : > { %v10777_v40 = vcombine.low %v1114_v11, %v1124_v24  ;;  %v1133_v42 = vrot.slane %v1132_v47, 4  ;;  %v1142_v44 = vor.u32 %v1141_v15, %v1137_v13  ;;  %v1152_v45 = vrot.slane %v1150_v22, 4  ;;  %v363_v59 = vld [vmem:[%s13287_s10 + $0x6c] sm:$0xf]  ;;  %v785_v9 = vld [vmem:[#allocation2 + $0xa4] sm:$0x1] }
  0x81   : > { %v1155_v50 = vrot.slane %v1153_v25, 5  ;;  %v1161_v51 = vrot.slane %v1159_v29, 5  ;;  %v1165_v54 = vrot.slane %v1163_v3, 4  ;;  %v1169_v55 = vshll.u32 %v13577_v18, 16  ;;  %v364_v15 = vld [vmem:[%s13287_s10 + $0x70] sm:$0xf] }
  0x82   : > { %11852 = vmatprep.mubr.msk.bf16.mxu0 %vm1295_vm9, %v10777_v40  ;;  %v1138_v60 = vsel %vm13293_vm8, %v1133_v42, %v1137_v13  ;;  %v1143_v61 = vrot.slane %v1142_v44, 4  ;;  %v581_v62 = vor.u32 %v579_v30, %v13556_v49  ;;  %v582_v63 = vrot.slane %v13556_v49, 4  ;;  %v788_v49 = vld [vmem:[#allocation2 + $0xa8] sm:$0xf]  ;;  %v365_v3 = vld [vmem:[%s13287_s10 + $0x74] sm:$0xf] }
  0x83   : > { %v1156_v41 = vor.u32 %v1155_v50, %v1152_v45  ;;  %v1166_v0 = vor.u32 %v1165_v54, %v1161_v51  ;;  %v1171_v46 = vrot.slane %v1169_v55, 5  ;;  %v584_v1 = vshrl.u32 %v361_v23, 16  ;;  %v792_v42 = vld [vmem:[#allocation2 + $0xb0] sm:$0x1] }
  0x84   : > { %v1148_v5 = vsel %vm13293_vm8, %v1143_v61, %v1147_v17  ;;  %v587_v6 = vshll.u32 %v361_v23, 16  ;;  %v782_v7 = vsel %vm13299_vm10, %v581_v62, %v781_v36  ;;  %v593_v11 = vshrl.u32 %v362_v39, 16 }
  0x85   : > { %v10778_v12 = vcombine.low %v1138_v60, %v1148_v5  ;;  %v1157_v13 = vrot.slane %v1156_v41, 4  ;;  %v1167_v30 = vrot.slane %v1166_v0, 4  ;;  %v586_v47 = vrot.slane %v584_v1, 7  ;;  %783 = vst [vmem:[#allocation2 + $0x9c] sm:$0xf] %v782_v7 }
  0x86   : > { %v595_v22 = vrot.slane %v593_v11, 7  ;;  %v596_v24 = vshll.u32 %v362_v39, 16  ;;  %v601_v25 = vshrl.u32 %v363_v59, 16  ;;  %v604_v29 = vshll.u32 %v363_v59, 16 }
  0x87   : > { %11853 = vmatmul.mubr.msk.bf16.gmra.mrb[20].mxu0 %vm1295_vm9, %v10778_v12  ;;  %v1162_v17 = vsel %vm13293_vm8, %v1157_v13, %v1161_v51  ;;  %v1172_v23 = vsel %vm13293_vm8, %v1167_v30, %v1171_v46  ;;  %v589_v36 = vor.u32 %v587_v6, %v586_v47  ;;  %v591_v40 = vrot.slane %v586_v47, 4  ;;  %v799_v30 = vld [vmem:[#allocation2 + $0xbc] sm:$0x1] }
  0x88   : > { %v10779_v44 = vcombine.low %v1162_v17, %v1172_v23  ;;  %v598_v45 = vor.u32 %v596_v24, %v595_v22  ;;  %v599_v50 = vrot.slane %v595_v22, 4  ;;  %v603_v54 = vrot.slane %v601_v25, 7 }
  0x89   : > { %v590_v39 = vsel %vm13313_vm12, %v582_v63, %v589_v36  ;;  %v786_v55 = vsel %vm13307_vm11, %v591_v40, %v785_v9  ;;  %v610_v59 = vshrl.u32 %v364_v15, 16  ;;  %v613_v60 = vshll.u32 %v364_v15, 16  ;;  %v795_v63 = vld [vmem:[#allocation2 + $0xb4] sm:$0xf] }
  0x8a   : > { %11856 = vmatprep.mubr.msk.bf16.mxu0 %vm1295_vm9, %v10779_v44  ;;  %784 = vst.msk [vmem:[#allocation2 + $0xa0] sm:$0xf] %vm280_vm1, %v590_v39  ;;  %787 = vst [vmem:[#allocation2 + $0xa4] sm:$0x1] %v786_v55  ;;  %v606_v51 = vor.u32 %v604_v29, %v603_v54  ;;  %v608_v61 = vrot.slane %v603_v54, 4  ;;  %v789_v62 = vsel %vm13299_vm10, %v598_v45, %v788_v49  ;;  %v618_v41 = vshrl.u32 %v365_v3, 16 }
  0x8b   : > { %790 = vst [vmem:[#allocation2 + $0xa8] sm:$0xf] %v789_v62  ;;  %v612_v0 = vrot.slane %v610_v59, 7  ;;  %v621_v46 = vshll.u32 %v365_v3, 16  ;;  %v10808_v3 = vcombine.low %v13508_v43, %v13527_v10  ;;  %v10809_v17 = vcombine.low %v13535_v14, %v13544_v27  ;;  %v13057_v59 = vld [vmem:[#allocation2 + $0x10] sm:$0xf] }
  0x8c   : > { %v13614_v1 = vld [vmem:[#allocation2 + $0x9c] sm:$0xf]  ;;  %v607_v5 = vsel %vm13313_vm12, %v599_v50, %v606_v51  ;;  %v793_v6 = vsel %vm13307_vm11, %v608_v61, %v792_v42  ;;  %v620_v7 = vrot.slane %v618_v41, 7  ;;  %v10810_v42 = vcombine.low %v13554_v48, %v13560_v21 }
  0x8d   : > { %v1174_v9 = vshrl.u32 %v13614_v1, 16  ;;  %v1177_v11 = vshll.u32 %v13614_v1, 16  ;;  %791 = vst.msk [vmem:[#allocation2 + $0xac] sm:$0xf] %vm280_vm1, %v607_v5  ;;  %794 = vst [vmem:[#allocation2 + $0xb0] sm:$0x1] %v793_v6  ;;  %v615_v12 = vor.u32 %v613_v60, %v612_v0  ;;  %v10811_v44 = vcombine.low %v13575_v31, %v13571_v8 }
  0x8e   : > { %v616_v13 = vrot.slane %v612_v0, 4  ;;  %v623_v47 = vor.u32 %v621_v46, %v620_v7  ;;  %v625_v49 = vrot.slane %v620_v7, 4  ;;  %v1861_v60 = vrot.slane %v13057_v59, 5 }
  0x8f   : > { %v1176_v15 = vrot.slane %v1174_v9, 4  ;;  %v1179_v22 = vrot.slane %v1177_v11, 5  ;;  %v796_v24 = vsel %vm13299_vm10, %v615_v12, %v795_v63  ;;  %vm1849_vm13 = vcmask 1042432  }
  0x90   : > { %v624_v25 = vsel %vm13313_vm12, %v616_v13, %v623_v47  ;;  %797 = vst [vmem:[#allocation2 + $0xb4] sm:$0xf] %v796_v24  ;;  %v800_v29 = vsel %vm13307_vm11, %v625_v49, %v799_v30  ;;  %vm1850_vm14 = vcmask 1046532   ;;  %v1864_v30 = vrot.slane %v13058_v2, 5 }
  0x91   : > { %v13633_v23 = vld [vmem:[#allocation2 + $0xa0] sm:$0xf]  ;;  %v13635_v36 = vld [vmem:[#allocation2 + $0xa4] sm:$0x1]  ;;  %v1180_v40 = vor.u32 %v1179_v22, %v1176_v15  ;;  %798 = vst.msk [vmem:[#allocation2 + $0xb8] sm:$0xf] %vm280_vm1, %v624_v25  ;;  %vm13684_vm15 = vmor %vm1849_vm13, %vm1850_vm14 }
  0x92   : > { %801 = vst [vmem:[#allocation2 + $0xbc] sm:$0x1] %v800_v29  ;;  %v1183_v45 = vshll.u32 %v13633_v23, 16  ;;  %v1187_v50 = vshrl.u32 %v13633_v23, 16  ;;  %v1193_v54 = vshll.u32 %v13635_v36, 16  ;;  %v1863_v2 = vrot.slane %v1861_v60, 4 }
  0x93   : > { %v13645_v39 = vld [vmem:[#allocation2 + $0xa8] sm:$0xf]  ;;  %v1181_v62 = vrot.slane %v1180_v40, 4  ;;  %v1924_v32 = vrot.slane %v13544_v27, 5  ;;  %v1801_v27 = vld [vmem:[#allocation2] sm:$0xe] }
  0x94   : > { %v1198_v51 = vshrl.u32 %v13645_v39, 16  ;;  %v1201_v61 = vshll.u32 %v13645_v39, 16  ;;  %v1185_v41 = vrot.slane %v1183_v45, 5  ;;  %v1189_v0 = vrot.slane %v1187_v50, 4  ;;  %v13651_v46 = vld [vmem:[#allocation2 + $0xac] sm:$0xf] }
  0x95   : > { %v13653_v63 = vld [vmem:[#allocation2 + $0xb0] sm:$0x1]  ;;  %v1207_v7 = vshll.u32 %v13651_v46, 16  ;;  %v1211_v9 = vshrl.u32 %v13651_v46, 16  ;;  %v1195_v12 = vrot.slane %v1193_v54, 5  ;;  %vm6598_vm2 = vcmask 1043456  }
  0x96   : > { %v1200_v5 = vrot.slane %v1198_v51, 4  ;;  %v1203_v6 = vrot.slane %v1201_v61, 5  ;;  %v1190_v11 = vor.u32 %v1189_v0, %v1185_v41  ;;  %v1217_v13 = vshll.u32 %v13653_v63, 16  ;;  %v1802_v61 = vld [vmem:[#allocation2 + $0xc] sm:$0xe] }
  0x97   : > { %v1209_v49 = vrot.slane %v1207_v7, 5  ;;  %v1213_v15 = vrot.slane %v1211_v9, 4  ;;  %v13660_v22 = vld [vmem:[#allocation2 + $0xb4] sm:$0xf]  ;;  %v1186_v24 = vsel %vm13293_vm8, %v1181_v62, %v1185_v41  ;;  %vm6549_vm3 = vcmask 64512  }
  0x98   : > { %v1204_v47 = vor.u32 %v1203_v6, %v1200_v5  ;;  %v1191_v25 = vrot.slane %v1190_v11, 4  ;;  %v1219_v29 = vrot.slane %v1217_v13, 5  ;;  %v13664_v40 = vld [vmem:[#allocation2 + $0xb8] sm:$0xf]  ;;  %v1222_v59 = vshrl.u32 %v13660_v22, 16 }
  0x99   : > { %v13666_v45 = vld [vmem:[#allocation2 + $0xbc] sm:$0x1]  ;;  %v1214_v54 = vor.u32 %v1213_v15, %v1209_v49  ;;  %v1225_v51 = vshll.u32 %v13660_v22, 16  ;;  %v1231_v5 = vshll.u32 %v13664_v40, 16  ;;  %v1235_v62 = vshrl.u32 %v13664_v40, 16 }
  0x9a   : > { %v1205_v50 = vrot.slane %v1204_v47, 4  ;;  %v1196_v0 = vsel %vm13293_vm8, %v1191_v25, %v1195_v12  ;;  %v1241_v41 = vshll.u32 %v13666_v45, 16  ;;  %v1224_v11 = vrot.slane %v1222_v59, 4 }
  0x9b   : > { %v10780_v6 = vcombine.low %v1186_v24, %v1196_v0  ;;  %v1215_v9 = vrot.slane %v1214_v54, 4  ;;  %v1227_v13 = vrot.slane %v1225_v51, 5  ;;  %v1233_v47 = vrot.slane %v1231_v5, 5 }
  0x9c   : > { %v1210_v7 = vsel %vm13293_vm8, %v1205_v50, %v1209_v49  ;;  %v1237_v15 = vrot.slane %v1235_v62, 4  ;;  %v1243_v25 = vrot.slane %v1241_v41, 5  ;;  %v10814_v55 = vcombine.low %v13660_v22, %v13664_v40  ;;  %v13071_v22 = vld [vmem:[#allocation2 + $0x2c] sm:$0x1] }
  0x9d   : > { %11857 = vmatmul.mubr.msk.bf16.gmra.mrb[24].mxu0 %vm1295_vm9, %v10780_v6  ;;  %v1220_v12 = vsel %vm13293_vm8, %v1215_v9, %v1219_v29  ;;  %v1228_v50 = vor.u32 %v1227_v13, %v1224_v11  ;;  %v10832_v59 = vrot.slane %v1802_v61, 9  ;;  %v13695_v5 = vsel %vm13684_vm15, %v1863_v2, %v1864_v30  ;;  %v13059_v61 = vld [vmem:[#allocation2] sm:$0xf]  ;;  %v13701_v6 = vld [vmem:[#allocation2 + $0x4] sm:$0xf] }
  0x9e   : > { %v10781_v24 = vcombine.low %v1210_v7, %v1220_v12  ;;  %v1238_v54 = vor.u32 %v1237_v15, %v1233_v47  ;;  %v10799_v7 = vcombine.low %v13059_v61, %v13701_v6  ;;  %v1810_v30 = vld [vmem:[#allocation2 + $0x6c] sm:$0xe]  ;;  %v13061_v11 = vld [vmem:[#allocation2 + $0x18] sm:$0xf]  ;;  %v13708_v13 = vld [vmem:[#allocation2 + $0x1c] sm:$0xf] }
  0x9f   : > { %v1229_v51 = vrot.slane %v1228_v50, 4  ;;  %v13691_v29 = vsel %vm13684_vm15, %v10832_v59, %v1861_v60  ;;  %v2063_v15 = vsel %vm1344_vm0, %v13436_v35, 0  ;;  %v13716_v12 = vld [vmem:[%s16924_s1 + $0x6] sm:$0x3]  ;;  %v1811_v50 = vld [vmem:[#allocation2 + $0x78] sm:$0xe] }
  0xa0   : > { %11860 = vmatprep.mubr.msk.bf16.mxu0 %vm1295_vm9, %v10781_v24  ;;  %v1239_v0 = vrot.slane %v1238_v54, 4  ;;  %v10849_v9 = vcombine.low %v13691_v29, %v13695_v5  ;;  %v1917_v24 = vrot.slane %v13527_v10, 5  ;;  %v1812_v54 = vld [vmem:[#allocation2 + $0x84] sm:$0xe]  ;;  %v1920_v2 = vrot.slane %v13529_v53, 5 }
  0xa1   : > { %v1234_v62 = vsel %vm13293_vm8, %v1229_v51, %v1233_v47  ;;  %v10801_v47 = vcombine.low %v13061_v11, %v13708_v13  ;;  %v13063_v51 = vld [vmem:[#allocation2 + $0x24] sm:$0xf]  ;;  %v10841_v19 = vrot.slane %v1811_v50, 9  ;;  %v13736_v61 = vld [vmem:[#allocation2 + $0x34] sm:$0xf]  ;;  %v1931_v11 = vrot.slane %v13560_v21, 5 }
  0xa2   : > { %v1244_v41 = vsel %vm13293_vm8, %v1239_v0, %v1243_v25  ;;  %v10840_v25 = vrot.slane %v1810_v30, 9  ;;  %v1919_v59 = vrot.slane %v1917_v24, 4  ;;  %v13729_v0 = vld [vmem:[#allocation2 + $0x28] sm:$0xf]  ;;  %v10842_v30 = vrot.slane %v1812_v54, 9 }
  0xa3   : > { %v10782_v60 = vcombine.low %v1234_v62, %v1244_v41  ;;  %v10802_v62 = vcombine.low %v13063_v51, %v13729_v0  ;;  %v1813_v41 = vld [vmem:[#allocation2 + $0x90] sm:$0xe]  ;;  %v1938_v54 = vrot.slane %v13571_v8, 5  ;;  %v13069_v21 = vld [vmem:[#allocation2 + $0x8] sm:$0x1] }
  0xa4   : > { %v13726_v35 = vsel %vm13684_vm15, %v10840_v25, %v1917_v24  ;;  %v13741_v53 = vsel %vm13684_vm15, %v1919_v59, %v1920_v2  ;;  %v1926_v25 = vrot.slane %v1924_v32, 4  ;;  %v1934_v24 = vrot.slane %v13562_v57, 5  ;;  %v1806_v29 = vld [vmem:[#allocation2 + $0x3c] sm:$0xe]  ;;  %v13073_v5 = vld [vmem:[#allocation2 + $0x4c] sm:$0xf] }
  0xa5   : > { %11861 = vmatmul.mubr.msk.bf16.gmra.mrb[28].mxu0 %vm1295_vm9, %v10782_v60  ;;  %v13753_v50 = vsel %vm13684_vm15, %v10842_v30, %v1931_v11  ;;  %v1933_v59 = vrot.slane %v1931_v11, 4  ;;  %v10843_v2 = vrot.slane %v1813_v41, 9  ;;  %v1940_v11 = vrot.slane %v1938_v54, 4 }
  0xa6   : > { %11866 = vmatprep.mubr.msk.bf16.mxu0 %vm1295_vm9, %v10799_v7  ;;  %v13066_v7 = vld [vmem:[#allocation2 + $0x30] sm:$0xf]  ;;  %v1948_v57 = vrot.slane %v13635_v36, 5  ;;  %v1959_v36 = vrot.slane %v13664_v40, 5  ;;  %v1878_v40 = vrot.slane %v13071_v22, 5 }
  0xa7   : > { %v10803_v60 = vcombine.low %v13066_v7, %v13736_v61  ;;  %v1941_v7 = vrot.slane %v13577_v18, 5  ;;  %v13766_v30 = vsel %vm13684_vm15, %v1933_v59, %v1934_v24  ;;  %v13770_v41 = vsel %vm13684_vm15, %v10843_v2, %v1938_v54  ;;  %v13801_v18 = vld [vmem:[#allocation2 + $0x40] sm:$0xf] }
  0xa8   : > { %v1952_v2 = vrot.slane %v13651_v46, 5 }
  0xa9   : > { %v13783_v24 = vsel %vm13684_vm15, %v1940_v11, %v1941_v7  ;;  %v13067_v11 = vld [vmem:[#allocation2 + $0x3c] sm:$0xf] }
  0xaa   : > { %v10804_v54 = vcombine.low %v13067_v11, %v13801_v18 }
  0xad   : > { %11867 = vmatmul.mubr.msk.bf16.vlgmr.msra.gmra.mrb[0].mxu0 %vm1295_vm9, %v10800_v58  ;;  %v1927_v58 = vrot.slane %v13549_v33, 5  ;;  %v13748_v33 = vsel %vm13684_vm15, %v10841_v19, %v1924_v32  ;;  %v1945_v19 = vrot.slane %v13633_v23, 5  ;;  %v1815_v32 = vld [vmem:[#allocation2 + $0xa8] sm:$0xe] }
  0xae   : > { %11899 = vmatpush3.bf16.msra.mxu0 %v2063_v15  ;;  %11870 = vmatprep.mubr.msk.bf16.mxu0 %vm1295_vm9, %v10801_v47  ;;  %v1814_v47 = vld [vmem:[#allocation2 + $0x9c] sm:$0xe]  ;;  %v10845_v59 = vrot.slane %v1815_v32, 9  ;;  %v1954_v32 = vrot.slane %v1952_v2, 4 }
  0xaf   : > { %12957 = vmatprep.subr.msk.bf16.mxu0 %vm1344_vm0, %v13716_v12  ;;  %v13758_v51 = vsel %vm13684_vm15, %v1926_v25, %v1927_v58  ;;  %v10844_v15 = vrot.slane %v1814_v47, 9  ;;  %v1816_v58 = vld [vmem:[#allocation2 + $0xb4] sm:$0xe]  ;;  %v1947_v25 = vrot.slane %v1945_v19, 4 }
  0xb0   : > { %v13798_v7 = vsel %vm13684_vm15, %v10845_v59, %v1952_v2 }
  0xb1   : > { %v13777_v47 = vsel %vm13684_vm15, %v10844_v15, %v1945_v19  ;;  %v13791_v15 = vsel %vm13684_vm15, %v1947_v25, %v1948_v57  ;;  %v10846_v19 = vrot.slane %v1816_v58, 9  ;;  %v1961_v58 = vrot.slane %v1959_v36, 4 }
  0xb2   : > { %v10805_v25 = vcombine.low %v13427_v26, %v13438_v37  ;;  %v10806_v26 = vcombine.low %v13451_v52, %v13456_v56  ;;  %v10807_v37 = vcombine.low %v13465_v4, %v13473_v16  ;;  %v1854_v4 = vrot.slane %v13701_v6, 5 }
  0xb3   : > { %v13806_v57 = vsel %vm13684_vm15, %v10846_v19, %v1959_v36  ;;  %v802_v36 = vld [vmem:[#allocation2 + $0xc0] sm:$0xf]  ;;  %v17057_v6 = vcombine.low %v13645_v39, %v13651_v46  ;;  %v1875_v39 = vrot.slane %v13729_v0, 5 }
  0xb5   : > { %11871 = vmatmul.mubr.msk.bf16.gmra.mrb[4].mxu0 %vm1295_vm9, %v10802_v62  ;;  %v1955_v62 = vrot.slane %v13653_v63, 5  ;;  %v1962_v63 = vrot.slane %v13666_v45, 5 }
  0xb6   : > { %11874 = vmatprep.mubr.msk.bf16.mxu0 %vm1295_vm9, %v10803_v60  ;;  %v10861_v60 = vcombine.low %v13777_v47, %v13791_v15  ;;  %v13969_v47 = vld [vmem:[#allocation2 + $0x38] sm:$0x1]  ;;  %v3429_v15 = vrot.slane %v13966_v34, 5 }
  0xb7   : > { %v13812_v59 = vsel %vm13684_vm15, %v1954_v32, %v1955_v62  ;;  %v13818_v2 = vsel %vm13684_vm15, %v1961_v58, %v1962_v63  ;;  %v366_v62 = vld [vmem:[%s13287_s10 + $0x78] sm:$0xf]  ;;  %v10831_v32 = vrot.slane %v1801_v27, 9  ;;  %v1856_v63 = vrot.slane %v1854_v4, 4 }
  0xb8   : > { %v10862_v45 = vcombine.low %v13798_v7, %v13812_v59  ;;  %v10863_v19 = vcombine.low %v13806_v57, %v13818_v2  ;;  %v627_v52 = vshrl.u32 %v366_v62, 16  ;;  %v630_v43 = vshll.u32 %v366_v62, 16  ;;  %v1803_v58 = vld [vmem:[#allocation2 + $0x18] sm:$0xe]  ;;  %v13072_v27 = vld [vmem:[#allocation2 + $0x38] sm:$0x1] }
  0xb9   : > { %v1855_v11 = vsel %vm13684_vm15, %v10831_v32, %v1854_v4  ;;  %v3432_v7 = vrot.slane %v13969_v47, 5  ;;  %v3431_v57 = vrot.slane %v3429_v15, 4  ;;  %v12987_v59 = vld [vmem:[#allocation2 + $0x30] sm:$0xff]   ;;  %v12988_v2 = vld [vmem:[#allocation2 + $0x3c] sm:$0xff]  }
  0xba   : > { %v629_v16 = vrot.slane %v627_v52, 7  ;;  %v1882_v52 = vrot.slane %v13736_v61, 5 }
  0xbc   : > { %v1884_v0 = vrot.slane %v1882_v52, 4 }
  0xbd   : > { %11875 = vmatmul.mubr.msk.bf16.gmra.mrb[8].mxu0 %vm1295_vm9, %v10804_v54  ;;  %v367_v54 = vld [vmem:[%s13287_s10 + $0x7c] sm:$0xf] }
  0xbe   : > { %11878 = vmatprep.mubr.msk.bf16.mxu0 %vm1295_vm9, %v10805_v25  ;;  %v635_v56 = vshrl.u32 %v367_v54, 16  ;;  %v638_v14 = vshll.u32 %v367_v54, 16  ;;  %v1868_v25 = vrot.slane %v13708_v13, 5  ;;  %v1804_v54 = vld [vmem:[#allocation2 + $0x24] sm:$0xe] }
  0xc0   : > { %v13849_v10 = vrot.slane %v635_v56, 7  ;;  %v1870_v62 = vrot.slane %v1868_v25, 4  ;;  %v1805_v56 = vld [vmem:[#allocation2 + $0x30] sm:$0xe] }
  0xc2   : > { %v640_v48 = vor.u32 %v638_v14, %v13849_v10  ;;  %v10835_v14 = vrot.slane %v1805_v56, 9 }
  0xc5   : > { %11879 = vmatmul.mubr.msk.bf16.gmra.mrb[12].mxu0 %vm1295_vm9, %v10806_v26 }
  0xc6   : > { %11882 = vmatprep.mubr.msk.bf16.mxu0 %vm1295_vm9, %v10807_v37  ;;  %v10833_v37 = vrot.slane %v1803_v58, 9 }
  0xc8   : > { %v1869_v46 = vsel %vm13684_vm15, %v10833_v37, %v1868_v25  ;;  %v13076_v37 = vld [vmem:[#allocation2 + $0x58] sm:$0xf] }
  0xcd   : > { %11883 = vmatmul.mubr.msk.bf16.gmra.mrb[16].mxu0 %vm1295_vm9, %v10808_v3  ;;  %v632_v3 = vor.u32 %v630_v43, %v629_v16  ;;  %v1877_v43 = vrot.slane %v1875_v39, 4 }
  0xce   : > { %11886 = vmatprep.mubr.msk.bf16.mxu0 %vm1295_vm9, %v10809_v17  ;;  %v633_v17 = vrot.slane %v629_v16, 4  ;;  %v10834_v16 = vrot.slane %v1804_v54, 9  ;;  %v1809_v54 = vld [vmem:[#allocation2 + $0x60] sm:$0xe] }
  0xcf   : > { %v803_v31 = vsel %vm13299_vm10, %v632_v3, %v802_v36  ;;  %v1885_v3 = vrot.slane %v13072_v27, 5  ;;  %v1879_v61 = vsel %vm13684_vm15, %v1877_v43, %v1878_v40  ;;  %v1807_v36 = vld [vmem:[#allocation2 + $0x48] sm:$0xe]  ;;  %v13078_v43 = vld [vmem:[#allocation2 + $0x5c] sm:$0x1]  ;;  %v10839_v40 = vrot.slane %v1809_v54, 9 }
  0xd0   : > { %v641_v8 = vsel %vm13313_vm12, %v633_v17, %v640_v48  ;;  %804 = vst [vmem:[#allocation2 + $0xc0] sm:$0xf] %v803_v31  ;;  %v13886_v17 = vld [vmem:[%s16924_s1 + $0x8] sm:$0x3]  ;;  %v1889_v48 = vrot.slane %v13801_v18, 5  ;;  %v10837_v18 = vrot.slane %v1807_v36, 9 }
  0xd1   : > { %805 = vst.msk [vmem:[#allocation2 + $0xc4] sm:$0xf] %vm280_vm1, %v641_v8  ;;  %v10836_v8 = vrot.slane %v1806_v29, 9  ;;  %v1906_v22 = vrot.slane %v13078_v43, 5  ;;  %v17059_v29 = vcombine.low %v13748_v33, %v13758_v51  ;;  %v642_v36 = vrot.slane %v13849_v10, 4  ;;  %v12984_v33 = vld [vmem:[#allocation2 + $0xc] sm:$0xff]  }
  0xd2   : > { %v1891_v31 = vrot.slane %v1889_v48, 4  ;;  %v12986_v51 = vld [vmem:[#allocation2 + $0x24] sm:$0xff]   ;;  %v3349_v54 = vld [vmem:[#allocation2 + $0x60] sm:$0xe]  ;;  %v2619_v43 = vld [vmem:[#allocation2 + $0x18] sm:$0xf] }
  0xd3   : > { %v1890_v25 = vsel %vm13684_vm15, %v10836_v8, %v1889_v48  ;;  %v12997_v10 = vld [vmem:[#allocation2 + $0xa8] sm:$0xff]   ;;  %vm5480_vm1 = vcmask 57344  }
  0xd4   : > { %vm15080_vm6 = vmand %vm5480_vm1, %vm368_vm5 }
  0xd5   : > { %11887 = vmatmul.mubr.msk.bf16.gmra.mrb[20].mxu0 %vm1295_vm9, %v10810_v42  ;;  %v1857_v42 = vrot.slane %v13069_v21, 5  ;;  %v1883_v21 = vsel %vm13684_vm15, %v10835_v14, %v1882_v52  ;;  %v13079_v14 = vld [vmem:[#allocation2 + $0x68] sm:$0x1] }
  0xd6   : > { %11890 = vmatprep.mubr.msk.bf16.mxu0 %vm1295_vm9, %v10811_v44  ;;  %v17056_v44 = vcombine.low %v13614_v1, %v13633_v23  ;;  %v13070_v1 = vld [vmem:[#allocation2 + $0x20] sm:$0x1] }
  0xd7   : > { %v1858_v28 = vsel %vm13684_vm15, %v1856_v63, %v1857_v42  ;;  %v1871_v23 = vrot.slane %v13070_v1, 5  ;;  %v1886_v42 = vsel %vm13684_vm15, %v1884_v0, %v1885_v3  ;;  %v1913_v0 = vrot.slane %v13079_v14, 5  ;;  %v14017_v14 = vld [vmem:[#allocation2 + $0x14] sm:$0x1] }
  0xd8   : > { %v10848_v26 = vcombine.low %v1855_v11, %v1858_v28  ;;  %v10852_v63 = vcombine.low %v1883_v21, %v1886_v42  ;;  %v13075_v28 = vld [vmem:[#allocation2 + $0x50] sm:$0x1]  ;;  %v17058_v42 = vcombine.low %v13726_v35, %v13741_v53  ;;  %v806_v35 = vld [vmem:[#allocation2 + $0xc8] sm:$0x1] }
  0xd9   : > { %v1872_v13 = vsel %vm13684_vm15, %v1870_v62, %v1871_v23  ;;  %v1899_v58 = vrot.slane %v13075_v28, 5  ;;  %v1903_v62 = vrot.slane %v13076_v37, 5  ;;  %v807_v53 = vsel %vm13307_vm11, %v642_v36, %v806_v35  ;;  %v2622_v35 = vld [vmem:[#allocation2 + $0x24] sm:$0xf] }
  0xda   : > { %v10850_v4 = vcombine.low %v1869_v46, %v1872_v13  ;;  %v13077_v46 = vld [vmem:[#allocation2 + $0x64] sm:$0xf]  ;;  %808 = vst [vmem:[#allocation2 + $0xc8] sm:$0x1] %v807_v53 }
  0xdb   : > { %v1910_v13 = vrot.slane %v13077_v46, 5  ;;  %v14008_v46 = vld [vmem:[#allocation2 + $0x64] sm:$0xf] }
  0xdd   : > { %11891 = vmatmul.mubr.msk.bf16.gmra.mrb[24].mxu0 %vm1295_vm9, %v17056_v44  ;;  %v13074_v44 = vld [vmem:[#allocation2 + $0x44] sm:$0x1] }
  0xde   : > { %11894 = vmatprep.mubr.msk.bf16.mxu0 %vm1295_vm9, %v17057_v6  ;;  %v1892_v6 = vrot.slane %v13074_v44, 5 }
  0xe5   : > { %11895 = vmatmul.mubr.msk.bf16.gmra.mrb[28].mxu0 %vm1295_vm9, %v10814_v55  ;;  %v2421_v55 = vsel %vm1344_vm0, %v13716_v12, 0  ;;  %v1876_v12 = vsel %vm13684_vm15, %v10834_v16, %v1875_v39  ;;  %v1808_v39 = vld [vmem:[#allocation2 + $0x54] sm:$0xe]  ;;  %v1905_v16 = vrot.slane %v1903_v62, 4 }
  0xe6   : > { %11900 = vmatprep.mubr.msk.bf16.mxu0 %vm1295_vm9, %v10848_v26  ;;  %v10851_v32 = vcombine.low %v1876_v12, %v1879_v61  ;;  %v1893_v26 = vsel %vm13684_vm15, %v1891_v31, %v1892_v6  ;;  %v1911_v12 = vsel %vm13684_vm15, %v10839_v40, %v1910_v13 }
  0xe7   : > { %v10853_v52 = vcombine.low %v1890_v25, %v1893_v26  ;;  %v1907_v3 = vsel %vm13684_vm15, %v1905_v16, %v1906_v22  ;;  %v13997_v25 = vld [vmem:[#allocation2 + $0x10] sm:$0xf]  ;;  %v14015_v22 = vld [vmem:[#allocation2 + $0x1c] sm:$0xf] }
  0xe8   : > { %v2698_v36 = vshll.u32 %v14015_v22, 16 }
  0xed   : > { %11901 = vmatmul.mubr.msk.bf16.vlgmr.msra.gmra.mrb[0].mxu0 %vm1295_vm9, %v10849_v9  ;;  %v1896_v9 = vrot.slane %v13073_v5, 5  ;;  %v17060_v5 = vcombine.low %v13753_v50, %v13766_v30  ;;  %v12985_v50 = vld [vmem:[#allocation2 + $0x18] sm:$0xff]   ;;  %v3147_v30 = vsel %vm1344_vm0, %v13886_v17, 0 }
  0xee   : > { %11933 = vmatpush3.bf16.msra.mxu0 %v2421_v55  ;;  %11904 = vmatprep.mubr.msk.bf16.mxu0 %vm1295_vm9, %v10850_v4  ;;  %v10838_v4 = vrot.slane %v1808_v39, 9  ;;  %v1912_v55 = vrot.slane %v1910_v13, 4  ;;  %v2678_v39 = vshrl.u32 %v13997_v25, 16  ;;  %v14010_v13 = vld [vmem:[#allocation2 + $0x68] sm:$0x1] }
  0xef   : > { %12958 = vmatprep.subr.msk.bf16.mxu0 %vm1344_vm0, %v13886_v17  ;;  %v1898_v11 = vrot.slane %v1896_v9, 4  ;;  %v1897_v1 = vsel %vm13684_vm15, %v10837_v18, %v1896_v9  ;;  %v17061_v9 = vcombine.low %v13770_v41, %v13783_v24  ;;  %v13963_v41 = vld [vmem:[%s16924_s1 + $0xa] sm:$0x3]  ;;  %v3345_v24 = vld [vmem:[#allocation2 + $0x30] sm:$0xe] }
  0xf0   : > { %v1904_v27 = vsel %vm13684_vm15, %v10838_v4, %v1903_v62  ;;  %v1914_v61 = vsel %vm13684_vm15, %v1912_v55, %v1913_v0  ;;  %v13986_v17 = vld [vmem:[#allocation2 + $0x4c] sm:$0xf]  ;;  %v10953_v4 = vrot.slane %v3349_v54, 9  ;;  %v12991_v55 = vld [vmem:[#allocation2 + $0x60] sm:$0xff]   ;;  %v2716_v54 = vshll.u32 %v2622_v35, 16 }
  0xf1   : > { %v1900_v23 = vsel %vm13684_vm15, %v1898_v11, %v1899_v58  ;;  %v10855_v48 = vcombine.low %v1904_v27, %v1907_v3  ;;  %v10856_v21 = vcombine.low %v1911_v12, %v1914_v61  ;;  %v3443_v8 = vrot.slane %v13986_v17, 5  ;;  %v12989_v18 = vld [vmem:[#allocation2 + $0x48] sm:$0xff]   ;;  %v12990_v58 = vld [vmem:[#allocation2 + $0x54] sm:$0xff]  }
  0xf2   : > { %v10854_v56 = vcombine.low %v1897_v1, %v1900_v23  ;;  %v2616_v11 = vld [vmem:[#allocation2 + $0xc] sm:$0xf]  ;;  %v2674_v23 = vshll.u32 %v13997_v25, 16  ;;  %v2680_v3 = vrot.slane %v2678_v39, 4  ;;  %v12994_v39 = vld [vmem:[#allocation2 + $0x84] sm:$0xff]  }
  0xf3   : > { %v3445_v6 = vrot.slane %v3443_v8, 4  ;;  %v2665_v62 = vshrl.u32 %v2616_v11, 16  ;;  %v2668_v1 = vshll.u32 %v2616_v11, 16  ;;  %v12992_v61 = vld [vmem:[#allocation2 + $0x6c] sm:$0xff]   ;;  %v12993_v11 = vld [vmem:[#allocation2 + $0x78] sm:$0xff]  }
  0xf4   : > { %v14019_v27 = vrot.slane %v2674_v23, 5 }
  0xf5   : > { %11905 = vmatmul.mubr.msk.bf16.gmra.mrb[4].mxu0 %vm1295_vm9, %v10851_v32  ;;  %v13988_v32 = vld [vmem:[#allocation2 + $0x50] sm:$0x1]  ;;  %v2667_v16 = vrot.slane %v2665_v62, 4  ;;  %v2670_v0 = vrot.slane %v2668_v1, 5 }
  0xf6   : > { %11908 = vmatprep.mubr.msk.bf16.mxu0 %vm1295_vm9, %v10852_v63  ;;  %v3347_v63 = vld [vmem:[#allocation2 + $0x48] sm:$0xe]  ;;  %v3446_v31 = vrot.slane %v13988_v32, 5 }
  0xf7   : > { %v10951_v44 = vrot.slane %v3347_v63, 9  ;;  %v2671_v53 = vor.u32 %v2670_v0, %v2667_v16  ;;  %v14072_v0 = vld [vmem:[#allocation2 + $0x88] sm:$0xf] }
  0xf8   : > { %v14001_v26 = vsel %vm13684_vm15, %v3445_v6, %v3446_v31  ;;  %v14049_v31 = vrot.slane %v2698_v36, 5  ;;  %v2625_v6 = vld [vmem:[#allocation2 + $0x30] sm:$0xf]  ;;  %v3478_v36 = vrot.slane %v14072_v0, 5 }
  0xf9   : > { %v13995_v28 = vsel %vm13684_vm15, %v10951_v44, %v3443_v8  ;;  %17065 = vst [vmem:[#allocation8_spill] sm:$0xff] %v14001_v26 }
  0xfa   : > { %17064 = vst [vmem:[#allocation7_spill] sm:$0xff] %v13995_v28  ;;  %v14190_v28 = vld [vmem:[#allocation2 + $0x58] sm:$0xf] }
  0xfd   : > { %11909 = vmatmul.mubr.msk.bf16.gmra.mrb[8].mxu0 %vm1295_vm9, %v10853_v52  ;;  %v3457_v52 = vrot.slane %v14008_v46, 5 }
  0xfe   : > { %11912 = vmatprep.mubr.msk.bf16.mxu0 %vm1295_vm9, %v10854_v56  ;;  %v3460_v56 = vrot.slane %v14010_v13, 5 }
  0xff   : > { %v3459_v40 = vrot.slane %v3457_v52, 4  ;;  %v14023_v12 = vsel %vm13684_vm15, %v10953_v4, %v3457_v52 }
 0x100   : > { %17066 = vst [vmem:[#allocation9_spill] sm:$0xff] %v14023_v12 }
 0x105   : > { %11913 = vmatmul.mubr.msk.bf16.gmra.mrb[12].mxu0 %vm1295_vm9, %v10855_v48  ;;  %v14027_v48 = vsel %vm13684_vm15, %v3459_v40, %v3460_v56  ;;  %v2740_v40 = vshll.u32 %v2625_v6, 16 }
 0x106   : > { %11916 = vmatprep.mubr.msk.bf16.mxu0 %vm1295_vm9, %v10856_v21  ;;  %17067 = vst [vmem:[#allocation10_spill] sm:$0xff] %v14027_v48  ;;  %v2689_v21 = vshrl.u32 %v2619_v43, 16 }
 0x10d   : > { %11917 = vmatmul.mubr.msk.bf16.gmra.mrb[16].mxu0 %vm1295_vm9, %v17058_v42  ;;  %v2692_v42 = vshll.u32 %v2619_v43, 16  ;;  %v2737_v43 = vshrl.u32 %v2625_v6, 16  ;;  %v2742_v6 = vrot.slane %v2740_v40, 5 }
 0x10e   : > { %11920 = vmatprep.mubr.msk.bf16.mxu0 %vm1295_vm9, %v17059_v29 }
 0x115   : > { %11921 = vmatmul.mubr.msk.bf16.gmra.mrb[20].mxu0 %vm1295_vm9, %v17060_v5  ;;  %v2684_v5 = vshll.u32 %v14017_v14, 16 }
 0x116   : > { %11924 = vmatprep.mubr.msk.bf16.mxu0 %vm1295_vm9, %v17061_v9  ;;  %v14032_v9 = vld [vmem:[#allocation2 + $0x20] sm:$0x1] }
 0x117   : > { %v14047_v8 = vrot.slane %v2684_v5, 5  ;;  %v2708_v44 = vshll.u32 %v14032_v9, 16  ;;  %v3352_v5 = vld [vmem:[#allocation2 + $0x84] sm:$0xe] }
 0x119   : > { %v14104_v40 = vrot.slane %v2708_v44, 5  ;;  %v3355_v44 = vld [vmem:[#allocation2 + $0xa8] sm:$0xe] }
 0x11d   : > { %11925 = vmatmul.mubr.msk.bf16.gmra.mrb[24].mxu0 %vm1295_vm9, %v10861_v60  ;;  %v10949_v60 = vrot.slane %v3345_v24, 9  ;;  %v3351_v24 = vld [vmem:[#allocation2 + $0x78] sm:$0xe] }
 0x11e   : > { %11928 = vmatprep.mubr.msk.bf16.mxu0 %vm1295_vm9, %v10862_v45  ;;  %v10955_v63 = vrot.slane %v3351_v24, 9 }
 0x11f   : > { %v13977_v45 = vsel %vm13684_vm15, %v10949_v60, %v3429_v15 }
 0x120   : > { %17062 = vst [vmem:[#allocation5_spill] sm:$0xff] %v13977_v45  ;;  %v2794_v45 = vshll.u32 %v13986_v17, 16 }
 0x125   : > { %11929 = vmatmul.mubr.msk.bf16.gmra.mrb[28].mxu0 %vm1295_vm9, %v10863_v19  ;;  %v13981_v19 = vsel %vm13684_vm15, %v3431_v57, %v3432_v7  ;;  %v2691_v7 = vrot.slane %v2689_v21, 4  ;;  %v2694_v57 = vrot.slane %v2692_v42, 5  ;;  %v14079_v42 = vld [vmem:[#allocation2 + $0x98] sm:$0x1] }
 0x126   : > { %11934 = vmatprep.mubr.msk.bf16.mxu0 %vm1295_vm9, %v12984_v33  ;;  %17063 = vst [vmem:[#allocation6_spill] sm:$0xff] %v13981_v19  ;;  %v2681_v33 = vor.u32 %v2680_v3, %v14019_v27  ;;  %v14074_v3 = vld [vmem:[#allocation2 + $0x8c] sm:$0x1] }
 0x127   : > { %v2695_v21 = vor.u32 %v2694_v57, %v2691_v7  ;;  %v3480_v7 = vrot.slane %v3478_v36, 4 }
 0x128   : > { %v14054_v62 = vrot.slane %v2681_v33, 4  ;;  %v10956_v33 = vrot.slane %v3352_v5, 9  ;;  %v2746_v5 = vshll.u32 %v13966_v34, 16 }
 0x12d   : > { %11935 = vmatmul.mubr.msk.bf16.vlgmr.msra.gmra.mrb[0].mxu0 %vm1295_vm9, %v12985_v50  ;;  %v2702_v50 = vshrl.u32 %v14015_v22, 16 }
 0x12e   : > { %11967 = vmatpush3.bf16.msra.mxu0 %v3147_v30  ;;  %11938 = vmatprep.mubr.msk.bf16.mxu0 %vm1295_vm9, %v12986_v51  ;;  %v14038_v51 = vld [vmem:[#allocation2 + $0x7c] sm:$0xf]  ;;  %v14040_v30 = vld [vmem:[#allocation2 + $0x80] sm:$0x1] }
 0x12f   : > { %12959 = vmatprep.subr.msk.bf16.mxu0 %vm1344_vm0, %v13963_v41  ;;  %v3471_v15 = vrot.slane %v14038_v51, 5  ;;  %v3474_v60 = vrot.slane %v14040_v30, 5  ;;  %v14056_v1 = vrot.slane %v2702_v50, 4  ;;  %v3353_v50 = vld [vmem:[#allocation2 + $0x90] sm:$0xe] }
 0x130   : > { %v10957_v57 = vrot.slane %v3353_v50, 9 }
 0x131   : > { %v14060_v23 = vsel %vm13684_vm15, %v10955_v63, %v3471_v15  ;;  %v2739_v63 = vrot.slane %v2737_v43, 4  ;;  %v12996_v43 = vld [vmem:[#allocation2 + $0x9c] sm:$0xff]   ;;  %v2705_v50 = vor.u32 %v14056_v1, %v14049_v31  ;;  %v14133_v1 = vrot.slane %v2746_v5, 5 }
 0x132   : > { %17068 = vst [vmem:[#allocation11_spill] sm:$0xff] %v14060_v23  ;;  %v14171_v23 = vld [vmem:[#allocation2 + $0xb8] sm:$0xf] }
 0x133   : > { %v14142_v37 = vrot.slane %v2705_v50, 4 }
 0x135   : > { %11939 = vmatmul.mubr.msk.bf16.gmra.mrb[4].mxu0 %vm1295_vm9, %v12987_v59  ;;  %v14045_v59 = vld [vmem:[#allocation2 + $0x28] sm:$0xf] }
 0x136   : > { %11942 = vmatprep.mubr.msk.bf16.mxu0 %vm1295_vm9, %v12988_v2  ;;  %v2713_v2 = vshrl.u32 %v2622_v35, 16  ;;  %v2722_v52 = vshll.u32 %v14045_v59, 16  ;;  %v2726_v56 = vshrl.u32 %v14045_v59, 16  ;;  %v3481_v35 = vrot.slane %v14074_v3, 5 }
 0x138   : > { %v14068_v16 = vrot.slane %v2713_v2, 4  ;;  %v2728_v2 = vrot.slane %v2726_v56, 4 }
 0x13d   : > { %11943 = vmatmul.mubr.msk.bf16.gmra.mrb[8].mxu0 %vm1295_vm9, %v12989_v18  ;;  %v3473_v18 = vrot.slane %v3471_v15, 4  ;;  %v3488_v15 = vrot.slane %v14079_v42, 5 }
 0x13e   : > { %11946 = vmatprep.mubr.msk.bf16.mxu0 %vm1295_vm9, %v12990_v58  ;;  %v14052_v58 = vrot.slane %v2671_v53, 4  ;;  %v2718_v53 = vrot.slane %v2716_v54, 5  ;;  %v14092_v54 = vld [vmem:[#allocation2 + $0x2c] sm:$0x1] }
 0x13f   : > { %v14066_v4 = vsel %vm13684_vm15, %v3473_v18, %v3474_v60  ;;  %v14086_v60 = vrot.slane %v2722_v52, 5  ;;  %v14090_v18 = vsel %vm13684_vm15, %v10956_v33, %v3478_v36  ;;  %v14098_v52 = vsel %vm13684_vm15, %v3480_v7, %v3481_v35  ;;  %v14126_v36 = vld [vmem:[#allocation2 + $0x40] sm:$0xf] }
 0x140   : > { %17069 = vst [vmem:[#allocation12_spill] sm:$0xff] %v14066_v4  ;;  %17070 = vst [vmem:[#allocation13_spill] sm:$0xff] %v14090_v18  ;;  %v14116_v35 = vrot.slane %v2695_v21, 4  ;;  %v2719_v7 = vor.u32 %v2718_v53, %v14068_v16  ;;  %v14135_v16 = vld [vmem:[#allocation2 + $0xac] sm:$0xf] }
 0x141   : > { %17071 = vst [vmem:[#allocation14_spill] sm:$0xff] %v14098_v52  ;;  %v14137_v53 = vld [vmem:[#allocation2 + $0xb0] sm:$0x1]  ;;  %v12998_v52 = vld [vmem:[#allocation2 + $0xb4] sm:$0xff]  }
 0x142   : > { %v3502_v29 = vrot.slane %v14137_v53, 5 }
 0x145   : > { %11947 = vmatmul.mubr.msk.bf16.gmra.mrb[12].mxu0 %vm1295_vm9, %v12991_v55  ;;  %v2750_v55 = vshrl.u32 %v13966_v34, 16  ;;  %v2677_v34 = vsel %vm13293_vm8, %v14052_v58, %v14019_v27  ;;  %v2687_v27 = vsel %vm13293_vm8, %v14054_v62, %v14047_v8  ;;  %v2743_v58 = vor.u32 %v2742_v6, %v2739_v63 }
 0x146   : > { %11950 = vmatprep.mubr.msk.bf16.mxu0 %vm1295_vm9, %v12992_v61  ;;  %v14076_v61 = vld [vmem:[#allocation2 + $0x94] sm:$0xf]  ;;  %v2770_v8 = vshll.u32 %v14126_v36, 16  ;;  %v2774_v62 = vshrl.u32 %v14126_v36, 16  ;;  %v10959_v63 = vrot.slane %v3355_v44, 9  ;;  %v14146_v6 = vrot.slane %v2719_v7, 4 }
 0x147   : > { %v3485_v24 = vrot.slane %v14076_v61, 5  ;;  %v2752_v21 = vrot.slane %v2750_v55, 4  ;;  %v2631_v55 = vld [vmem:[#allocation2 + $0x48] sm:$0xf]  ;;  %v14152_v38 = vrot.slane %v2743_v58, 4 }
 0x148   : > { %v2785_v18 = vshrl.u32 %v2631_v55, 16  ;;  %v14167_v58 = vrot.slane %v2770_v8, 5  ;;  %v2776_v4 = vrot.slane %v2774_v62, 4  ;;  %v14182_v8 = vld [vmem:[#allocation2 + $0xc8] sm:$0x1] }
 0x149   : > { %v14102_v56 = vsel %vm13684_vm15, %v10957_v57, %v3485_v24  ;;  %v2729_v57 = vor.u32 %v2728_v2, %v14086_v60  ;;  %v3356_v62 = vld [vmem:[#allocation2 + $0xb4] sm:$0xe] }
 0x14a   : > { %17072 = vst [vmem:[#allocation15_spill] sm:$0xff] %v14102_v56  ;;  %v2787_v12 = vrot.slane %v2785_v18, 4  ;;  %v2777_v19 = vor.u32 %v2776_v4, %v14167_v58 }
 0x14b   : > { %v14148_v5 = vrot.slane %v2729_v57, 4 }
 0x14d   : > { %11951 = vmatmul.mubr.msk.bf16.gmra.mrb[16].mxu0 %vm1295_vm9, %v12993_v11  ;;  %v3487_v11 = vrot.slane %v3485_v24, 4  ;;  %v2628_v24 = vld [vmem:[#allocation2 + $0x3c] sm:$0xf] }
 0x14e   : > { %11954 = vmatprep.mubr.msk.bf16.mxu0 %vm1295_vm9, %v12994_v39  ;;  %v12995_v39 = vld [vmem:[#allocation2 + $0x90] sm:$0xff]   ;;  %v2764_v2 = vshll.u32 %v2628_v24, 16 }
 0x14f   : > { %v14110_v33 = vsel %vm13684_vm15, %v3487_v11, %v3488_v15  ;;  %v2732_v15 = vshll.u32 %v14092_v54, 16  ;;  %v2756_v11 = vshll.u32 %v13969_v47, 16  ;;  %v2761_v47 = vshrl.u32 %v2628_v24, 16 }
 0x150   : > { %17073 = vst [vmem:[#allocation16_spill] sm:$0xff] %v14110_v33  ;;  %v2753_v33 = vor.u32 %v2752_v21, %v14133_v1  ;;  %v2766_v7 = vrot.slane %v2764_v2, 5  ;;  %v2788_v21 = vshll.u32 %v2631_v55, 16  ;;  %v10914_v2 = vcombine.low %v2677_v34, %v2687_v27 }
 0x151   : > { %v14155_v50 = vrot.slane %v2756_v11, 5  ;;  %v2763_v44 = vrot.slane %v2761_v47, 4  ;;  %v14175_v47 = vld [vmem:[#allocation2 + $0xc4] sm:$0xf]  ;;  %v3506_v55 = vrot.slane %v14171_v23, 5  ;;  %v10960_v11 = vrot.slane %v3356_v62, 9 }
 0x152   : > { %v3516_v34 = vrot.slane %v14182_v8, 5  ;;  %v2790_v26 = vrot.slane %v2788_v21, 5  ;;  %v12999_v62 = vld [vmem:[#allocation2 + $0xc0] sm:$0xff]  }
 0x153   : > { %v2767_v27 = vor.u32 %v2766_v7, %v2763_v44  ;;  %v2798_v7 = vshrl.u32 %v13986_v17, 16  ;;  %v2711_v17 = vsel %vm13293_vm8, %v14142_v37, %v14104_v40 }
 0x155   : > { %11955 = vmatmul.mubr.msk.bf16.gmra.mrb[20].mxu0 %vm1295_vm9, %v12995_v39  ;;  %v3499_v39 = vrot.slane %v14135_v16, 5  ;;  %v2768_v40 = vrot.slane %v2767_v27, 4 }
 0x156   : > { %11958 = vmatprep.mubr.msk.bf16.mxu0 %vm1295_vm9, %v12996_v43  ;;  %v14150_v43 = vrot.slane %v2732_v15, 5  ;;  %v14165_v15 = vld [vmem:[#allocation2 + $0x44] sm:$0x1] }
 0x157   : > { %v3501_v24 = vrot.slane %v3499_v39, 4  ;;  %v14159_v56 = vsel %vm13684_vm15, %v10959_v63, %v3499_v39  ;;  %v14173_v39 = vld [vmem:[#allocation2 + $0xbc] sm:$0x1] }
 0x158   : > { %17074 = vst [vmem:[#allocation17_spill] sm:$0xff] %v14159_v56  ;;  %v3509_v63 = vrot.slane %v14173_v39, 5  ;;  %v2780_v56 = vshll.u32 %v14165_v15, 16 }
 0x159   : > { %v14163_v57 = vsel %vm13684_vm15, %v3501_v24, %v3502_v29  ;;  %v2701_v29 = vsel %vm13293_vm8, %v14116_v35, %v14049_v31  ;;  %v2754_v24 = vrot.slane %v2753_v33, 4  ;;  %v2634_v31 = vld [vmem:[#allocation2 + $0x54] sm:$0xf]  ;;  %v3508_v35 = vrot.slane %v3506_v55, 4 }
 0x15a   : > { %17075 = vst [vmem:[#allocation18_spill] sm:$0xff] %v14163_v57  ;;  %v3357_v57 = vld [vmem:[#allocation2 + $0xc0] sm:$0xe]  ;;  %v2812_v4 = vshll.u32 %v2634_v31, 16 }
 0x15b   : > { %v10961_v48 = vrot.slane %v3357_v57, 9  ;;  %v14200_v44 = vsel %vm13684_vm15, %v3508_v35, %v3509_v63  ;;  %v2809_v57 = vshrl.u32 %v2634_v31, 16  ;;  %v2822_v63 = vshrl.u32 %v14190_v28, 16 }
 0x15c   : > { %v2759_v37 = vsel %vm13293_vm8, %v2754_v24, %v14155_v50  ;;  %v2782_v31 = vrot.slane %v2780_v56, 5  ;;  %v14238_v35 = vrot.slane %v2794_v45, 5  ;;  %v10915_v56 = vcombine.low %v2701_v29, %v2711_v17  ;;  %v2643_v17 = vld [vmem:[#allocation2 + $0x78] sm:$0xf] }
 0x15d   : > { %11959 = vmatmul.mubr.msk.bf16.gmra.mrb[24].mxu0 %vm1295_vm9, %v12997_v10  ;;  %v3513_v10 = vrot.slane %v14175_v47, 5  ;;  %v2811_v21 = vrot.slane %v2809_v57, 4  ;;  %v3617_v45 = vsel %vm1344_vm0, %v13963_v41, 0 }
 0x15e   : > { %11962 = vmatprep.mubr.msk.bf16.mxu0 %vm1295_vm9, %v12998_v52  ;;  %v14194_v52 = vsel %vm13684_vm15, %v10960_v11, %v3506_v55  ;;  %v2818_v55 = vshll.u32 %v14190_v28, 16 }
 0x15f   : > { %v3515_v33 = vrot.slane %v3513_v10, 4  ;;  %v14204_v18 = vsel %vm13684_vm15, %v10961_v48, %v3513_v10  ;;  %v2725_v48 = vsel %vm13293_vm8, %v14146_v6, %v14086_v60  ;;  %v2735_v10 = vsel %vm13293_vm8, %v14148_v5, %v14150_v43  ;;  %v2637_v60 = vld [vmem:[#allocation2 + $0x60] sm:$0xf] }
 0x160   : > { %v2778_v6 = vrot.slane %v2777_v19, 4  ;;  %v2800_v5 = vrot.slane %v2798_v7, 4  ;;  %v2804_v43 = vshll.u32 %v13988_v32, 16  ;;  %v2833_v50 = vshrl.u32 %v2637_v60, 16 }
 0x161   : > { %v14211_v11 = vsel %vm13684_vm15, %v3515_v33, %v3516_v34  ;;  %v2749_v34 = vsel %vm13293_vm8, %v14152_v38, %v14133_v1  ;;  %v2791_v33 = vor.u32 %v2790_v26, %v2787_v12  ;;  %v2814_v38 = vrot.slane %v2812_v4, 5  ;;  %v2640_v4 = vld [vmem:[#allocation2 + $0x6c] sm:$0xf] }
 0x162   : > { %17076 = vst [vmem:[#allocation19_spill] sm:$0xff] %v14211_v11  ;;  %v14241_v1 = vrot.slane %v2818_v55, 5  ;;  %v14243_v11 = vld [vmem:[#allocation2 + $0x5c] sm:$0x1]  ;;  %v2836_v24 = vshll.u32 %v2637_v60, 16  ;;  %v2842_v26 = vshll.u32 %v14008_v46, 16  ;;  %v10916_v19 = vcombine.low %v2725_v48, %v2735_v10 }
 0x163   : > { %v2846_v12 = vshrl.u32 %v14008_v46, 16  ;;  %v2773_v32 = vsel %vm13293_vm8, %v2768_v40, %v14167_v58  ;;  %v14252_v27 = vrot.slane %v2791_v33, 4  ;;  %v2801_v7 = vor.u32 %v2800_v5, %v14238_v35  ;;  %v14257_v55 = vld [vmem:[#allocation2 + $0x70] sm:$0xf] }
 0x164   : > { %v14255_v57 = vrot.slane %v2804_v43, 5  ;;  %v2783_v46 = vsel %vm13293_vm8, %v2778_v6, %v2782_v31  ;;  %v2815_v29 = vor.u32 %v2814_v38, %v2811_v21  ;;  %v2835_v48 = vrot.slane %v2833_v50, 4 }
 0x165   : > { %11963 = vmatmul.mubr.msk.bf16.gmra.mrb[28].mxu0 %vm1295_vm9, %v12999_v62  ;;  %v2824_v62 = vrot.slane %v2822_v63, 4  ;;  %v2828_v63 = vshll.u32 %v14243_v11, 16  ;;  %v2838_v58 = vrot.slane %v2836_v24, 5  ;;  %v14263_v10 = vrot.slane %v2842_v26, 5 }
 0x166   : > { %11968 = vmatprep.mubr.msk.bf16.mxu0 %vm1295_vm9, %v10914_v2  ;;  %v10917_v2 = vcombine.low %v2749_v34, %v2759_v37  ;;  %v2848_v34 = vrot.slane %v2846_v12, 4  ;;  %v14268_v37 = vld [vmem:[%s16924_s1 + $0xc] sm:$0x3]  ;;  %v2857_v40 = vshrl.u32 %v2640_v4, 16  ;;  %v2860_v31 = vshll.u32 %v2640_v4, 16 }
 0x167   : > { %v2825_v41 = vor.u32 %v2824_v62, %v14241_v1  ;;  %v2866_v21 = vshll.u32 %v14257_v55, 16  ;;  %v2870_v33 = vshrl.u32 %v14257_v55, 16  ;;  %v10918_v60 = vcombine.low %v2773_v32, %v2783_v46 }
 0x168   : > { %v2802_v6 = vrot.slane %v2801_v7, 4  ;;  %v2881_v5 = vshrl.u32 %v2643_v17, 16  ;;  %v2884_v43 = vshll.u32 %v2643_v17, 16  ;;  %v2816_v38 = vrot.slane %v2815_v29, 4 }
 0x169   : > { %v2830_v62 = vrot.slane %v2828_v63, 5  ;;  %v2890_v50 = vshll.u32 %v14038_v51, 16  ;;  %v2894_v24 = vshrl.u32 %v14038_v51, 16  ;;  %v2826_v26 = vrot.slane %v2825_v41, 4  ;;  %v14289_v41 = vld [vmem:[#allocation2 + $0x74] sm:$0x1] }
 0x16a   : > { %v2839_v12 = vor.u32 %v2838_v58, %v2835_v48  ;;  %v2859_v32 = vrot.slane %v2857_v40, 4  ;;  %v2862_v7 = vrot.slane %v2860_v31, 5  ;;  %v14280_v4 = vrot.slane %v2866_v21, 5 }
 0x16b   : > { %v2872_v46 = vrot.slane %v2870_v33, 4  ;;  %v2797_v51 = vsel %vm13293_vm8, %v14252_v27, %v14238_v35  ;;  %v2807_v29 = vsel %vm13293_vm8, %v2802_v6, %v14255_v57  ;;  %v2883_v63 = vrot.slane %v2881_v5, 4 }
 0x16c   : > { %v2886_v17 = vrot.slane %v2884_v43, 5  ;;  %v2896_v48 = vrot.slane %v2894_v24, 4  ;;  %v2821_v40 = vsel %vm13293_vm8, %v2816_v38, %v14241_v1  ;;  %v2831_v35 = vsel %vm13293_vm8, %v2826_v26, %v2830_v62 }
 0x16d   : > { %11969 = vmatmul.mubr.msk.bf16.vlgmr.msra.gmra.mrb[0].mxu0 %vm1295_vm9, %v10915_v56  ;;  %v2849_v56 = vor.u32 %v2848_v34, %v14263_v10  ;;  %v2840_v27 = vrot.slane %v2839_v12, 4  ;;  %v2863_v21 = vor.u32 %v2862_v7, %v2859_v32  ;;  %v2873_v33 = vor.u32 %v2872_v46, %v14280_v4  ;;  %v2652_v32 = vld [vmem:[#allocation2 + $0x9c] sm:$0xf] }
 0x16e   : > { %12001 = vmatpush3.bf16.msra.mxu0 %v3617_v45  ;;  %11972 = vmatprep.mubr.msk.bf16.mxu0 %vm1295_vm9, %v10916_v19  ;;  %v2852_v45 = vshll.u32 %v14010_v13, 16  ;;  %v2646_v19 = vld [vmem:[#allocation2 + $0x84] sm:$0xf]  ;;  %v14291_v13 = vrot.slane %v2890_v50, 5  ;;  %v2876_v6 = vshll.u32 %v14289_v41, 16  ;;  %v2900_v5 = vshll.u32 %v14040_v30, 16 }
 0x16f   : > { %12960 = vmatprep.subr.msk.bf16.mxu0 %vm1344_vm0, %v14268_v37  ;;  %v2905_v58 = vshrl.u32 %v2646_v19, 16  ;;  %v2908_v34 = vshll.u32 %v2646_v19, 16  ;;  %v2850_v57 = vrot.slane %v2849_v56, 4  ;;  %v2914_v43 = vshll.u32 %v14072_v0, 16 }
 0x170   : > { %v2854_v31 = vrot.slane %v2852_v45, 5  ;;  %v2918_v1 = vshrl.u32 %v14072_v0, 16  ;;  %v2887_v38 = vor.u32 %v2886_v17, %v2883_v63  ;;  %v2897_v62 = vor.u32 %v2896_v48, %v14291_v13  ;;  %v14313_v17 = vld [vmem:[#allocation2 + $0xa0] sm:$0xf] }
 0x171   : > { %v2907_v50 = vrot.slane %v2905_v58, 4  ;;  %v2910_v24 = vrot.slane %v2908_v34, 5  ;;  %v10919_v26 = vcombine.low %v2797_v51, %v2807_v29  ;;  %v10920_v12 = vcombine.low %v2821_v40, %v2831_v35 }
 0x172   : > { %v2845_v56 = vsel %vm13293_vm8, %v2840_v27, %v14263_v10  ;;  %v2864_v30 = vrot.slane %v2863_v21, 4  ;;  %v2874_v45 = vrot.slane %v2873_v33, 4  ;;  %v2878_v19 = vrot.slane %v2876_v6, 5 }
 0x173   : > { %v14311_v0 = vrot.slane %v2914_v43, 5  ;;  %v2920_v7 = vrot.slane %v2918_v1, 4  ;;  %v2888_v51 = vrot.slane %v2887_v38, 4  ;;  %v2898_v29 = vrot.slane %v2897_v62, 4 }
 0x174   : > { %v2902_v48 = vrot.slane %v2900_v5, 5  ;;  %v2911_v58 = vor.u32 %v2910_v24, %v2907_v50  ;;  %v2938_v10 = vshll.u32 %v14076_v61, 16  ;;  %v2942_v34 = vshrl.u32 %v14076_v61, 16 }
 0x175   : > { %11973 = vmatmul.mubr.msk.bf16.gmra.mrb[4].mxu0 %vm1295_vm9, %v10917_v2  ;;  %v2649_v2 = vld [vmem:[#allocation2 + $0x90] sm:$0xf]  ;;  %v2953_v40 = vshrl.u32 %v2652_v32, 16  ;;  %v2956_v35 = vshll.u32 %v2652_v32, 16  ;;  %v2869_v27 = vsel %vm13293_vm8, %v2864_v30, %v14280_v4  ;;  %v2966_v21 = vshrl.u32 %v14313_v17, 16 }
 0x176   : > { %11976 = vmatprep.mubr.msk.bf16.mxu0 %vm1295_vm9, %v10918_v60  ;;  %v2855_v60 = vsel %vm13293_vm8, %v2850_v57, %v2854_v31  ;;  %v2929_v46 = vshrl.u32 %v2649_v2, 16  ;;  %v2932_v63 = vshll.u32 %v2649_v2, 16  ;;  %v2879_v31 = vsel %vm13293_vm8, %v2874_v45, %v2878_v19  ;;  %v2655_v45 = vld [vmem:[#allocation2 + $0xa8] sm:$0xf] }
 0x177   : > { %v2962_v57 = vshll.u32 %v14313_v17, 16  ;;  %v2921_v33 = vor.u32 %v2920_v7, %v14311_v0  ;;  %v2924_v61 = vshll.u32 %v14074_v3, 16  ;;  %v2893_v43 = vsel %vm13293_vm8, %v2888_v51, %v14291_v13 }
 0x178   : > { %v2931_v6 = vrot.slane %v2929_v46, 4  ;;  %v2934_v5 = vrot.slane %v2932_v63, 5  ;;  %v2903_v4 = vsel %vm13293_vm8, %v2898_v29, %v2902_v48  ;;  %v2912_v1 = vrot.slane %v2911_v58, 4  ;;  %v2658_v58 = vld [vmem:[#allocation2 + $0xb4] sm:$0xf] }
 0x179   : > { %v14333_v38 = vrot.slane %v2938_v10, 5  ;;  %v2944_v62 = vrot.slane %v2942_v34, 4  ;;  %v2955_v50 = vrot.slane %v2953_v40, 4  ;;  %v2958_v24 = vrot.slane %v2956_v35, 5 }
 0x17a   : > { %v10921_v2 = vcombine.low %v2845_v56, %v2855_v60  ;;  %v2964_v3 = vrot.slane %v2962_v57, 5  ;;  %v2968_v30 = vrot.slane %v2966_v21, 4  ;;  %v2922_v19 = vrot.slane %v2921_v33, 4 }
 0x17b   : > { %v2926_v32 = vrot.slane %v2924_v61, 5  ;;  %v2935_v7 = vor.u32 %v2934_v5, %v2931_v6  ;;  %v2948_v13 = vshll.u32 %v14079_v42, 16  ;;  %v10923_v46 = vcombine.low %v2893_v43, %v2903_v4 }
 0x17c   : > { %v2945_v63 = vor.u32 %v2944_v62, %v14333_v38  ;;  %v2959_v51 = vor.u32 %v2958_v24, %v2955_v50  ;;  %v2977_v48 = vshrl.u32 %v2655_v45, 16  ;;  %v2969_v56 = vor.u32 %v2968_v30, %v2964_v3  ;;  %v2661_v30 = vld [vmem:[#allocation2 + $0xc0] sm:$0xf] }
 0x17d   : > { %11977 = vmatmul.mubr.msk.bf16.gmra.mrb[8].mxu0 %vm1295_vm9, %v10919_v26  ;;  %v10922_v26 = vcombine.low %v2869_v27, %v2879_v31  ;;  %v2980_v60 = vshll.u32 %v2655_v45, 16  ;;  %v2986_v10 = vshll.u32 %v14135_v16, 16  ;;  %v2990_v34 = vshrl.u32 %v14135_v16, 16 }
 0x17e   : > { %11980 = vmatprep.mubr.msk.bf16.mxu0 %vm1295_vm9, %v10920_v12  ;;  %v14335_v12 = vld [vmem:[#allocation2 + $0xa4] sm:$0x1]  ;;  %v2917_v42 = vsel %vm13293_vm8, %v2912_v1, %v14311_v0  ;;  %v2927_v40 = vsel %vm13293_vm8, %v2922_v19, %v2926_v32  ;;  %v2936_v35 = vrot.slane %v2935_v7, 4  ;;  %v2950_v27 = vrot.slane %v2948_v13, 5 }
 0x17f   : > { %v2972_v29 = vshll.u32 %v14335_v12, 16  ;;  %v3001_v31 = vshrl.u32 %v2658_v58, 16  ;;  %v3004_v57 = vshll.u32 %v2658_v58, 16  ;;  %v3010_v21 = vshll.u32 %v14171_v23, 16 }
 0x180   : > { %v3014_v33 = vshrl.u32 %v14171_v23, 16  ;;  %v2946_v61 = vrot.slane %v2945_v63, 4  ;;  %v2960_v6 = vrot.slane %v2959_v51, 4  ;;  %v2979_v5 = vrot.slane %v2977_v48, 4 }
 0x181   : > { %v2974_v16 = vrot.slane %v2972_v29, 5  ;;  %v2970_v43 = vrot.slane %v2969_v56, 4  ;;  %v2982_v4 = vrot.slane %v2980_v60, 5  ;;  %v2988_v62 = vrot.slane %v2986_v10, 5 }
 0x182   : > { %v2992_v50 = vrot.slane %v2990_v34, 4  ;;  %v10924_v0 = vcombine.low %v2917_v42, %v2927_v40  ;;  %v3003_v1 = vrot.slane %v3001_v31, 4  ;;  %v3006_v24 = vrot.slane %v3004_v57, 5 }
 0x183   : > { %v2941_v45 = vsel %vm13293_vm8, %v2936_v35, %v14333_v38  ;;  %v2951_v23 = vsel %vm13293_vm8, %v2946_v61, %v2950_v27  ;;  %v2996_v19 = vshll.u32 %v14137_v53, 16  ;;  %v2965_v32 = vsel %vm13293_vm8, %v2960_v6, %v2964_v3 }
 0x184   : > { %v2975_v7 = vsel %vm13293_vm8, %v2970_v43, %v2974_v16  ;;  %v2983_v13 = vor.u32 %v2982_v4, %v2979_v5  ;;  %v2993_v63 = vor.u32 %v2992_v50, %v2988_v62  ;;  %v3025_v51 = vshrl.u32 %v2661_v30, 16  ;;  %v3342_v4 = vld [vmem:[#allocation2 + $0xc] sm:$0xe] }
 0x185   : > { %11981 = vmatmul.mubr.msk.bf16.gmra.mrb[12].mxu0 %vm1295_vm9, %v10921_v2  ;;  %v3012_v2 = vrot.slane %v3010_v21, 5  ;;  %v3028_v29 = vshll.u32 %v2661_v30, 16  ;;  %v3034_v38 = vshll.u32 %v14175_v47, 16  ;;  %v3038_v48 = vshrl.u32 %v14175_v47, 16 }
 0x186   : > { %11984 = vmatprep.mubr.msk.bf16.mxu0 %vm1295_vm9, %v10922_v26  ;;  %v3016_v26 = vrot.slane %v3014_v33, 4  ;;  %v3007_v58 = vor.u32 %v3006_v24, %v3003_v1  ;;  %v10925_v56 = vcombine.low %v2941_v45, %v2951_v23  ;;  %v10926_v60 = vcombine.low %v2965_v32, %v2975_v7  ;;  %v3343_v32 = vld [vmem:[#allocation2 + $0x18] sm:$0xe]  ;;  %v3344_v7 = vld [vmem:[#allocation2 + $0x24] sm:$0xe] }
 0x187   : > { %v2984_v3 = vrot.slane %v2983_v13, 4  ;;  %v2994_v10 = vrot.slane %v2993_v63, 4  ;;  %v2998_v34 = vrot.slane %v2996_v19, 5  ;;  %v3027_v42 = vrot.slane %v3025_v51, 4 }
 0x188   : > { %v3017_v53 = vor.u32 %v3016_v26, %v3012_v2  ;;  %v3030_v40 = vrot.slane %v3028_v29, 5  ;;  %v3036_v35 = vrot.slane %v3034_v38, 5  ;;  %v3040_v27 = vrot.slane %v3038_v48, 4 }
 0x189   : > { %v3008_v31 = vrot.slane %v3007_v58, 4  ;;  %v2989_v47 = vsel %vm13293_vm8, %v2984_v3, %v2988_v62  ;;  %v3044_v6 = vshll.u32 %v14182_v8, 16  ;;  %v3408_v43 = vrot.slane %v13997_v25, 5 }
 0x18a   : > { %v3018_v57 = vrot.slane %v3017_v53, 4  ;;  %v3031_v33 = vor.u32 %v3030_v40, %v3027_v42  ;;  %v3041_v61 = vor.u32 %v3040_v27, %v3036_v35  ;;  %v10946_v26 = vrot.slane %v3342_v4, 9 }
 0x18b   : > { %v3013_v16 = vsel %vm13293_vm8, %v3008_v31, %v3012_v2  ;;  %v3046_v24 = vrot.slane %v3044_v6, 5  ;;  %v3410_v30 = vrot.slane %v3408_v43, 4  ;;  %v3411_v45 = vrot.slane %v14017_v14, 5 }
 0x18c   : > { %v3042_v1 = vrot.slane %v3041_v61, 4  ;;  %v3415_v2 = vrot.slane %v14015_v22, 5  ;;  %v3409_v23 = vsel %vm13684_vm15, %v10946_v26, %v3408_v43  ;;  %v3422_v14 = vrot.slane %v14045_v59, 5 }
 0x18d   : > { %11985 = vmatmul.mubr.msk.bf16.gmra.mrb[16].mxu0 %vm1295_vm9, %v10923_v46  ;;  %v3020_v46 = vshll.u32 %v14173_v39, 16  ;;  %v2999_v39 = vsel %vm13293_vm8, %v2994_v10, %v2998_v34  ;;  %v3412_v19 = vsel %vm13684_vm15, %v3410_v30, %v3411_v45  ;;  %v10947_v51 = vrot.slane %v3343_v32, 9  ;;  %v17083_v30 = vld [vmem:[#allocation9_spill] sm:$0xff]  ;;  %v17084_v45 = vld [vmem:[#allocation10_spill] sm:$0xff]  ;;  %v17086_v32 = vld [vmem:[#allocation11_spill] sm:$0xff] }
 0x18e   : > { %11988 = vmatprep.mubr.msk.bf16.mxu0 %vm1295_vm9, %v10924_v0  ;;  %v10927_v50 = vcombine.low %v2989_v47, %v2999_v39  ;;  %v3032_v0 = vrot.slane %v3031_v33, 4  ;;  %v3047_v25 = vsel %vm13293_vm8, %v3042_v1, %v3046_v24  ;;  %v10963_v63 = vcombine.low %v3409_v23, %v3412_v19  ;;  %v17077_v39 = vld [vmem:[#allocation5_spill] sm:$0xff]  ;;  %v17078_v33 = vld [vmem:[#allocation6_spill] sm:$0xff] }
 0x18f   : > { %v3022_v21 = vrot.slane %v3020_v46, 5  ;;  %v3417_v29 = vrot.slane %v3415_v2, 4  ;;  %v3418_v38 = vrot.slane %v14032_v9, 5  ;;  %v10948_v48 = vrot.slane %v3344_v7, 9 }
 0x190   : > { %v3037_v8 = vsel %vm13293_vm8, %v3032_v0, %v3036_v35  ;;  %v3424_v58 = vrot.slane %v3422_v14, 4  ;;  %v3425_v22 = vrot.slane %v14092_v54, 5  ;;  %v3416_v53 = vsel %vm13684_vm15, %v10947_v51, %v3415_v2  ;;  %v11028_v35 = vld [vmem:[%s16924_s1 + $0xe] sm:$0x3]  ;;  %v17081_v0 = vld [vmem:[#allocation8_spill] sm:$0xff] }
 0x191   : > { %v3023_v5 = vsel %vm13293_vm8, %v3018_v57, %v3022_v21  ;;  %v10929_v13 = vcombine.low %v3037_v8, %v3047_v25  ;;  %v3419_v59 = vsel %vm13684_vm15, %v3417_v29, %v3418_v38  ;;  %v3423_v46 = vsel %vm13684_vm15, %v10948_v48, %v3422_v14  ;;  %v3354_v25 = vld [vmem:[#allocation2 + $0x9c] sm:$0xe]  ;;  %v17087_v14 = vld [vmem:[#allocation12_spill] sm:$0xff]  ;;  %v17092_v48 = vld [vmem:[#allocation15_spill] sm:$0xff] }
 0x192   : > { %v10928_v62 = vcombine.low %v3013_v16, %v3023_v5  ;;  %v3426_v9 = vsel %vm13684_vm15, %v3424_v58, %v3425_v22  ;;  %v10964_v54 = vcombine.low %v3416_v53, %v3419_v59  ;;  %v3976_v10 = vsel %vm1344_vm0, %v14268_v37, 0  ;;  %v3350_v5 = vld [vmem:[#allocation2 + $0x6c] sm:$0xe]  ;;  %v17093_v58 = vld [vmem:[#allocation16_spill] sm:$0xff]  ;;  %v17095_v22 = vld [vmem:[#allocation17_spill] sm:$0xff] }
 0x193   : > { %v10965_v3 = vcombine.low %v3423_v46, %v3426_v9  ;;  %v3439_v40 = vrot.slane %v14165_v15, 5  ;;  %v3450_v37 = vrot.slane %v14190_v28, 5  ;;  %v3348_v15 = vld [vmem:[#allocation2 + $0x54] sm:$0xe]  ;;  %v3453_v47 = vrot.slane %v14243_v11, 5  ;;  %v17096_v53 = vld [vmem:[#allocation18_spill] sm:$0xff] }
 0x194   : > { %v10952_v57 = vrot.slane %v3348_v15, 9  ;;  %v17079_v61 = vcombine.low %v17077_v39, %v17078_v33  ;;  %v3464_v16 = vrot.slane %v14257_v55, 5  ;;  %v10954_v4 = vrot.slane %v3350_v5, 9  ;;  %v13000_v9 = vld [vmem:[#allocation2 + $0x18] sm:$0xff]   ;;  %v14505_v39 = vld [vmem:[#allocation2 + $0x70] sm:$0xf] }
 0x195   : > { %11989 = vmatmul.mubr.msk.bf16.gmra.mrb[20].mxu0 %vm1295_vm9, %v10925_v56  ;;  %v3436_v56 = vrot.slane %v14126_v36, 5  ;;  %v3452_v21 = vrot.slane %v3450_v37, 4  ;;  %v3467_v11 = vrot.slane %v14289_v41, 5  ;;  %v17085_v8 = vcombine.low %v17083_v30, %v17084_v45  ;;  %v13005_v15 = vld [vmem:[#allocation2 + $0x54] sm:$0xff]  }
 0x196   : > { %11992 = vmatprep.mubr.msk.bf16.mxu0 %vm1295_vm9, %v10926_v60  ;;  %v3346_v60 = vld [vmem:[#allocation2 + $0x3c] sm:$0xe]  ;;  %v3451_v6 = vsel %vm13684_vm15, %v10952_v57, %v3450_v37  ;;  %v3465_v24 = vsel %vm13684_vm15, %v10954_v4, %v3464_v16  ;;  %v3492_v41 = vrot.slane %v14313_v17, 5  ;;  %v10958_v2 = vrot.slane %v3354_v25, 9  ;;  %v13006_v57 = vld [vmem:[#allocation2 + $0x60] sm:$0xff]  }
 0x197   : > { %v10950_v34 = vrot.slane %v3346_v60, 9  ;;  %v3438_v42 = vrot.slane %v3436_v56, 4  ;;  %v3454_v28 = vsel %vm13684_vm15, %v3452_v21, %v3453_v47  ;;  %v3495_v19 = vrot.slane %v14335_v12, 5  ;;  %v14507_v33 = vld [vmem:[#allocation2 + $0x74] sm:$0x1] }
 0x198   : > { %v10969_v43 = vcombine.low %v3451_v6, %v3454_v28  ;;  %v3494_v23 = vrot.slane %v3492_v41, 4  ;;  %v17088_v7 = vcombine.low %v17086_v32, %v17087_v14  ;;  %v3493_v29 = vsel %vm13684_vm15, %v10958_v2, %v3492_v41  ;;  %v4171_v4 = vld [vmem:[#allocation2 + $0x18] sm:$0xf]  ;;  %v14529_v41 = vld [vmem:[#allocation2 + $0x8c] sm:$0x1] }
 0x199   : > { %v3437_v36 = vsel %vm13684_vm15, %v10950_v34, %v3436_v56  ;;  %v3440_v27 = vsel %vm13684_vm15, %v3438_v42, %v3439_v40  ;;  %v17094_v12 = vcombine.low %v17092_v48, %v17093_v58  ;;  %v17097_v59 = vcombine.low %v17095_v22, %v17096_v53  ;;  %v17099_v56 = vld [vmem:[#allocation19_spill] sm:$0xff]  ;;  %v14480_v34 = vld [vmem:[%s16924_s1 + $0x10] sm:$0x3]  ;;  %v14489_v42 = vld [vmem:[#allocation2 + $0x5c] sm:$0x1] }
 0x19a   : > { %v10967_v31 = vcombine.low %v3437_v36, %v3440_v27  ;;  %v3496_v17 = vsel %vm13684_vm15, %v3494_v23, %v3495_v19  ;;  %v17098_v46 = vcombine.low %v14194_v52, %v14200_v44  ;;  %v17100_v60 = vcombine.low %v14204_v18, %v17099_v56  ;;  %v13003_v52 = vld [vmem:[#allocation2 + $0x3c] sm:$0xff]   ;;  %v13004_v44 = vld [vmem:[#allocation2 + $0x48] sm:$0xff]   ;;  %v14487_v18 = vld [vmem:[#allocation2 + $0x58] sm:$0xf] }
 0x19b   : > { %v10975_v38 = vcombine.low %v3493_v29, %v3496_v17  ;;  %v4902_v40 = vld [vmem:[#allocation2 + $0x54] sm:$0xe]  ;;  %v5001_v36 = vrot.slane %v14489_v42, 5  ;;  %v5012_v6 = vrot.slane %v14505_v39, 5  ;;  %v5015_v28 = vrot.slane %v14507_v33, 5 }
 0x19c   : > { %v11066_v27 = vrot.slane %v4902_v40, 9  ;;  %v4906_v23 = vld [vmem:[#allocation2 + $0x84] sm:$0xe]  ;;  %v5029_v32 = vrot.slane %v14529_v41, 5  ;;  %v14534_v14 = vld [vmem:[#allocation2 + $0x28] sm:$0xf] }
 0x19d   : > { %11993 = vmatmul.mubr.msk.bf16.gmra.mrb[24].mxu0 %vm1295_vm9, %v10927_v50  ;;  %v3466_v50 = vrot.slane %v3464_v16, 4  ;;  %v5014_v5 = vrot.slane %v5012_v6, 4  ;;  %v14536_v29 = vld [vmem:[#allocation2 + $0x20] sm:$0x1]  ;;  %v14642_v56 = vld [vmem:[#allocation2 + $0xd4] sm:$0x1] }
 0x19e   : > { %11996 = vmatprep.mubr.msk.bf16.mxu0 %vm1295_vm9, %v10928_v62  ;;  %v17080_v62 = vld [vmem:[#allocation7_spill] sm:$0xff]  ;;  %v14559_v40 = vld [vmem:[#allocation2 + $0xa0] sm:$0xf] }
 0x19f   : > { %v17082_v1 = vcombine.low %v17080_v62, %v17081_v0  ;;  %v3468_v26 = vsel %vm13684_vm15, %v3466_v50, %v3467_v11  ;;  %v13008_v11 = vld [vmem:[#allocation2 + $0x78] sm:$0xff]   ;;  %v14520_v0 = vsel %vm13684_vm15, %v5014_v5, %v5015_v28 }
 0x1a0   : > { %v10971_v55 = vcombine.low %v3465_v24, %v3468_v26  ;;  %v14516_v62 = vld [vmem:[#allocation2 + $0x1c] sm:$0xf]  ;;  %17101 = vst [vmem:[#allocation5_spill] sm:$0xff] %v14520_v0  ;;  %v4220_v26 = vshrl.u32 %v4171_v4, 16  ;;  %v13015_v24 = vld [vmem:[#allocation2 + $0xcc] sm:$0xff]  }
 0x1a1   : > { %v4229_v30 = vshll.u32 %v14516_v62, 16  ;;  %v4233_v45 = vshrl.u32 %v14516_v62, 16  ;;  %v13011_v5 = vld [vmem:[#allocation2 + $0x9c] sm:$0xff]  }
 0x1a3   : > { %v4235_v48 = vrot.slane %v4233_v45, 4 }
 0x1a5   : > { %11997 = vmatmul.mubr.msk.bf16.gmra.mrb[28].mxu0 %vm1295_vm9, %v10929_v13  ;;  %v17089_v13 = vld [vmem:[#allocation13_spill] sm:$0xff] }
 0x1a6   : > { %12002 = vmatprep.mubr.msk.bf16.mxu0 %vm1295_vm9, %v10963_v63  ;;  %v17090_v63 = vld [vmem:[#allocation14_spill] sm:$0xff] }
 0x1a7   : > { %v17091_v51 = vcombine.low %v17089_v13, %v17090_v63  ;;  %v4222_v13 = vrot.slane %v4220_v26, 4 }
 0x1ad   : > { %12003 = vmatmul.mubr.msk.bf16.vlgmr.msra.gmra.mrb[0].mxu0 %vm1295_vm9, %v10964_v54  ;;  %v13001_v54 = vld [vmem:[#allocation2 + $0x24] sm:$0xff]  }
 0x1ae   : > { %12035 = vmatpush3.bf16.msra.mxu0 %v3976_v10  ;;  %12006 = vmatprep.mubr.msk.bf16.mxu0 %vm1295_vm9, %v10965_v3  ;;  %v13002_v3 = vld [vmem:[#allocation2 + $0x30] sm:$0xff]   ;;  %v4702_v10 = vsel %vm1344_vm0, %v11028_v35, 0 }
 0x1af   : > { %12961 = vmatprep.subr.msk.bf16.mxu0 %vm1344_vm0, %v11028_v35  ;;  %v4998_v35 = vrot.slane %v14487_v18, 5 }
 0x1b1   : > { %v5000_v37 = vrot.slane %v4998_v35, 4 }
 0x1b3   : > { %v14500_v21 = vsel %vm13684_vm15, %v5000_v37, %v5001_v36  ;;  %v4908_v37 = vld [vmem:[#allocation2 + $0x9c] sm:$0xe] }
 0x1b5   : > { %12007 = vmatmul.mubr.msk.bf16.gmra.mrb[4].mxu0 %vm1295_vm9, %v17079_v61  ;;  %v4904_v61 = vld [vmem:[#allocation2 + $0x6c] sm:$0xe] }
 0x1b6   : > { %12010 = vmatprep.mubr.msk.bf16.mxu0 %vm1295_vm9, %v10967_v31  ;;  %v14496_v31 = vsel %vm13684_vm15, %v11066_v27, %v4998_v35  ;;  %v11068_v16 = vrot.slane %v4904_v61, 9  ;;  %v14561_v35 = vld [vmem:[#allocation2 + $0xa4] sm:$0x1] }
 0x1b8   : > { %v14514_v50 = vsel %vm13684_vm15, %v11068_v16, %v5012_v6  ;;  %v11072_v16 = vrot.slane %v4908_v37, 9 }
 0x1bd   : > { %12011 = vmatmul.mubr.msk.bf16.gmra.mrb[8].mxu0 %vm1295_vm9, %v17082_v1  ;;  %v4174_v1 = vld [vmem:[#allocation2 + $0x24] sm:$0xf] }
 0x1be   : > { %12014 = vmatprep.mubr.msk.bf16.mxu0 %vm1295_vm9, %v10969_v43  ;;  %v13007_v43 = vld [vmem:[#allocation2 + $0x6c] sm:$0xff]   ;;  %v4244_v25 = vshrl.u32 %v4174_v1, 16  ;;  %v4247_v2 = vshll.u32 %v4174_v1, 16 }
 0x1c0   : > { %v4246_v22 = vrot.slane %v4244_v25, 4  ;;  %v4249_v53 = vrot.slane %v4247_v2, 5  ;;  %v13012_v25 = vld [vmem:[#allocation2 + $0xa8] sm:$0xff]  }
 0x1c2   : > { %v4250_v36 = vor.u32 %v4249_v53, %v4246_v22 }
 0x1c5   : > { %12015 = vmatmul.mubr.msk.bf16.gmra.mrb[12].mxu0 %vm1295_vm9, %v17085_v8  ;;  %v14527_v8 = vld [vmem:[#allocation2 + $0x88] sm:$0xf] }
 0x1c6   : > { %12018 = vmatprep.mubr.msk.bf16.mxu0 %vm1295_vm9, %v10971_v55  ;;  %v4223_v55 = vshll.u32 %v4171_v4, 16  ;;  %v5026_v19 = vrot.slane %v14527_v8, 5 }
 0x1c8   : > { %v5028_v63 = vrot.slane %v5026_v19, 4  ;;  %v4225_v17 = vrot.slane %v4223_v55, 5  ;;  %v4180_v55 = vld [vmem:[#allocation2 + $0x3c] sm:$0xf] }
 0x1c9   : > { %v4295_v22 = vshll.u32 %v4180_v55, 16 }
 0x1cd   : > { %12019 = vmatmul.mubr.msk.bf16.gmra.mrb[16].mxu0 %vm1295_vm9, %v17088_v7  ;;  %v11070_v7 = vrot.slane %v4906_v23, 9 }
 0x1ce   : > { %12022 = vmatprep.mubr.msk.bf16.mxu0 %vm1295_vm9, %v17091_v51  ;;  %v13009_v51 = vld [vmem:[#allocation2 + $0x84] sm:$0xff]  }
 0x1cf   : > { %v14542_v58 = vsel %vm13684_vm15, %v11070_v7, %v5026_v19  ;;  %v14577_v19 = vrot.slane %v4250_v36, 4  ;;  %v4910_v36 = vld [vmem:[#allocation2 + $0xb4] sm:$0xe] }
 0x1d0   : > { %17102 = vst [vmem:[#allocation6_spill] sm:$0xff] %v14542_v58 }
 0x1d5   : > { %12023 = vmatmul.mubr.msk.bf16.gmra.mrb[20].mxu0 %vm1295_vm9, %v17094_v12  ;;  %v13010_v12 = vld [vmem:[#allocation2 + $0x90] sm:$0xff]  }
 0x1d6   : > { %12026 = vmatprep.mubr.msk.bf16.mxu0 %vm1295_vm9, %v10975_v38  ;;  %v14538_v38 = vrot.slane %v4229_v30, 5  ;;  %v14571_v30 = vld [vmem:[#allocation2 + $0x40] sm:$0xf] }
 0x1d7   : > { %v4301_v53 = vshll.u32 %v14571_v30, 16 }
 0x1dd   : > { %12027 = vmatmul.mubr.msk.bf16.gmra.mrb[24].mxu0 %vm1295_vm9, %v17097_v59  ;;  %v4253_v59 = vshll.u32 %v14534_v14, 16 }
 0x1de   : > { %12030 = vmatprep.mubr.msk.bf16.mxu0 %vm1295_vm9, %v17098_v46  ;;  %v14547_v46 = vsel %vm13684_vm15, %v5028_v63, %v5029_v32 }
 0x1df   : > { %17103 = vst [vmem:[#allocation7_spill] sm:$0xff] %v14547_v46  ;;  %v14564_v27 = vrot.slane %v4253_v59, 5 }
 0x1e5   : > { %12031 = vmatmul.mubr.msk.bf16.gmra.mrb[28].mxu0 %vm1295_vm9, %v17100_v60  ;;  %v4239_v60 = vshll.u32 %v14536_v29, 16 }
 0x1e6   : > { %12036 = vmatprep.mubr.msk.bf16.mxu0 %vm1295_vm9, %v13000_v9  ;;  %v4257_v9 = vshrl.u32 %v14534_v14, 16 }
 0x1e7   : > { %v4241_v23 = vrot.slane %v4239_v60, 5  ;;  %v14593_v60 = vld [vmem:[#allocation2 + $0xb8] sm:$0xf] }
 0x1e8   : > { %v4259_v61 = vrot.slane %v4257_v9, 4  ;;  %v4305_v9 = vshrl.u32 %v14571_v30, 16  ;;  %v5054_v37 = vrot.slane %v14593_v60, 5 }
 0x1ea   : > { %v4260_v7 = vor.u32 %v4259_v61, %v14564_v27 }
 0x1ec   : > { %v14607_v61 = vrot.slane %v4260_v7, 4  ;;  %v13014_v7 = vld [vmem:[#allocation2 + $0xc0] sm:$0xff]  }
 0x1ed   : > { %12037 = vmatmul.mubr.msk.bf16.vlgmr.msra.gmra.mrb[0].mxu0 %vm1295_vm9, %v13001_v54  ;;  %v14553_v54 = vld [vmem:[#allocation2 + $0x2c] sm:$0x1] }
 0x1ee   : > { %12069 = vmatpush3.bf16.msra.mxu0 %v4702_v10  ;;  %12040 = vmatprep.mubr.msk.bf16.mxu0 %vm1295_vm9, %v13002_v3  ;;  %v4177_v3 = vld [vmem:[#allocation2 + $0x30] sm:$0xf]  ;;  %v4226_v10 = vor.u32 %v4225_v17, %v4222_v13  ;;  %v14586_v17 = vld [vmem:[#allocation2 + $0x38] sm:$0x1] }
 0x1ef   : > { %12962 = vmatprep.subr.msk.bf16.mxu0 %vm1344_vm0, %v14480_v34  ;;  %v4268_v6 = vshrl.u32 %v4177_v3, 16  ;;  %v4271_v28 = vshll.u32 %v4177_v3, 16  ;;  %v14595_v3 = vld [vmem:[#allocation2 + $0xbc] sm:$0x1] }
 0x1f0   : > { %v4227_v1 = vrot.slane %v4226_v10, 4 }
 0x1f1   : > { %v4270_v13 = vrot.slane %v4268_v6, 4  ;;  %v4273_v63 = vrot.slane %v4271_v28, 5  ;;  %v4183_v28 = vld [vmem:[#allocation2 + $0x48] sm:$0xf] }
 0x1f2   : > { %v4232_v10 = vsel %vm13293_vm8, %v4227_v1, %v14538_v38  ;;  %v13013_v1 = vld [vmem:[#allocation2 + $0xb4] sm:$0xff]  }
 0x1f3   : > { %v4274_v6 = vor.u32 %v4273_v63, %v4270_v13  ;;  %v4316_v63 = vshrl.u32 %v4183_v28, 16 }
 0x1f5   : > { %12041 = vmatmul.mubr.msk.bf16.gmra.mrb[4].mxu0 %vm1295_vm9, %v13003_v52  ;;  %v4236_v52 = vor.u32 %v4235_v48, %v14538_v38  ;;  %v14610_v38 = vld [vmem:[#allocation2 + $0x4c] sm:$0xf] }
 0x1f6   : > { %12044 = vmatprep.mubr.msk.bf16.mxu0 %vm1295_vm9, %v13004_v44  ;;  %v14557_v44 = vld [vmem:[#allocation2 + $0x34] sm:$0xf] }
 0x1f7   : > { %v4277_v4 = vshll.u32 %v14557_v44, 16  ;;  %v4281_v26 = vshrl.u32 %v14557_v44, 16  ;;  %v4237_v2 = vrot.slane %v4236_v52, 4 }
 0x1f9   : > { %v14588_v48 = vrot.slane %v4277_v4, 5  ;;  %v4283_v59 = vrot.slane %v4281_v26, 4 }
 0x1fb   : > { %v4284_v26 = vor.u32 %v4283_v59, %v14588_v48  ;;  %v4325_v59 = vshll.u32 %v14610_v38, 16 }
 0x1fd   : > { %12045 = vmatmul.mubr.msk.bf16.gmra.mrb[8].mxu0 %vm1295_vm9, %v13005_v15  ;;  %v5040_v15 = vrot.slane %v14559_v40, 5 }
 0x1fe   : > { %12048 = vmatprep.mubr.msk.bf16.mxu0 %vm1295_vm9, %v13006_v57  ;;  %v5043_v57 = vrot.slane %v14561_v35, 5 }
 0x1ff   : > { %v14575_v45 = vsel %vm13684_vm15, %v11072_v16, %v5040_v15  ;;  %v11074_v16 = vrot.slane %v4910_v36, 9 }
 0x200   : > { %17104 = vst [vmem:[#allocation8_spill] sm:$0xff] %v14575_v45 }
 0x205   : > { %12049 = vmatmul.mubr.msk.bf16.gmra.mrb[12].mxu0 %vm1295_vm9, %v13007_v43  ;;  %v4263_v43 = vshll.u32 %v14553_v54, 16 }
 0x206   : > { %12052 = vmatprep.mubr.msk.bf16.mxu0 %vm1295_vm9, %v13008_v11  ;;  %v5042_v11 = vrot.slane %v5040_v15, 4  ;;  %v5057_v15 = vrot.slane %v14595_v3, 5 }
 0x207   : > { %v14601_v52 = vrot.slane %v4263_v43, 5  ;;  %v5056_v43 = vrot.slane %v5054_v37, 4 }
 0x208   : > { %v14581_v32 = vsel %vm13684_vm15, %v5042_v11, %v5043_v57  ;;  %v4242_v57 = vsel %vm13293_vm8, %v4237_v2, %v4241_v23  ;;  %v4297_v11 = vrot.slane %v4295_v22, 5  ;;  %v4307_v2 = vrot.slane %v4305_v9, 4  ;;  %v4186_v22 = vld [vmem:[#allocation2 + $0x54] sm:$0xf] }
 0x209   : > { %17105 = vst [vmem:[#allocation9_spill] sm:$0xff] %v14581_v32  ;;  %v14619_v23 = vsel %vm13684_vm15, %v11074_v16, %v5054_v37  ;;  %v11029_v13 = vcombine.low %v4232_v10, %v4242_v57  ;;  %v14623_v36 = vsel %vm13684_vm15, %v5056_v43, %v5057_v15  ;;  %v4329_v9 = vshrl.u32 %v14610_v38, 16  ;;  %v14647_v37 = vld [vmem:[#allocation2 + $0x50] sm:$0x1] }
 0x20a   : > { %17106 = vst [vmem:[#allocation10_spill] sm:$0xff] %v14619_v23  ;;  %17107 = vst [vmem:[#allocation11_spill] sm:$0xff] %v14623_v36  ;;  %v4275_v10 = vrot.slane %v4274_v6, 4  ;;  %v4266_v15 = vsel %vm13293_vm8, %v14607_v61, %v14601_v52  ;;  %v4340_v43 = vshrl.u32 %v4186_v22, 16  ;;  %v4318_v6 = vrot.slane %v4316_v63, 4 }
 0x20b   : > { %v14649_v52 = vrot.slane %v4325_v59, 5  ;;  %v4331_v61 = vrot.slane %v4329_v9, 4  ;;  %v4349_v23 = vshll.u32 %v14487_v18, 16  ;;  %v4353_v59 = vshrl.u32 %v14487_v18, 16  ;;  %v4189_v9 = vld [vmem:[#allocation2 + $0x60] sm:$0xf] }
 0x20c   : > { %v4280_v47 = vsel %vm13293_vm8, %v4275_v10, %v14588_v48  ;;  %v4364_v45 = vshrl.u32 %v4189_v9, 16  ;;  %v4367_v46 = vshll.u32 %v4189_v9, 16 }
 0x20d   : > { %12053 = vmatmul.mubr.msk.bf16.gmra.mrb[16].mxu0 %vm1295_vm9, %v13009_v51  ;;  %v14640_v51 = vld [vmem:[#allocation2 + $0xd0] sm:$0xf] }
 0x20e   : > { %12056 = vmatprep.mubr.msk.bf16.mxu0 %vm1295_vm9, %v13010_v12  ;;  %v4292_v12 = vshrl.u32 %v4180_v55, 16  ;;  %v14613_v55 = vld [vmem:[#allocation2 + $0x44] sm:$0x1] }
 0x20f   : > { %v4311_v16 = vshll.u32 %v14613_v55, 16 }
 0x210   : > { %v4294_v4 = vrot.slane %v4292_v12, 4  ;;  %v4319_v12 = vshll.u32 %v4183_v28, 16 }
 0x211   : > { %v14656_v63 = vrot.slane %v4311_v16, 5 }
 0x212   : > { %v4298_v28 = vor.u32 %v4297_v11, %v4294_v4  ;;  %v4912_v4 = vld [vmem:[#allocation2 + $0xcc] sm:$0xe]  ;;  %v5068_v11 = vrot.slane %v14640_v51, 5 }
 0x215   : > { %12057 = vmatmul.mubr.msk.bf16.gmra.mrb[20].mxu0 %vm1295_vm9, %v13011_v5  ;;  %v4287_v5 = vshll.u32 %v14586_v17, 16 }
 0x216   : > { %12060 = vmatprep.mubr.msk.bf16.mxu0 %vm1295_vm9, %v13012_v25  ;;  %v14615_v25 = vrot.slane %v4301_v53, 5  ;;  %v4256_v53 = vsel %vm13293_vm8, %v14577_v19, %v14564_v27  ;;  %v4285_v27 = vrot.slane %v4284_v26, 4  ;;  %v4343_v26 = vshll.u32 %v4186_v22, 16  ;;  %v14662_v22 = vld [vmem:[#allocation2 + $0x64] sm:$0xf] }
 0x217   : > { %v4289_v57 = vrot.slane %v4287_v5, 5  ;;  %v4321_v5 = vrot.slane %v4319_v12, 5  ;;  %v5070_v12 = vrot.slane %v5068_v11, 4 }
 0x218   : > { %v4308_v19 = vor.u32 %v4307_v2, %v14615_v25  ;;  %v11076_v2 = vrot.slane %v4912_v4, 9  ;;  %v4345_v18 = vrot.slane %v4343_v26, 5 }
 0x219   : > { %v4290_v36 = vsel %vm13293_vm8, %v4285_v27, %v4289_v57  ;;  %v4322_v10 = vor.u32 %v4321_v5, %v4318_v6  ;;  %v4332_v57 = vor.u32 %v4331_v61, %v14649_v52  ;;  %v4342_v27 = vrot.slane %v4340_v43, 4 }
 0x21a   : > { %v14666_v4 = vsel %vm13684_vm15, %v11076_v2, %v5068_v11  ;;  %v14668_v48 = vrot.slane %v4308_v19, 4  ;;  %v4373_v11 = vshll.u32 %v14662_v22, 16  ;;  %v4377_v19 = vshrl.u32 %v14662_v22, 16 }
 0x21b   : > { %17108 = vst [vmem:[#allocation12_spill] sm:$0xff] %v14666_v4  ;;  %v11030_v6 = vcombine.low %v4256_v53, %v4266_v15  ;;  %v5172_v5 = vsel %vm1344_vm0, %v14480_v34, 0  ;;  %v4355_v61 = vrot.slane %v4353_v59, 4  ;;  %v11031_v43 = vcombine.low %v4280_v47, %v4290_v36  ;;  %v14694_v15 = vld [vmem:[#allocation2 + $0x68] sm:$0x1] }
 0x21c   : > { %v4192_v34 = vld [vmem:[#allocation2 + $0x6c] sm:$0xf]  ;;  %v4333_v2 = vrot.slane %v4332_v57, 4  ;;  %v4195_v47 = vld [vmem:[#allocation2 + $0x78] sm:$0xf]  ;;  %v4366_v36 = vrot.slane %v4364_v45, 4 }
 0x21d   : > { %12061 = vmatmul.mubr.msk.bf16.gmra.mrb[24].mxu0 %vm1295_vm9, %v13013_v1  ;;  %v5071_v1 = vrot.slane %v14642_v56, 5  ;;  %v4369_v59 = vrot.slane %v4367_v46, 5  ;;  %v14697_v9 = vrot.slane %v4373_v11, 5  ;;  %v4401_v57 = vshrl.u32 %v14505_v39, 16  ;;  %v4198_v4 = vld [vmem:[#allocation2 + $0x84] sm:$0xf] }
 0x21e   : > { %12064 = vmatprep.mubr.msk.bf16.mxu0 %vm1295_vm9, %v13014_v7  ;;  %v14654_v7 = vrot.slane %v4298_v28, 4  ;;  %v4335_v28 = vshll.u32 %v14647_v37, 16  ;;  %vm5477_vm0 = vcmask 60416  }
 0x21f   : > { %v14673_v16 = vsel %vm13684_vm15, %v5070_v12, %v5071_v1  ;;  %v14683_v1 = vrot.slane %v4349_v23, 5  ;;  %v4323_v23 = vrot.slane %v4322_v10, 4  ;;  %v4346_v12 = vor.u32 %v4345_v18, %v4342_v27  ;;  %vm15073_vm4 = vmand %vm5477_vm0, %vm693_vm7 }
 0x220   : > { %17109 = vst [vmem:[#allocation13_spill] sm:$0xff] %v14673_v16  ;;  %v4304_v26 = vsel %vm13293_vm8, %v14654_v7, %v14615_v25  ;;  %v4337_v53 = vrot.slane %v4335_v28, 5  ;;  %v4379_v25 = vrot.slane %v4377_v19, 4  ;;  %v14699_v7 = vld [vmem:[#allocation2 + $0x7c] sm:$0xf]  ;;  %v4391_v28 = vshll.u32 %v4192_v34, 16 }
 0x221   : > { %v4356_v32 = vor.u32 %v4355_v61, %v14683_v1  ;;  %v4397_v10 = vshll.u32 %v14505_v39, 16  ;;  %v4412_v27 = vshrl.u32 %v4195_v47, 16  ;;  %v4328_v46 = vsel %vm13293_vm8, %v4323_v23, %v14649_v52 }
 0x222   : > { %v4338_v45 = vsel %vm13293_vm8, %v4333_v2, %v4337_v53  ;;  %v4421_v18 = vshll.u32 %v14699_v7, 16  ;;  %v4425_v11 = vshrl.u32 %v14699_v7, 16  ;;  %v4347_v19 = vrot.slane %v4346_v12, 4  ;;  %v14717_v12 = vld [vmem:[#allocation2 + $0x80] sm:$0x1] }
 0x223   : > { %v4380_v16 = vor.u32 %v4379_v25, %v14697_v9  ;;  %v4357_v39 = vrot.slane %v4356_v32, 4  ;;  %v4393_v0 = vrot.slane %v4391_v28, 5  ;;  %v14715_v52 = vrot.slane %v4397_v10, 5 }
 0x224   : > { %v4403_v53 = vrot.slane %v4401_v57, 4  ;;  %v4414_v23 = vrot.slane %v4412_v27, 4  ;;  %v4439_v25 = vshll.u32 %v4198_v4, 16  ;;  %v4352_v28 = vsel %vm13293_vm8, %v4347_v19, %v14683_v1 }
 0x225   : > { %12065 = vmatmul.mubr.msk.bf16.gmra.mrb[28].mxu0 %vm1295_vm9, %v13015_v24  ;;  %v4314_v24 = vsel %vm13293_vm8, %v14668_v48, %v14656_v63  ;;  %v4383_v63 = vshll.u32 %v14694_v15, 16  ;;  %v4388_v48 = vshrl.u32 %v4192_v34, 16  ;;  %v4370_v34 = vor.u32 %v4369_v59, %v4366_v36 }
 0x226   : > { %12070 = vmatprep.mubr.msk.bf16.mxu0 %vm1295_vm9, %v11029_v13  ;;  %v4359_v13 = vshll.u32 %v14489_v42, 16  ;;  %v4415_v42 = vshll.u32 %v4195_v47, 16  ;;  %v4427_v36 = vrot.slane %v4425_v11, 4  ;;  %v4436_v59 = vshrl.u32 %v4198_v4, 16 }
 0x227   : > { %v4385_v47 = vrot.slane %v4383_v63, 5  ;;  %v4390_v58 = vrot.slane %v4388_v48, 4  ;;  %v4381_v32 = vrot.slane %v4380_v16, 4  ;;  %v4445_v63 = vshll.u32 %v14527_v8, 16 }
 0x228   : > { %v4361_v61 = vrot.slane %v4359_v13, 5  ;;  %v4417_v2 = vrot.slane %v4415_v42, 5  ;;  %v14719_v13 = vrot.slane %v4421_v18, 5  ;;  %v11032_v48 = vcombine.low %v4304_v26, %v4314_v24  ;;  %v4201_v42 = vld [vmem:[#allocation2 + $0x90] sm:$0xf] }
 0x229   : > { %v4394_v57 = vor.u32 %v4393_v0, %v4390_v58  ;;  %v4404_v27 = vor.u32 %v4403_v53, %v14715_v52  ;;  %v4407_v4 = vshll.u32 %v14507_v33, 16  ;;  %v4431_v16 = vshll.u32 %v14717_v12, 16  ;;  %v14731_v18 = vld [vmem:[#allocation2 + $0x94] sm:$0xf] }
 0x22a   : > { %v4362_v10 = vsel %vm13293_vm8, %v4357_v39, %v4361_v61  ;;  %v4428_v26 = vor.u32 %v4427_v36, %v14719_v13  ;;  %v4438_v24 = vrot.slane %v4436_v59, 4  ;;  %v4386_v0 = vsel %vm13293_vm8, %v4381_v32, %v4385_v47  ;;  %v4204_v59 = vld [vmem:[#allocation2 + $0x9c] sm:$0xf] }
 0x22b   : > { %v14739_v58 = vrot.slane %v4445_v63, 5  ;;  %v4463_v11 = vshll.u32 %v4201_v42, 16  ;;  %v4469_v19 = vshll.u32 %v14731_v18, 16  ;;  %v4473_v61 = vshrl.u32 %v14731_v18, 16  ;;  %v14747_v63 = vld [vmem:[#allocation2 + $0x98] sm:$0x1] }
 0x22c   : > { %v4405_v39 = vrot.slane %v4404_v27, 4  ;;  %v4409_v53 = vrot.slane %v4407_v4, 5  ;;  %v4455_v36 = vshll.u32 %v14529_v41, 16  ;;  %v4484_v41 = vshrl.u32 %v4204_v59, 16 }
 0x22d   : > { %12071 = vmatmul.mubr.msk.bf16.vlgmr.msra.gmra.mrb[0].mxu0 %vm1295_vm9, %v11030_v6  ;;  %v4371_v6 = vrot.slane %v4370_v34, 4  ;;  %v4395_v34 = vrot.slane %v4394_v57, 4  ;;  %v4487_v4 = vshll.u32 %v4204_v59, 16  ;;  %v14778_v59 = vld [vmem:[#allocation2 + $0xb0] sm:$0x1] }
 0x22e   : > { %12103 = vmatpush3.bf16.msra.mxu0 %v5172_v5  ;;  %12074 = vmatprep.mubr.msk.bf16.mxu0 %vm1295_vm9, %v11031_v43  ;;  %v4449_v5 = vshrl.u32 %v14527_v8, 16  ;;  %v11033_v43 = vcombine.low %v4328_v46, %v4338_v45  ;;  %v4418_v8 = vor.u32 %v4417_v2, %v4414_v23  ;;  %v4441_v46 = vrot.slane %v4439_v25, 5 }
 0x22f   : > { %v4376_v1 = vsel %vm13293_vm8, %v4371_v6, %v14697_v9  ;;  %v4460_v45 = vshrl.u32 %v4201_v42, 16  ;;  %v4433_v9 = vrot.slane %v4431_v16, 5  ;;  %v4429_v2 = vrot.slane %v4428_v26, 4 }
 0x230   : > { %v4451_v33 = vrot.slane %v4449_v5, 4  ;;  %v4419_v23 = vrot.slane %v4418_v8, 4  ;;  %v4442_v47 = vor.u32 %v4441_v46, %v4438_v24  ;;  %v11034_v25 = vcombine.low %v4352_v28, %v4362_v10  ;;  %v4207_v28 = vld [vmem:[#allocation2 + $0xa8] sm:$0xf]  ;;  %v14756_v10 = vld [vmem:[#allocation2 + $0xac] sm:$0xf] }
 0x231   : > { %v11035_v6 = vcombine.low %v4376_v1, %v4386_v0  ;;  %v4462_v5 = vrot.slane %v4460_v45, 4  ;;  %v14749_v42 = vrot.slane %v4469_v19, 5  ;;  %v4400_v57 = vsel %vm13293_vm8, %v4395_v34, %v14715_v52 }
 0x232   : > { %v4452_v32 = vor.u32 %v4451_v33, %v14739_v58  ;;  %v4410_v27 = vsel %vm13293_vm8, %v4405_v39, %v4409_v53  ;;  %v4424_v16 = vsel %vm13293_vm8, %v4419_v23, %v14719_v13  ;;  %v4434_v8 = vsel %vm13293_vm8, %v4429_v2, %v4433_v9 }
 0x233   : > { %v4443_v26 = vrot.slane %v4442_v47, 4  ;;  %v4457_v24 = vrot.slane %v4455_v36, 5  ;;  %v4479_v52 = vshll.u32 %v14747_v63, 16  ;;  %v4493_v1 = vshll.u32 %v14559_v40, 16 }
 0x234   : > { %v4453_v46 = vrot.slane %v4452_v32, 4  ;;  %v4497_v0 = vshrl.u32 %v14559_v40, 16  ;;  %v4508_v33 = vshrl.u32 %v4207_v28, 16  ;;  %v4511_v45 = vshll.u32 %v4207_v28, 16 }
 0x235   : > { %12075 = vmatmul.mubr.msk.bf16.gmra.mrb[4].mxu0 %vm1295_vm9, %v11032_v48  ;;  %v4465_v48 = vrot.slane %v4463_v11, 5  ;;  %v4517_v11 = vshll.u32 %v14756_v10, 16  ;;  %v4521_v13 = vshrl.u32 %v14756_v10, 16  ;;  %v4486_v34 = vrot.slane %v4484_v41, 4 }
 0x236   : > { %12078 = vmatprep.mubr.msk.bf16.mxu0 %vm1295_vm9, %v11033_v43  ;;  %v4475_v43 = vrot.slane %v4473_v61, 4  ;;  %v4489_v39 = vrot.slane %v4487_v4, 5  ;;  %v11036_v53 = vcombine.low %v4400_v57, %v4410_v27  ;;  %v11037_v9 = vcombine.low %v4424_v16, %v4434_v8 }
 0x237   : > { %v4466_v19 = vor.u32 %v4465_v48, %v4462_v5  ;;  %v4448_v40 = vsel %vm13293_vm8, %v4443_v26, %v14739_v58  ;;  %v4458_v23 = vsel %vm13293_vm8, %v4453_v46, %v4457_v24  ;;  %v4481_v2 = vrot.slane %v4479_v52, 5  ;;  %v4210_v48 = vld [vmem:[#allocation2 + $0xb4] sm:$0xf]  ;;  %v4213_v26 = vld [vmem:[#allocation2 + $0xc0] sm:$0xf] }
 0x238   : > { %v4476_v61 = vor.u32 %v4475_v43, %v14749_v42  ;;  %v14776_v47 = vrot.slane %v4493_v1, 5  ;;  %v4499_v36 = vrot.slane %v4497_v0, 4  ;;  %v4519_v32 = vrot.slane %v4517_v11, 5  ;;  %v14783_v24 = vld [vmem:[#allocation2 + $0xc4] sm:$0xf] }
 0x239   : > { %v4523_v5 = vrot.slane %v4521_v13, 4  ;;  %v4467_v43 = vrot.slane %v4466_v19, 4  ;;  %v4490_v27 = vor.u32 %v4489_v39, %v4486_v34  ;;  %v4503_v41 = vshll.u32 %v14561_v35, 16 }
 0x23a   : > { %v4477_v57 = vrot.slane %v4476_v61, 4  ;;  %v4527_v58 = vshll.u32 %v14778_v59, 16  ;;  %v11038_v4 = vcombine.low %v4448_v40, %v4458_v23  ;;  %v4500_v28 = vor.u32 %v4499_v36, %v14776_v47 }
 0x23b   : > { %v4532_v16 = vshrl.u32 %v4210_v48, 16  ;;  %v4535_v8 = vshll.u32 %v4210_v48, 16  ;;  %v4524_v52 = vor.u32 %v4523_v5, %v4519_v32  ;;  %v4541_v1 = vshll.u32 %v14593_v60, 16 }
 0x23c   : > { %v4545_v0 = vshrl.u32 %v14593_v60, 16  ;;  %v4472_v35 = vsel %vm13293_vm8, %v4467_v43, %v14749_v42  ;;  %v4505_v11 = vrot.slane %v4503_v41, 5  ;;  %v4556_v13 = vshrl.u32 %v4213_v26, 16  ;;  %v4216_v43 = vld [vmem:[#allocation2 + $0xcc] sm:$0xf] }
 0x23d   : > { %12079 = vmatmul.mubr.msk.bf16.gmra.mrb[8].mxu0 %vm1295_vm9, %v11034_v25  ;;  %v4510_v25 = vrot.slane %v4508_v33, 4  ;;  %v4482_v33 = vsel %vm13293_vm8, %v4477_v57, %v4481_v2  ;;  %v4559_v19 = vshll.u32 %v4213_v26, 16  ;;  %v4565_v61 = vshll.u32 %v14783_v24, 16 }
 0x23e   : > { %12082 = vmatprep.mubr.msk.bf16.mxu0 %vm1295_vm9, %v11035_v6  ;;  %v4513_v6 = vrot.slane %v4511_v45, 5  ;;  %v4491_v45 = vrot.slane %v4490_v27, 4  ;;  %v4569_v34 = vshrl.u32 %v14783_v24, 16  ;;  %v4501_v39 = vrot.slane %v4500_v28, 4 }
 0x23f   : > { %v4534_v60 = vrot.slane %v4532_v16, 4  ;;  %v4537_v40 = vrot.slane %v4535_v8, 5  ;;  %v4525_v23 = vrot.slane %v4524_v52, 4  ;;  %v4543_v36 = vrot.slane %v4541_v1, 5 }
 0x240   : > { %v4514_v46 = vor.u32 %v4513_v6, %v4510_v25  ;;  %v4547_v25 = vrot.slane %v4545_v0, 4  ;;  %v11039_v42 = vcombine.low %v4472_v35, %v4482_v33  ;;  %v4558_v6 = vrot.slane %v4556_v13, 4 }
 0x241   : > { %v4561_v5 = vrot.slane %v4559_v19, 5  ;;  %v4567_v2 = vrot.slane %v4565_v61, 5  ;;  %v4571_v48 = vrot.slane %v4569_v34, 4  ;;  %v4496_v57 = vsel %vm13293_vm8, %v4491_v45, %v14776_v47 }
 0x242   : > { %v4506_v27 = vsel %vm13293_vm8, %v4501_v39, %v4505_v11  ;;  %v4538_v41 = vor.u32 %v4537_v40, %v4534_v60  ;;  %v4548_v8 = vor.u32 %v4547_v25, %v4543_v36  ;;  %v4551_v26 = vshll.u32 %v14595_v3, 16 }
 0x243   : > { %v4580_v47 = vshrl.u32 %v4216_v43, 16  ;;  %v4589_v52 = vshll.u32 %v14640_v51, 16  ;;  %v4593_v1 = vshrl.u32 %v14640_v51, 16  ;;  %v4562_v0 = vor.u32 %v4561_v5, %v4558_v6 }
 0x244   : > { %v4572_v35 = vor.u32 %v4571_v48, %v4567_v2  ;;  %v11040_v33 = vcombine.low %v4496_v57, %v4506_v27  ;;  %v4539_v45 = vrot.slane %v4538_v41, 4  ;;  %v4549_v11 = vrot.slane %v4548_v8, 4  ;;  %v4897_v48 = vld [vmem:[#allocation2 + $0x18] sm:$0xe] }
 0x245   : > { %12083 = vmatmul.mubr.msk.bf16.gmra.mrb[12].mxu0 %vm1295_vm9, %v11036_v53  ;;  %v4529_v53 = vrot.slane %v4527_v58, 5  ;;  %v14801_v58 = vld [vmem:[#allocation2 + $0xc8] sm:$0x1]  ;;  %v4553_v13 = vrot.slane %v4551_v26, 5  ;;  %v4582_v19 = vrot.slane %v4580_v47, 4  ;;  %v4591_v3 = vrot.slane %v4589_v52, 5 }
 0x246   : > { %12086 = vmatprep.mubr.msk.bf16.mxu0 %vm1295_vm9, %v11037_v9  ;;  %v4515_v9 = vrot.slane %v4514_v46, 4  ;;  %v4583_v46 = vshll.u32 %v4216_v43, 16  ;;  %v4595_v34 = vrot.slane %v4593_v1, 4  ;;  %v4563_v39 = vrot.slane %v4562_v0, 4  ;;  %v4899_v52 = vld [vmem:[#allocation2 + $0x30] sm:$0xe] }
 0x247   : > { %v4530_v16 = vsel %vm13293_vm8, %v4525_v23, %v4529_v53  ;;  %v4573_v53 = vrot.slane %v4572_v35, 4  ;;  %v4544_v51 = vsel %vm13293_vm8, %v4539_v45, %v4543_v36  ;;  %v4554_v40 = vsel %vm13293_vm8, %v4549_v11, %v4553_v13 }
 0x248   : > { %v4520_v28 = vsel %vm13293_vm8, %v4515_v9, %v4519_v32  ;;  %v4585_v61 = vrot.slane %v4583_v46, 5  ;;  %v4596_v23 = vor.u32 %v4595_v34, %v4591_v3  ;;  %v4599_v25 = vshll.u32 %v14642_v56, 16  ;;  %v4898_v46 = vld [vmem:[#allocation2 + $0x24] sm:$0xe] }
 0x249   : > { %v11041_v32 = vcombine.low %v4520_v28, %v4530_v16  ;;  %v4963_v5 = vrot.slane %v14516_v62, 5  ;;  %v11042_v43 = vcombine.low %v4544_v51, %v4554_v40  ;;  %v11061_v28 = vrot.slane %v4897_v48, 9 }
 0x24a   : > { %v4586_v9 = vor.u32 %v4585_v61, %v4582_v19  ;;  %v4597_v27 = vrot.slane %v4596_v23, 4  ;;  %v4601_v41 = vrot.slane %v4599_v25, 5  ;;  %v4966_v8 = vrot.slane %v14536_v29, 5  ;;  %v4900_v61 = vld [vmem:[#allocation2 + $0x3c] sm:$0xe] }
 0x24b   : > { %v4965_v16 = vrot.slane %v4963_v5, 4  ;;  %v4964_v26 = vsel %vm13684_vm15, %v11061_v28, %v4963_v5  ;;  %v4977_v29 = vrot.slane %v14557_v44, 5  ;;  %v11062_v35 = vrot.slane %v4898_v46, 9 }
 0x24c   : > { %v4587_v57 = vrot.slane %v4586_v9, 4  ;;  %v4602_v62 = vsel %vm13293_vm8, %v4597_v27, %v4601_v41  ;;  %v4984_v13 = vrot.slane %v14571_v30, 5  ;;  %v4987_v51 = vrot.slane %v14613_v55, 5 }
 0x24d   : > { %12087 = vmatmul.mubr.msk.bf16.gmra.mrb[16].mxu0 %vm1295_vm9, %v11038_v4  ;;  %v4575_v4 = vshll.u32 %v14801_v58, 16  ;;  %v4967_v47 = vsel %vm13684_vm15, %v4965_v16, %v4966_v8  ;;  %v4979_v45 = vrot.slane %v4977_v29, 4  ;;  %v4994_v30 = vrot.slane %v14647_v37, 5 }
 0x24e   : > { %12090 = vmatprep.mubr.msk.bf16.mxu0 %vm1295_vm9, %v11039_v42  ;;  %v4568_v42 = vsel %vm13293_vm8, %v4563_v39, %v4567_v2  ;;  %v4592_v56 = vsel %vm13293_vm8, %v4587_v57, %v4591_v3  ;;  %v4970_v2 = vrot.slane %v14534_v14, 5  ;;  %v11078_v0 = vcombine.low %v4964_v26, %v4967_v47  ;;  %v4901_v3 = vld [vmem:[#allocation2 + $0x48] sm:$0xe]  ;;  %v4907_v26 = vld [vmem:[#allocation2 + $0x90] sm:$0xe] }
 0x24f   : > { %v4577_v60 = vrot.slane %v4575_v4, 5  ;;  %v11044_v1 = vcombine.low %v4592_v56, %v4602_v62  ;;  %v4980_v14 = vrot.slane %v14586_v17, 5  ;;  %v4991_v17 = vrot.slane %v14610_v38, 5 }
 0x250   : > { %v4972_v4 = vrot.slane %v4970_v2, 4  ;;  %v4971_v11 = vsel %vm13684_vm15, %v11062_v35, %v4970_v2  ;;  %v11065_v40 = vrot.slane %v4901_v3, 9  ;;  %v5019_v41 = vrot.slane %v14699_v7, 5 }
 0x251   : > { %v4578_v6 = vsel %vm13293_vm8, %v4573_v53, %v4577_v60  ;;  %v11064_v53 = vrot.slane %v4900_v61, 9  ;;  %v4986_v60 = vrot.slane %v4984_v13, 4  ;;  %v4993_v9 = vrot.slane %v4991_v17, 4  ;;  %v17116_v61 = vld [vmem:[#allocation8_spill] sm:$0xff] }
 0x252   : > { %v11043_v36 = vcombine.low %v4568_v42, %v4578_v6  ;;  %v4992_v25 = vsel %vm13684_vm15, %v11065_v40, %v4991_v17  ;;  %v5005_v42 = vrot.slane %v14662_v22, 5  ;;  %v4903_v6 = vld [vmem:[#allocation2 + $0x60] sm:$0xe]  ;;  %v4905_v22 = vld [vmem:[#allocation2 + $0x78] sm:$0xe]  ;;  %v5021_v8 = vrot.slane %v5019_v41, 4 }
 0x253   : > { %v4985_v23 = vsel %vm13684_vm15, %v11064_v53, %v4984_v13  ;;  %v4988_v38 = vsel %vm13684_vm15, %v4986_v60, %v4987_v51  ;;  %v4995_v55 = vsel %vm13684_vm15, %v4993_v9, %v4994_v30  ;;  %v11067_v48 = vrot.slane %v4903_v6, 9  ;;  %v17117_v17 = vld [vmem:[#allocation9_spill] sm:$0xff]  ;;  %v17119_v53 = vld [vmem:[#allocation10_spill] sm:$0xff]  ;;  %v17120_v60 = vld [vmem:[#allocation11_spill] sm:$0xff] }
 0x254   : > { %v11081_v37 = vcombine.low %v4985_v23, %v4988_v38  ;;  %v11082_v5 = vcombine.low %v4992_v25, %v4995_v55  ;;  %v11069_v16 = vrot.slane %v4905_v22, 9  ;;  %v5022_v56 = vrot.slane %v14717_v12, 5  ;;  %v17123_v40 = vld [vmem:[#allocation13_spill] sm:$0xff] }
 0x255   : > { %12091 = vmatmul.mubr.msk.bf16.gmra.mrb[20].mxu0 %vm1295_vm9, %v11040_v33  ;;  %v4973_v33 = vrot.slane %v14553_v54, 5  ;;  %v4981_v54 = vsel %vm13684_vm15, %v4979_v45, %v4980_v14  ;;  %v5006_v57 = vsel %vm13684_vm15, %v11067_v48, %v5005_v42  ;;  %v5033_v7 = vrot.slane %v14731_v18, 5 }
 0x256   : > { %12094 = vmatprep.mubr.msk.bf16.mxu0 %vm1295_vm9, %v11041_v32  ;;  %v11063_v32 = vrot.slane %v4899_v52, 9  ;;  %v5020_v62 = vsel %vm13684_vm15, %v11069_v16, %v5019_v41  ;;  %v5023_v2 = vsel %vm13684_vm15, %v5021_v8, %v5022_v56  ;;  %v11071_v46 = vrot.slane %v4907_v26, 9  ;;  %v15053_v26 = vld [vmem:[%s16925_s2] ss:$0 sm:$0xff] }
 0x257   : > { %v4974_v44 = vsel %vm13684_vm15, %v4972_v4, %v4973_v33  ;;  %v11086_v47 = vcombine.low %v5020_v62, %v5023_v2  ;;  %v5036_v12 = vrot.slane %v14747_v63, 5  ;;  %v5047_v18 = vrot.slane %v14756_v10, 5 }
 0x258   : > { %v4978_v19 = vsel %vm13684_vm15, %v11063_v32, %v4977_v29  ;;  %v11079_v34 = vcombine.low %v4971_v11, %v4974_v44  ;;  %v5035_v29 = vrot.slane %v5033_v7, 4  ;;  %v5034_v52 = vsel %vm13684_vm15, %v11071_v46, %v5033_v7  ;;  %v17113_v32 = vld [vmem:[#allocation6_spill] sm:$0xff] }
 0x259   : > { %v11080_v39 = vcombine.low %v4978_v19, %v4981_v54  ;;  %v5049_v33 = vrot.slane %v5047_v18, 4  ;;  %v5050_v63 = vrot.slane %v14778_v59, 5  ;;  %v5061_v10 = vrot.slane %v14783_v24, 5  ;;  %v4911_v44 = vld [vmem:[#allocation2 + $0xc0] sm:$0xe] }
 0x25a   : > { %v11075_v19 = vrot.slane %v4911_v44, 9  ;;  %v5064_v59 = vrot.slane %v14801_v58, 5  ;;  %v17118_v3 = vcombine.low %v17116_v61, %v17117_v17  ;;  %v17121_v51 = vcombine.low %v17119_v53, %v17120_v60  ;;  %v17122_v58 = vld [vmem:[#allocation12_spill] sm:$0xff]  ;;  %v15046_v7 = vld [vmem:[%s16927_s4] sm:$0xf] }
 0x25b   : > { %v5051_v11 = vsel %vm13684_vm15, %v5049_v33, %v5050_v63  ;;  %v5063_v54 = vrot.slane %v5061_v10, 4  ;;  %v17124_v9 = vcombine.low %v17122_v58, %v17123_v40  ;;  %v17125_v30 = vmov 0   ;;  %v15058_v46 = vld [vmem:[%s16926_s3] ss:$0 sm:$0xff] }
 0x25c   : > { %5485 = vst.msk [vmem:[#allocation3 + $0x18] sm:$0xf] %vm5477_vm0, %v17125_v30  ;;  %5478 = vst.msk [vmem:[#allocation3] sm:$0xf] %vm5477_vm0, %v17125_v30 }
 0x25d   : > { %12095 = vmatmul.mubr.msk.bf16.gmra.mrb[24].mxu0 %vm1295_vm9, %v11042_v43  ;;  %v5007_v43 = vrot.slane %v5005_v42, 4  ;;  %5479 = vst.msk [vmem:[#allocation3 + $0x4] sm:$0xf] %vm5477_vm0, %v17125_v30  ;;  %5482 = vst.msk [vmem:[#allocation3 + $0xc] sm:$0xf] %vm5477_vm0, %v17125_v30 }
 0x25e   : > { %12098 = vmatprep.mubr.msk.bf16.mxu0 %vm1295_vm9, %v11043_v36  ;;  %v5008_v36 = vrot.slane %v14694_v15, 5  ;;  %v17110_v15 = vcombine.low %v14496_v31, %v14500_v21  ;;  %v17111_v31 = vld [vmem:[#allocation5_spill] sm:$0xff]  ;;  %5483 = vst.msk [vmem:[#allocation3 + $0x10] sm:$0xf] %vm5477_vm0, %v17125_v30  ;;  %5486 = vst.msk [vmem:[#allocation3 + $0x1c] sm:$0xf] %vm5477_vm0, %v17125_v30 }
 0x25f   : > { %v17112_v21 = vcombine.low %v14514_v50, %v17111_v31  ;;  %v17114_v50 = vld [vmem:[#allocation7_spill] sm:$0xff]  ;;  %5488 = vst.msk [vmem:[#allocation3 + $0x24] sm:$0xf] %vm5477_vm0, %v17125_v30  ;;  %5489 = vst.msk [vmem:[#allocation3 + $0x28] sm:$0xf] %vm5477_vm0, %v17125_v30 }
 0x260   : > { %v5009_v27 = vsel %vm13684_vm15, %v5007_v43, %v5008_v36  ;;  %v17115_v45 = vcombine.low %v17113_v32, %v17114_v50  ;;  %5491 = vst.msk [vmem:[#allocation3 + $0x30] sm:$0xf] %vm5477_vm0, %v17125_v30  ;;  %5492 = vst.msk [vmem:[#allocation3 + $0x34] sm:$0xf] %vm5477_vm0, %v17125_v30 }
 0x261   : > { %v11084_v28 = vcombine.low %v5006_v57, %v5009_v27  ;;  %5494 = vst.msk [vmem:[#allocation3 + $0x3c] sm:$0xf] %vm5477_vm0, %v17125_v30  ;;  %5495 = vst.msk [vmem:[#allocation3 + $0x40] sm:$0xf] %vm5477_vm0, %v17125_v30  ;;  %v11144_v57 = vld [vmem:[%s16927_s4 + $0x4] sm:$0xf] }
 0x262   : > { %5497 = vst.msk [vmem:[#allocation3 + $0x48] sm:$0xf] %vm5477_vm0, %v17125_v30  ;;  %5498 = vst.msk [vmem:[#allocation3 + $0x4c] sm:$0xf] %vm5477_vm0, %v17125_v30  ;;  %12963 = vmatprep.subr.msk.bf16.mxu1 %vm6598_vm2, %v11144_v57  ;;  %v6600_v56 = vsel %vm6598_vm2, %v11144_v57, 0 }
 0x263   : > { %5500 = vst.msk [vmem:[#allocation3 + $0x54] sm:$0xf] %vm5477_vm0, %v17125_v30  ;;  %5501 = vst.msk [vmem:[#allocation3 + $0x58] sm:$0xf] %vm5477_vm0, %v17125_v30  ;;  %v6066_v23 = vld [vmem:[#allocation3] sm:$0xf]  ;;  %12137 = vmatpush3.bf16.msra.mxu1 %v6600_v56 }
 0x264   : > { %5503 = vst.msk [vmem:[#allocation3 + $0x60] sm:$0xf] %vm5477_vm0, %v17125_v30  ;;  %5504 = vst.msk [vmem:[#allocation3 + $0x64] sm:$0xf] %vm5477_vm0, %v17125_v30  ;;  %v6067_v38 = vld [vmem:[#allocation3 + $0x4] sm:$0xf]  ;;  %12964 = vmatprep.subr.msk.bf16.mxu1 %vm6598_vm2, %v15046_v7 }
 0x265   : > { %12099 = vmatmul.mubr.msk.bf16.gmra.mrb[28].mxu0 %vm1295_vm9, %v11044_v1  ;;  %v5037_v1 = vsel %vm13684_vm15, %v5035_v29, %v5036_v12  ;;  %5506 = vst.msk [vmem:[#allocation3 + $0x6c] sm:$0xf] %vm5477_vm0, %v17125_v30  ;;  %5507 = vst.msk [vmem:[#allocation3 + $0x70] sm:$0xf] %vm5477_vm0, %v17125_v30  ;;  %v6116_v25 = vshrl.u32 %v6066_v23, 16  ;;  %v6119_v55 = vshll.u32 %v6066_v23, 16 }
 0x266   : > { %12104 = vmatprep.mubr.msk.bf16.mxu0 %vm1295_vm9, %v11078_v0  ;;  %v4909_v0 = vld [vmem:[#allocation2 + $0xa8] sm:$0xe]  ;;  %v11088_v35 = vcombine.low %v5034_v52, %v5037_v1  ;;  %5509 = vst.msk [vmem:[#allocation3 + $0x78] sm:$0xf] %vm5477_vm0, %v17125_v30  ;;  %5510 = vst.msk [vmem:[#allocation3 + $0x7c] sm:$0xf] %vm5477_vm0, %v17125_v30 }
 0x267   : > { %v11073_v4 = vrot.slane %v4909_v0, 9  ;;  %5512 = vst.msk [vmem:[#allocation3 + $0x84] sm:$0xf] %vm5477_vm0, %v17125_v30  ;;  %5513 = vst.msk [vmem:[#allocation3 + $0x88] sm:$0xf] %vm5477_vm0, %v17125_v30  ;;  %v6125_v42 = vshll.u32 %v6067_v38, 16 }
 0x268   : > { %5515 = vst.msk [vmem:[#allocation3 + $0x90] sm:$0xf] %vm5477_vm0, %v17125_v30  ;;  %5516 = vst.msk [vmem:[#allocation3 + $0x94] sm:$0xf] %vm5477_vm0, %v17125_v30  ;;  %v6129_v6 = vshrl.u32 %v6067_v38, 16 }
 0x269   : > { %v5048_v14 = vsel %vm13684_vm15, %v11073_v4, %v5047_v18  ;;  %5518 = vst.msk [vmem:[#allocation3 + $0x9c] sm:$0xf] %vm5477_vm0, %v17125_v30  ;;  %5519 = vst.msk [vmem:[#allocation3 + $0xa0] sm:$0xf] %vm5477_vm0, %v17125_v30  ;;  %v6127_v48 = vrot.slane %v6125_v42, 5 }
 0x26a   : > { %v11090_v13 = vcombine.low %v5048_v14, %v5051_v11  ;;  %5521 = vst.msk [vmem:[#allocation3 + $0xa8] sm:$0xf] %vm5477_vm0, %v17125_v30  ;;  %5522 = vst.msk [vmem:[#allocation3 + $0xac] sm:$0xf] %vm5477_vm0, %v17125_v30  ;;  %v6131_v43 = vrot.slane %v6129_v6, 4 }
 0x26b   : > { %5524 = vst.msk [vmem:[#allocation3 + $0xb4] sm:$0xf] %vm5477_vm0, %v17125_v30  ;;  %5525 = vst.msk [vmem:[#allocation3 + $0xb8] sm:$0xf] %vm5477_vm0, %v17125_v30 }
 0x26c   : > { %5527 = vst.msk [vmem:[#allocation3 + $0xc0] sm:$0xf] %vm5477_vm0, %v17125_v30  ;;  %5528 = vst.msk [vmem:[#allocation3 + $0xc4] sm:$0xf] %vm5477_vm0, %v17125_v30  ;;  %v6132_v41 = vor.u32 %v6131_v43, %v6127_v48 }
 0x26d   : > { %12105 = vmatmul.mubr.msk.bf16.vlgmr.msra.gmra.mrb[0].mxu0 %vm1295_vm9, %v11079_v34  ;;  %v5062_v34 = vsel %vm13684_vm15, %v11075_v19, %v5061_v10  ;;  %5530 = vst.msk [vmem:[#allocation3 + $0xcc] sm:$0xf] %vm5477_vm0, %v17125_v30  ;;  %5531 = vst.msk [vmem:[#allocation3 + $0xd0] sm:$0xf] %vm5477_vm0, %v17125_v30 }
 0x26e   : > { %12108 = vmatprep.mubr.msk.bf16.mxu0 %vm1295_vm9, %v11080_v39  ;;  %v5065_v39 = vsel %vm13684_vm15, %v5063_v54, %v5064_v59  ;;  %5487 = vst.msk [vmem:[#allocation3 + $0x20] sm:$0x1] %vm5480_vm1, %v17125_v30  ;;  %5481 = vst.msk [vmem:[#allocation3 + $0x8] sm:$0x1] %vm5480_vm1, %v17125_v30  ;;  %v6133_v16 = vrot.slane %v6132_v41, 4 }
 0x26f   : > { %v11092_v24 = vcombine.low %v5062_v34, %v5065_v39  ;;  %5484 = vst.msk [vmem:[#allocation3 + $0x14] sm:$0x1] %vm5480_vm1, %v17125_v30  ;;  %5490 = vst.msk [vmem:[#allocation3 + $0x2c] sm:$0x1] %vm5480_vm1, %v17125_v30 }
 0x270   : > { %5493 = vst.msk [vmem:[#allocation3 + $0x38] sm:$0x1] %vm5480_vm1, %v17125_v30  ;;  %5496 = vst.msk [vmem:[#allocation3 + $0x44] sm:$0x1] %vm5480_vm1, %v17125_v30 }
 0x271   : > { %5499 = vst.msk [vmem:[#allocation3 + $0x50] sm:$0x1] %vm5480_vm1, %v17125_v30  ;;  %5502 = vst.msk [vmem:[#allocation3 + $0x5c] sm:$0x1] %vm5480_vm1, %v17125_v30 }
 0x272   : > { %5505 = vst.msk [vmem:[#allocation3 + $0x68] sm:$0x1] %vm5480_vm1, %v17125_v30  ;;  %5508 = vst.msk [vmem:[#allocation3 + $0x74] sm:$0x1] %vm5480_vm1, %v17125_v30 }
 0x273   : > { %5511 = vst.msk [vmem:[#allocation3 + $0x80] sm:$0x1] %vm5480_vm1, %v17125_v30  ;;  %5514 = vst.msk [vmem:[#allocation3 + $0x8c] sm:$0x1] %vm5480_vm1, %v17125_v30 }
 0x274   : > { %5517 = vst.msk [vmem:[#allocation3 + $0x98] sm:$0x1] %vm5480_vm1, %v17125_v30  ;;  %5520 = vst.msk [vmem:[#allocation3 + $0xa4] sm:$0x1] %vm5480_vm1, %v17125_v30 }
 0x275   : > { %12109 = vmatmul.mubr.msk.bf16.gmra.mrb[4].mxu0 %vm1295_vm9, %v11081_v37  ;;  %5523 = vst.msk [vmem:[#allocation3 + $0xb0] sm:$0x1] %vm5480_vm1, %v17125_v30  ;;  %5526 = vst.msk [vmem:[#allocation3 + $0xbc] sm:$0x1] %vm5480_vm1, %v17125_v30  ;;  %v6118_v37 = vrot.slane %v6116_v25, 4 }
 0x276   : > { %12112 = vmatprep.mubr.msk.bf16.mxu0 %vm1295_vm9, %v11082_v5  ;;  %5529 = vst.msk [vmem:[#allocation3 + $0xc8] sm:$0x1] %vm5480_vm1, %v17125_v30  ;;  %5532 = vst.msk [vmem:[#allocation3 + $0xd4] sm:$0x1] %vm5480_vm1, %v17125_v30  ;;  %v6121_v5 = vrot.slane %v6119_v55, 5 }
 0x277   : > { %v6099_v36 = vld [vmem:[#allocation3 + $0x8] sm:$0x1]  ;;  %v5958_v56 = vld [vmem:[#allocation3 + $0x14] sm:$0x1] }
 0x278   : > { %v6122_v27 = vor.u32 %v6121_v5, %v6118_v37  ;;  %v6135_v22 = vshll.u32 %v6099_v36, 16  ;;  %v5952_v37 = vld [vmem:[#allocation3 + $0xc] sm:$0xf] }
 0x27a   : > { %v6137_v8 = vrot.slane %v6135_v22, 5 }
 0x27c   : > { %v6138_v62 = vsel %vm13293_vm8, %v6133_v16, %v6137_v8 }
 0x27d   : > { %12113 = vmatmul.mubr.msk.bf16.gmra.mrb[8].mxu0 %vm1295_vm9, %v17110_v15 }
 0x27e   : > { %12116 = vmatprep.mubr.msk.bf16.mxu0 %vm1295_vm9, %v11084_v28  ;;  %v6123_v28 = vrot.slane %v6122_v27, 4  ;;  %v5965_v27 = vld [vmem:[#allocation3 + $0x20] sm:$0x1] }
 0x280   : > { %v6128_v15 = vsel %vm13293_vm8, %v6123_v28, %v6127_v48 }
 0x281   : > { %v11145_v2 = vcombine.low %v6128_v15, %v6138_v62 }
 0x283   : > { %12138 = vmatprep.mubr.msk.bf16.mxu1 %vm6549_vm3, %v11145_v2 }
 0x285   : > { %12117 = vmatmul.mubr.msk.bf16.gmra.mrb[12].mxu0 %vm1295_vm9, %v17112_v21 }
 0x286   : > { %12120 = vmatprep.mubr.msk.bf16.mxu0 %vm1295_vm9, %v11086_v47 }
 0x28d   : > { %12121 = vmatmul.mubr.msk.bf16.gmra.mrb[16].mxu0 %vm1295_vm9, %v17115_v45 }
 0x28e   : > { %12124 = vmatprep.mubr.msk.bf16.mxu0 %vm1295_vm9, %v11088_v35 }
 0x295   : > { %12125 = vmatmul.mubr.msk.bf16.gmra.mrb[20].mxu0 %vm1295_vm9, %v17118_v3 }
 0x296   : > { %12128 = vmatprep.mubr.msk.bf16.mxu0 %vm1295_vm9, %v11090_v13 }
 0x29d   : > { %12129 = vmatmul.mubr.msk.bf16.gmra.mrb[24].mxu0 %vm1295_vm9, %v17121_v51 }
 0x29e   : > { %12132 = vmatprep.mubr.msk.bf16.mxu0 %vm1295_vm9, %v11092_v24 }
 0x2a5   : > { %12133 = vmatmul.mubr.msk.bf16.gmra.mrb[28].mxu0 %vm1295_vm9, %v17124_v9  ;;  %v5961_v9 = vld [vmem:[#allocation3 + $0x18] sm:$0xf] }
 0x340   : > { %v12106_v47 = vpop.f32.mrb[0].mxu0 }
 0x341   : > { %v5376_v29 = vmul.f32 %v12106_v47, %v15053_v26  ;;  %v5208_v12 = vpop.f32.mrb[1].mxu0 }
 0x342   : > { %v5374_v31 = vmul.f32 %v15053_v26, %v5208_v12  ;;  %v12107_v21 = vpop.f32.mrb[2].mxu0 }
 0x343   : > { %v5415_v52 = vadd.f32 %v15058_v46, %v5376_v29  ;;  %v5377_v1 = vmul.f32 %v12107_v21, %v15053_v26  ;;  %v5211_v18 = vpop.f32.mrb[3].mxu0 }
 0x344   : > { %v5413_v0 = vadd.f32 %v15058_v46, %v5374_v31  ;;  %v5375_v35 = vmul.f32 %v15053_v26, %v5211_v18 }
 0x345   : > { %v5447_v4 = vmax.f32 %v5415_v52, 0.0  ;;  %v5416_v33 = vadd.f32 %v15058_v46, %v5377_v1 }
 0x346   : > { %v5445_v63 = vmax.f32 %v5413_v0, 0.0  ;;  %v5414_v32 = vadd.f32 %v15058_v46, %v5375_v35 }
 0x347   : > { %v11494_v50 = vpack.c.bf16 %v5447_v4, %v5447_v4  ;;  %v5448_v45 = vmax.f32 %v5416_v33, 0.0 }
 0x348   : > { %v11492_v14 = vpack.c.bf16 %v5445_v63, %v5445_v63  ;;  %v5446_v11 = vmax.f32 %v5414_v32, 0.0  ;;  %v12110_v10 = vpop.f32.mrb[4].mxu0 }
 0x349   : > { %v5647_v44 = vshrl.u32 %v11494_v50, 16  ;;  %v5650_v13 = vshll.u32 %v11494_v50, 16  ;;  %v11495_v19 = vpack.c.bf16 %v5448_v45, %v5448_v45  ;;  %v5380_v54 = vmul.f32 %v12110_v10, %v15053_v26  ;;  %v5224_v59 = vpop.f32.mrb[5].mxu0 }
 0x34a   : > { %v5630_v61 = vshrl.u32 %v11492_v14, 16  ;;  %v5633_v17 = vshll.u32 %v11492_v14, 16  ;;  %v11493_v3 = vpack.c.bf16 %v5446_v11, %v5446_v11  ;;  %v5378_v34 = vmul.f32 %v15053_v26, %v5224_v59  ;;  %v12111_v39 = vpop.f32.mrb[6].mxu0 }
 0x34b   : > { %v5649_v24 = vrot.slane %v5647_v44, 7  ;;  %v5655_v53 = vshrl.u32 %v11495_v19, 16  ;;  %v5658_v60 = vshll.u32 %v11495_v19, 16  ;;  %v5419_v51 = vadd.f32 %v15058_v46, %v5380_v54  ;;  %v5227_v58 = vpop.f32.mrb[7].mxu0  ;;  %v5975_v44 = vld [vmem:[#allocation3 + $0x30] sm:$0xf] }
 0x34c   : > { %v5632_v23 = vrot.slane %v5630_v61, 7  ;;  %v5638_v38 = vshrl.u32 %v11493_v3, 16  ;;  %v5641_v25 = vshll.u32 %v11493_v3, 16  ;;  %v5417_v55 = vadd.f32 %v15058_v46, %v5378_v34  ;;  %v5968_v3 = vld [vmem:[#allocation3 + $0x24] sm:$0xf] }
 0x34d   : > { %v5652_v42 = vor.u32 %v5650_v13, %v5649_v24  ;;  %v5653_v6 = vrot.slane %v5649_v24, 4  ;;  %v5657_v5 = vrot.slane %v5655_v53, 7  ;;  %v5451_v48 = vmax.f32 %v5419_v51, 0.0 }
 0x34e   : > { %v5635_v43 = vor.u32 %v5633_v17, %v5632_v23  ;;  %v5636_v36 = vrot.slane %v5632_v23, 4  ;;  %v5640_v41 = vrot.slane %v5638_v38, 7  ;;  %v5449_v22 = vmax.f32 %v5417_v55, 0.0 }
 0x34f   : > { %v5962_v28 = vsel %vm15073_vm4, %v5652_v42, %v5961_v9  ;;  %v5660_v16 = vor.u32 %v5658_v60, %v5657_v5  ;;  %v5662_v8 = vrot.slane %v5657_v5, 4  ;;  %v11498_v15 = vpack.c.bf16 %v5451_v48, %v5451_v48 }
 0x350   : > { %5963 = vst [vmem:[#allocation3 + $0x18] sm:$0xf] %v5962_v28  ;;  %v5953_v62 = vsel %vm15073_vm4, %v5635_v43, %v5952_v37  ;;  %v5643_v2 = vor.u32 %v5641_v25, %v5640_v41  ;;  %v5645_v47 = vrot.slane %v5640_v41, 4  ;;  %v11496_v29 = vpack.c.bf16 %v5449_v22, %v5449_v22  ;;  %v12114_v12 = vpop.f32.mrb[8].mxu0 }
 0x351   : > { %5954 = vst [vmem:[#allocation3 + $0xc] sm:$0xf] %v5953_v62  ;;  %v5661_v21 = vsel %vm13313_vm12, %v5653_v6, %v5660_v16  ;;  %v5966_v52 = vsel %vm15080_vm6, %v5662_v8, %v5965_v27  ;;  %v5681_v1 = vshrl.u32 %v11498_v15, 16  ;;  %v5684_v18 = vshll.u32 %v11498_v15, 16  ;;  %v5240_v0 = vpop.f32.mrb[9].mxu0 }
 0x352   : > { %5964 = vst.msk [vmem:[#allocation3 + $0x1c] sm:$0xf] %vm5477_vm0, %v5661_v21  ;;  %5967 = vst [vmem:[#allocation3 + $0x20] sm:$0x1] %v5966_v52  ;;  %v5644_v35 = vsel %vm13313_vm12, %v5636_v36, %v5643_v2  ;;  %v5959_v4 = vsel %vm15080_vm6, %v5645_v47, %v5958_v56  ;;  %v5664_v33 = vshrl.u32 %v11496_v29, 16  ;;  %v5667_v63 = vshll.u32 %v11496_v29, 16 }
 0x353   : > { %v12115_v32 = vpop.f32.mrb[10].mxu0  ;;  %5955 = vst.msk [vmem:[#allocation3 + $0x10] sm:$0xf] %vm5477_vm0, %v5644_v35  ;;  %5960 = vst [vmem:[#allocation3 + $0x14] sm:$0x1] %v5959_v4  ;;  %v15098_v50 = vrot.slane %v5681_v1, 7  ;;  %v5381_v45 = vmul.f32 %v12111_v39, %v15053_v26  ;;  %v5379_v14 = vmul.f32 %v15053_v26, %v5227_v58  ;;  %v5384_v11 = vmul.f32 %v12114_v12, %v15053_v26 }
 0x354   : > { %v5243_v10 = vpop.f32.mrb[11].mxu0  ;;  %v15103_v13 = vrot.slane %v5664_v33, 7  ;;  %v5382_v19 = vmul.f32 %v15053_v26, %v5240_v0  ;;  %v5385_v54 = vmul.f32 %v12115_v32, %v15053_v26  ;;  %v5979_v29 = vld [vmem:[#allocation3 + $0x38] sm:$0x1]  ;;  %v5972_v12 = vld [vmem:[#allocation3 + $0x2c] sm:$0x1] }
 0x355   : > { %v5383_v59 = vmul.f32 %v15053_v26, %v5243_v10  ;;  %v5686_v61 = vor.u32 %v5684_v18, %v15098_v50  ;;  %v5687_v17 = vrot.slane %v15098_v50, 4  ;;  %v5420_v34 = vadd.f32 %v15058_v46, %v5381_v45  ;;  %v5989_v4 = vld [vmem:[#allocation3 + $0x48] sm:$0xf] }
 0x356   : > { %v5418_v39 = vadd.f32 %v15058_v46, %v5379_v14  ;;  %v5669_v24 = vor.u32 %v5667_v63, %v15103_v13  ;;  %v5670_v53 = vrot.slane %v15103_v13, 4  ;;  %v5423_v60 = vadd.f32 %v15058_v46, %v5384_v11 }
 0x357   : > { %v5421_v51 = vadd.f32 %v15058_v46, %v5382_v19  ;;  %v5976_v58 = vsel %vm15073_vm4, %v5686_v61, %v5975_v44  ;;  %v5452_v9 = vmax.f32 %v5420_v34, 0.0  ;;  %v5424_v38 = vadd.f32 %v15058_v46, %v5385_v54  ;;  %v5982_v19 = vld [vmem:[#allocation3 + $0x3c] sm:$0xf] }
 0x358   : > { %v5450_v23 = vmax.f32 %v5418_v39, 0.0  ;;  %5977 = vst [vmem:[#allocation3 + $0x30] sm:$0xf] %v5976_v58  ;;  %v5969_v25 = vsel %vm15073_vm4, %v5669_v24, %v5968_v3  ;;  %v5455_v55 = vmax.f32 %v5423_v60, 0.0  ;;  %v5422_v6 = vadd.f32 %v15058_v46, %v5383_v59  ;;  %v12118_v37 = vpop.f32.mrb[12].mxu0 }
 0x359   : > { %v5453_v42 = vmax.f32 %v5421_v51, 0.0  ;;  %5970 = vst [vmem:[#allocation3 + $0x24] sm:$0xf] %v5969_v25  ;;  %v11499_v5 = vpack.c.bf16 %v5452_v9, %v5452_v9  ;;  %v5456_v43 = vmax.f32 %v5424_v38, 0.0  ;;  %v5388_v36 = vmul.f32 %v12118_v37, %v15053_v26  ;;  %v5256_v27 = vpop.f32.mrb[13].mxu0 }
 0x35a   : > { %v11497_v48 = vpack.c.bf16 %v5450_v23, %v5450_v23  ;;  %v11502_v41 = vpack.c.bf16 %v5455_v55, %v5455_v55  ;;  %v5454_v28 = vmax.f32 %v5422_v6, 0.0  ;;  %v5386_v16 = vmul.f32 %v15053_v26, %v5256_v27  ;;  %v12119_v8 = vpop.f32.mrb[14].mxu0 }
 0x35b   : > { %v11500_v22 = vpack.c.bf16 %v5453_v42, %v5453_v42  ;;  %v5689_v56 = vshrl.u32 %v11499_v5, 16  ;;  %v5692_v15 = vshll.u32 %v11499_v5, 16  ;;  %v5259_v47 = vpop.f32.mrb[15].mxu0  ;;  %v11503_v33 = vpack.c.bf16 %v5456_v43, %v5456_v43 }
 0x35c   : > { %v5672_v62 = vshrl.u32 %v11497_v48, 16  ;;  %v5675_v2 = vshll.u32 %v11497_v48, 16  ;;  %v5715_v21 = vshrl.u32 %v11502_v41, 16  ;;  %v5718_v52 = vshll.u32 %v11502_v41, 16  ;;  %v5993_v48 = vld [vmem:[#allocation3 + $0x50] sm:$0x1] }
 0x35d   : > { %v5698_v1 = vshrl.u32 %v11500_v22, 16  ;;  %v5701_v18 = vshll.u32 %v11500_v22, 16  ;;  %v5691_v0 = vrot.slane %v5689_v56, 7  ;;  %v11501_v63 = vpack.c.bf16 %v5454_v28, %v5454_v28 }
 0x35e   : > { %v5674_v35 = vrot.slane %v5672_v62, 7  ;;  %v5717_v32 = vrot.slane %v5715_v21, 7  ;;  %v5427_v45 = vadd.f32 %v15058_v46, %v5388_v36  ;;  %v5425_v14 = vadd.f32 %v15058_v46, %v5386_v16  ;;  %v5986_v62 = vld [vmem:[#allocation3 + $0x44] sm:$0x1] }
 0x35f   : > { %v5700_v50 = vrot.slane %v5698_v1, 7  ;;  %v5694_v11 = vor.u32 %v5692_v15, %v5691_v0  ;;  %v5696_v10 = vrot.slane %v5691_v0, 4  ;;  %v5723_v23 = vshrl.u32 %v11503_v33, 16 }
 0x360   : > { %v5677_v44 = vor.u32 %v5675_v2, %v5674_v35  ;;  %v5679_v13 = vrot.slane %v5674_v35, 4  ;;  %v5720_v54 = vor.u32 %v5718_v52, %v5717_v32  ;;  %v5721_v59 = vrot.slane %v5717_v32, 4  ;;  %v12122_v34 = vpop.f32.mrb[16].mxu0 }
 0x361   : > { %v5703_v61 = vor.u32 %v5701_v18, %v5700_v50  ;;  %v5704_v3 = vrot.slane %v5700_v50, 4  ;;  %v5695_v39 = vsel %vm13313_vm12, %v5687_v17, %v5694_v11  ;;  %v5980_v24 = vsel %vm15080_vm6, %v5696_v10, %v5979_v29  ;;  %v5272_v58 = vpop.f32.mrb[17].mxu0 }
 0x362   : > { %v5678_v60 = vsel %vm13313_vm12, %v5670_v53, %v5677_v44  ;;  %v5973_v51 = vsel %vm15080_vm6, %v5679_v13, %v5972_v12  ;;  %5978 = vst.msk [vmem:[#allocation3 + $0x34] sm:$0xf] %vm5477_vm0, %v5695_v39  ;;  %5981 = vst [vmem:[#allocation3 + $0x38] sm:$0x1] %v5980_v24  ;;  %v5990_v9 = vsel %vm15073_vm4, %v5720_v54, %v5989_v4  ;;  %v5726_v38 = vshll.u32 %v11503_v33, 16  ;;  %v12123_v25 = vpop.f32.mrb[18].mxu0 }
 0x363   : > { %5971 = vst.msk [vmem:[#allocation3 + $0x28] sm:$0xf] %vm5477_vm0, %v5678_v60  ;;  %5974 = vst [vmem:[#allocation3 + $0x2c] sm:$0x1] %v5973_v51  ;;  %v5983_v17 = vsel %vm15073_vm4, %v5703_v61, %v5982_v19  ;;  %v5706_v53 = vshrl.u32 %v11501_v63, 16  ;;  %v5709_v55 = vshll.u32 %v11501_v63, 16  ;;  %v5389_v43 = vmul.f32 %v12119_v8, %v15053_v26 }
 0x364   : > { %5991 = vst [vmem:[#allocation3 + $0x48] sm:$0xf] %v5990_v9  ;;  %5984 = vst [vmem:[#allocation3 + $0x3c] sm:$0xf] %v5983_v17  ;;  %v5459_v42 = vmax.f32 %v5427_v45, 0.0  ;;  %v5457_v6 = vmax.f32 %v5425_v14, 0.0  ;;  %v5387_v36 = vmul.f32 %v15053_v26, %v5259_v47  ;;  %v5392_v27 = vmul.f32 %v12122_v34, %v15053_v26 }
 0x365   : > { %v15140_v37 = vpop.f32.mrb[19].mxu0  ;;  %v5725_v5 = vrot.slane %v5723_v23, 7  ;;  %v5708_v41 = vrot.slane %v5706_v53, 7  ;;  %v5390_v16 = vmul.f32 %v15053_v26, %v5272_v58  ;;  %v5428_v2 = vadd.f32 %v15058_v46, %v5389_v43  ;;  %v6003_v45 = vld [vmem:[#allocation3 + $0x60] sm:$0xf] }
 0x366   : > { %v11506_v22 = vpack.c.bf16 %v5459_v42, %v5459_v42  ;;  %v11504_v28 = vpack.c.bf16 %v5457_v6, %v5457_v6  ;;  %v5426_v29 = vadd.f32 %v15058_v46, %v5387_v36  ;;  %v5431_v10 = vadd.f32 %v15058_v46, %v5392_v27  ;;  %v15169_v58 = vld [vmem:[#allocation3 + $0xc] sm:$0xf] }
 0x367   : > { %v5728_v56 = vor.u32 %v5726_v38, %v5725_v5  ;;  %v5730_v15 = vrot.slane %v5725_v5, 4  ;;  %v5711_v12 = vor.u32 %v5709_v55, %v5708_v41  ;;  %v5713_v21 = vrot.slane %v5708_v41, 4  ;;  %v6007_v5 = vld [vmem:[#allocation3 + $0x68] sm:$0x1] }
 0x368   : > { %v5749_v52 = vshrl.u32 %v11506_v22, 16  ;;  %v5752_v8 = vshll.u32 %v11506_v22, 16  ;;  %v5732_v18 = vshrl.u32 %v11504_v28, 16  ;;  %v5735_v0 = vshll.u32 %v11504_v28, 16  ;;  %v15152_v35 = vpop.f32.mrb[20].mxu0 }
 0x369   : > { %v5729_v47 = vsel %vm13313_vm12, %v5721_v59, %v5728_v56  ;;  %v5994_v1 = vsel %vm15080_vm6, %v5730_v15, %v5993_v48  ;;  %v5712_v4 = vsel %vm13313_vm12, %v5704_v3, %v5711_v12  ;;  %v5987_v33 = vsel %vm15080_vm6, %v5713_v21, %v5986_v62  ;;  %v15159_v50 = vpop.f32.mrb[21].mxu0  ;;  %v5996_v59 = vld [vmem:[#allocation3 + $0x54] sm:$0xf]  ;;  %v6000_v62 = vld [vmem:[#allocation3 + $0x5c] sm:$0x1] }
 0x36a   : > { %5992 = vst.msk [vmem:[#allocation3 + $0x4c] sm:$0xf] %vm5477_vm0, %v5729_v47  ;;  %5995 = vst [vmem:[#allocation3 + $0x50] sm:$0x1] %v5994_v1  ;;  %v5751_v63 = vrot.slane %v5749_v52, 7  ;;  %v5460_v32 = vmax.f32 %v5428_v2, 0.0  ;;  %v5429_v44 = vadd.f32 %v15058_v46, %v5390_v16  ;;  %v5393_v3 = vmul.f32 %v12123_v25, %v15053_v26 }
 0x36b   : > { %5985 = vst.msk [vmem:[#allocation3 + $0x40] sm:$0xf] %vm5477_vm0, %v5712_v4  ;;  %5988 = vst [vmem:[#allocation3 + $0x44] sm:$0x1] %v5987_v33  ;;  %v5734_v14 = vrot.slane %v5732_v18, 7  ;;  %v5458_v11 = vmax.f32 %v5426_v29, 0.0  ;;  %v5391_v36 = vmul.f32 %v15053_v26, %v15140_v37 }
 0x36c   : > { %v15164_v13 = vpop.f32.mrb[22].mxu0  ;;  %v5754_v19 = vor.u32 %v5752_v8, %v5751_v63  ;;  %v5755_v54 = vrot.slane %v5751_v63, 4  ;;  %v11507_v61 = vpack.c.bf16 %v5460_v32, %v5460_v32  ;;  %v5463_v51 = vmax.f32 %v5431_v10, 0.0  ;;  %v6069_v63 = vld [vmem:[#allocation3 + $0x10] sm:$0xf] }
 0x36d   : > { %v15167_v34 = vpop.f32.mrb[23].mxu0  ;;  %v5737_v39 = vor.u32 %v5735_v0, %v5734_v14  ;;  %v5738_v24 = vrot.slane %v5734_v14, 4  ;;  %v11505_v60 = vpack.c.bf16 %v5458_v11, %v5458_v11  ;;  %v5461_v38 = vmax.f32 %v5429_v44, 0.0  ;;  %v6017_v0 = vld [vmem:[#allocation3 + $0x78] sm:$0xf] }
 0x36e   : > { %v6004_v9 = vsel %vm15073_vm4, %v5754_v19, %v6003_v45  ;;  %v5757_v17 = vshrl.u32 %v11507_v61, 16  ;;  %v5760_v23 = vshll.u32 %v11507_v61, 16  ;;  %v11510_v42 = vpack.c.bf16 %v5463_v51, %v5463_v51  ;;  %v6010_v10 = vld [vmem:[#allocation3 + $0x6c] sm:$0xf] }
 0x36f   : > { %6005 = vst [vmem:[#allocation3 + $0x60] sm:$0xf] %v6004_v9  ;;  %v5997_v53 = vsel %vm15073_vm4, %v5737_v39, %v5996_v59  ;;  %v5740_v55 = vshrl.u32 %v11505_v60, 16  ;;  %v5743_v25 = vshll.u32 %v11505_v60, 16  ;;  %v11508_v48 = vpack.c.bf16 %v5461_v38, %v5461_v38  ;;  %v6100_v59 = vld [vmem:[#allocation3 + $0x14] sm:$0x1] }
 0x370   : > { %5998 = vst [vmem:[#allocation3 + $0x54] sm:$0xf] %v5997_v53  ;;  %v5759_v6 = vrot.slane %v5757_v17, 7  ;;  %v5432_v43 = vadd.f32 %v15058_v46, %v5393_v3  ;;  %v5783_v41 = vshrl.u32 %v11510_v42, 16  ;;  %v5786_v22 = vshll.u32 %v11510_v42, 16  ;;  %v15179_v16 = vpop.f32.mrb[24].mxu0 }
 0x371   : > { %v5742_v27 = vrot.slane %v5740_v55, 7  ;;  %v6140_v28 = vshrl.u32 %v15169_v58, 16  ;;  %v5766_v2 = vshrl.u32 %v11508_v48, 16  ;;  %v5769_v29 = vshll.u32 %v11508_v48, 16  ;;  %v15181_v12 = vpop.f32.mrb[25].mxu0 }
 0x372   : > { %v5762_v56 = vor.u32 %v5760_v23, %v5759_v6  ;;  %v5764_v15 = vrot.slane %v5759_v6, 4  ;;  %v15183_v8 = vrot.slane %v5783_v41, 7  ;;  %v5464_v47 = vmax.f32 %v5432_v43, 0.0  ;;  %v15185_v37 = vpop.f32.mrb[26].mxu0  ;;  %v6070_v38 = vld [vmem:[#allocation3 + $0x18] sm:$0xf] }
 0x373   : > { %v5745_v21 = vor.u32 %v5743_v25, %v5742_v27  ;;  %v5747_v52 = vrot.slane %v5742_v27, 4  ;;  %v15191_v4 = vrot.slane %v5766_v2, 7  ;;  %v5430_v33 = vadd.f32 %v15058_v46, %v5391_v36  ;;  %v15194_v32 = vpop.f32.mrb[27].mxu0  ;;  %v6071_v53 = vld [vmem:[#allocation3 + $0x1c] sm:$0xf] }
 0x374   : > { %v5763_v1 = vsel %vm13313_vm12, %v5755_v54, %v5762_v56  ;;  %v6008_v18 = vsel %vm15080_vm6, %v5764_v15, %v6007_v5  ;;  %v5788_v11 = vor.u32 %v5786_v22, %v15183_v8  ;;  %v11511_v19 = vpack.c.bf16 %v5464_v47, %v5464_v47 }
 0x375   : > { %6006 = vst.msk [vmem:[#allocation3 + $0x64] sm:$0xf] %vm5477_vm0, %v5763_v1  ;;  %6009 = vst [vmem:[#allocation3 + $0x68] sm:$0x1] %v6008_v18  ;;  %v5746_v45 = vsel %vm13313_vm12, %v5738_v24, %v5745_v21  ;;  %v6001_v14 = vsel %vm15080_vm6, %v5747_v52, %v6000_v62  ;;  %v5771_v44 = vor.u32 %v5769_v29, %v15191_v4  ;;  %v5462_v54 = vmax.f32 %v5430_v33, 0.0 }
 0x376   : > { %5999 = vst.msk [vmem:[#allocation3 + $0x58] sm:$0xf] %vm5477_vm0, %v5746_v45  ;;  %6002 = vst [vmem:[#allocation3 + $0x5c] sm:$0x1] %v6001_v14  ;;  %v15206_v61 = vsel %vm6598_vm2, %v15046_v7, 0  ;;  %v6018_v3 = vsel %vm15073_vm4, %v5788_v11, %v6017_v0  ;;  %v6142_v39 = vrot.slane %v6140_v28, 4 }
 0x377   : > { %v6143_v24 = vshll.u32 %v15169_v58, 16  ;;  %v6149_v60 = vshll.u32 %v6069_v63, 16  ;;  %v5789_v51 = vrot.slane %v15183_v8, 4  ;;  %6019 = vst [vmem:[#allocation3 + $0x78] sm:$0xf] %v6018_v3  ;;  %v6011_v9 = vsel %vm15073_vm4, %v5771_v44, %v6010_v10 }
 0x378   : > { %v5791_v17 = vshrl.u32 %v11511_v19, 16  ;;  %v11509_v23 = vpack.c.bf16 %v5462_v54, %v5462_v54  ;;  %6012 = vst [vmem:[#allocation3 + $0x6c] sm:$0xf] %v6011_v9  ;;  %v6021_v7 = vld [vmem:[#allocation3 + $0x80] sm:$0x1]  ;;  %v6153_v42 = vshrl.u32 %v6069_v63, 16 }
 0x379   : > { %v6145_v55 = vrot.slane %v6143_v24, 5  ;;  %v6151_v25 = vrot.slane %v6149_v60, 5  ;;  %v6159_v6 = vshll.u32 %v6100_v59, 16  ;;  %v15214_v5 = vpop.f32.mrb[28].mxu0  ;;  %v5772_v58 = vrot.slane %v15191_v4, 4 }
 0x37a   : > { %v5793_v48 = vrot.slane %v5791_v17, 7  ;;  %v5794_v43 = vshll.u32 %v11511_v19, 16  ;;  %v5774_v36 = vshrl.u32 %v11509_v23, 16  ;;  %v15217_v27 = vpop.f32.mrb[29].mxu0  ;;  %v5777_v41 = vshll.u32 %v11509_v23, 16 }
 0x37b   : > { %v6146_v22 = vor.u32 %v6145_v55, %v6142_v39  ;;  %v6155_v28 = vrot.slane %v6153_v42, 4  ;;  %v6161_v56 = vrot.slane %v6159_v6, 5  ;;  %v15219_v15 = vpop.f32.mrb[30].mxu0  ;;  %v6164_v21 = vshrl.u32 %v6070_v38, 16  ;;  %v6014_v8 = vld [vmem:[#allocation3 + $0x74] sm:$0x1] }
 0x37c   : > { %v5796_v62 = vor.u32 %v5794_v43, %v5793_v48  ;;  %v5798_v2 = vrot.slane %v5793_v48, 4  ;;  %v5776_v29 = vrot.slane %v5774_v36, 7  ;;  %v15221_v52 = vpop.f32.mrb[31].mxu0  ;;  %v6167_v18 = vshll.u32 %v6070_v38, 16  ;;  %v6101_v14 = vld [vmem:[#allocation3 + $0x20] sm:$0x1] }
 0x37d   : > { %v6147_v47 = vrot.slane %v6146_v22, 4  ;;  %v6156_v1 = vor.u32 %v6155_v28, %v6151_v25  ;;  %v6173_v0 = vshll.u32 %v6071_v53, 16  ;;  %v6166_v44 = vrot.slane %v6164_v21, 4  ;;  %v6072_v24 = vld [vmem:[#allocation3 + $0x24] sm:$0xf] }
 0x37e   : > { %v5797_v4 = vsel %vm13313_vm12, %v5789_v51, %v5796_v62  ;;  %v6022_v33 = vsel %vm15080_vm6, %v5798_v2, %v6021_v7  ;;  %v5779_v63 = vor.u32 %v5777_v41, %v5776_v29  ;;  %v5781_v45 = vrot.slane %v5776_v29, 4  ;;  %v15242_v23 = vld [vmem:[%s16927_s4 + $0x8] sm:$0xf]  ;;  %v15254_v36 = vld [vmem:[#allocation3 + $0x28] sm:$0xf] }
 0x37f   : > { %6020 = vst.msk [vmem:[#allocation3 + $0x7c] sm:$0xf] %vm5477_vm0, %v5797_v4  ;;  %6023 = vst [vmem:[#allocation3 + $0x80] sm:$0x1] %v6022_v33  ;;  %v6152_v11 = vsel %vm13293_vm8, %v6147_v47, %v6151_v25  ;;  %v6157_v10 = vrot.slane %v6156_v1, 4  ;;  %v6169_v19 = vrot.slane %v6167_v18, 5  ;;  %v5396_v17 = vmul.f32 %v15152_v35, %v15053_v26 }
 0x380   : > { %v5780_v54 = vsel %vm13313_vm12, %v5772_v58, %v5779_v63  ;;  %v6015_v59 = vsel %vm15080_vm6, %v5781_v45, %v6014_v8  ;;  %v6175_v3 = vrot.slane %v6173_v0, 5  ;;  %v6177_v39 = vshrl.u32 %v6071_v53, 16 }
 0x381   : > { %6013 = vst.msk [vmem:[#allocation3 + $0x70] sm:$0xf] %vm5477_vm0, %v5780_v54  ;;  %6016 = vst [vmem:[#allocation3 + $0x74] sm:$0x1] %v6015_v59  ;;  %v6162_v60 = vsel %vm13293_vm8, %v6157_v10, %v6161_v56  ;;  %v6170_v51 = vor.u32 %v6169_v19, %v6166_v44  ;;  %v6183_v9 = vshll.u32 %v6101_v14, 16  ;;  %v5394_v53 = vmul.f32 %v15053_v26, %v15159_v50 }
 0x382   : > { %v11146_v38 = vcombine.low %v6152_v11, %v6162_v60  ;;  %v6179_v7 = vrot.slane %v6177_v39, 4  ;;  %v5397_v55 = vmul.f32 %v15164_v13, %v15053_v26  ;;  %v5435_v6 = vadd.f32 %v15058_v46, %v5396_v17  ;;  %v6031_v14 = vld [vmem:[#allocation3 + $0x90] sm:$0xf]  ;;  %v6024_v59 = vld [vmem:[#allocation3 + $0x84] sm:$0xf] }
 0x383   : > { %v6171_v25 = vrot.slane %v6170_v51, 4  ;;  %v6185_v42 = vrot.slane %v6183_v9, 5  ;;  %v5395_v35 = vmul.f32 %v15053_v26, %v15167_v34  ;;  %v5433_v48 = vadd.f32 %v15058_v46, %v5394_v53  ;;  %v6035_v9 = vld [vmem:[#allocation3 + $0x98] sm:$0x1] }
 0x384   : > { %12139 = vmatmul.mubr.msk.bf16.vlgmr.msra.gmra.mrb[0].mxu1 %vm6549_vm3, %v11146_v38  ;;  %v6180_v58 = vor.u32 %v6179_v7, %v6175_v3  ;;  %v5436_v43 = vadd.f32 %v15058_v46, %v5397_v55  ;;  %v6188_v50 = vshrl.u32 %v6072_v24, 16  ;;  %v5467_v41 = vmax.f32 %v5435_v6, 0.0 }
 0x385   : > { %12171 = vmatpush3.bf16.msra.mxu1 %v15206_v61  ;;  %v6176_v13 = vsel %vm13293_vm8, %v6171_v25, %v6175_v3  ;;  %v5434_v22 = vadd.f32 %v15058_v46, %v5395_v35  ;;  %v6191_v28 = vshll.u32 %v6072_v24, 16  ;;  %v5465_v56 = vmax.f32 %v5433_v48, 0.0  ;;  %v6028_v25 = vld [vmem:[#allocation3 + $0x8c] sm:$0x1] }
 0x386   : > { %v6181_v34 = vrot.slane %v6180_v58, 4  ;;  %v5468_v62 = vmax.f32 %v5436_v43, 0.0  ;;  %v6190_v2 = vrot.slane %v6188_v50, 4  ;;  %12965 = vmatprep.subr.msk.bf16.mxu1 %vm6598_vm2, %v15242_v23  ;;  %v11514_v29 = vpack.c.bf16 %v5467_v41, %v5467_v41  ;;  %v6102_v43 = vld [vmem:[#allocation3 + $0x2c] sm:$0x1] }
 0x387   : > { %v5466_v21 = vmax.f32 %v5434_v22, 0.0  ;;  %v6193_v8 = vrot.slane %v6191_v28, 5  ;;  %v6197_v47 = vshll.u32 %v15254_v36, 16  ;;  %v11512_v1 = vpack.c.bf16 %v5465_v56, %v5465_v56  ;;  %v15267_v50 = vld [vmem:[#allocation3 + $0x30] sm:$0xf] }
 0x388   : > { %v6186_v61 = vsel %vm13293_vm8, %v6181_v34, %v6185_v42  ;;  %v11515_v18 = vpack.c.bf16 %v5468_v62, %v5468_v62  ;;  %v6201_v0 = vshrl.u32 %v15254_v36, 16  ;;  %v5817_v33 = vshrl.u32 %v11514_v29, 16  ;;  %v15273_v34 = vld [vmem:[#allocation3 + $0x34] sm:$0xf] }
 0x389   : > { %v11147_v4 = vcombine.low %v6176_v13, %v6186_v61  ;;  %v5820_v63 = vshll.u32 %v11514_v29, 16  ;;  %v11513_v45 = vpack.c.bf16 %v5466_v21, %v5466_v21  ;;  %v5800_v11 = vshrl.u32 %v11512_v1, 16  ;;  %v6103_v21 = vld [vmem:[#allocation3 + $0x38] sm:$0x1] }
 0x38a   : > { %v5803_v10 = vshll.u32 %v11512_v1, 16  ;;  %v5825_v44 = vshrl.u32 %v11515_v18, 16  ;;  %v5828_v19 = vshll.u32 %v11515_v18, 16  ;;  %v5819_v54 = vrot.slane %v5817_v33, 7 }
 0x38b   : > { %12142 = vmatprep.mubr.msk.bf16.mxu1 %vm6549_vm3, %v11147_v4  ;;  %v5808_v3 = vshrl.u32 %v11513_v45, 16  ;;  %v5811_v39 = vshll.u32 %v11513_v45, 16  ;;  %v6194_v24 = vor.u32 %v6193_v8, %v6190_v2  ;;  %v5802_v60 = vrot.slane %v5800_v11, 7 }
 0x38c   : > { %v5827_v51 = vrot.slane %v5825_v44, 7  ;;  %v6199_v17 = vrot.slane %v6197_v47, 5  ;;  %v6203_v38 = vrot.slane %v6201_v0, 4  ;;  %v5822_v7 = vor.u32 %v5820_v63, %v5819_v54  ;;  %v15291_v63 = vld [vmem:[#allocation3 + $0x3c] sm:$0xf] }
 0x38d   : > { %v5823_v53 = vrot.slane %v5819_v54, 4  ;;  %v5810_v55 = vrot.slane %v5808_v3, 7  ;;  %v6195_v42 = vrot.slane %v6194_v24, 4  ;;  %v5805_v6 = vor.u32 %v5803_v10, %v5802_v60 }
 0x38e   : > { %v5806_v35 = vrot.slane %v5802_v60, 4  ;;  %v5830_v58 = vor.u32 %v5828_v19, %v5827_v51  ;;  %v5832_v48 = vrot.slane %v5827_v51, 4  ;;  %v6032_v13 = vsel %vm15073_vm4, %v5822_v7, %v6031_v14 }
 0x38f   : > { %v5813_v41 = vor.u32 %v5811_v39, %v5810_v55  ;;  %v5815_v22 = vrot.slane %v5810_v55, 4  ;;  %v6200_v28 = vsel %vm13293_vm8, %v6195_v42, %v6199_v17  ;;  %6033 = vst [vmem:[#allocation3 + $0x90] sm:$0xf] %v6032_v13  ;;  %v6025_v56 = vsel %vm15073_vm4, %v5805_v6, %v6024_v59  ;;  %v15314_v13 = vld [vmem:[#allocation3 + $0x40] sm:$0xf] }
 0x390   : > { %v5831_v62 = vsel %vm13313_vm12, %v5823_v53, %v5830_v58  ;;  %v6036_v2 = vsel %vm15080_vm6, %v5832_v48, %v6035_v9  ;;  %v6204_v29 = vor.u32 %v6203_v38, %v6199_v17  ;;  %6026 = vst [vmem:[#allocation3 + $0x84] sm:$0xf] %v6025_v56  ;;  %v6207_v61 = vshll.u32 %v6102_v43, 16 }
 0x391   : > { %6034 = vst.msk [vmem:[#allocation3 + $0x94] sm:$0xf] %vm5477_vm0, %v5831_v62  ;;  %6037 = vst [vmem:[#allocation3 + $0x98] sm:$0x1] %v6036_v2  ;;  %v5814_v8 = vsel %vm13313_vm12, %v5806_v35, %v5813_v41  ;;  %v6029_v47 = vsel %vm15080_vm6, %v5815_v22, %v6028_v25  ;;  %v6212_v1 = vshrl.u32 %v15267_v50, 16  ;;  %v6215_v0 = vshll.u32 %v15267_v50, 16 }
 0x392   : > { %6027 = vst.msk [vmem:[#allocation3 + $0x88] sm:$0xf] %vm5477_vm0, %v5814_v8  ;;  %6030 = vst [vmem:[#allocation3 + $0x8c] sm:$0x1] %v6029_v47  ;;  %v6205_v18 = vrot.slane %v6204_v29, 4  ;;  %v6221_v4 = vshll.u32 %v15273_v34, 16  ;;  %v5400_v10 = vmul.f32 %v15179_v16, %v15053_v26  ;;  %v5398_v59 = vmul.f32 %v15053_v26, %v15181_v12 }
 0x393   : > { %v6225_v33 = vshrl.u32 %v15273_v34, 16  ;;  %v6209_v45 = vrot.slane %v6207_v61, 5  ;;  %v6214_v14 = vrot.slane %v6212_v1, 4  ;;  %v6231_v11 = vshll.u32 %v6103_v21, 16  ;;  %v6045_v2 = vld [vmem:[#allocation3 + $0xa8] sm:$0xf] }
 0x394   : > { %v6217_v44 = vrot.slane %v6215_v0, 5  ;;  %v6223_v19 = vrot.slane %v6221_v4, 5  ;;  %v5439_v24 = vadd.f32 %v15058_v46, %v5400_v10  ;;  %v5401_v60 = vmul.f32 %v15185_v37, %v15053_v26  ;;  %v6038_v61 = vld [vmem:[#allocation3 + $0x9c] sm:$0xf] }
 0x395   : > { %v6227_v54 = vrot.slane %v6225_v33, 4  ;;  %v6210_v3 = vsel %vm13293_vm8, %v6205_v18, %v6209_v45  ;;  %v6233_v39 = vrot.slane %v6231_v11, 5  ;;  %v5437_v16 = vadd.f32 %v15058_v46, %v5398_v59  ;;  %v6049_v33 = vld [vmem:[#allocation3 + $0xb0] sm:$0x1] }
 0x396   : > { %v11148_v51 = vcombine.low %v6200_v28, %v6210_v3  ;;  %v6218_v9 = vor.u32 %v6217_v44, %v6214_v14  ;;  %v5471_v38 = vmax.f32 %v5439_v24, 0.0  ;;  %v5440_v7 = vadd.f32 %v15058_v46, %v5401_v60 }
 0x397   : > { %v6228_v17 = vor.u32 %v6227_v54, %v6223_v19  ;;  %v5399_v12 = vmul.f32 %v15053_v26, %v15194_v32  ;;  %v6236_v53 = vshrl.u32 %v15291_v63, 16  ;;  %v5469_v42 = vmax.f32 %v5437_v16, 0.0  ;;  %v15319_v54 = vld [vmem:[#allocation3 + $0x44] sm:$0x1] }
 0x398   : > { %12143 = vmatmul.mubr.msk.bf16.gmra.mrb[4].mxu1 %vm6549_vm3, %v11148_v51  ;;  %v6219_v55 = vrot.slane %v6218_v9, 4  ;;  %v6239_v37 = vshll.u32 %v15291_v63, 16  ;;  %v11518_v6 = vpack.c.bf16 %v5471_v38, %v5471_v38  ;;  %v5472_v35 = vmax.f32 %v5440_v7, 0.0  ;;  %v15321_v51 = vld [vmem:[#allocation3 + $0x48] sm:$0xf] }
 0x399   : > { %v6229_v25 = vrot.slane %v6228_v17, 4  ;;  %v5438_v58 = vadd.f32 %v15058_v46, %v5399_v12  ;;  %v6238_v48 = vrot.slane %v6236_v53, 4  ;;  %v11516_v32 = vpack.c.bf16 %v5469_v42, %v5469_v42 }
 0x39a   : > { %v6224_v43 = vsel %vm13293_vm8, %v6219_v55, %v6223_v19  ;;  %v6241_v41 = vrot.slane %v6239_v37, 5  ;;  %v5851_v28 = vshrl.u32 %v11518_v6, 16  ;;  %v5854_v56 = vshll.u32 %v11518_v6, 16  ;;  %v6042_v6 = vld [vmem:[#allocation3 + $0xa4] sm:$0x1] }
 0x39b   : > { %v6234_v26 = vsel %vm13293_vm8, %v6229_v25, %v6233_v39  ;;  %v11519_v62 = vpack.c.bf16 %v5472_v35, %v5472_v35  ;;  %v5834_v29 = vshrl.u32 %v11516_v32, 16  ;;  %v5837_v21 = vshll.u32 %v11516_v32, 16  ;;  %v15330_v25 = vld [vmem:[#allocation3 + $0x4c] sm:$0xf]  ;;  %v15336_v35 = vld [vmem:[#allocation3 + $0x50] sm:$0x1] }
 0x39c   : > { %v11149_v22 = vcombine.low %v6224_v43, %v6234_v26  ;;  %v5470_v8 = vmax.f32 %v5438_v58, 0.0  ;;  %v6242_v46 = vor.u32 %v6241_v41, %v6238_v48  ;;  %v5853_v47 = vrot.slane %v5851_v28, 7 }
 0x39d   : > { %v5859_v1 = vshrl.u32 %v11519_v62, 16  ;;  %v5862_v18 = vshll.u32 %v11519_v62, 16  ;;  %v6245_v0 = vshll.u32 %v15314_v13, 16  ;;  %v5836_v4 = vrot.slane %v5834_v29, 7 }
 0x39e   : > { %12146 = vmatprep.mubr.msk.bf16.mxu1 %vm6549_vm3, %v11149_v22  ;;  %v11517_v45 = vpack.c.bf16 %v5470_v8, %v5470_v8  ;;  %v6243_v14 = vrot.slane %v6242_v46, 4  ;;  %v6249_v11 = vshrl.u32 %v15314_v13, 16  ;;  %v5856_v10 = vor.u32 %v5854_v56, %v5853_v47 }
 0x39f   : > { %v5857_v44 = vrot.slane %v5853_v47, 4  ;;  %v5861_v19 = vrot.slane %v5859_v1, 7  ;;  %v6247_v59 = vrot.slane %v6245_v0, 5  ;;  %v5839_v3 = vor.u32 %v5837_v21, %v5836_v4  ;;  %v13080_v1 = vld [vmem:[%s16925_s2] ss:$0 sm:$0xff] }
 0x3a0   : > { %v5840_v39 = vrot.slane %v5836_v4, 4  ;;  %v5842_v24 = vshrl.u32 %v11517_v45, 16  ;;  %v5845_v60 = vshll.u32 %v11517_v45, 16  ;;  %v6046_v9 = vsel %vm15073_vm4, %v5856_v10, %v6045_v2  ;;  %v15353_v0 = vld [vmem:[#allocation3 + $0x54] sm:$0xf] }
 0x3a1   : > { %v5864_v17 = vor.u32 %v5862_v18, %v5861_v19  ;;  %v5866_v16 = vrot.slane %v5861_v19, 4  ;;  %v6248_v38 = vsel %vm13293_vm8, %v6243_v14, %v6247_v59  ;;  %6047 = vst [vmem:[#allocation3 + $0xa8] sm:$0xf] %v6046_v9  ;;  %v6039_v7 = vsel %vm15073_vm4, %v5839_v3, %v6038_v61  ;;  %v13081_v19 = vld [vmem:[%s16926_s3] ss:$0 sm:$0xff] }
 0x3a2   : > { %v5844_v12 = vrot.slane %v5842_v24, 7  ;;  %v6251_v53 = vrot.slane %v6249_v11, 4  ;;  %v6255_v55 = vshll.u32 %v15319_v54, 16  ;;  %6040 = vst [vmem:[#allocation3 + $0x9c] sm:$0xf] %v6039_v7  ;;  %v6260_v58 = vshrl.u32 %v15321_v51, 16 }
 0x3a3   : > { %v5865_v42 = vsel %vm13313_vm12, %v5857_v44, %v5864_v17  ;;  %v6050_v37 = vsel %vm15080_vm6, %v5866_v16, %v6049_v33  ;;  %v6263_v48 = vshll.u32 %v15321_v51, 16  ;;  %v6269_v56 = vshll.u32 %v15330_v25, 16  ;;  %v15363_v24 = vld [vmem:[#allocation3 + $0x58] sm:$0xf] }
 0x3a4   : > { %6048 = vst.msk [vmem:[#allocation3 + $0xac] sm:$0xf] %vm5477_vm0, %v5865_v42  ;;  %6051 = vst [vmem:[#allocation3 + $0xb0] sm:$0x1] %v6050_v37  ;;  %v5847_v43 = vor.u32 %v5845_v60, %v5844_v12  ;;  %v5849_v26 = vrot.slane %v5844_v12, 4  ;;  %v6252_v32 = vor.u32 %v6251_v53, %v6247_v59  ;;  %v6257_v41 = vrot.slane %v6255_v55, 5 }
 0x3a5   : > { %v6262_v22 = vrot.slane %v6260_v58, 4  ;;  %v6265_v28 = vrot.slane %v6263_v48, 5  ;;  %v6273_v62 = vshrl.u32 %v15330_v25, 16  ;;  %v6279_v8 = vshll.u32 %v15336_v35, 16 }
 0x3a6   : > { %v5848_v2 = vsel %vm13313_vm12, %v5840_v39, %v5847_v43  ;;  %v6043_v29 = vsel %vm15080_vm6, %v5849_v26, %v6042_v6  ;;  %v6253_v21 = vrot.slane %v6252_v32, 4  ;;  %v6271_v47 = vrot.slane %v6269_v56, 5  ;;  %v15373_v43 = vld [vmem:[#allocation3 + $0x5c] sm:$0x1]  ;;  %v15375_v26 = vld [vmem:[#allocation3 + $0x60] sm:$0xf] }
 0x3a7   : > { %6041 = vst.msk [vmem:[#allocation3 + $0xa0] sm:$0xf] %vm5477_vm0, %v5848_v2  ;;  %6044 = vst [vmem:[#allocation3 + $0xa4] sm:$0x1] %v6043_v29  ;;  %v6266_v46 = vor.u32 %v6265_v28, %v6262_v22  ;;  %v6275_v61 = vrot.slane %v6273_v62, 4  ;;  %v5404_v18 = vmul.f32 %v13080_v1, %v15214_v5  ;;  %v6281_v33 = vrot.slane %v6279_v8, 5 }
 0x3a8   : > { %v6258_v4 = vsel %vm13293_vm8, %v6253_v21, %v6257_v41  ;;  %v5402_v45 = vmul.f32 %v13080_v1, %v15217_v27  ;;  %v5405_v14 = vmul.f32 %v13080_v1, %v15219_v15  ;;  %v5403_v39 = vmul.f32 %v13080_v1, %v15221_v52  ;;  %v6059_v8 = vld [vmem:[#allocation3 + $0xc0] sm:$0xf] }
 0x3a9   : > { %v11150_v11 = vcombine.low %v6248_v38, %v6258_v4  ;;  %v6267_v10 = vrot.slane %v6266_v46, 4  ;;  %v6276_v44 = vor.u32 %v6275_v61, %v6271_v47  ;;  %v5443_v59 = vadd.f32 %v13081_v19, %v5404_v18  ;;  %v6052_v18 = vld [vmem:[#allocation3 + $0xb4] sm:$0xf] }
 0x3aa   : > { %v5441_v3 = vadd.f32 %v13081_v19, %v5402_v45  ;;  %v5444_v5 = vadd.f32 %v13081_v19, %v5405_v14  ;;  %v6284_v60 = vshrl.u32 %v15353_v0, 16  ;;  %v6287_v17 = vshll.u32 %v15353_v0, 16 }
 0x3ab   : > { %12147 = vmatmul.mubr.msk.bf16.gmra.mrb[8].mxu1 %vm6549_vm3, %v11150_v11  ;;  %v6272_v27 = vsel %vm13293_vm8, %v6267_v10, %v6271_v47  ;;  %v6277_v15 = vrot.slane %v6276_v44, 4  ;;  %v5475_v9 = vmax.f32 %v5443_v59, 0.0  ;;  %v5442_v7 = vadd.f32 %v13081_v19, %v5403_v39  ;;  %v6063_v10 = vld [vmem:[#allocation3 + $0xc8] sm:$0x1] }
 0x3ac   : > { %v5473_v16 = vmax.f32 %v5441_v3, 0.0  ;;  %v5476_v38 = vmax.f32 %v5444_v5, 0.0  ;;  %v6286_v12 = vrot.slane %v6284_v60, 4  ;;  %v6289_v55 = vrot.slane %v6287_v17, 5  ;;  %v6056_v60 = vld [vmem:[#allocation3 + $0xbc] sm:$0x1] }
 0x3ad   : > { %v6282_v52 = vsel %vm13293_vm8, %v6277_v15, %v6281_v33  ;;  %v11522_v53 = vpack.c.bf16 %v5475_v9, %v5475_v9  ;;  %v6293_v42 = vshll.u32 %v15363_v24, 16  ;;  %v5474_v48 = vmax.f32 %v5442_v7, 0.0 }
 0x3ae   : > { %v11151_v37 = vcombine.low %v6272_v27, %v6282_v52  ;;  %v11520_v6 = vpack.c.bf16 %v5473_v16, %v5473_v16  ;;  %v11523_v58 = vpack.c.bf16 %v5476_v38, %v5476_v38  ;;  %v6290_v22 = vor.u32 %v6289_v55, %v6286_v12  ;;  %v15388_v16 = vld [vmem:[#allocation3 + $0x64] sm:$0xf]  ;;  %v15390_v38 = vld [vmem:[#allocation3 + $0x68] sm:$0x1]  ;;  %v15398_v55 = vld [vmem:[#allocation3 + $0x6c] sm:$0xf] }
 0x3af   : > { %v5885_v32 = vshrl.u32 %v11522_v53, 16  ;;  %v5888_v41 = vshll.u32 %v11522_v53, 16  ;;  %v15377_v28 = vrot.slane %v6293_v42, 5  ;;  %v11521_v46 = vpack.c.bf16 %v5474_v48, %v5474_v48  ;;  %v15400_v42 = vld [vmem:[#allocation3 + $0x70] sm:$0xf] }
 0x3b0   : > { %12150 = vmatprep.mubr.msk.bf16.mxu1 %vm6549_vm3, %v11151_v37  ;;  %v5868_v56 = vshrl.u32 %v11520_v6, 16  ;;  %v5871_v62 = vshll.u32 %v11520_v6, 16  ;;  %v5893_v2 = vshrl.u32 %v11523_v58, 16  ;;  %v5896_v29 = vshll.u32 %v11523_v58, 16 }
 0x3b1   : > { %v5887_v21 = vrot.slane %v5885_v32, 7  ;;  %v6291_v47 = vrot.slane %v6290_v22, 4  ;;  %v6297_v61 = vshrl.u32 %v15363_v24, 16  ;;  %v6303_v33 = vshll.u32 %v15373_v43, 16 }
 0x3b2   : > { %v5870_v1 = vrot.slane %v5868_v56, 7  ;;  %v5895_v4 = vrot.slane %v5893_v2, 7  ;;  %v6308_v45 = vshrl.u32 %v15375_v26, 16  ;;  %v5876_v44 = vshrl.u32 %v11521_v46, 16  ;;  %v15408_v56 = vld [vmem:[#allocation3 + $0x78] sm:$0xf] }
 0x3b3   : > { %v5890_v14 = vor.u32 %v5888_v41, %v5887_v21  ;;  %v5891_v11 = vrot.slane %v5887_v21, 4  ;;  %v5879_v19 = vshll.u32 %v11521_v46, 16  ;;  %v6296_v9 = vsel %vm13293_vm8, %v6291_v47, %v15377_v28 }
 0x3b4   : > { %v5873_v59 = vor.u32 %v5871_v62, %v5870_v1  ;;  %v5874_v3 = vrot.slane %v5870_v1, 4  ;;  %v5898_v5 = vor.u32 %v5896_v29, %v5895_v4  ;;  %v5900_v39 = vrot.slane %v5895_v4, 4  ;;  %v15418_v1 = vld [vmem:[#allocation3 + $0x7c] sm:$0xf] }
 0x3b5   : > { %v6060_v27 = vsel %vm15073_vm4, %v5890_v14, %v6059_v8  ;;  %v5878_v15 = vrot.slane %v5876_v44, 7  ;;  %v6299_v17 = vrot.slane %v6297_v61, 4  ;;  %v6305_v53 = vrot.slane %v6303_v33, 5  ;;  %v15416_v61 = vld [vmem:[#allocation3 + $0x74] sm:$0x1] }
 0x3b6   : > { %6061 = vst [vmem:[#allocation3 + $0xc0] sm:$0xf] %v6060_v27  ;;  %v6053_v7 = vsel %vm15073_vm4, %v5873_v59, %v6052_v18  ;;  %v5899_v12 = vsel %vm13313_vm12, %v5891_v11, %v5898_v5  ;;  %v6064_v52 = vsel %vm15080_vm6, %v5900_v39, %v6063_v10  ;;  %v6310_v58 = vrot.slane %v6308_v45, 4  ;;  %v15426_v59 = vld [vmem:[#allocation3 + $0x80] sm:$0x1] }
 0x3b7   : > { %6054 = vst [vmem:[#allocation3 + $0xb4] sm:$0xf] %v6053_v7  ;;  %6062 = vst.msk [vmem:[#allocation3 + $0xc4] sm:$0xf] %vm5477_vm0, %v5899_v12  ;;  %v5881_v37 = vor.u32 %v5879_v19, %v5878_v15  ;;  %v5883_v6 = vrot.slane %v5878_v15, 4  ;;  %v6300_v40 = vor.u32 %v6299_v17, %v15377_v28  ;;  %v6311_v48 = vshll.u32 %v15375_v26, 16 }
 0x3b8   : > { %6065 = vst [vmem:[#allocation3 + $0xc8] sm:$0x1] %v6064_v52  ;;  %v6317_v32 = vshll.u32 %v15388_v16, 16  ;;  %v6321_v41 = vshrl.u32 %v15388_v16, 16  ;;  %v6327_v22 = vshll.u32 %v15390_v38, 16  ;;  %v6332_v28 = vshrl.u32 %v15398_v55, 16 }
 0x3b9   : > { %v5882_v62 = vsel %vm13313_vm12, %v5874_v3, %v5881_v37  ;;  %v6057_v2 = vsel %vm15080_vm6, %v5883_v6, %v6056_v60  ;;  %v6301_v29 = vrot.slane %v6300_v40, 4  ;;  %v6313_v21 = vrot.slane %v6311_v48, 5  ;;  %v15431_v15 = vld [vmem:[#allocation3 + $0x84] sm:$0xf]  ;;  %v15434_v52 = vld [vmem:[#allocation3 + $0x88] sm:$0xf] }
 0x3ba   : > { %6055 = vst.msk [vmem:[#allocation3 + $0xb8] sm:$0xf] %vm5477_vm0, %v5882_v62  ;;  %6058 = vst [vmem:[#allocation3 + $0xbc] sm:$0x1] %v6057_v2  ;;  %v6319_v8 = vrot.slane %v6317_v32, 5  ;;  %v6323_v46 = vrot.slane %v6321_v41, 4 }
 0x3bb   : > { %v6329_v47 = vrot.slane %v6327_v22, 5  ;;  %v6306_v31 = vsel %vm13293_vm8, %v6301_v29, %v6305_v53  ;;  %v6334_v18 = vrot.slane %v6332_v28, 4  ;;  %v6335_v57 = vshll.u32 %v15398_v55, 16  ;;  %v15441_v22 = vld [vmem:[#allocation3 + $0x90] sm:$0xf] }
 0x3bc   : > { %v6341_v4 = vshll.u32 %v15400_v42, 16  ;;  %v11152_v33 = vcombine.low %v6296_v9, %v6306_v31  ;;  %v6314_v45 = vor.u32 %v6313_v21, %v6310_v58  ;;  %v6324_v14 = vor.u32 %v6323_v46, %v6319_v8  ;;  %v15444_v28 = vld [vmem:[#allocation3 + $0x8c] sm:$0x1] }
 0x3bd   : > { %v6345_v11 = vshrl.u32 %v15400_v42, 16  ;;  %v6337_v10 = vrot.slane %v6335_v57, 5  ;;  %v6351_v19 = vshll.u32 %v15416_v61, 16  ;;  %v6356_v3 = vshrl.u32 %v15408_v56, 16 }
 0x3be   : > { %v6343_v44 = vrot.slane %v6341_v4, 5  ;;  %12151 = vmatmul.mubr.msk.bf16.gmra.mrb[12].mxu1 %vm6549_vm3, %v11152_v33  ;;  %v6315_v5 = vrot.slane %v6314_v45, 4  ;;  %v6325_v39 = vrot.slane %v6324_v14, 4  ;;  %v6359_v27 = vshll.u32 %v15408_v56, 16  ;;  %v15454_v45 = vld [vmem:[#allocation3 + $0x94] sm:$0xf] }
 0x3bf   : > { %v6347_v60 = vrot.slane %v6345_v11, 4  ;;  %v6338_v9 = vor.u32 %v6337_v10, %v6334_v18  ;;  %v6353_v17 = vrot.slane %v6351_v19, 5  ;;  %v6358_v7 = vrot.slane %v6356_v3, 4 }
 0x3c0   : > { %v6365_v12 = vshll.u32 %v15418_v1, 16  ;;  %v6320_v53 = vsel %vm13293_vm8, %v6315_v5, %v6319_v8  ;;  %v6330_v37 = vsel %vm13293_vm8, %v6325_v39, %v6329_v47  ;;  %v6361_v40 = vrot.slane %v6359_v27, 5 }
 0x3c1   : > { %v6348_v6 = vor.u32 %v6347_v60, %v6343_v44  ;;  %v11153_v58 = vcombine.low %v6320_v53, %v6330_v37  ;;  %v6339_v48 = vrot.slane %v6338_v9, 4  ;;  %v6369_v41 = vshrl.u32 %v15418_v1, 16  ;;  %v15462_v9 = vld [vmem:[#allocation3 + $0x98] sm:$0x1] }
 0x3c2   : > { %v6367_v32 = vrot.slane %v6365_v12, 5  ;;  %v6362_v2 = vor.u32 %v6361_v40, %v6358_v7  ;;  %v6375_v29 = vshll.u32 %v15426_v59, 16  ;;  %v6380_v21 = vshrl.u32 %v15431_v15, 16  ;;  %v15467_v40 = vld [vmem:[#allocation3 + $0x9c] sm:$0xf] }
 0x3c3   : > { %v6349_v62 = vrot.slane %v6348_v6, 4  ;;  %12154 = vmatprep.mubr.msk.bf16.mxu1 %vm6549_vm3, %v11153_v58  ;;  %v6344_v8 = vsel %vm13293_vm8, %v6339_v48, %v6343_v44  ;;  %v6371_v46 = vrot.slane %v6369_v41, 4  ;;  %v6383_v47 = vshll.u32 %v15431_v15, 16 }
 0x3c4   : > { %v6389_v31 = vshll.u32 %v15434_v52, 16  ;;  %v6363_v57 = vrot.slane %v6362_v2, 4  ;;  %v6377_v4 = vrot.slane %v6375_v29, 5  ;;  %v6382_v33 = vrot.slane %v6380_v21, 4 }
 0x3c5   : > { %v6354_v18 = vsel %vm13293_vm8, %v6349_v62, %v6353_v17  ;;  %v6372_v11 = vor.u32 %v6371_v46, %v6367_v32  ;;  %v6385_v10 = vrot.slane %v6383_v47, 5  ;;  %v6393_v3 = vshrl.u32 %v15434_v52, 16  ;;  %v15471_v62 = vld [vmem:[#allocation3 + $0xa0] sm:$0xf]  ;;  %v15474_v46 = vld [vmem:[#allocation3 + $0xa4] sm:$0x1] }
 0x3c6   : > { %v11154_v14 = vcombine.low %v6344_v8, %v6354_v18  ;;  %v6391_v19 = vrot.slane %v6389_v31, 5  ;;  %v6368_v44 = vsel %vm13293_vm8, %v6363_v57, %v6367_v32  ;;  %v6399_v5 = vshll.u32 %v15444_v28, 16 }
 0x3c7   : > { %v6404_v39 = vshrl.u32 %v15441_v22, 16  ;;  %v6373_v60 = vrot.slane %v6372_v11, 4  ;;  %v6386_v27 = vor.u32 %v6385_v10, %v6382_v33  ;;  %v6407_v17 = vshll.u32 %v15441_v22, 16 }
 0x3c8   : > { %12155 = vmatmul.mubr.msk.bf16.gmra.mrb[16].mxu1 %vm6549_vm3, %v11154_v14  ;;  %v6413_v7 = vshll.u32 %v15454_v45, 16  ;;  %v6395_v12 = vrot.slane %v6393_v3, 4  ;;  %v6401_v53 = vrot.slane %v6399_v5, 5  ;;  %v6417_v6 = vshrl.u32 %v15454_v45, 16 }
 0x3c9   : > { %v6406_v37 = vrot.slane %v6404_v39, 4  ;;  %v6378_v58 = vsel %vm13293_vm8, %v6373_v60, %v6377_v4  ;;  %v6387_v48 = vrot.slane %v6386_v27, 4  ;;  %v6409_v32 = vrot.slane %v6407_v17, 5  ;;  %v15480_v4 = vld [vmem:[#allocation3 + $0xa8] sm:$0xf] }
 0x3ca   : > { %v6415_v41 = vrot.slane %v6413_v7, 5  ;;  %v11155_v2 = vcombine.low %v6368_v44, %v6378_v58  ;;  %v6396_v29 = vor.u32 %v6395_v12, %v6391_v19  ;;  %v6419_v21 = vrot.slane %v6417_v6, 4  ;;  %v15490_v12 = vld [vmem:[#allocation3 + $0xb0] sm:$0x1] }
 0x3cb   : > { %v6423_v8 = vshll.u32 %v15462_v9, 16  ;;  %v6392_v47 = vsel %vm13293_vm8, %v6387_v48, %v6391_v19  ;;  %v6410_v31 = vor.u32 %v6409_v32, %v6406_v37  ;;  %v6428_v18 = vshrl.u32 %v15467_v40, 16  ;;  %v15485_v19 = vld [vmem:[#allocation3 + $0xac] sm:$0xf]  ;;  %v15492_v37 = vld [vmem:[#allocation3 + $0xb4] sm:$0xf] }
 0x3cc   : > { %v6431_v57 = vshll.u32 %v15467_v40, 16  ;;  %12158 = vmatprep.mubr.msk.bf16.mxu1 %vm6549_vm3, %v11155_v2  ;;  %v6397_v33 = vrot.slane %v6396_v29, 4  ;;  %v6420_v14 = vor.u32 %v6419_v21, %v6415_v41  ;;  %v6437_v10 = vshll.u32 %v15471_v62, 16  ;;  %v15500_v21 = vld [vmem:[#allocation3 + $0xb8] sm:$0xf] }
 0x3cd   : > { %v6425_v11 = vrot.slane %v6423_v8, 5  ;;  %v6411_v44 = vrot.slane %v6410_v31, 4  ;;  %v6430_v3 = vrot.slane %v6428_v18, 4  ;;  %v6441_v39 = vshrl.u32 %v15471_v62, 16 }
 0x3ce   : > { %v6433_v5 = vrot.slane %v6431_v57, 5  ;;  %v6402_v60 = vsel %vm13293_vm8, %v6397_v33, %v6401_v53  ;;  %v6421_v27 = vrot.slane %v6420_v14, 4  ;;  %v6439_v17 = vrot.slane %v6437_v10, 5 }
 0x3cf   : > { %v6447_v7 = vshll.u32 %v15474_v46, 16  ;;  %v11156_v6 = vcombine.low %v6392_v47, %v6402_v60  ;;  %v6443_v48 = vrot.slane %v6441_v39, 4  ;;  %v6416_v32 = vsel %vm13293_vm8, %v6411_v44, %v6415_v41 }
 0x3d0   : > { %v6434_v58 = vor.u32 %v6433_v5, %v6430_v3  ;;  %v6426_v2 = vsel %vm13293_vm8, %v6421_v27, %v6425_v11  ;;  %v6452_v29 = vshrl.u32 %v15480_v4, 16  ;;  %v6455_v53 = vshll.u32 %v15480_v4, 16  ;;  %v15510_v27 = vld [vmem:[#allocation3 + $0xbc] sm:$0x1] }
 0x3d1   : > { %12159 = vmatmul.mubr.msk.bf16.gmra.mrb[20].mxu1 %vm6549_vm3, %v11156_v6  ;;  %v11157_v8 = vcombine.low %v6416_v32, %v6426_v2  ;;  %v6444_v18 = vor.u32 %v6443_v48, %v6439_v17  ;;  %v6461_v47 = vshll.u32 %v15485_v19, 16  ;;  %v6449_v57 = vrot.slane %v6447_v7, 5 }
 0x3d2   : > { %v6435_v31 = vrot.slane %v6434_v58, 4  ;;  %v6454_v33 = vrot.slane %v6452_v29, 4  ;;  %v6457_v14 = vrot.slane %v6455_v53, 5  ;;  %v6465_v41 = vshrl.u32 %v15485_v19, 16 }
 0x3d3   : > { %12162 = vmatprep.mubr.msk.bf16.mxu1 %vm6549_vm3, %v11157_v8  ;;  %v6445_v11 = vrot.slane %v6444_v18, 4  ;;  %v6463_v10 = vrot.slane %v6461_v47, 5  ;;  %v6471_v44 = vshll.u32 %v15490_v12, 16  ;;  %v6476_v3 = vshrl.u32 %v15492_v37, 16 }
 0x3d4   : > { %v6440_v5 = vsel %vm13293_vm8, %v6435_v31, %v6439_v17  ;;  %v6458_v39 = vor.u32 %v6457_v14, %v6454_v33  ;;  %v6467_v60 = vrot.slane %v6465_v41, 4  ;;  %v6479_v7 = vshll.u32 %v15492_v37, 16 }
 0x3d5   : > { %v6450_v6 = vsel %vm13293_vm8, %v6445_v11, %v6449_v57  ;;  %v6478_v58 = vrot.slane %v6476_v3, 4  ;;  %v6485_v48 = vshll.u32 %v15500_v21, 16  ;;  %v6489_v32 = vshrl.u32 %v15500_v21, 16 }
 0x3d6   : > { %v11158_v2 = vcombine.low %v6440_v5, %v6450_v6  ;;  %v6459_v29 = vrot.slane %v6458_v39, 4  ;;  %v6468_v53 = vor.u32 %v6467_v60, %v6463_v10  ;;  %v6481_v8 = vrot.slane %v6479_v7, 5  ;;  %v13082_v7 = vld [vmem:[#allocation3] sm:$0xf]  ;;  %v15523_v6 = vld [vmem:[#allocation3 + $0x4] sm:$0xf] }
 0x3d7   : > { %v6487_v18 = vrot.slane %v6485_v48, 5  ;;  %v6491_v17 = vrot.slane %v6489_v32, 4  ;;  %v6495_v31 = vshll.u32 %v15510_v27, 16  ;;  %v6473_v33 = vrot.slane %v6471_v44, 5 }
 0x3d8   : > { %v6469_v47 = vrot.slane %v6468_v53, 4  ;;  %v6482_v14 = vor.u32 %v6481_v8, %v6478_v58  ;;  %v6464_v57 = vsel %vm13293_vm8, %v6459_v29, %v6463_v10  ;;  %v11177_v48 = vcombine.low %v13082_v7, %v15523_v6  ;;  %v7063_v7 = vld [vmem:[#allocation3 + $0x60] sm:$0xe]  ;;  %v7066_v8 = vld [vmem:[#allocation3 + $0x84] sm:$0xe] }
 0x3d9   : > { %12163 = vmatmul.mubr.msk.bf16.gmra.mrb[24].mxu1 %vm6549_vm3, %v11158_v2  ;;  %v6492_v41 = vor.u32 %v6491_v17, %v6487_v18  ;;  %v6497_v60 = vrot.slane %v6495_v31, 5  ;;  %v11184_v58 = vcombine.low %v15353_v0, %v15363_v24  ;;  %v11185_v10 = vcombine.low %v15375_v26, %v15388_v16  ;;  %v7065_v31 = vld [vmem:[#allocation3 + $0x78] sm:$0xe] }
 0x3da   : > { %v6474_v11 = vsel %vm13293_vm8, %v6469_v47, %v6473_v33  ;;  %v6483_v3 = vrot.slane %v6482_v14, 4  ;;  %v11186_v32 = vcombine.low %v15398_v55, %v15400_v42  ;;  %v13084_v33 = vld [vmem:[#allocation3 + $0xc] sm:$0xf]  ;;  %v15551_v14 = vld [vmem:[#allocation3 + $0x10] sm:$0xf]  ;;  %v11217_v47 = vrot.slane %v7063_v7, 9 }
 0x3db   : > { %v11159_v5 = vcombine.low %v6464_v57, %v6474_v11  ;;  %v6493_v39 = vrot.slane %v6492_v41, 4  ;;  %v11178_v41 = vcombine.low %v13084_v33, %v15551_v14  ;;  %v7314_v57 = vsel %vm6598_vm2, %v15242_v23, 0  ;;  %v13086_v11 = vld [vmem:[#allocation3 + $0x18] sm:$0xf]  ;;  %v7064_v23 = vld [vmem:[#allocation3 + $0x6c] sm:$0xe] }
 0x3dc   : > { %v6488_v44 = vsel %vm13293_vm8, %v6483_v3, %v6487_v18  ;;  %v15556_v3 = vld [vmem:[#allocation3 + $0x1c] sm:$0xf]  ;;  %v7199_v53 = vrot.slane %v15474_v46, 5  ;;  %v7210_v46 = vrot.slane %v15500_v21, 5  ;;  %v17132_v0 = vcombine.low %v15431_v15, %v15434_v52  ;;  %v13089_v55 = vld [vmem:[#allocation3 + $0x8] sm:$0x1] }
 0x3dd   : > { %12166 = vmatprep.mubr.msk.bf16.mxu1 %vm6549_vm3, %v11159_v5  ;;  %v6498_v2 = vsel %vm13293_vm8, %v6493_v39, %v6497_v60  ;;  %v11179_v5 = vcombine.low %v13086_v11, %v15556_v3  ;;  %v15562_v39 = vld [vmem:[%s16927_s4 + $0xc] sm:$0xf]  ;;  %v7161_v11 = vrot.slane %v15388_v16, 5  ;;  %v7105_v26 = vrot.slane %v15523_v6, 5  ;;  %v7055_v16 = vld [vmem:[#allocation3] sm:$0xe] }
 0x3de   : > { %v11160_v18 = vcombine.low %v6488_v44, %v6498_v2  ;;  %v7062_v60 = vld [vmem:[#allocation3 + $0x54] sm:$0xe]  ;;  %v13088_v44 = vld [vmem:[#allocation3 + $0x24] sm:$0xf] }
 0x3df   : > { %v11180_v2 = vcombine.low %v13088_v44, %v15254_v36  ;;  %v11216_v33 = vrot.slane %v7062_v60, 9  ;;  %v7163_v36 = vrot.slane %v7161_v11, 4  ;;  %v11218_v44 = vrot.slane %v7064_v23, 9 }
 0x3e0   : > { %v15586_v60 = vsel %vm13684_vm15, %v11217_v47, %v7161_v11  ;;  %v7192_v47 = vrot.slane %v15462_v9, 5 }
 0x3e1   : > { %12167 = vmatmul.mubr.msk.bf16.gmra.mrb[28].mxu1 %vm6549_vm3, %v11160_v18  ;;  %v11181_v18 = vcombine.low %v15267_v50, %v15273_v34  ;;  %v7168_v50 = vrot.slane %v15400_v42, 5  ;;  %v7108_v42 = vrot.slane %v13089_v55, 5  ;;  %v15744_v55 = vld [vmem:[%s16927_s4 + $0x10] sm:$0xf] }
 0x3e2   : > { %12172 = vmatprep.mubr.msk.bf16.mxu1 %vm6549_vm3, %v11177_v48  ;;  %v7154_v48 = vrot.slane %v15363_v24, 5  ;;  %v17133_v24 = vcombine.low %v15441_v22, %v15454_v45  ;;  %v7112_v22 = vrot.slane %v15551_v14, 5 }
 0x3e3   : > { %v7170_v23 = vrot.slane %v7168_v50, 4  ;;  %v15604_v7 = vsel %vm13684_vm15, %v11218_v44, %v7168_v50  ;;  %v7189_v44 = vrot.slane %v15454_v45, 5  ;;  %v7068_v50 = vld [vmem:[#allocation3 + $0x9c] sm:$0xe]  ;;  %v7119_v45 = vrot.slane %v15556_v3, 5 }
 0x3e4   : > { %v15577_v17 = vsel %vm13684_vm15, %v11216_v33, %v7154_v48  ;;  %v11219_v33 = vrot.slane %v7065_v31, 9  ;;  %v13092_v3 = vld [vmem:[#allocation3 + $0x28] sm:$0xf] }
 0x3e9   : > { %12173 = vmatmul.mubr.msk.bf16.vlgmr.msra.gmra.mrb[0].mxu1 %vm6549_vm3, %v11178_v41  ;;  %v7156_v41 = vrot.slane %v7154_v48, 4 }
 0x3ea   : > { %12205 = vmatpush3.bf16.msra.mxu1 %v7314_v57  ;;  %12176 = vmatprep.mubr.msk.bf16.mxu1 %vm6549_vm3, %v11179_v5  ;;  %v7157_v57 = vrot.slane %v15373_v43, 5  ;;  %v7164_v5 = vrot.slane %v15390_v38, 5  ;;  %v7171_v43 = vrot.slane %v15416_v61, 5  ;;  %v7175_v38 = vrot.slane %v15418_v1, 5 }
 0x3eb   : > { %12966 = vmatprep.subr.msk.bf16.mxu1 %vm6598_vm2, %v15562_v39  ;;  %v7178_v61 = vrot.slane %v15426_v59, 5  ;;  %v7191_v59 = vrot.slane %v7189_v44, 4 }
 0x3ec   : > { %v15582_v34 = vsel %vm13684_vm15, %v7156_v41, %v7157_v57  ;;  %v15594_v48 = vsel %vm13684_vm15, %v7163_v36, %v7164_v5  ;;  %v11182_v41 = vcombine.low %v15291_v63, %v15314_v13  ;;  %v7177_v11 = vrot.slane %v7175_v38, 4  ;;  %v7067_v57 = vld [vmem:[#allocation3 + $0x90] sm:$0xe] }
 0x3ed   : > { %v15608_v31 = vsel %vm13684_vm15, %v7170_v23, %v7171_v43  ;;  %v15612_v63 = vsel %vm13684_vm15, %v11219_v33, %v7175_v38  ;;  %v7182_v5 = vrot.slane %v15434_v52, 5  ;;  %v11220_v36 = vrot.slane %v7066_v8, 9  ;;  %v7069_v8 = vld [vmem:[#allocation3 + $0xa8] sm:$0xe] }
 0x3ee   : > { %v7185_v23 = vrot.slane %v15444_v28, 5  ;;  %v11221_v33 = vrot.slane %v7067_v57, 9  ;;  %v11222_v28 = vrot.slane %v7068_v50, 9  ;;  %v7203_v57 = vrot.slane %v15485_v19, 5  ;;  %v7070_v50 = vld [vmem:[#allocation3 + $0xb4] sm:$0xe] }
 0x3ef   : > { %v7184_v38 = vrot.slane %v7182_v5, 4  ;;  %v15645_v9 = vsel %vm13684_vm15, %v7191_v59, %v7192_v47  ;;  %v8605_v59 = vld [vmem:[#allocation3 + $0x9c] sm:$0xe] }
 0x3f0   : > { %v15638_v43 = vsel %vm13684_vm15, %v11221_v33, %v7189_v44  ;;  %v7205_v29 = vrot.slane %v7203_v57, 4  ;;  %v7206_v44 = vrot.slane %v15490_v12, 5  ;;  %v11183_v33 = vcombine.low %v15321_v51, %v15330_v25 }
 0x3f1   : > { %12177 = vmatmul.mubr.msk.bf16.gmra.mrb[4].mxu1 %vm6549_vm3, %v11180_v2  ;;  %v15620_v2 = vsel %vm13684_vm15, %v7177_v11, %v7178_v61  ;;  %v7196_v11 = vrot.slane %v15471_v62, 5  ;;  %v15634_v61 = vsel %vm13684_vm15, %v7184_v38, %v7185_v23  ;;  %v11223_v23 = vrot.slane %v7069_v8, 9 }
 0x3f2   : > { %12180 = vmatprep.mubr.msk.bf16.mxu1 %vm6549_vm3, %v11181_v18  ;;  %v15628_v18 = vsel %vm13684_vm15, %v11220_v36, %v7182_v5  ;;  %v15671_v51 = vsel %vm13684_vm15, %v7205_v29, %v7206_v44  ;;  %v7212_v8 = vrot.slane %v7210_v46, 4  ;;  %v13091_v44 = vld [vmem:[#allocation3 + $0x20] sm:$0x1] }
 0x3f3   : > { %v7198_v36 = vrot.slane %v7196_v11, 4  ;;  %v15655_v5 = vsel %vm13684_vm15, %v11222_v28, %v7196_v11  ;;  %v15667_v12 = vsel %vm13684_vm15, %v11223_v23, %v7203_v57  ;;  %v11224_v11 = vrot.slane %v7070_v50, 9  ;;  %v7057_v23 = vld [vmem:[#allocation3 + $0x18] sm:$0xe] }
 0x3f4   : > { %v7122_v50 = vrot.slane %v13091_v44, 5  ;;  %v7060_v44 = vld [vmem:[#allocation3 + $0x3c] sm:$0xe]  ;;  %v17155_v38 = vcombine.low %v15628_v18, %v15634_v61 }
 0x3f5   : > { %v15659_v47 = vsel %vm13684_vm15, %v7198_v36, %v7199_v53  ;;  %v15679_v28 = vsel %vm13684_vm15, %v11224_v11, %v7210_v46  ;;  %v7126_v46 = vrot.slane %v13092_v3, 5  ;;  %v11211_v11 = vrot.slane %v7057_v23, 9 }
 0x3f9   : > { %12181 = vmatmul.mubr.msk.bf16.gmra.mrb[8].mxu1 %vm6549_vm3, %v11182_v41  ;;  %v7213_v41 = vrot.slane %v15510_v27, 5  ;;  %v17131_v27 = vcombine.low %v15408_v56, %v15418_v1  ;;  %v17134_v56 = vcombine.low %v15467_v40, %v15471_v62  ;;  %v17135_v1 = vcombine.low %v15480_v4, %v15485_v19  ;;  %v7056_v62 = vld [vmem:[#allocation3 + $0xc] sm:$0xe]  ;;  %v13090_v19 = vld [vmem:[#allocation3 + $0x14] sm:$0x1] }
 0x3fa   : > { %12184 = vmatprep.mubr.msk.bf16.mxu1 %vm6549_vm3, %v11183_v33  ;;  %v17136_v40 = vcombine.low %v15492_v37, %v15500_v21  ;;  %v7121_v4 = vrot.slane %v7119_v45, 4  ;;  %v7115_v36 = vrot.slane %v13090_v19, 5  ;;  %v11210_v33 = vrot.slane %v7056_v62, 9  ;;  %v13093_v21 = vld [vmem:[#allocation3 + $0x34] sm:$0xf] }
 0x3fb   : > { %v15683_v57 = vsel %vm13684_vm15, %v7212_v8, %v7213_v41  ;;  %v7133_v8 = vrot.slane %v13093_v21, 5 }
 0x3fc   : > { %v7123_v37 = vsel %vm13684_vm15, %v7121_v4, %v7122_v50  ;;  %v7113_v41 = vsel %vm13684_vm15, %v11210_v33, %v7112_v22  ;;  %v7061_v33 = vld [vmem:[#allocation3 + $0x48] sm:$0xe] }
 0x401   : > { %12185 = vmatmul.mubr.msk.bf16.gmra.mrb[12].mxu1 %vm6549_vm3, %v11184_v58  ;;  %v11209_v58 = vrot.slane %v7055_v16, 9  ;;  %v7128_v16 = vrot.slane %v7126_v46, 4 }
 0x402   : > { %12188 = vmatprep.mubr.msk.bf16.mxu1 %vm6549_vm3, %v11185_v10  ;;  %v7107_v10 = vrot.slane %v7105_v26, 4 }
 0x403   : > { %v7106_v15 = vsel %vm13684_vm15, %v11209_v58, %v7105_v26  ;;  %v7135_v58 = vrot.slane %v7133_v8, 4 }
 0x404   : > { %v7109_v52 = vsel %vm13684_vm15, %v7107_v10, %v7108_v42  ;;  %v7058_v42 = vld [vmem:[#allocation3 + $0x24] sm:$0xe]  ;;  %v13094_v10 = vld [vmem:[#allocation3 + $0x2c] sm:$0x1] }
 0x405   : > { %v11226_v6 = vcombine.low %v7106_v15, %v7109_v52  ;;  %v11212_v52 = vrot.slane %v7058_v42, 9  ;;  %v8596_v42 = vld [vmem:[#allocation3 + $0x30] sm:$0xe] }
 0x407   : > { %v7127_v62 = vsel %vm13684_vm15, %v11212_v52, %v7126_v46  ;;  %v11215_v46 = vrot.slane %v7061_v33, 9  ;;  %v15795_v52 = vld [vmem:[#allocation3 + $0x4c] sm:$0xf]  ;;  %v8599_v33 = vld [vmem:[#allocation3 + $0x54] sm:$0xe] }
 0x409   : > { %12189 = vmatmul.mubr.msk.bf16.gmra.mrb[16].mxu1 %vm6549_vm3, %v11186_v32  ;;  %v7114_v32 = vrot.slane %v7112_v22, 4 }
 0x40a   : > { %12192 = vmatprep.mubr.msk.bf16.mxu1 %vm6549_vm3, %v17131_v27 }
 0x40b   : > { %v7116_v14 = vsel %vm13684_vm15, %v7114_v32, %v7115_v36 }
 0x40c   : > { %v11227_v27 = vcombine.low %v7113_v41, %v7116_v14  ;;  %v11214_v14 = vrot.slane %v7060_v44, 9 }
 0x411   : > { %12193 = vmatmul.mubr.msk.bf16.gmra.mrb[20].mxu1 %vm6549_vm3, %v17132_v0  ;;  %v7672_v0 = vsel %vm6598_vm2, %v15562_v39, 0  ;;  %v7059_v39 = vld [vmem:[#allocation3 + $0x30] sm:$0xe] }
 0x412   : > { %12196 = vmatprep.mubr.msk.bf16.mxu1 %vm6549_vm3, %v17133_v24  ;;  %v7120_v24 = vsel %vm13684_vm15, %v11211_v11, %v7119_v45  ;;  %v7140_v45 = vrot.slane %v15314_v13, 5  ;;  %v7143_v13 = vrot.slane %v15319_v54, 5  ;;  %v15774_v54 = vld [vmem:[#allocation3 + $0x28] sm:$0xf] }
 0x413   : > { %v11228_v26 = vcombine.low %v7120_v24, %v7123_v37  ;;  %v8673_v24 = vrot.slane %v15774_v54, 5 }
 0x414   : > { %v7142_v23 = vrot.slane %v7140_v45, 4  ;;  %v7141_v37 = vsel %vm13684_vm15, %v11214_v14, %v7140_v45 }
 0x416   : > { %v7144_v3 = vsel %vm13684_vm15, %v7142_v23, %v7143_v13  ;;  %v15924_v23 = vld [vmem:[#allocation3 + $0xa4] sm:$0x1] }
 0x417   : > { %v11231_v21 = vcombine.low %v7141_v37, %v7144_v3  ;;  %v8600_v37 = vld [vmem:[#allocation3 + $0x60] sm:$0xe] }
 0x419   : > { %12197 = vmatmul.mubr.msk.bf16.gmra.mrb[24].mxu1 %vm6549_vm3, %v17134_v56  ;;  %v7129_v56 = vrot.slane %v13094_v10, 5  ;;  %v15791_v10 = vld [vmem:[#allocation3 + $0x38] sm:$0x1] }
 0x41a   : > { %12200 = vmatprep.mubr.msk.bf16.mxu1 %vm6549_vm3, %v17135_v1  ;;  %v13095_v1 = vld [vmem:[#allocation3 + $0x38] sm:$0x1] }
 0x41b   : > { %v7136_v15 = vrot.slane %v13095_v1, 5  ;;  %v7130_v22 = vsel %vm13684_vm15, %v7128_v16, %v7129_v56  ;;  %v15785_v16 = vld [vmem:[#allocation3 + $0x40] sm:$0xf]  ;;  %v8597_v1 = vld [vmem:[#allocation3 + $0x3c] sm:$0xe] }
 0x41c   : > { %v11229_v4 = vcombine.low %v7127_v62, %v7130_v22  ;;  %v15799_v22 = vld [vmem:[#allocation3 + $0x50] sm:$0x1]  ;;  %v8687_v45 = vrot.slane %v15785_v16, 5 }
 0x41d   : > { %v7137_v32 = vsel %vm13684_vm15, %v7135_v58, %v7136_v15  ;;  %v17138_v58 = vcombine.low %v15586_v60, %v15594_v48  ;;  %v15793_v15 = vld [vmem:[#allocation3 + $0x44] sm:$0x1]  ;;  %v11327_v48 = vrot.slane %v8596_v42, 9  ;;  %v17145_v42 = vcombine.low %v15604_v7, %v15608_v31 }
 0x41e   : > { %v8690_v13 = vrot.slane %v15793_v15, 5 }
 0x421   : > { %12201 = vmatmul.mubr.msk.bf16.gmra.mrb[28].mxu1 %vm6549_vm3, %v17136_v40  ;;  %v7147_v40 = vrot.slane %v15330_v25, 5  ;;  %v7150_v25 = vrot.slane %v15336_v35, 5  ;;  %v8595_v35 = vld [vmem:[#allocation3 + $0x24] sm:$0xe] }
 0x422   : > { %12206 = vmatprep.mubr.msk.bf16.mxu1 %vm6549_vm3, %v11226_v6  ;;  %v11213_v6 = vrot.slane %v7059_v39, 9  ;;  %v11326_v56 = vrot.slane %v8595_v35, 9  ;;  %v8675_v39 = vrot.slane %v8673_v24, 4 }
 0x423   : > { %v7149_v50 = vrot.slane %v7147_v40, 4 }
 0x424   : > { %v7134_v19 = vsel %vm13684_vm15, %v11213_v6, %v7133_v8  ;;  %v7148_v8 = vsel %vm13684_vm15, %v11215_v46, %v7147_v40  ;;  %v15803_v60 = vsel %vm13684_vm15, %v11326_v56, %v8673_v24  ;;  %v8598_v6 = vld [vmem:[#allocation3 + $0x48] sm:$0xe]  ;;  %v8697_v24 = vrot.slane %v15799_v22, 5 }
 0x425   : > { %v11230_v36 = vcombine.low %v7134_v19, %v7137_v32  ;;  %v7151_v11 = vsel %vm13684_vm15, %v7149_v50, %v7150_v25  ;;  %17139 = vst [vmem:[#allocation14_spill] sm:$0xff] %v15803_v60  ;;  %v15806_v32 = vld [vmem:[#allocation3 + $0x58] sm:$0xf]  ;;  %v11328_v19 = vrot.slane %v8597_v1, 9  ;;  %v8689_v50 = vrot.slane %v8687_v45, 4 }
 0x426   : > { %v11232_v41 = vcombine.low %v7148_v8, %v7151_v11  ;;  %v15822_v25 = vld [vmem:[#allocation3 + $0x64] sm:$0xf]  ;;  %v11329_v46 = vrot.slane %v8598_v6, 9  ;;  %v8694_v11 = vrot.slane %v15795_v52, 5  ;;  %v15835_v8 = vld [vmem:[#allocation3 + $0x70] sm:$0xf] }
 0x427   : > { %v15830_v3 = vsel %vm13684_vm15, %v11328_v19, %v8687_v45  ;;  %v15841_v35 = vsel %vm13684_vm15, %v8689_v50, %v8690_v13  ;;  %v11331_v45 = vrot.slane %v8600_v37, 9  ;;  %v8708_v6 = vrot.slane %v15822_v25, 5  ;;  %v8602_v50 = vld [vmem:[#allocation3 + $0x78] sm:$0xe]  ;;  %v15875_v13 = vld [vmem:[#allocation3 + $0x80] sm:$0x1] }
 0x428   : > { %17143 = vst [vmem:[#allocation18_spill] sm:$0xff] %v15830_v3  ;;  %17144 = vst [vmem:[#allocation19_spill] sm:$0xff] %v15841_v35  ;;  %v8696_v56 = vrot.slane %v8694_v11, 4  ;;  %v15860_v7 = vsel %vm13684_vm15, %v11329_v46, %v8694_v11  ;;  %v8715_v19 = vrot.slane %v15835_v8, 5  ;;  %v15894_v46 = vld [vmem:[#allocation3 + $0x94] sm:$0xf] }
 0x429   : > { %12207 = vmatmul.mubr.msk.bf16.vlgmr.msra.gmra.mrb[0].mxu1 %vm6549_vm3, %v11227_v27  ;;  %v15776_v27 = vld [vmem:[#allocation3 + $0x2c] sm:$0x1]  ;;  %17147 = vst [vmem:[#allocation5_spill] sm:$0xff] %v15860_v7  ;;  %v8710_v37 = vrot.slane %v8708_v6, 4  ;;  %v13034_v60 = vld [vmem:[#allocation3 + $0x78] sm:$0xff]  }
 0x42a   : > { %12239 = vmatpush3.bf16.msra.mxu1 %v7672_v0  ;;  %12210 = vmatprep.mubr.msk.bf16.mxu1 %vm6549_vm3, %v11228_v26  ;;  %v15778_v0 = vld [vmem:[#allocation3 + $0x34] sm:$0xf]  ;;  %v17137_v26 = vcombine.low %v15577_v17, %v15582_v34  ;;  %v8676_v17 = vrot.slane %v15776_v27, 5 }
 0x42b   : > { %12967 = vmatprep.subr.msk.bf16.mxu1 %vm6598_vm2, %v15744_v55  ;;  %v8680_v34 = vrot.slane %v15778_v0, 5 }
 0x42c   : > { %v15810_v40 = vsel %vm13684_vm15, %v8675_v39, %v8676_v17  ;;  %v11330_v39 = vrot.slane %v8599_v33, 9  ;;  %v8601_v17 = vld [vmem:[#allocation3 + $0x6c] sm:$0xe]  ;;  %v15877_v33 = vld [vmem:[#allocation3 + $0x88] sm:$0xf] }
 0x42d   : > { %17140 = vst [vmem:[#allocation15_spill] sm:$0xff] %v15810_v40  ;;  %v8682_v62 = vrot.slane %v8680_v34, 4  ;;  %v15819_v44 = vsel %vm13684_vm15, %v11327_v48, %v8680_v34  ;;  %v17146_v34 = vcombine.low %v15612_v63, %v15620_v2  ;;  %v15856_v48 = vld [vmem:[#allocation3 + $0x74] sm:$0x1] }
 0x42e   : > { %17141 = vst [vmem:[#allocation16_spill] sm:$0xff] %v15819_v44 }
 0x431   : > { %12211 = vmatmul.mubr.msk.bf16.gmra.mrb[4].mxu1 %vm6549_vm3, %v11229_v4  ;;  %v8683_v4 = vrot.slane %v15791_v10, 5 }
 0x432   : > { %12214 = vmatprep.mubr.msk.bf16.mxu1 %vm6549_vm3, %v11230_v36  ;;  %v15813_v36 = vld [vmem:[#allocation3 + $0x5c] sm:$0x1] }
 0x433   : > { %v15826_v14 = vsel %vm13684_vm15, %v8682_v62, %v8683_v4  ;;  %v8704_v1 = vrot.slane %v15813_v36, 5  ;;  %v15863_v62 = vld [vmem:[#allocation3 + $0x7c] sm:$0xf]  ;;  %v15867_v4 = vsel %vm13684_vm15, %v8696_v56, %v8697_v24  ;;  %v11332_v24 = vrot.slane %v8601_v17, 9 }
 0x434   : > { %17142 = vst [vmem:[#allocation17_spill] sm:$0xff] %v15826_v14  ;;  %17148 = vst [vmem:[#allocation6_spill] sm:$0xff] %v15867_v4  ;;  %v15891_v56 = vsel %vm13684_vm15, %v11331_v45, %v8708_v6  ;;  %v15905_v45 = vld [vmem:[#allocation3 + $0x98] sm:$0x1]  ;;  %v15907_v6 = vld [vmem:[#allocation3 + $0xa0] sm:$0xf] }
 0x435   : > { %17151 = vst [vmem:[#allocation9_spill] sm:$0xff] %v15891_v56  ;;  %v15902_v17 = vsel %vm13684_vm15, %v11332_v24, %v8715_v19  ;;  %v15960_v56 = vld [vmem:[#allocation3 + $0xbc] sm:$0x1] }
 0x436   : > { %17153 = vst [vmem:[#allocation11_spill] sm:$0xff] %v15902_v17  ;;  %v8746_v17 = vrot.slane %v15924_v23, 5 }
 0x439   : > { %12215 = vmatmul.mubr.msk.bf16.gmra.mrb[8].mxu1 %vm6549_vm3, %v11231_v21  ;;  %v15833_v21 = vld [vmem:[#allocation3 + $0x68] sm:$0x1] }
 0x43a   : > { %12218 = vmatprep.mubr.msk.bf16.mxu1 %vm6549_vm3, %v11232_v41  ;;  %v8711_v2 = vrot.slane %v15833_v21, 5  ;;  %v8604_v41 = vld [vmem:[#allocation3 + $0x90] sm:$0xe] }
 0x43b   : > { %v11335_v30 = vrot.slane %v8604_v41, 9  ;;  %v8743_v41 = vrot.slane %v15907_v6, 5 }
 0x441   : > { %12219 = vmatmul.mubr.msk.bf16.gmra.mrb[12].mxu1 %vm6549_vm3, %v17137_v26  ;;  %v8701_v26 = vrot.slane %v15806_v32, 5 }
 0x442   : > { %12222 = vmatprep.mubr.msk.bf16.mxu1 %vm6549_vm3, %v17138_v58  ;;  %v8603_v58 = vld [vmem:[#allocation3 + $0x84] sm:$0xe] }
 0x443   : > { %v8703_v31 = vrot.slane %v8701_v26, 4  ;;  %v15871_v63 = vsel %vm13684_vm15, %v11330_v39, %v8701_v26  ;;  %v15885_v26 = vld [vmem:[#allocation3 + $0x8c] sm:$0x1]  ;;  %v8717_v39 = vrot.slane %v8715_v19, 4  ;;  %v8729_v19 = vrot.slane %v15877_v33, 5 }
 0x444   : > { %17149 = vst [vmem:[#allocation7_spill] sm:$0xff] %v15871_v63  ;;  %v11334_v24 = vrot.slane %v8603_v58, 9  ;;  %v8732_v53 = vrot.slane %v15885_v26, 5  ;;  %v17157_v58 = vcombine.low %v15638_v43, %v15645_v9  ;;  %v8760_v43 = vrot.slane %v15960_v56, 5 }
 0x445   : > { %v15883_v11 = vsel %vm13684_vm15, %v8703_v31, %v8704_v1  ;;  %v15898_v1 = vsel %vm13684_vm15, %v8710_v37, %v8711_v2  ;;  %v11333_v31 = vrot.slane %v8602_v50, 9  ;;  %v8725_v2 = vrot.slane %v15875_v13, 5 }
 0x446   : > { %17150 = vst [vmem:[#allocation8_spill] sm:$0xff] %v15883_v11  ;;  %17152 = vst [vmem:[#allocation10_spill] sm:$0xff] %v15898_v1  ;;  %v8736_v50 = vrot.slane %v15894_v46, 5  ;;  %v15943_v61 = vsel %vm13684_vm15, %v11334_v24, %v8729_v19  ;;  %v8745_v24 = vrot.slane %v8743_v41, 4  ;;  %v8607_v1 = vld [vmem:[#allocation3 + $0xb4] sm:$0xe] }
 0x447   : > { %17159 = vst [vmem:[#allocation20_spill] sm:$0xff] %v15943_v61  ;;  %v15962_v11 = vld [vmem:[#allocation3 + $0xc4] sm:$0xf]  ;;  %v7973_v63 = vshll.u32 %v15774_v54, 16 }
 0x449   : > { %12223 = vmatmul.mubr.msk.bf16.gmra.mrb[16].mxu1 %vm6549_vm3, %v17145_v42  ;;  %v8722_v42 = vrot.slane %v15863_v62, 5  ;;  %v16069_v35 = vrot.slane %v7973_v63, 5 }
 0x44a   : > { %12226 = vmatprep.mubr.msk.bf16.mxu1 %vm6549_vm3, %v17146_v34  ;;  %v8718_v34 = vrot.slane %v15856_v48, 5 }
 0x44b   : > { %v8724_v37 = vrot.slane %v8722_v42, 4 }
 0x44c   : > { %v15913_v29 = vsel %vm13684_vm15, %v8717_v39, %v8718_v34  ;;  %v15928_v39 = vsel %vm13684_vm15, %v11333_v31, %v8722_v42  ;;  %v8731_v34 = vrot.slane %v8729_v19, 4  ;;  %v15947_v42 = vld [vmem:[#allocation3 + $0xb8] sm:$0xf]  ;;  %v8738_v31 = vrot.slane %v8736_v50, 4 }
 0x44d   : > { %17154 = vst [vmem:[#allocation12_spill] sm:$0xff] %v15913_v29  ;;  %17156 = vst [vmem:[#allocation13_spill] sm:$0xff] %v15928_v39  ;;  %v15935_v29 = vld [vmem:[#allocation3 + $0xac] sm:$0xf]  ;;  %v15939_v18 = vsel %vm13684_vm15, %v8724_v37, %v8725_v2  ;;  %v11336_v2 = vrot.slane %v8605_v59, 9 }
 0x44e   : > { %17158 = vst [vmem:[#allocation4_spill] sm:$0xff] %v15939_v18  ;;  %v15953_v9 = vsel %vm13684_vm15, %v8731_v34, %v8732_v53  ;;  %v8606_v37 = vld [vmem:[#allocation3 + $0xa8] sm:$0xe]  ;;  %v15966_v53 = vsel %vm13684_vm15, %v11335_v30, %v8736_v50  ;;  %v8750_v19 = vrot.slane %v15935_v29, 5  ;;  %v8757_v30 = vrot.slane %v15947_v42, 5 }
 0x44f   : > { %17160 = vst [vmem:[#allocation21_spill] sm:$0xff] %v15953_v9  ;;  %17161 = vst [vmem:[#allocation22_spill] sm:$0xff] %v15966_v53  ;;  %v15974_v34 = vsel %vm13684_vm15, %v11336_v2, %v8743_v41  ;;  %v15981_v9 = vsel %vm13684_vm15, %v8745_v24, %v8746_v17  ;;  %v11337_v61 = vrot.slane %v8606_v37, 9  ;;  %v8608_v50 = vld [vmem:[#allocation3 + $0xc0] sm:$0xe]  ;;  %v11338_v2 = vrot.slane %v8607_v1, 9 }
 0x450   : > { %17163 = vst [vmem:[#allocation24_spill] sm:$0xff] %v15974_v34  ;;  %17164 = vst [vmem:[#allocation25_spill] sm:$0xff] %v15981_v9  ;;  %v15984_v18 = vld [vmem:[#allocation3 + $0xc8] sm:$0x1]  ;;  %v8752_v41 = vrot.slane %v8750_v19, 4  ;;  %v8759_v39 = vrot.slane %v8757_v30, 4  ;;  %v17166_v17 = vcombine.low %v15655_v5, %v15659_v47  ;;  %v17170_v9 = vcombine.low %v15667_v12, %v15671_v51 }
 0x451   : > { %12227 = vmatmul.mubr.msk.bf16.gmra.mrb[20].mxu1 %vm6549_vm3, %v17155_v38  ;;  %v8739_v38 = vrot.slane %v15905_v45, 5  ;;  %17165 = vst [vmem:[#allocation26_spill] sm:$0xff] %v15984_v18  ;;  %v15997_v37 = vsel %vm13684_vm15, %v11337_v61, %v8750_v19  ;;  %v16005_v1 = vsel %vm13684_vm15, %v11338_v2, %v8757_v30  ;;  %v8767_v19 = vrot.slane %v15984_v18, 5  ;;  %v13028_v2 = vld [vmem:[#allocation3 + $0x30] sm:$0xff]  }
 0x452   : > { %12230 = vmatprep.mubr.msk.bf16.mxu1 %vm6549_vm3, %v17157_v58  ;;  %v15955_v58 = vld [vmem:[#allocation3 + $0xb0] sm:$0x1]  ;;  %17167 = vst [vmem:[#allocation27_spill] sm:$0xff] %v15997_v37  ;;  %17169 = vst [vmem:[#allocation29_spill] sm:$0xff] %v16005_v1  ;;  %v16015_v47 = vsel %vm13684_vm15, %v8759_v39, %v8760_v43  ;;  %v17174_v39 = vcombine.low %v15679_v28, %v15683_v57  ;;  %v13026_v43 = vld [vmem:[#allocation3 + $0x18] sm:$0xff]  }
 0x453   : > { %v15970_v59 = vsel %vm13684_vm15, %v8738_v31, %v8739_v38  ;;  %v8753_v31 = vrot.slane %v15955_v58, 5  ;;  %v11339_v38 = vrot.slane %v8608_v50, 9  ;;  %17171 = vst [vmem:[#allocation30_spill] sm:$0xff] %v16015_v47  ;;  %v16044_v28 = vld [vmem:[#allocation3 + $0x10] sm:$0xf]  ;;  %v13030_v37 = vld [vmem:[#allocation3 + $0x48] sm:$0xff]  }
 0x454   : > { %17162 = vst [vmem:[#allocation23_spill] sm:$0xff] %v15970_v59  ;;  %v8764_v59 = vrot.slane %v15962_v11, 5  ;;  %v7867_v57 = vld [vmem:[#allocation3 + $0xc] sm:$0xf]  ;;  %v7873_v47 = vld [vmem:[#allocation3 + $0x24] sm:$0xf] }
 0x455   : > { %v16001_v24 = vsel %vm13684_vm15, %v8752_v41, %v8753_v31  ;;  %v16040_v41 = vld [vmem:[%s16927_s4 + $0x14] sm:$0xf]  ;;  %v7925_v31 = vshll.u32 %v16044_v28, 16  ;;  %v13031_v34 = vld [vmem:[#allocation3 + $0x54] sm:$0xff]  }
 0x456   : > { %17168 = vst [vmem:[#allocation28_spill] sm:$0xff] %v16001_v24  ;;  %v8766_v61 = vrot.slane %v8764_v59, 4  ;;  %v16022_v50 = vsel %vm13684_vm15, %v11339_v38, %v8764_v59  ;;  %v8398_v59 = vsel %vm6598_vm2, %v15744_v55, 0  ;;  %v13027_v38 = vld [vmem:[#allocation3 + $0x24] sm:$0xff]   ;;  %v7929_v55 = vshrl.u32 %v16044_v28, 16 }
 0x457   : > { %17172 = vst [vmem:[#allocation31_spill] sm:$0xff] %v16022_v50  ;;  %v10153_v18 = vld [vmem:[#allocation3 + $0x54] sm:$0xe] }
 0x458   : > { %v16026_v12 = vsel %vm13684_vm15, %v8766_v61, %v8767_v19  ;;  %v7919_v61 = vshll.u32 %v7867_v57, 16  ;;  %v7870_v19 = vld [vmem:[#allocation3 + $0x18] sm:$0xf] }
 0x459   : > { %12231 = vmatmul.mubr.msk.bf16.gmra.mrb[24].mxu1 %vm6549_vm3, %v17166_v17  ;;  %17173 = vst [vmem:[#allocation32_spill] sm:$0xff] %v16026_v12  ;;  %v7916_v17 = vshrl.u32 %v7867_v57, 16  ;;  %v7943_v51 = vshll.u32 %v7870_v19, 16  ;;  %v16054_v12 = vld [vmem:[#allocation3 + $0x14] sm:$0x1] }
 0x45a   : > { %12234 = vmatprep.mubr.msk.bf16.mxu1 %vm6549_vm3, %v17170_v9  ;;  %v13025_v9 = vld [vmem:[#allocation3 + $0xc] sm:$0xff]   ;;  %v7921_v5 = vrot.slane %v7919_v61, 5  ;;  %17176 = vst [vmem:[#allocation34_spill] sm:$0xff] %v16054_v12  ;;  %v7964_v61 = vshrl.u32 %v7873_v47, 16 }
 0x45b   : > { %v7918_v30 = vrot.slane %v7916_v17, 4 }
 0x45c   : > { %v7966_v7 = vrot.slane %v7964_v61, 4 }
 0x45d   : > { %v7922_v53 = vor.u32 %v7921_v5, %v7918_v30 }
 0x45f   : > { %v7923_v5 = vrot.slane %v7922_v53, 4  ;;  %v7879_v53 = vld [vmem:[#allocation3 + $0x3c] sm:$0xf] }
 0x461   : > { %12235 = vmatmul.mubr.msk.bf16.gmra.mrb[28].mxu1 %vm6549_vm3, %v17174_v39  ;;  %v16051_v39 = vld [vmem:[#allocation3 + $0x1c] sm:$0xf] }
 0x462   : > { %12240 = vmatprep.mubr.msk.bf16.mxu1 %vm6549_vm3, %v13025_v9  ;;  %v13029_v9 = vld [vmem:[#allocation3 + $0x3c] sm:$0xff]   ;;  %17175 = vst [vmem:[#allocation33_spill] sm:$0xff] %v16051_v39  ;;  %v7949_v50 = vshll.u32 %v16051_v39, 16  ;;  %v7953_v57 = vshrl.u32 %v16051_v39, 16 }
 0x464   : > { %v7955_v17 = vrot.slane %v7953_v57, 4 }
 0x469   : > { %12241 = vmatmul.mubr.msk.bf16.vlgmr.msra.gmra.mrb[0].mxu1 %vm6549_vm3, %v13026_v43  ;;  %v7927_v43 = vrot.slane %v7925_v31, 5  ;;  %v7935_v31 = vshll.u32 %v16054_v12, 16 }
 0x46a   : > { %12273 = vmatpush3.bf16.msra.mxu1 %v8398_v59  ;;  %12244 = vmatprep.mubr.msk.bf16.mxu1 %vm6549_vm3, %v13027_v38  ;;  %v7931_v59 = vrot.slane %v7929_v55, 4  ;;  %v7940_v38 = vshrl.u32 %v7870_v19, 16  ;;  %v16059_v55 = vld [vmem:[#allocation3 + $0x20] sm:$0x1]  ;;  %v16061_v19 = vrot.slane %v7949_v50, 5 }
 0x46b   : > { %12968 = vmatprep.subr.msk.bf16.mxu1 %vm6598_vm2, %v16040_v41  ;;  %17177 = vst [vmem:[#allocation35_spill] sm:$0xff] %v16059_v55  ;;  %v7959_v30 = vshll.u32 %v16059_v55, 16  ;;  %v7937_v4 = vrot.slane %v7935_v31, 5 }
 0x46c   : > { %v7932_v1 = vor.u32 %v7931_v59, %v7927_v43  ;;  %v7942_v24 = vrot.slane %v7940_v38, 4  ;;  %v7977_v59 = vshrl.u32 %v15774_v54, 16  ;;  %v7956_v50 = vor.u32 %v7955_v17, %v16061_v19  ;;  %v13033_v17 = vld [vmem:[#allocation3 + $0x6c] sm:$0xff]  }
 0x46d   : > { %v7961_v31 = vrot.slane %v7959_v30, 5  ;;  %v8015_v30 = vshll.u32 %v7879_v53, 16 }
 0x46e   : > { %v7957_v61 = vrot.slane %v7956_v50, 4  ;;  %v8025_v50 = vshrl.u32 %v15785_v16, 16 }
 0x471   : > { %12245 = vmatmul.mubr.msk.bf16.gmra.mrb[4].mxu1 %vm6549_vm3, %v13028_v2  ;;  %v7945_v2 = vrot.slane %v7943_v51, 5  ;;  %v7933_v51 = vrot.slane %v7932_v1, 4  ;;  %v13032_v1 = vld [vmem:[#allocation3 + $0x60] sm:$0xff]  }
 0x472   : > { %12248 = vmatprep.mubr.msk.bf16.mxu1 %vm6549_vm3, %v13029_v9  ;;  %v7967_v9 = vshll.u32 %v7873_v47, 16  ;;  %v7979_v47 = vrot.slane %v7977_v59, 4 }
 0x473   : > { %v7946_v38 = vor.u32 %v7945_v2, %v7942_v24  ;;  %v7938_v3 = vsel %vm13293_vm8, %v7933_v51, %v7937_v4  ;;  %v8001_v24 = vshrl.u32 %v15778_v0, 16  ;;  %v7928_v2 = vsel %vm13293_vm8, %v7923_v5, %v7927_v43 }
 0x474   : > { %v7969_v57 = vrot.slane %v7967_v9, 5  ;;  %v7983_v9 = vshll.u32 %v15776_v27, 16  ;;  %v16079_v4 = vcombine.low %v7928_v2, %v7938_v3  ;;  %v7980_v51 = vor.u32 %v7979_v47, %v16069_v35  ;;  %v7882_v3 = vld [vmem:[#allocation3 + $0x48] sm:$0xf] }
 0x475   : > { %v7947_v54 = vrot.slane %v7946_v38, 4  ;;  %v8021_v27 = vshll.u32 %v15785_v16, 16  ;;  %v8049_v47 = vshrl.u32 %v15795_v52, 16  ;;  %v8017_v16 = vrot.slane %v8015_v30, 5  ;;  %v7888_v30 = vld [vmem:[#allocation3 + $0x60] sm:$0xf] }
 0x476   : > { %v7970_v63 = vor.u32 %v7969_v57, %v7966_v7  ;;  %v8003_v7 = vrot.slane %v8001_v24, 4  ;;  %v8045_v57 = vshll.u32 %v15795_v52, 16  ;;  %v7985_v2 = vrot.slane %v7983_v9, 5 }
 0x477   : > { %v7952_v43 = vsel %vm13293_vm8, %v7947_v54, %v16061_v19  ;;  %v7981_v19 = vrot.slane %v7980_v51, 4  ;;  %v8036_v44 = vshrl.u32 %v7882_v3, 16  ;;  %v8039_v40 = vshll.u32 %v7882_v3, 16 }
 0x478   : > { %v16096_v55 = vrot.slane %v8021_v27, 5  ;;  %v8027_v52 = vrot.slane %v8025_v50, 4  ;;  %v16098_v39 = vrot.slane %v8045_v57, 5  ;;  %v8031_v27 = vshll.u32 %v15793_v15, 16 }
 0x479   : > { %12249 = vmatmul.mubr.msk.bf16.gmra.mrb[8].mxu1 %vm6549_vm3, %v13030_v37  ;;  %v7876_v37 = vld [vmem:[#allocation3 + $0x30] sm:$0xf]  ;;  %v8038_v50 = vrot.slane %v8036_v44, 4 }
 0x47a   : > { %12252 = vmatprep.mubr.msk.bf16.mxu1 %vm6549_vm3, %v13031_v34  ;;  %v7997_v34 = vshll.u32 %v15778_v0, 16  ;;  %v7988_v59 = vshrl.u32 %v7876_v37, 16  ;;  %v7991_v38 = vshll.u32 %v7876_v37, 16  ;;  %v8012_v0 = vshrl.u32 %v7879_v53, 16  ;;  %v7885_v53 = vld [vmem:[#allocation3 + $0x54] sm:$0xf] }
 0x47b   : > { %v7962_v37 = vsel %vm13293_vm8, %v7957_v61, %v7961_v31  ;;  %v8051_v31 = vrot.slane %v8049_v47, 4  ;;  %v13035_v61 = vld [vmem:[#allocation3 + $0x84] sm:$0xff]   ;;  %v8060_v9 = vshrl.u32 %v7885_v53, 16 }
 0x47c   : > { %v16086_v5 = vrot.slane %v7997_v34, 5  ;;  %v7993_v54 = vrot.slane %v7991_v38, 5  ;;  %v8007_v34 = vshll.u32 %v15791_v10, 16  ;;  %v8014_v24 = vrot.slane %v8012_v0, 4 }
 0x47d   : > { %v8069_v0 = vshll.u32 %v15806_v32, 16  ;;  %v8052_v47 = vor.u32 %v8051_v31, %v16098_v39 }
 0x47e   : > { %v8004_v14 = vor.u32 %v8003_v7, %v16086_v5  ;;  %v8009_v38 = vrot.slane %v8007_v34, 5  ;;  %v8073_v7 = vshrl.u32 %v15806_v32, 16  ;;  %v8018_v57 = vor.u32 %v8017_v16, %v8014_v24  ;;  %v13036_v24 = vld [vmem:[#allocation3 + $0x90] sm:$0xff]  }
 0x47f   : > { %v8087_v32 = vshll.u32 %v7888_v30, 16  ;;  %v8055_v34 = vshll.u32 %v15799_v22, 16 }
 0x480   : > { %v8005_v3 = vrot.slane %v8004_v14, 4  ;;  %v8097_v14 = vshrl.u32 %v15822_v25, 16 }
 0x481   : > { %12253 = vmatmul.mubr.msk.bf16.gmra.mrb[12].mxu1 %vm6549_vm3, %v13032_v1  ;;  %v7971_v1 = vrot.slane %v7970_v63, 4  ;;  %v16100_v63 = vcombine.low %v7952_v43, %v7962_v37  ;;  %v7986_v43 = vsel %vm13293_vm8, %v7981_v19, %v7985_v2  ;;  %v8062_v37 = vrot.slane %v8060_v9, 4  ;;  %v7891_v19 = vld [vmem:[#allocation3 + $0x6c] sm:$0xf] }
 0x482   : > { %12256 = vmatprep.mubr.msk.bf16.mxu1 %vm6549_vm3, %v13033_v17  ;;  %v7990_v17 = vrot.slane %v7988_v59, 4  ;;  %v8063_v59 = vshll.u32 %v7885_v53, 16  ;;  %v16117_v53 = vrot.slane %v8069_v0, 5  ;;  %v8075_v2 = vrot.slane %v8073_v7, 4 }
 0x483   : > { %v7976_v10 = vsel %vm13293_vm8, %v7971_v1, %v16069_v35  ;;  %v8041_v35 = vrot.slane %v8039_v40, 5  ;;  %v8093_v40 = vshll.u32 %v15822_v25, 16  ;;  %v8010_v16 = vsel %vm13293_vm8, %v8005_v3, %v8009_v38 }
 0x484   : > { %v7994_v51 = vor.u32 %v7993_v54, %v7990_v17  ;;  %v8065_v1 = vrot.slane %v8063_v59, 5  ;;  %v8084_v17 = vshrl.u32 %v7888_v30, 16  ;;  %v16114_v54 = vcombine.low %v7976_v10, %v7986_v43  ;;  %v13037_v10 = vld [vmem:[#allocation3 + $0x9c] sm:$0xff]  }
 0x485   : > { %v8042_v44 = vor.u32 %v8041_v35, %v8038_v50  ;;  %v8053_v9 = vrot.slane %v8052_v47, 4  ;;  %v8089_v0 = vrot.slane %v8087_v32, 5  ;;  %v8076_v7 = vor.u32 %v8075_v2, %v16117_v53 }
 0x486   : > { %v7995_v15 = vrot.slane %v7994_v51, 4  ;;  %v8066_v22 = vor.u32 %v8065_v1, %v8062_v37  ;;  %v8086_v59 = vrot.slane %v8084_v17, 4  ;;  %v8057_v51 = vrot.slane %v8055_v34, 5  ;;  %v7894_v17 = vld [vmem:[#allocation3 + $0x78] sm:$0xf] }
 0x487   : > { %v8108_v30 = vshrl.u32 %v7891_v19, 16  ;;  %v8111_v25 = vshll.u32 %v7891_v19, 16  ;;  %v8043_v43 = vrot.slane %v8042_v44, 4  ;;  %v8079_v38 = vshll.u32 %v15813_v36, 16  ;;  %v16161_v19 = vld [vmem:[#allocation3 + $0x20] sm:$0x1] }
 0x488   : > { %v16127_v50 = vrot.slane %v8093_v40, 5  ;;  %v8000_v35 = vsel %vm13293_vm8, %v7995_v15, %v16086_v5  ;;  %v8058_v37 = vsel %vm13293_vm8, %v8053_v9, %v8057_v51  ;;  %v16140_v36 = vrot.slane %v8066_v22, 4  ;;  %17179 = vst [vmem:[#allocation37_spill] sm:$0xff] %v16161_v19  ;;  %v13039_v9 = vld [vmem:[#allocation3 + $0xb4] sm:$0xff]  }
 0x489   : > { %12257 = vmatmul.mubr.msk.bf16.gmra.mrb[16].mxu1 %vm6549_vm3, %v13034_v60  ;;  %v8028_v60 = vor.u32 %v8027_v52, %v16096_v55  ;;  %v8019_v52 = vrot.slane %v8018_v57, 4  ;;  %v8117_v57 = vshll.u32 %v15835_v8, 16  ;;  %v16136_v47 = vcombine.low %v8000_v35, %v8010_v16 }
 0x48a   : > { %12260 = vmatprep.mubr.msk.bf16.mxu1 %vm6549_vm3, %v13035_v61  ;;  %v8033_v61 = vrot.slane %v8031_v27, 5  ;;  %v8099_v27 = vrot.slane %v8097_v14, 4  ;;  %v8090_v1 = vor.u32 %v8089_v0, %v8086_v59  ;;  %v16145_v32 = vrot.slane %v8076_v7, 4  ;;  %v16178_v0 = vld [vmem:[#allocation3 + $0x28] sm:$0xf] }
 0x48b   : > { %v8029_v31 = vrot.slane %v8028_v60, 4  ;;  %v8121_v60 = vshrl.u32 %v15835_v8, 16  ;;  %v8024_v5 = vsel %vm13293_vm8, %v8019_v52, %v16096_v55  ;;  %v16147_v34 = vrot.slane %v8108_v30, 4  ;;  %v16151_v8 = vld [vmem:[#allocation3 + $0x1c] sm:$0xf]  ;;  %17181 = vst [vmem:[#allocation39_spill] sm:$0xff] %v16178_v0 }
 0x48c   : > { %v16149_v2 = vrot.slane %v8111_v25, 5  ;;  %17178 = vst [vmem:[#allocation36_spill] sm:$0xff] %v16151_v8  ;;  %v8048_v44 = vsel %vm13293_vm8, %v8043_v43, %v16098_v39  ;;  %v16158_v40 = vrot.slane %v8079_v38, 5  ;;  %v8100_v14 = vor.u32 %v8099_v27, %v16127_v50  ;;  %v10148_v55 = vld [vmem:[#allocation3 + $0x18] sm:$0xe] }
 0x48d   : > { %v8034_v3 = vsel %vm13293_vm8, %v8029_v31, %v8033_v61  ;;  %v16163_v16 = vcombine.low %v8048_v44, %v8058_v37  ;;  %v16166_v31 = vrot.slane %v8117_v57, 5  ;;  %v16168_v61 = vrot.slane %v8121_v60, 4  ;;  %v16189_v38 = vld [vmem:[#allocation3 + $0x2c] sm:$0x1]  ;;  %v10150_v27 = vld [vmem:[#allocation3 + $0x30] sm:$0xe] }
 0x48e   : > { %v16153_v15 = vcombine.low %v8024_v5, %v8034_v3  ;;  %v16176_v22 = vrot.slane %v8090_v1, 4  ;;  %v8132_v59 = vshrl.u32 %v7894_v17, 16  ;;  %v10214_v51 = vrot.slane %v16151_v8, 5  ;;  %17182 = vst [vmem:[#allocation40_spill] sm:$0xff] %v16189_v38  ;;  %v16194_v3 = vld [vmem:[#allocation3 + $0x38] sm:$0x1] }
 0x48f   : > { %v8135_v43 = vshll.u32 %v7894_v17, 16  ;;  %v16192_v35 = vrot.slane %v8100_v14, 4  ;;  %17183 = vst [vmem:[#allocation41_spill] sm:$0xff] %v16194_v3  ;;  %v11439_v57 = vrot.slane %v10148_v55, 9  ;;  %v10217_v37 = vrot.slane %v16161_v19, 5  ;;  %v13040_v5 = vld [vmem:[#allocation3 + $0xc0] sm:$0xff]  }
 0x490   : > { %v10216_v60 = vrot.slane %v10214_v51, 4  ;;  %v10149_v1 = vld [vmem:[#allocation3 + $0x24] sm:$0xe]  ;;  %v16204_v14 = vrot.slane %v8132_v59, 4  ;;  %v16206_v25 = vld [vmem:[#allocation3 + $0x40] sm:$0xf] }
 0x491   : > { %12261 = vmatmul.mubr.msk.bf16.gmra.mrb[20].mxu1 %vm6549_vm3, %v13036_v24  ;;  %v13038_v24 = vld [vmem:[#allocation3 + $0xa8] sm:$0xff]   ;;  %v16208_v55 = vld [vmem:[#allocation3 + $0x44] sm:$0x1]  ;;  %v16212_v52 = vsel %vm13684_vm15, %v11439_v57, %v10214_v51  ;;  %v16219_v30 = vrot.slane %v8135_v43, 5  ;;  %v16221_v17 = vld [vmem:[#allocation3 + $0x50] sm:$0x1] }
 0x492   : > { %12264 = vmatprep.mubr.msk.bf16.mxu1 %vm6549_vm3, %v13037_v10  ;;  %v16170_v10 = vld [vmem:[#allocation3 + $0x34] sm:$0xf]  ;;  %17185 = vst [vmem:[#allocation43_spill] sm:$0xff] %v16208_v55  ;;  %17186 = vst [vmem:[#allocation44_spill] sm:$0xff] %v16212_v52  ;;  %v16216_v39 = vsel %vm13684_vm15, %v10216_v60, %v10217_v37  ;;  %v11440_v44 = vrot.slane %v10149_v1, 9  ;;  %v11441_v19 = vrot.slane %v10150_v27, 9 }
 0x493   : > { %17180 = vst [vmem:[#allocation38_spill] sm:$0xff] %v16170_v10  ;;  %17187 = vst [vmem:[#allocation45_spill] sm:$0xff] %v16216_v39  ;;  %v10228_v7 = vrot.slane %v16170_v10, 5  ;;  %v16227_v51 = vsel %vm6598_vm2, %v16040_v41, 0  ;;  %v10224_v60 = vrot.slane %v16189_v38, 5  ;;  %v10231_v41 = vrot.slane %v16194_v3, 5 }
 0x494   : > { %17188 = vst [vmem:[#allocation46_spill] sm:$0xff] %v16221_v17  ;;  %v10152_v10 = vld [vmem:[#allocation3 + $0x48] sm:$0xe]  ;;  %v16230_v8 = vld [vmem:[#allocation3 + $0x58] sm:$0xf]  ;;  %v10235_v1 = vrot.slane %v16206_v25, 5 }
 0x495   : > { %v10230_v37 = vrot.slane %v10228_v7, 4  ;;  %17189 = vst [vmem:[#allocation47_spill] sm:$0xff] %v16230_v8  ;;  %v16232_v43 = vld [vmem:[#allocation3 + $0x64] sm:$0xf]  ;;  %v16240_v27 = vsel %vm13684_vm15, %v11441_v19, %v10228_v7  ;;  %v10238_v52 = vrot.slane %v16208_v55, 5  ;;  %v10245_v7 = vrot.slane %v16221_v17, 5 }
 0x496   : > { %17191 = vst [vmem:[#allocation49_spill] sm:$0xff] %v16240_v27  ;;  %v16253_v19 = vld [vmem:[#allocation3 + $0x68] sm:$0x1]  ;;  %v16298_v3 = vld [vmem:[#allocation3 + $0x94] sm:$0xf] }
 0x497   : > { %17194 = vst [vmem:[#allocation52_spill] sm:$0xff] %v16253_v19  ;;  %v10259_v17 = vrot.slane %v16253_v19, 5  ;;  %17204 = vst [vmem:[#allocation62_spill] sm:$0xff] %v16298_v3 }
 0x499   : > { %12265 = vmatmul.mubr.msk.bf16.gmra.mrb[24].mxu1 %vm6549_vm3, %v13038_v24  ;;  %v16201_v24 = vld [vmem:[#allocation3 + $0x4c] sm:$0xf] }
 0x49a   : > { %12268 = vmatprep.mubr.msk.bf16.mxu1 %vm6549_vm3, %v13039_v9  ;;  %17184 = vst [vmem:[#allocation42_spill] sm:$0xff] %v16201_v24  ;;  %v10221_v9 = vrot.slane %v16178_v0, 5  ;;  %v10151_v0 = vld [vmem:[#allocation3 + $0x3c] sm:$0xe]  ;;  %v10242_v38 = vrot.slane %v16201_v24, 5 }
 0x49b   : > { %v11442_v39 = vrot.slane %v10151_v0, 9  ;;  %v11443_v0 = vrot.slane %v10152_v10, 9 }
 0x49c   : > { %v10223_v57 = vrot.slane %v10221_v9, 4  ;;  %v16236_v12 = vsel %vm13684_vm15, %v11440_v44, %v10221_v9  ;;  %v16251_v44 = vld [vmem:[#allocation3 + $0x5c] sm:$0x1]  ;;  %v16259_v9 = vsel %vm13684_vm15, %v10230_v37, %v10231_v41  ;;  %v10244_v24 = vrot.slane %v10242_v38, 4  ;;  %v16272_v37 = vld [vmem:[#allocation3 + $0x70] sm:$0xf] }
 0x49d   : > { %17190 = vst [vmem:[#allocation48_spill] sm:$0xff] %v16236_v12  ;;  %17193 = vst [vmem:[#allocation51_spill] sm:$0xff] %v16251_v44  ;;  %v16269_v55 = vsel %vm13684_vm15, %v11442_v39, %v10235_v1  ;;  %v11444_v41 = vrot.slane %v10153_v18, 9  ;;  %v16283_v39 = vld [vmem:[#allocation3 + $0x74] sm:$0x1] }
 0x49e   : > { %v16246_v59 = vsel %vm13684_vm15, %v10223_v57, %v10224_v60  ;;  %17195 = vst [vmem:[#allocation53_spill] sm:$0xff] %v16259_v9  ;;  %v10237_v57 = vrot.slane %v10235_v1, 4  ;;  %v16263_v60 = vld [vmem:[#allocation3 + $0x7c] sm:$0xf]  ;;  %17197 = vst [vmem:[#allocation55_spill] sm:$0xff] %v16269_v55  ;;  %v16291_v12 = vsel %vm13684_vm15, %v10244_v24, %v10245_v7 }
 0x49f   : > { %17192 = vst [vmem:[#allocation50_spill] sm:$0xff] %v16246_v59  ;;  %17196 = vst [vmem:[#allocation54_spill] sm:$0xff] %v16263_v60  ;;  %v10154_v59 = vld [vmem:[#allocation3 + $0x60] sm:$0xe]  ;;  %v10155_v9 = vld [vmem:[#allocation3 + $0x6c] sm:$0xe] }
 0x4a0   : > { %17198 = vst [vmem:[#allocation56_spill] sm:$0xff] %v16272_v37  ;;  %v16276_v10 = vsel %vm13684_vm15, %v10237_v57, %v10238_v52  ;;  %17201 = vst [vmem:[#allocation59_spill] sm:$0xff] %v16283_v39  ;;  %v16285_v1 = vld [vmem:[#allocation3 + $0x80] sm:$0x1]  ;;  %v10252_v52 = vrot.slane %v16251_v44, 5  ;;  %v11446_v7 = vrot.slane %v10155_v9, 9 }
 0x4a1   : > { %12269 = vmatmul.mubr.msk.bf16.gmra.mrb[28].mxu1 %vm6549_vm3, %v13040_v5  ;;  %17199 = vst [vmem:[#allocation57_spill] sm:$0xff] %v16276_v10  ;;  %v10249_v5 = vrot.slane %v16230_v8, 5  ;;  %17202 = vst [vmem:[#allocation60_spill] sm:$0xff] %v16285_v1  ;;  %v10156_v8 = vld [vmem:[#allocation3 + $0x78] sm:$0xe]  ;;  %v10263_v10 = vrot.slane %v16272_v37, 5 }
 0x4a2   : > { %12274 = vmatprep.mubr.msk.bf16.mxu1 %vm6549_vm3, %v16079_v4  ;;  %v16280_v4 = vsel %vm13684_vm15, %v11443_v0, %v10242_v38  ;;  %17203 = vst [vmem:[#allocation61_spill] sm:$0xff] %v16291_v12  ;;  %v10256_v38 = vrot.slane %v16232_v43, 5  ;;  %v11445_v0 = vrot.slane %v10154_v59, 9  ;;  %v16305_v55 = vld [vmem:[#allocation3 + $0x88] sm:$0xf]  ;;  %v10266_v12 = vrot.slane %v16283_v39, 5 }
 0x4a3   : > { %17200 = vst [vmem:[#allocation58_spill] sm:$0xff] %v16280_v4  ;;  %v10251_v57 = vrot.slane %v10249_v5, 4  ;;  %v16302_v27 = vsel %vm13684_vm15, %v11444_v41, %v10249_v5  ;;  %v16307_v44 = vld [vmem:[#allocation3 + $0x8c] sm:$0x1]  ;;  %v10270_v5 = vrot.slane %v16263_v60, 5  ;;  %v17211_v39 = vshll.u32 %v15863_v62, 16 }
 0x4a4   : > { %17205 = vst [vmem:[#allocation63_spill] sm:$0xff] %v16302_v27  ;;  %v10258_v24 = vrot.slane %v10256_v38, 4  ;;  %17206 = vst [vmem:[#allocation64_spill] sm:$0xff] %v16307_v44  ;;  %v16315_v18 = vsel %vm13684_vm15, %v11445_v0, %v10256_v38  ;;  %v16322_v9 = vld [vmem:[%s16927_s4 + $0x18] sm:$0xf]  ;;  %v10265_v38 = vrot.slane %v10263_v10, 4 }
 0x4a5   : > { %v16311_v59 = vsel %vm13684_vm15, %v10251_v57, %v10252_v52  ;;  %17208 = vst [vmem:[#allocation66_spill] sm:$0xff] %v16315_v18  ;;  %v16324_v41 = vld [vmem:[#allocation3 + $0x98] sm:$0x1]  ;;  %v11447_v57 = vrot.slane %v10156_v8, 9  ;;  %v10157_v0 = vld [vmem:[#allocation3 + $0x84] sm:$0xe] }
 0x4a6   : > { %17207 = vst [vmem:[#allocation65_spill] sm:$0xff] %v16311_v59  ;;  %17209 = vst [vmem:[#allocation67_spill] sm:$0xff] %v16324_v41  ;;  %v16330_v52 = vsel %vm13684_vm15, %v10258_v24, %v10259_v17  ;;  %v16336_v19 = vrot.slane %v17211_v39, 5  ;;  %v10272_v37 = vrot.slane %v10270_v5, 4  ;;  %v10273_v4 = vrot.slane %v16285_v1, 5  ;;  %v17305_v20 = vld [vmem:[#allocation55_spill] sm:$0xff] }
 0x4a7   : > { %17210 = vst [vmem:[#allocation68_spill] sm:$0xff] %v16330_v52  ;;  %v10158_v59 = vld [vmem:[#allocation3 + $0x90] sm:$0xe]  ;;  %v16344_v8 = vld [vmem:[#allocation3 + $0xa0] sm:$0xf]  ;;  %v16354_v39 = vsel %vm13684_vm15, %v10265_v38, %v10266_v12  ;;  %v16358_v24 = vsel %vm13684_vm15, %v11447_v57, %v10270_v5  ;;  %v11448_v12 = vrot.slane %v10157_v0, 9 }
 0x4a8   : > { %17212 = vst [vmem:[#allocation69_spill] sm:$0xff] %v16344_v8  ;;  %v16346_v17 = vld [vmem:[#allocation3 + $0xac] sm:$0xf]  ;;  %17215 = vst [vmem:[#allocation72_spill] sm:$0xff] %v16354_v39  ;;  %v10159_v38 = vld [vmem:[#allocation3 + $0x9c] sm:$0xe] }
 0x4a9   : > { %12275 = vmatmul.mubr.msk.bf16.vlgmr.msra.gmra.mrb[0].mxu1 %vm6549_vm3, %v16100_v63  ;;  %17213 = vst [vmem:[#allocation70_spill] sm:$0xff] %v16346_v17  ;;  %v16350_v63 = vsel %vm13684_vm15, %v11446_v7, %v10263_v10  ;;  %17216 = vst [vmem:[#allocation73_spill] sm:$0xff] %v16358_v24  ;;  %v16369_v10 = vsel %vm13684_vm15, %v10272_v37, %v10273_v4  ;;  %v10284_v7 = vrot.slane %v16298_v3, 5  ;;  %v9460_v5 = vld [vmem:[#allocation3 + $0xb0] sm:$0x1]  ;;  %v10280_v18 = vrot.slane %v16307_v44, 5 }
 0x4aa   : > { %12307 = vmatpush3.bf16.msra.mxu1 %v16227_v51  ;;  %12278 = vmatprep.mubr.msk.bf16.mxu1 %vm6549_vm3, %v16114_v54  ;;  %17214 = vst [vmem:[#allocation71_spill] sm:$0xff] %v16350_v63  ;;  %v10277_v51 = vrot.slane %v16305_v55, 5  ;;  %v16363_v54 = vld [vmem:[#allocation3 + $0xa4] sm:$0x1]  ;;  %17217 = vst [vmem:[#allocation74_spill] sm:$0xff] %v16369_v10  ;;  %v11449_v27 = vrot.slane %v10158_v59, 9 }
 0x4ab   : > { %12969 = vmatprep.subr.msk.bf16.mxu1 %vm6598_vm2, %v16322_v9  ;;  %v10286_v60 = vrot.slane %v10284_v7, 4  ;;  %v10287_v37 = vrot.slane %v16324_v41, 5  ;;  %v10291_v4 = vrot.slane %v16344_v8, 5  ;;  %v10160_v0 = vld [vmem:[#allocation3 + $0xa8] sm:$0xe]  ;;  %v11450_v59 = vrot.slane %v10159_v38, 9 }
 0x4ac   : > { %v10279_v52 = vrot.slane %v10277_v51, 4  ;;  %v16377_v1 = vsel %vm13684_vm15, %v11448_v12, %v10277_v51  ;;  %v16381_v39 = vld [vmem:[#allocation3 + $0xb8] sm:$0xf]  ;;  %v16389_v57 = vsel %vm13684_vm15, %v11449_v27, %v10284_v7  ;;  %v10298_v51 = vrot.slane %v16346_v17, 5  ;;  %v7897_v12 = vld [vmem:[#allocation3 + $0x84] sm:$0xf] }
 0x4ad   : > { %17219 = vst [vmem:[#allocation76_spill] sm:$0xff] %v16389_v57  ;;  %v9463_v10 = vld [vmem:[#allocation3 + $0xbc] sm:$0x1]  ;;  %v16392_v24 = vld [vmem:[#allocation3 + $0xc4] sm:$0xf]  ;;  %v16398_v8 = vsel %vm13684_vm15, %v10286_v60, %v10287_v37  ;;  %v11451_v7 = vrot.slane %v10160_v0, 9  ;;  %v16409_v60 = vsel %vm13684_vm15, %v11450_v59, %v10291_v4 }
 0x4ae   : > { %v16385_v63 = vsel %vm13684_vm15, %v10279_v52, %v10280_v18  ;;  %17220 = vst [vmem:[#allocation77_spill] sm:$0xff] %v16398_v8  ;;  %v10293_v18 = vrot.slane %v10291_v4, 4  ;;  %v10294_v52 = vrot.slane %v16363_v54, 5  ;;  %v10300_v38 = vrot.slane %v10298_v51, 4  ;;  %v10161_v44 = vld [vmem:[#allocation3 + $0xb4] sm:$0xe] }
 0x4af   : > { %17218 = vst [vmem:[#allocation75_spill] sm:$0xff] %v16385_v63  ;;  %v10301_v17 = vrot.slane %v9460_v5, 5  ;;  %v17221_v3 = vshrl.u32 %v15863_v62, 16  ;;  %v9466_v63 = vld [vmem:[#allocation3 + $0xc8] sm:$0x1]  ;;  %v10305_v0 = vrot.slane %v16381_v39, 5  ;;  %v16422_v62 = vsel %vm13684_vm15, %v11451_v7, %v10298_v51 }
 0x4b0   : > { %v16413_v37 = vsel %vm13684_vm15, %v10293_v18, %v10294_v52  ;;  %v10162_v27 = vld [vmem:[#allocation3 + $0xc0] sm:$0xe]  ;;  %v10312_v5 = vrot.slane %v16392_v24, 5  ;;  %v11452_v59 = vrot.slane %v10161_v44, 9  ;;  %v10308_v52 = vrot.slane %v9463_v10, 5 }
 0x4b1   : > { %12279 = vmatmul.mubr.msk.bf16.gmra.mrb[4].mxu1 %vm6549_vm3, %v16136_v47  ;;  %v8147_v41 = vrot.slane %v17221_v3, 4  ;;  %17222 = vst [vmem:[#allocation78_spill] sm:$0xff] %v16413_v37  ;;  %v16426_v3 = vsel %vm13684_vm15, %v10300_v38, %v10301_v17  ;;  %v10307_v18 = vrot.slane %v10305_v0, 4  ;;  %v11453_v8 = vrot.slane %v10162_v27, 9 }
 0x4b2   : > { %12282 = vmatprep.mubr.msk.bf16.mxu1 %vm6549_vm3, %v16153_v15  ;;  %v11468_v4 = vcombine.low %v16422_v62, %v16426_v3  ;;  %v8156_v15 = vshrl.u32 %v7897_v12, 16  ;;  %v10314_v57 = vrot.slane %v10312_v5, 4  ;;  %v10315_v47 = vrot.slane %v9466_v63, 5 }
 0x4b3   : > { %v8165_v37 = vshll.u32 %v15877_v33, 16  ;;  %v8169_v51 = vshrl.u32 %v15877_v33, 16  ;;  %v16435_v17 = vsel %vm13684_vm15, %v11452_v59, %v10305_v0  ;;  %v16439_v7 = vsel %vm13684_vm15, %v10307_v18, %v10308_v52 }
 0x4b4   : > { %v8159_v38 = vshll.u32 %v7897_v12, 16  ;;  %v11469_v44 = vcombine.low %v16435_v17, %v16439_v7  ;;  %v16445_v10 = vsel %vm13684_vm15, %v11453_v8, %v10312_v5  ;;  %v16449_v63 = vsel %vm13684_vm15, %v10314_v57, %v10315_v47 }
 0x4b5   : > { %v17223_v33 = vor.u32 %v16149_v2, %v16147_v34  ;;  %v17224_v0 = vor.u32 %v16168_v61, %v16166_v31  ;;  %v8148_v12 = vor.u32 %v8147_v41, %v16336_v19  ;;  %v11470_v18 = vcombine.low %v16445_v10, %v16449_v63 }
 0x4b6   : > { %v17225_v8 = vsel %vm13293_vm8, %v16145_v32, %v16158_v40  ;;  %v17226_v34 = vsel %vm13293_vm8, %v16140_v36, %v16117_v53  ;;  %v17227_v57 = vshll.u32 %v15833_v21, 16  ;;  %v17228_v41 = vshll.u32 %v15856_v48, 16  ;;  %v7900_v40 = vld [vmem:[#allocation3 + $0x90] sm:$0xf] }
 0x4b7   : > { %v8115_v27 = vrot.slane %v17223_v33, 4  ;;  %v8125_v59 = vrot.slane %v17224_v0, 4  ;;  %v11298_v2 = vcombine.low %v17226_v34, %v17225_v8  ;;  %v8151_v5 = vshll.u32 %v15875_v13, 16 }
 0x4b8   : > { %v8105_v61 = vrot.slane %v17227_v57, 5  ;;  %v8129_v47 = vrot.slane %v17228_v41, 5  ;;  %v16477_v52 = vrot.slane %v8165_v37, 5  ;;  %v8171_v32 = vrot.slane %v8169_v51, 4 }
 0x4b9   : > { %12283 = vmatmul.mubr.msk.bf16.gmra.mrb[8].mxu1 %vm6549_vm3, %v16163_v16  ;;  %v8096_v21 = vsel %vm13293_vm8, %v16176_v22, %v16127_v50  ;;  %v8138_v53 = vor.u32 %v16219_v30, %v16204_v14  ;;  %v8158_v36 = vrot.slane %v8156_v15, 4  ;;  %v8161_v16 = vrot.slane %v8159_v38, 5  ;;  %v7903_v30 = vld [vmem:[#allocation3 + $0x9c] sm:$0xf] }
 0x4ba   : > { %12286 = vmatprep.mubr.msk.bf16.mxu1 %vm6549_vm3, %v11298_v2  ;;  %v8106_v48 = vsel %vm13293_vm8, %v16192_v35, %v8105_v61  ;;  %v8120_v13 = vsel %vm13293_vm8, %v8115_v27, %v16166_v31  ;;  %v8130_v37 = vsel %vm13293_vm8, %v8125_v59, %v8129_v47  ;;  %v8149_v51 = vrot.slane %v8148_v12, 4 }
 0x4bb   : > { %v8180_v33 = vshrl.u32 %v7900_v40, 16  ;;  %v8183_v0 = vshll.u32 %v7900_v40, 16  ;;  %v8189_v50 = vshll.u32 %v15894_v46, 16  ;;  %v8193_v22 = vshrl.u32 %v15894_v46, 16 }
 0x4bc   : > { %v8153_v14 = vrot.slane %v8151_v5, 5  ;;  %v8172_v15 = vor.u32 %v8171_v32, %v16477_v52  ;;  %v8213_v35 = vshll.u32 %v15907_v6, 16  ;;  %v8217_v38 = vshrl.u32 %v15907_v6, 16 }
 0x4bd   : > { %v11299_v8 = vcombine.low %v8096_v21, %v8106_v48  ;;  %v11300_v31 = vcombine.low %v8120_v13, %v8130_v37  ;;  %v8139_v27 = vrot.slane %v8138_v53, 4  ;;  %v8162_v34 = vor.u32 %v8161_v16, %v8158_v36  ;;  %v7906_v48 = vld [vmem:[#allocation3 + $0xa8] sm:$0xf] }
 0x4be   : > { %v8154_v59 = vsel %vm13293_vm8, %v8149_v51, %v8153_v14  ;;  %v8175_v12 = vshll.u32 %v15885_v26, 16  ;;  %v8204_v2 = vshrl.u32 %v7903_v30, 16  ;;  %v8207_v57 = vshll.u32 %v7903_v30, 16 }
 0x4bf   : > { %v8182_v46 = vrot.slane %v8180_v33, 4  ;;  %v8185_v61 = vrot.slane %v8183_v0, 5  ;;  %v8191_v41 = vrot.slane %v8189_v50, 5  ;;  %v8195_v47 = vrot.slane %v8193_v22, 4  ;;  %v7909_v0 = vld [vmem:[#allocation3 + $0xb4] sm:$0xf] }
 0x4c0   : > { %v8173_v5 = vrot.slane %v8172_v15, 4  ;;  %v8215_v32 = vrot.slane %v8213_v35, 5  ;;  %v8219_v6 = vrot.slane %v8217_v38, 4  ;;  %v8144_v40 = vsel %vm13293_vm8, %v8139_v27, %v16336_v19 }
 0x4c1   : > { %12287 = vmatmul.mubr.msk.bf16.gmra.mrb[12].mxu1 %vm6549_vm3, %v11299_v8  ;;  %v8163_v21 = vrot.slane %v8162_v34, 4  ;;  %v11301_v53 = vcombine.low %v8144_v40, %v8154_v59  ;;  %v8177_v26 = vrot.slane %v8175_v12, 5  ;;  %v8206_v36 = vrot.slane %v8204_v2, 4 }
 0x4c2   : > { %12290 = vmatprep.mubr.msk.bf16.mxu1 %vm6549_vm3, %v11300_v31  ;;  %v8209_v16 = vrot.slane %v8207_v57, 5  ;;  %v8186_v13 = vor.u32 %v8185_v61, %v8182_v46  ;;  %v8196_v37 = vor.u32 %v8195_v47, %v8191_v41  ;;  %v8237_v51 = vshll.u32 %v15935_v29, 16 }
 0x4c3   : > { %v8241_v33 = vshrl.u32 %v15935_v29, 16  ;;  %v8178_v50 = vsel %vm13293_vm8, %v8173_v5, %v8177_v26  ;;  %v8220_v22 = vor.u32 %v8219_v6, %v8215_v32  ;;  %v8261_v30 = vshll.u32 %v15947_v42, 16 }
 0x4c4   : > { %v8265_v19 = vshrl.u32 %v15947_v42, 16  ;;  %v8168_v14 = vsel %vm13293_vm8, %v8163_v21, %v16477_v52  ;;  %v8199_v15 = vshll.u32 %v15905_v45, 16  ;;  %v8228_v35 = vshrl.u32 %v7906_v48, 16  ;;  %v7912_v21 = vld [vmem:[#allocation3 + $0xc0] sm:$0xf] }
 0x4c5   : > { %v8231_v38 = vshll.u32 %v7906_v48, 16  ;;  %v8210_v8 = vor.u32 %v8209_v16, %v8206_v36  ;;  %v8223_v29 = vshll.u32 %v15924_v23, 16  ;;  %v8252_v31 = vshrl.u32 %v7909_v0, 16 }
 0x4c6   : > { %v8255_v27 = vshll.u32 %v7909_v0, 16  ;;  %v11302_v34 = vcombine.low %v8168_v14, %v8178_v50  ;;  %v8197_v59 = vrot.slane %v8196_v37, 4  ;;  %v8239_v12 = vrot.slane %v8237_v51, 5 }
 0x4c7   : > { %v8243_v2 = vrot.slane %v8241_v33, 4  ;;  %v8187_v42 = vrot.slane %v8186_v13, 4  ;;  %v8221_v57 = vrot.slane %v8220_v22, 4  ;;  %v8263_v46 = vrot.slane %v8261_v30, 5 }
 0x4c8   : > { %v8267_v61 = vrot.slane %v8265_v19, 4  ;;  %v8201_v45 = vrot.slane %v8199_v15, 5  ;;  %v8230_v52 = vrot.slane %v8228_v35, 4  ;;  %v8233_v47 = vrot.slane %v8231_v38, 5 }
 0x4c9   : > { %12291 = vmatmul.mubr.msk.bf16.gmra.mrb[16].mxu1 %vm6549_vm3, %v11301_v53  ;;  %v8211_v5 = vrot.slane %v8210_v8, 4  ;;  %v8225_v6 = vrot.slane %v8223_v29, 5  ;;  %v8254_v23 = vrot.slane %v8252_v31, 4  ;;  %v8257_v40 = vrot.slane %v8255_v27, 5 }
 0x4ca   : > { %12294 = vmatprep.mubr.msk.bf16.mxu1 %vm6549_vm3, %v11302_v34  ;;  %v8202_v26 = vsel %vm13293_vm8, %v8197_v59, %v8201_v45  ;;  %v8244_v36 = vor.u32 %v8243_v2, %v8239_v12  ;;  %v8285_v53 = vshll.u32 %v15962_v11, 16  ;;  %v8289_v16 = vshrl.u32 %v15962_v11, 16 }
 0x4cb   : > { %v8192_v48 = vsel %vm13293_vm8, %v8187_v42, %v8191_v41  ;;  %v8226_v13 = vsel %vm13293_vm8, %v8221_v57, %v8225_v6  ;;  %v8268_v37 = vor.u32 %v8267_v61, %v8263_v46  ;;  %v8234_v51 = vor.u32 %v8233_v47, %v8230_v52  ;;  %v17229_v61 = vld [vmem:[#allocation26_spill] sm:$0xff] }
 0x4cc   : > { %v8247_v33 = vshll.u32 %v15955_v58, 16  ;;  %v8276_v0 = vshrl.u32 %v7912_v21, 16  ;;  %v8279_v50 = vshll.u32 %v7912_v21, 16  ;;  %v11303_v22 = vcombine.low %v8192_v48, %v8202_v26  ;;  %v17230_v26 = vld [vmem:[#allocation34_spill] sm:$0xff] }
 0x4cd   : > { %v8216_v30 = vsel %vm13293_vm8, %v8211_v5, %v8215_v32  ;;  %v8258_v19 = vor.u32 %v8257_v40, %v8254_v23  ;;  %v8271_v14 = vshll.u32 %v15960_v56, 16  ;;  %v8245_v15 = vrot.slane %v8244_v36, 4 }
 0x4ce   : > { %v11304_v11 = vcombine.low %v8216_v30, %v8226_v13  ;;  %v8287_v35 = vrot.slane %v8285_v53, 5  ;;  %v8291_v41 = vrot.slane %v8289_v16, 4  ;;  %v8269_v38 = vrot.slane %v8268_v37, 4  ;;  %v17231_v53 = vld [vmem:[#allocation33_spill] sm:$0xff] }
 0x4cf   : > { %v8235_v8 = vrot.slane %v8234_v51, 4  ;;  %v8249_v58 = vrot.slane %v8247_v33, 5  ;;  %v8278_v29 = vrot.slane %v8276_v0, 4  ;;  %v8281_v31 = vrot.slane %v8279_v50, 5  ;;  %v8594_v50 = vld [vmem:[#allocation3 + $0x18] sm:$0xe] }
 0x4d0   : > { %v8259_v27 = vrot.slane %v8258_v19, 4  ;;  %v8273_v34 = vrot.slane %v8271_v14, 5  ;;  %v8292_v59 = vor.u32 %v8291_v41, %v8287_v35  ;;  %v8659_v2 = vrot.slane %v16044_v28, 5  ;;  %v8593_v28 = vld [vmem:[#allocation3 + $0xc] sm:$0xe] }
 0x4d1   : > { %12295 = vmatmul.mubr.msk.bf16.gmra.mrb[20].mxu1 %vm6549_vm3, %v11303_v22  ;;  %v8250_v32 = vsel %vm13293_vm8, %v8245_v15, %v8249_v58  ;;  %v8240_v42 = vsel %vm13293_vm8, %v8235_v8, %v8239_v12  ;;  %v8282_v57 = vor.u32 %v8281_v31, %v8278_v29  ;;  %v8295_v45 = vshll.u32 %v17229_v61, 16  ;;  %v17232_v22 = vld [vmem:[#allocation35_spill] sm:$0xff]  ;;  %v11406_v41 = vld [vmem:[%s16927_s4 + $0x1c] sm:$0xf]  ;;  %v17236_v29 = vld [vmem:[#allocation16_spill] sm:$0xff] }
 0x4d2   : > { %12298 = vmatprep.mubr.msk.bf16.mxu1 %vm6549_vm3, %v11304_v11  ;;  %v8274_v56 = vsel %vm13293_vm8, %v8269_v38, %v8273_v34  ;;  %v11305_v52 = vcombine.low %v8240_v42, %v8250_v32  ;;  %v8264_v47 = vsel %vm13293_vm8, %v8259_v27, %v8263_v46  ;;  %v8293_v6 = vrot.slane %v8292_v59, 4  ;;  %v17233_v38 = vld [vmem:[#allocation14_spill] sm:$0xff]  ;;  %v17234_v8 = vld [vmem:[#allocation15_spill] sm:$0xff]  ;;  %v17237_v31 = vld [vmem:[#allocation17_spill] sm:$0xff] }
 0x4d3   : > { %v11306_v5 = vcombine.low %v8264_v47, %v8274_v56  ;;  %v8661_v23 = vrot.slane %v8659_v2, 4  ;;  %v8283_v40 = vrot.slane %v8282_v57, 4  ;;  %v8297_v21 = vrot.slane %v8295_v45, 5  ;;  %v17240_v34 = vld [vmem:[#allocation19_spill] sm:$0xff]  ;;  %v17242_v59 = vld [vmem:[#allocation5_spill] sm:$0xff]  ;;  %v17243_v56 = vld [vmem:[#allocation6_spill] sm:$0xff] }
 0x4d4   : > { %v8662_v36 = vrot.slane %v17230_v26, 5  ;;  %v8666_v16 = vrot.slane %v17231_v53, 5  ;;  %v11324_v48 = vrot.slane %v8593_v28, 9  ;;  %v8669_v30 = vrot.slane %v17232_v22, 5  ;;  %v17245_v42 = vld [vmem:[#allocation7_spill] sm:$0xff]  ;;  %v17246_v57 = vld [vmem:[#allocation8_spill] sm:$0xff] }
 0x4d5   : > { %v8298_v12 = vsel %vm13293_vm8, %v8293_v6, %v8297_v21  ;;  %v8288_v13 = vsel %vm13293_vm8, %v8283_v40, %v8287_v35  ;;  %v11325_v19 = vrot.slane %v8594_v50, 9  ;;  %v9227_v35 = vsel %vm6598_vm2, %v16322_v9, 0  ;;  %v17239_v9 = vld [vmem:[#allocation18_spill] sm:$0xff]  ;;  %v17248_v45 = vld [vmem:[#allocation9_spill] sm:$0xff]  ;;  %v17252_v6 = vld [vmem:[#allocation12_spill] sm:$0xff] }
 0x4d6   : > { %v8663_v46 = vsel %vm13684_vm15, %v8661_v23, %v8662_v36  ;;  %v11307_v37 = vcombine.low %v8288_v13, %v8298_v12  ;;  %v8660_v51 = vsel %vm13684_vm15, %v11324_v48, %v8659_v2  ;;  %v8668_v0 = vrot.slane %v8666_v16, 4  ;;  %v17254_v40 = vld [vmem:[#allocation13_spill] sm:$0xff]  ;;  %v17255_v21 = vld [vmem:[#allocation4_spill] sm:$0xff]  ;;  %v17260_v53 = vld [vmem:[#allocation22_spill] sm:$0xff] }
 0x4d7   : > { %v11341_v33 = vcombine.low %v8660_v51, %v8663_v46  ;;  %v8667_v11 = vsel %vm13684_vm15, %v11325_v19, %v8666_v16  ;;  %v17235_v58 = vcombine.low %v17233_v38, %v17234_v8  ;;  %v17238_v27 = vcombine.low %v17236_v29, %v17237_v31  ;;  %v17257_v26 = vld [vmem:[#allocation20_spill] sm:$0xff]  ;;  %v17258_v36 = vld [vmem:[#allocation21_spill] sm:$0xff]  ;;  %v17261_v16 = vld [vmem:[#allocation23_spill] sm:$0xff] }
 0x4d8   : > { %v8670_v14 = vsel %vm13684_vm15, %v8668_v0, %v8669_v30  ;;  %v17241_v32 = vcombine.low %v17239_v9, %v17240_v34  ;;  %v17244_v2 = vcombine.low %v17242_v59, %v17243_v56  ;;  %v17247_v61 = vcombine.low %v17245_v42, %v17246_v57  ;;  %v17263_v46 = vld [vmem:[#allocation24_spill] sm:$0xff]  ;;  %v17264_v13 = vld [vmem:[#allocation25_spill] sm:$0xff]  ;;  %v17266_v51 = vld [vmem:[#allocation27_spill] sm:$0xff] }
 0x4d9   : > { %12299 = vmatmul.mubr.msk.bf16.gmra.mrb[24].mxu1 %vm6549_vm3, %v11305_v52  ;;  %v11342_v15 = vcombine.low %v8667_v11, %v8670_v14  ;;  %v17249_v52 = vld [vmem:[#allocation10_spill] sm:$0xff]  ;;  %v17256_v28 = vcombine.low %v17254_v40, %v17255_v21  ;;  %v17259_v12 = vcombine.low %v17257_v26, %v17258_v36  ;;  %v17262_v48 = vcombine.low %v17260_v53, %v17261_v16  ;;  %v17269_v50 = vld [vmem:[#allocation29_spill] sm:$0xff]  ;;  %v13041_v19 = vld [vmem:[#allocation3 + $0x18] sm:$0xff]  }
 0x4da   : > { %12302 = vmatprep.mubr.msk.bf16.mxu1 %vm6549_vm3, %v11306_v5  ;;  %v17250_v47 = vcombine.low %v17248_v45, %v17249_v52  ;;  %v17251_v5 = vld [vmem:[#allocation11_spill] sm:$0xff]  ;;  %v17270_v22 = vld [vmem:[#allocation30_spill] sm:$0xff]  ;;  %v17273_v11 = vld [vmem:[#allocation32_spill] sm:$0xff]  ;;  %v9953_v38 = vsel %vm6598_vm2, %v11406_v41, 0 }
 0x4db   : > { %v17253_v23 = vcombine.low %v17251_v5, %v17252_v6  ;;  %v17271_v30 = vcombine.low %v17269_v50, %v17270_v22  ;;  %v17272_v14 = vld [vmem:[#allocation31_spill] sm:$0xff]  ;;  %v13044_v29 = vld [vmem:[#allocation3 + $0x3c] sm:$0xff]   ;;  %v13045_v31 = vld [vmem:[#allocation3 + $0x48] sm:$0xff]  }
 0x4dc   : > { %v13043_v8 = vld [vmem:[#allocation3 + $0x30] sm:$0xff]   ;;  %v13049_v34 = vld [vmem:[#allocation3 + $0x78] sm:$0xff]   ;;  %v9425_v52 = vld [vmem:[#allocation3 + $0x24] sm:$0xf] }
 0x4dd   : > { %v13048_v9 = vld [vmem:[#allocation3 + $0x6c] sm:$0xff]   ;;  %v17275_v57 = vld [vmem:[#allocation36_spill] sm:$0xff]  ;;  %v9495_v40 = vshrl.u32 %v9425_v52, 16  ;;  %v9498_v21 = vshll.u32 %v9425_v52, 16  ;;  %v9552_v52 = vshll.u32 %v16206_v25, 16 }
 0x4de   : > { %v13051_v42 = vld [vmem:[#allocation3 + $0x90] sm:$0xff]   ;;  %v9484_v45 = vshrl.u32 %v17275_v57, 16  ;;  %v13052_v16 = vld [vmem:[#allocation3 + $0x9c] sm:$0xff]  }
 0x4df   : > { %v9428_v53 = vld [vmem:[#allocation3 + $0x30] sm:$0xf] }
 0x4e1   : > { %12303 = vmatmul.mubr.msk.bf16.gmra.mrb[28].mxu1 %vm6549_vm3, %v11307_v37  ;;  %v17265_v37 = vcombine.low %v17263_v46, %v17264_v13 }
 0x4e2   : > { %12308 = vmatprep.mubr.msk.bf16.mxu1 %vm6549_vm3, %v11341_v33  ;;  %v17267_v33 = vld [vmem:[#allocation28_spill] sm:$0xff] }
 0x4e3   : > { %v17268_v0 = vcombine.low %v17266_v51, %v17267_v33  ;;  %v9497_v33 = vrot.slane %v9495_v40, 4 }
 0x4e9   : > { %12309 = vmatmul.mubr.msk.bf16.vlgmr.msra.gmra.mrb[0].mxu1 %vm6549_vm3, %v11342_v15  ;;  %v17274_v15 = vcombine.low %v17272_v14, %v17273_v11  ;;  %v17278_v11 = vld [vmem:[#allocation37_spill] sm:$0xff] }
 0x4ea   : > { %12341 = vmatpush3.bf16.msra.mxu1 %v9227_v35  ;;  %12312 = vmatprep.mubr.msk.bf16.mxu1 %vm6549_vm3, %v17235_v58  ;;  %v13042_v35 = vld [vmem:[#allocation3 + $0x24] sm:$0xff]  }
 0x4eb   : > { %12970 = vmatprep.subr.msk.bf16.mxu1 %vm6598_vm2, %v11406_v41  ;;  %v16631_v58 = vld [vmem:[%s16927_s4 + $0x20] sm:$0xf]  ;;  %v13046_v41 = vld [vmem:[#allocation3 + $0x54] sm:$0xff]  }
 0x4f1   : > { %12313 = vmatmul.mubr.msk.bf16.gmra.mrb[4].mxu1 %vm6549_vm3, %v17238_v27  ;;  %v13047_v27 = vld [vmem:[#allocation3 + $0x60] sm:$0xff]  }
 0x4f2   : > { %12316 = vmatprep.mubr.msk.bf16.mxu1 %vm6549_vm3, %v17241_v32  ;;  %v9422_v32 = vld [vmem:[#allocation3 + $0x18] sm:$0xf] }
 0x4f3   : > { %v9471_v59 = vshrl.u32 %v9422_v32, 16  ;;  %v9474_v56 = vshll.u32 %v9422_v32, 16 }
 0x4f5   : > { %v9476_v5 = vrot.slane %v9474_v56, 5 }
 0x4f9   : > { %12317 = vmatmul.mubr.msk.bf16.gmra.mrb[8].mxu1 %vm6549_vm3, %v17244_v2  ;;  %v13050_v2 = vld [vmem:[#allocation3 + $0x84] sm:$0xff]  }
 0x4fa   : > { %12320 = vmatprep.mubr.msk.bf16.mxu1 %vm6549_vm3, %v17247_v61  ;;  %v9480_v61 = vshll.u32 %v17275_v57, 16  ;;  %v13054_v57 = vld [vmem:[#allocation3 + $0xb4] sm:$0xff]  }
 0x4fc   : > { %v16647_v6 = vrot.slane %v9480_v61, 5 }
 0x501   : > { %12321 = vmatmul.mubr.msk.bf16.gmra.mrb[12].mxu1 %vm6549_vm3, %v17250_v47  ;;  %v9473_v47 = vrot.slane %v9471_v59, 4 }
 0x502   : > { %12324 = vmatprep.mubr.msk.bf16.mxu1 %vm6549_vm3, %v17253_v23  ;;  %v9486_v23 = vrot.slane %v9484_v45, 4 }
 0x504   : > { %v9487_v51 = vor.u32 %v9486_v23, %v16647_v6  ;;  %v13055_v23 = vld [vmem:[#allocation3 + $0xc0] sm:$0xff]  }
 0x509   : > { %12325 = vmatmul.mubr.msk.bf16.gmra.mrb[16].mxu1 %vm6549_vm3, %v17256_v28  ;;  %v17276_v28 = vld [vmem:[#allocation39_spill] sm:$0xff] }
 0x50a   : > { %12328 = vmatprep.mubr.msk.bf16.mxu1 %vm6549_vm3, %v17259_v12  ;;  %v9504_v26 = vshll.u32 %v17276_v28, 16  ;;  %v9508_v36 = vshrl.u32 %v17276_v28, 16  ;;  %v9477_v12 = vor.u32 %v9476_v5, %v9473_v47  ;;  %v9556_v47 = vshrl.u32 %v16206_v25, 16  ;;  %v9434_v5 = vld [vmem:[#allocation3 + $0x48] sm:$0xf] }
 0x50b   : > { %v16677_v25 = vld [vmem:[#allocation3 + $0xd4] sm:$0x1] }
 0x50c   : > { %v16655_v50 = vrot.slane %v9504_v26, 5  ;;  %v9510_v22 = vrot.slane %v9508_v36, 4  ;;  %v9478_v14 = vrot.slane %v9477_v12, 4  ;;  %v17281_v26 = vld [vmem:[#allocation42_spill] sm:$0xff] }
 0x50d   : > { %v9576_v36 = vshll.u32 %v17281_v26, 16  ;;  %v9580_v12 = vshrl.u32 %v17281_v26, 16 }
 0x50e   : > { %v9483_v56 = vsel %vm13293_vm8, %v9478_v14, %v16647_v6 }
 0x511   : > { %12329 = vmatmul.mubr.msk.bf16.gmra.mrb[20].mxu1 %vm6549_vm3, %v17262_v48  ;;  %v17277_v48 = vld [vmem:[#allocation38_spill] sm:$0xff] }
 0x512   : > { %12332 = vmatprep.mubr.msk.bf16.mxu1 %vm6549_vm3, %v17265_v37  ;;  %v9528_v46 = vshll.u32 %v17277_v48, 16  ;;  %v9532_v13 = vshrl.u32 %v17277_v48, 16  ;;  %v13053_v37 = vld [vmem:[#allocation3 + $0xa8] sm:$0xff]  }
 0x519   : > { %12333 = vmatmul.mubr.msk.bf16.gmra.mrb[24].mxu1 %vm6549_vm3, %v17268_v0  ;;  %v9500_v0 = vrot.slane %v9498_v21, 5  ;;  %v17280_v21 = vld [vmem:[#allocation41_spill] sm:$0xff] }
 0x51a   : > { %12336 = vmatprep.mubr.msk.bf16.mxu1 %vm6549_vm3, %v17271_v30  ;;  %v9519_v30 = vshrl.u32 %v9428_v53, 16  ;;  %v9538_v28 = vshll.u32 %v17280_v21, 16 }
 0x521   : > { %12337 = vmatmul.mubr.msk.bf16.gmra.mrb[28].mxu1 %vm6549_vm3, %v17274_v15  ;;  %v9490_v15 = vshll.u32 %v17278_v11, 16  ;;  %v9570_v11 = vshll.u32 %v9434_v5, 16 }
 0x522   : > { %12342 = vmatprep.mubr.msk.bf16.mxu1 %vm6549_vm3, %v13041_v19  ;;  %v9522_v19 = vshll.u32 %v9428_v53, 16 }
 0x524   : > { %v9524_v32 = vrot.slane %v9522_v19, 5  ;;  %v9558_v19 = vrot.slane %v9556_v47, 4 }
 0x529   : > { %12343 = vmatmul.mubr.msk.bf16.vlgmr.msra.gmra.mrb[0].mxu1 %vm6549_vm3, %v13042_v35  ;;  %v9431_v35 = vld [vmem:[#allocation3 + $0x3c] sm:$0xf] }
 0x52a   : > { %12375 = vmatpush3.bf16.msra.mxu1 %v9953_v38  ;;  %12346 = vmatprep.mubr.msk.bf16.mxu1 %vm6549_vm3, %v13043_v8  ;;  %v17279_v38 = vld [vmem:[#allocation40_spill] sm:$0xff]  ;;  %v9543_v59 = vshrl.u32 %v9431_v35, 16 }
 0x52b   : > { %12971 = vmatprep.subr.msk.bf16.mxu1 %vm6598_vm2, %v16631_v58  ;;  %v9514_v8 = vshll.u32 %v17279_v38, 16  ;;  %v9437_v38 = vld [vmem:[#allocation3 + $0x54] sm:$0xf] }
 0x52c   : > { %v9545_v48 = vrot.slane %v9543_v59, 4  ;;  %v9594_v47 = vshll.u32 %v9437_v38, 16 }
 0x52d   : > { %v9516_v61 = vrot.slane %v9514_v8, 5 }
 0x531   : > { %12347 = vmatmul.mubr.msk.bf16.gmra.mrb[4].mxu1 %vm6549_vm3, %v13044_v29  ;;  %v16660_v29 = vrot.slane %v9528_v46, 5  ;;  %v16675_v46 = vld [vmem:[#allocation3 + $0xd0] sm:$0xf] }
 0x532   : > { %12350 = vmatprep.mubr.msk.bf16.mxu1 %vm6549_vm3, %v13045_v31  ;;  %v9534_v31 = vrot.slane %v9532_v13, 4 }
 0x534   : > { %v9535_v45 = vor.u32 %v9534_v31, %v16660_v29  ;;  %v13056_v31 = vld [vmem:[#allocation3 + $0xcc] sm:$0xff]  }
 0x539   : > { %12351 = vmatmul.mubr.msk.bf16.gmra.mrb[8].mxu1 %vm6549_vm3, %v13046_v41  ;;  %v9488_v41 = vrot.slane %v9487_v51, 4  ;;  %v10163_v51 = vld [vmem:[#allocation3 + $0xcc] sm:$0xe] }
 0x53a   : > { %12354 = vmatprep.mubr.msk.bf16.mxu1 %vm6549_vm3, %v13047_v27  ;;  %v9501_v27 = vor.u32 %v9500_v0, %v9497_v33  ;;  %v10319_v33 = vrot.slane %v16675_v46, 5  ;;  %v10322_v0 = vrot.slane %v16677_v25, 5  ;;  %v11454_v14 = vrot.slane %v10163_v51, 9  ;;  %v9443_v51 = vld [vmem:[#allocation3 + $0x6c] sm:$0xf] }
 0x53c   : > { %v9502_v40 = vrot.slane %v9501_v27, 4  ;;  %v10321_v8 = vrot.slane %v10319_v33, 4 }
 0x53e   : > { %v9507_v49 = vsel %vm13293_vm8, %v9502_v40, %v16655_v50 }
 0x541   : > { %12355 = vmatmul.mubr.msk.bf16.gmra.mrb[12].mxu1 %vm6549_vm3, %v13048_v9  ;;  %v9511_v9 = vor.u32 %v9510_v22, %v16655_v50  ;;  %v9536_v22 = vrot.slane %v9535_v45, 4 }
 0x542   : > { %12358 = vmatprep.mubr.msk.bf16.mxu1 %vm6549_vm3, %v13049_v34  ;;  %v9521_v34 = vrot.slane %v9519_v30, 4  ;;  %v16682_v30 = vrot.slane %v9552_v52, 5  ;;  %v9591_v52 = vshrl.u32 %v9437_v38, 16  ;;  %v9624_v38 = vshll.u32 %v16232_v43, 16 }
 0x543   : > { %v9512_v53 = vrot.slane %v9511_v9, 4  ;;  %v9540_v9 = vrot.slane %v9538_v28, 5  ;;  %v17283_v28 = vld [vmem:[#allocation47_spill] sm:$0xff] }
 0x544   : > { %v9600_v26 = vshll.u32 %v17283_v28, 16  ;;  %v9593_v40 = vrot.slane %v9591_v52, 4 }
 0x545   : > { %v9517_v27 = vsel %vm13293_vm8, %v9512_v53, %v9516_v61  ;;  %v9541_v61 = vsel %vm13293_vm8, %v9536_v22, %v9540_v9  ;;  %v9642_v9 = vshll.u32 %v9443_v51, 16 }
 0x549   : > { %12359 = vmatmul.mubr.msk.bf16.gmra.mrb[16].mxu1 %vm6549_vm3, %v13050_v2  ;;  %v9492_v2 = vrot.slane %v9490_v15, 5  ;;  %v16684_v15 = vrot.slane %v9576_v36, 5  ;;  %v10682_v36 = vld [vmem:[%s16928_s5] sm:$0xff] }
 0x54a   : > { %12362 = vmatprep.mubr.msk.bf16.mxu1 %vm6549_vm3, %v13051_v42  ;;  %v9546_v42 = vshll.u32 %v9431_v35, 16  ;;  %v9582_v35 = vrot.slane %v9580_v12, 4  ;;  %v11408_v12 = vcombine.low %v9507_v49, %v9517_v27  ;;  %10685 = vperm.xlu1 %12981, %v10682_v36   ;;  %v9639_v27 = vshrl.u32 %v9443_v51, 16 }
 0x54b   : > { %v9493_v6 = vsel %vm13293_vm8, %v9488_v41, %v9492_v2  ;;  %v17282_v2 = vld [vmem:[#allocation43_spill] sm:$0xff]  ;;  %v9644_v36 = vrot.slane %v9642_v9, 5 }
 0x54c   : > { %v9548_v13 = vrot.slane %v9546_v42, 5  ;;  %v11407_v41 = vcombine.low %v9483_v56, %v9493_v6  ;;  %v9562_v42 = vshll.u32 %v17282_v2, 16  ;;  %v9583_v21 = vor.u32 %v9582_v35, %v16684_v15  ;;  %v17285_v2 = vld [vmem:[#allocation56_spill] sm:$0xff] }
 0x54e   : > { %v9549_v59 = vor.u32 %v9548_v13, %v9545_v48  ;;  %v9564_v53 = vrot.slane %v9562_v42, 5  ;;  %v9440_v48 = vld [vmem:[#allocation3 + $0x60] sm:$0xf]  ;;  %v9648_v42 = vshll.u32 %v17285_v2, 16 }
 0x54f   : > { %v9615_v35 = vshrl.u32 %v9440_v48, 16 }
 0x550   : > { %v9550_v50 = vrot.slane %v9549_v59, 4 }
 0x551   : > { %12363 = vmatmul.mubr.msk.bf16.gmra.mrb[20].mxu1 %vm6549_vm3, %v13052_v16  ;;  %v9525_v16 = vor.u32 %v9524_v32, %v9521_v34  ;;  %v16690_v34 = vsel %vm13684_vm15, %v11454_v14, %v10319_v33  ;;  %v10690_v33 = vld [vmem:[%s16929_s6] sm:$0xff] }
 0x552   : > { %12366 = vmatprep.mubr.msk.bf16.mxu1 %vm6549_vm3, %v13053_v37  ;;  %v9567_v37 = vshrl.u32 %v9434_v5, 16  ;;  %v9559_v5 = vor.u32 %v9558_v19, %v16682_v30  ;;  %v9584_v19 = vrot.slane %v9583_v21, 4  ;;  %v17284_v14 = vld [vmem:[#allocation46_spill] sm:$0xff]  ;;  %10693 = vperm.xlu1 %12981, %v10690_v33   ;;  %v9555_v52 = vsel %vm13293_vm8, %v9550_v50, %v16682_v30  ;;  %v9446_v50 = vld [vmem:[#allocation3 + $0x78] sm:$0xf] }
 0x553   : > { %v9526_v32 = vrot.slane %v9525_v16, 4  ;;  %v9604_v16 = vshrl.u32 %v17283_v28, 16  ;;  %v9617_v21 = vrot.slane %v9615_v35, 4  ;;  %v9641_v30 = vrot.slane %v9639_v27, 4 }
 0x554   : > { %v9569_v45 = vrot.slane %v9567_v37, 4  ;;  %v9596_v37 = vrot.slane %v9594_v47, 5  ;;  %v9663_v27 = vshrl.u32 %v9446_v50, 16  ;;  %v9666_v9 = vshll.u32 %v9446_v50, 16  ;;  %v17291_v50 = vld [vmem:[#allocation60_spill] sm:$0xff] }
 0x555   : > { %v9531_v6 = vsel %vm13293_vm8, %v9526_v32, %v16660_v29  ;;  %v16720_v29 = vrot.slane %v9600_v26, 5  ;;  %v10423_v32 = vsel %vm6598_vm2, %v16631_v58, 0  ;;  %v16735_v58 = vrot.slane %v9624_v38, 5 }
 0x556   : > { %v11409_v13 = vcombine.low %v9531_v6, %v9541_v61  ;;  %v9597_v59 = vor.u32 %v9596_v37, %v9593_v40  ;;  %v17287_v40 = vld [vmem:[#allocation54_spill] sm:$0xff]  ;;  %v9645_v38 = vor.u32 %v9644_v36, %v9641_v30 }
 0x557   : > { %v9672_v37 = vshll.u32 %v17287_v40, 16  ;;  %v9676_v51 = vshrl.u32 %v17287_v40, 16  ;;  %v9682_v40 = vshll.u32 %v17291_v50, 16 }
 0x559   : > { %12367 = vmatmul.mubr.msk.bf16.gmra.mrb[24].mxu1 %vm6549_vm3, %v13054_v57  ;;  %v16695_v57 = vsel %vm13684_vm15, %v10321_v8, %v10322_v0  ;;  %v9560_v0 = vrot.slane %v9559_v5, 4  ;;  %v9628_v8 = vshrl.u32 %v16232_v43, 16  ;;  %v17286_v5 = vld [vmem:[#allocation51_spill] sm:$0xff] }
 0x55a   : > { %12370 = vmatprep.mubr.msk.bf16.mxu1 %vm6549_vm3, %v13055_v23  ;;  %v11471_v56 = vcombine.low %v16690_v34, %v16695_v57  ;;  %v9572_v23 = vrot.slane %v9570_v11, 5  ;;  %v9586_v11 = vshll.u32 %v17284_v14, 16 }
 0x55b   : > { %v9565_v43 = vsel %vm13293_vm8, %v9560_v0, %v9564_v53  ;;  %v9630_v49 = vrot.slane %v9628_v8, 4  ;;  %v9598_v53 = vrot.slane %v9597_v59, 4  ;;  %v9449_v8 = vld [vmem:[#allocation3 + $0x84] sm:$0xf]  ;;  %v9696_v59 = vshll.u32 %v16305_v55, 16 }
 0x55c   : > { %v9573_v22 = vor.u32 %v9572_v23, %v9569_v45  ;;  %v9652_v45 = vshrl.u32 %v17285_v2, 16  ;;  %v9588_v61 = vrot.slane %v9586_v11, 5  ;;  %v9610_v23 = vshll.u32 %v17286_v5, 16  ;;  %v17289_v5 = vld [vmem:[#allocation59_spill] sm:$0xff] }
 0x55d   : > { %v9631_v0 = vor.u32 %v9630_v49, %v16735_v58  ;;  %v9700_v2 = vshrl.u32 %v16305_v55, 16  ;;  %v9668_v49 = vrot.slane %v9666_v9, 5 }
 0x55e   : > { %v9574_v47 = vrot.slane %v9573_v22, 4  ;;  %v9589_v6 = vsel %vm13293_vm8, %v9584_v19, %v9588_v61  ;;  %v9612_v33 = vrot.slane %v9610_v23, 5  ;;  %v17288_v22 = vld [vmem:[#allocation52_spill] sm:$0xff]  ;;  %v9646_v61 = vrot.slane %v9645_v38, 4 }
 0x55f   : > { %v9634_v14 = vshll.u32 %v17288_v22, 16  ;;  %v9658_v23 = vshll.u32 %v17289_v5, 16  ;;  %v9455_v38 = vld [vmem:[#allocation3 + $0x9c] sm:$0xf] }
 0x561   : > { %12371 = vmatmul.mubr.msk.bf16.gmra.mrb[28].mxu1 %vm6549_vm3, %v13056_v31  ;;  %v9606_v31 = vrot.slane %v9604_v16, 4  ;;  %v16741_v16 = vrot.slane %v9648_v42, 5  ;;  %v9632_v42 = vrot.slane %v9631_v0, 4 }
 0x562   : > { %12376 = vmatprep.mubr.msk.bf16.mxu1 %vm6549_vm3, %v11407_v41  ;;  %v9618_v41 = vshll.u32 %v9440_v48, 16  ;;  %v11410_v48 = vcombine.low %v9555_v52, %v9565_v43  ;;  %v9687_v52 = vshrl.u32 %v9449_v8, 16  ;;  %v9690_v43 = vshll.u32 %v9449_v8, 16 }
 0x563   : > { %v9607_v28 = vor.u32 %v9606_v31, %v16720_v29  ;;  %v9603_v31 = vsel %vm13293_vm8, %v9598_v53, %v16720_v29  ;;  %v16766_v53 = vrot.slane %v9696_v59, 5  ;;  %v17292_v59 = vld [vmem:[#allocation64_spill] sm:$0xff] }
 0x564   : > { %v9620_v26 = vrot.slane %v9618_v41, 5 }
 0x565   : > { %v9608_v11 = vrot.slane %v9607_v28, 4  ;;  %v9452_v28 = vld [vmem:[#allocation3 + $0x90] sm:$0xf] }
 0x566   : > { %v9621_v35 = vor.u32 %v9620_v26, %v9617_v21  ;;  %v9665_v21 = vrot.slane %v9663_v27, 4  ;;  %v17290_v26 = vld [vmem:[#allocation62_spill] sm:$0xff]  ;;  %v9711_v0 = vshrl.u32 %v9452_v28, 16  ;;  %v9714_v22 = vshll.u32 %v9452_v28, 16 }
 0x567   : > { %v9613_v29 = vsel %vm13293_vm8, %v9608_v11, %v9612_v33  ;;  %v9720_v55 = vshll.u32 %v17290_v26, 16  ;;  %v9724_v30 = vshrl.u32 %v17290_v26, 16  ;;  %v9660_v33 = vrot.slane %v9658_v23, 5  ;;  %v9458_v28 = vld [vmem:[#allocation3 + $0xa8] sm:$0xf] }
 0x569   : > { %12377 = vmatmul.mubr.msk.bf16.vlgmr.msra.gmra.mrb[0].mxu1 %vm6549_vm3, %v11408_v12  ;;  %v9654_v12 = vrot.slane %v9652_v45, 4  ;;  %v9636_v45 = vrot.slane %v9634_v14, 5  ;;  %v16774_v11 = vrot.slane %v9720_v55, 5  ;;  %v17294_v55 = vld [vmem:[#allocation67_spill] sm:$0xff] }
 0x56a   : > { %12409 = vmatpush3.bf16.msra.mxu1 %v10423_v32  ;;  %12380 = vmatprep.mubr.msk.bf16.mxu1 %vm6549_vm3, %v11409_v13  ;;  %v9579_v13 = vsel %vm13293_vm8, %v9574_v47, %v16684_v15  ;;  %v16754_v32 = vrot.slane %v9672_v37, 5  ;;  %v9678_v15 = vrot.slane %v9676_v51, 4  ;;  %v9622_v47 = vrot.slane %v9621_v35, 4 }
 0x56b   : > { %v11411_v19 = vcombine.low %v9579_v13, %v9589_v6  ;;  %v9655_v41 = vor.u32 %v9654_v12, %v16741_v16  ;;  %v9702_v12 = vrot.slane %v9700_v2, 4  ;;  %v9689_v37 = vrot.slane %v9687_v52, 4 }
 0x56c   : > { %v9679_v6 = vor.u32 %v9678_v15, %v16754_v32  ;;  %v9692_v51 = vrot.slane %v9690_v43, 5  ;;  %v11412_v13 = vcombine.low %v9603_v31, %v9613_v29  ;;  %v9627_v14 = vsel %vm13293_vm8, %v9622_v47, %v16735_v58 }
 0x56d   : > { %v9656_v36 = vrot.slane %v9655_v41, 4  ;;  %v9726_v35 = vrot.slane %v9724_v30, 4  ;;  %v9703_v9 = vor.u32 %v9702_v12, %v16766_v53  ;;  %v9651_v31 = vsel %vm13293_vm8, %v9646_v61, %v16741_v16 }
 0x56e   : > { %v9680_v27 = vrot.slane %v9679_v6, 4  ;;  %v9684_v15 = vrot.slane %v9682_v40, 5  ;;  %v9693_v58 = vor.u32 %v9692_v51, %v9689_v37  ;;  %v9706_v2 = vshll.u32 %v17292_v59, 16 }
 0x56f   : > { %v9661_v41 = vsel %vm13293_vm8, %v9656_v36, %v9660_v33  ;;  %v9735_v52 = vshrl.u32 %v9455_v38, 16  ;;  %v9738_v43 = vshll.u32 %v9455_v38, 16  ;;  %v9727_v5 = vor.u32 %v9726_v35, %v16774_v11  ;;  %v17295_v36 = vld [vmem:[#allocation70_spill] sm:$0xff] }
 0x570   : > { %v11414_v29 = vcombine.low %v9651_v31, %v9661_v41  ;;  %v9685_v23 = vsel %vm13293_vm8, %v9680_v27, %v9684_v15  ;;  %v9708_v26 = vrot.slane %v9706_v2, 5  ;;  %v9730_v30 = vshll.u32 %v17294_v55, 16  ;;  %v9461_v27 = vld [vmem:[#allocation3 + $0xb4] sm:$0xf] }
 0x571   : > { %12381 = vmatmul.mubr.msk.bf16.gmra.mrb[4].mxu1 %vm6549_vm3, %v11410_v48  ;;  %v9637_v48 = vsel %vm13293_vm8, %v9632_v42, %v9636_v45  ;;  %v9713_v42 = vrot.slane %v9711_v0, 4  ;;  %v9716_v45 = vrot.slane %v9714_v22, 5  ;;  %v9768_v6 = vshll.u32 %v17295_v36, 16 }
 0x572   : > { %12384 = vmatprep.mubr.msk.bf16.mxu1 %vm6549_vm3, %v11411_v19  ;;  %v9669_v19 = vor.u32 %v9668_v49, %v9665_v21  ;;  %v11413_v8 = vcombine.low %v9627_v14, %v9637_v48  ;;  %v9704_v21 = vrot.slane %v9703_v9, 4  ;;  %v17293_v49 = vld [vmem:[#allocation69_spill] sm:$0xff]  ;;  %v9772_v12 = vshrl.u32 %v17295_v36, 16  ;;  %v9467_v36 = vld [vmem:[#allocation3 + $0xcc] sm:$0xf] }
 0x573   : > { %v9744_v16 = vshll.u32 %v17293_v49, 16  ;;  %v9748_v61 = vshrl.u32 %v17293_v49, 16  ;;  %v9694_v48 = vrot.slane %v9693_v58, 4  ;;  %v9717_v50 = vor.u32 %v9716_v45, %v9713_v42 }
 0x574   : > { %v9670_v47 = vrot.slane %v9669_v19, 4  ;;  %v9737_v40 = vrot.slane %v9735_v52, 4  ;;  %v9740_v37 = vrot.slane %v9738_v43, 5  ;;  %v9759_v33 = vshrl.u32 %v9458_v28, 16 }
 0x575   : > { %v9762_v0 = vshll.u32 %v9458_v28, 16  ;;  %v9709_v14 = vsel %vm13293_vm8, %v9704_v21, %v9708_v26  ;;  %v16798_v19 = vrot.slane %v9744_v16, 5  ;;  %v9750_v35 = vrot.slane %v9748_v61, 4  ;;  %v13096_v61 = vld [vmem:[#allocation3 + $0xb0] sm:$0x1] }
 0x576   : > { %v9675_v51 = vsel %vm13293_vm8, %v9670_v47, %v16754_v32  ;;  %v9732_v38 = vrot.slane %v9730_v30, 5  ;;  %v9774_v41 = vrot.slane %v9772_v12, 4  ;;  %v9699_v32 = vsel %vm13293_vm8, %v9694_v48, %v16766_v53  ;;  %v9464_v47 = vld [vmem:[#allocation3 + $0xc0] sm:$0xf] }
 0x577   : > { %v11415_v22 = vcombine.low %v9675_v51, %v9685_v23  ;;  %v9718_v9 = vrot.slane %v9717_v50, 4  ;;  %v9741_v31 = vor.u32 %v9740_v37, %v9737_v40  ;;  %v9754_v15 = vshll.u32 %v16363_v54, 16 }
 0x578   : > { %v11416_v58 = vcombine.low %v9699_v32, %v9709_v14  ;;  %v9761_v2 = vrot.slane %v9759_v33, 4  ;;  %v9764_v42 = vrot.slane %v9762_v0, 5  ;;  %v9751_v45 = vor.u32 %v9750_v35, %v16798_v19 }
 0x579   : > { %12385 = vmatmul.mubr.msk.bf16.gmra.mrb[8].mxu1 %vm6549_vm3, %v11412_v13  ;;  %v9728_v13 = vrot.slane %v9727_v5, 4  ;;  %v9783_v52 = vshrl.u32 %v9461_v27, 16  ;;  %v9792_v43 = vshll.u32 %v16381_v39, 16  ;;  %v9786_v5 = vshll.u32 %v9461_v27, 16 }
 0x57a   : > { %12388 = vmatprep.mubr.msk.bf16.mxu1 %vm6549_vm3, %v11413_v8  ;;  %v16801_v8 = vrot.slane %v9768_v6, 5  ;;  %v9816_v23 = vshll.u32 %v16392_v24, 16  ;;  %v9820_v54 = vshrl.u32 %v16392_v24, 16  ;;  %v9723_v21 = vsel %vm13293_vm8, %v9718_v9, %v16774_v11 }
 0x57b   : > { %v9733_v59 = vsel %vm13293_vm8, %v9728_v13, %v9732_v38  ;;  %v9742_v49 = vrot.slane %v9741_v31, 4  ;;  %v9756_v16 = vrot.slane %v9754_v15, 5  ;;  %v9778_v28 = vshll.u32 %v13096_v61, 16  ;;  %v13097_v15 = vld [vmem:[#allocation3 + $0xbc] sm:$0x1] }
 0x57c   : > { %v9775_v53 = vor.u32 %v9774_v41, %v16801_v8  ;;  %v11417_v26 = vcombine.low %v9723_v21, %v9733_v59  ;;  %v9765_v55 = vor.u32 %v9764_v42, %v9761_v2  ;;  %v9807_v30 = vshrl.u32 %v9464_v47, 16 }
 0x57d   : > { %v9752_v6 = vrot.slane %v9751_v45, 4  ;;  %v9785_v12 = vrot.slane %v9783_v52, 4  ;;  %v9794_v48 = vrot.slane %v9792_v43, 5  ;;  %v9788_v40 = vrot.slane %v9786_v5, 5 }
 0x57e   : > { %v9776_v24 = vrot.slane %v9775_v53, 4  ;;  %v9818_v37 = vrot.slane %v9816_v23, 5  ;;  %v9822_v51 = vrot.slane %v9820_v54, 4  ;;  %v9831_v11 = vshrl.u32 %v9467_v36, 16 }
 0x57f   : > { %v9834_v13 = vshll.u32 %v9467_v36, 16  ;;  %v9840_v33 = vshll.u32 %v16675_v46, 16  ;;  %v9844_v0 = vshrl.u32 %v16675_v46, 16  ;;  %v9780_v14 = vrot.slane %v9778_v28, 5 }
 0x580   : > { %v9809_v35 = vrot.slane %v9807_v30, 4  ;;  %v9747_v41 = vsel %vm13293_vm8, %v9742_v49, %v16798_v19  ;;  %v9757_v27 = vsel %vm13293_vm8, %v9752_v6, %v9756_v16  ;;  %v9789_v31 = vor.u32 %v9788_v40, %v9785_v12 }
 0x581   : > { %12389 = vmatmul.mubr.msk.bf16.gmra.mrb[12].mxu1 %vm6549_vm3, %v11414_v29  ;;  %v9796_v29 = vshrl.u32 %v16381_v39, 16  ;;  %v9810_v39 = vshll.u32 %v9464_v47, 16  ;;  %v9781_v9 = vsel %vm13293_vm8, %v9776_v24, %v9780_v14  ;;  %v9823_v59 = vor.u32 %v9822_v51, %v9818_v37  ;;  %v17303_v14 = vld [vmem:[#allocation53_spill] sm:$0xff] }
 0x582   : > { %12392 = vmatprep.mubr.msk.bf16.mxu1 %vm6549_vm3, %v11415_v22  ;;  %v9766_v22 = vrot.slane %v9765_v55, 4  ;;  %v9833_v46 = vrot.slane %v9831_v11, 4  ;;  %v9836_v2 = vrot.slane %v9834_v13, 5  ;;  %v9842_v42 = vrot.slane %v9840_v33, 5  ;;  %v17297_v11 = vld [vmem:[#allocation45_spill] sm:$0xff]  ;;  %v17300_v33 = vld [vmem:[#allocation50_spill] sm:$0xff] }
 0x583   : > { %v9798_v50 = vrot.slane %v9796_v29, 4  ;;  %v9812_v38 = vrot.slane %v9810_v39, 5  ;;  %v9846_v45 = vrot.slane %v9844_v0, 4  ;;  %v11418_v52 = vcombine.low %v9747_v41, %v9757_v27  ;;  %v13098_v29 = vld [vmem:[#allocation3 + $0xc8] sm:$0x1] }
 0x584   : > { %v9771_v19 = vsel %vm13293_vm8, %v9766_v22, %v16801_v8  ;;  %v9826_v47 = vshll.u32 %v13098_v29, 16  ;;  %v9824_v54 = vrot.slane %v9823_v59, 4  ;;  %v9790_v21 = vrot.slane %v9789_v31, 4  ;;  %v17302_v22 = vld [vmem:[#allocation49_spill] sm:$0xff]  ;;  %v17308_v27 = vld [vmem:[#allocation58_spill] sm:$0xff]  ;;  %v17311_v31 = vld [vmem:[#allocation63_spill] sm:$0xff] }
 0x585   : > { %v9799_v32 = vor.u32 %v9798_v50, %v9794_v48  ;;  %v9813_v43 = vor.u32 %v9812_v38, %v9809_v35  ;;  %v11419_v53 = vcombine.low %v9771_v19, %v9781_v9  ;;  %v9837_v49 = vor.u32 %v9836_v2, %v9833_v46  ;;  %v17306_v38 = vld [vmem:[#allocation57_spill] sm:$0xff]  ;;  %v17314_v59 = vld [vmem:[#allocation66_spill] sm:$0xff]  ;;  %v17315_v46 = vld [vmem:[#allocation68_spill] sm:$0xff] }
 0x586   : > { %v9847_v16 = vor.u32 %v9846_v45, %v9842_v42  ;;  %v9850_v61 = vshll.u32 %v16677_v25, 16  ;;  %v9795_v30 = vsel %vm13293_vm8, %v9790_v21, %v9794_v48  ;;  %v17296_v48 = vld [vmem:[#allocation44_spill] sm:$0xff]  ;;  %v17304_v35 = vcombine.low %v17302_v22, %v17303_v14  ;;  %v17320_v19 = vld [vmem:[#allocation73_spill] sm:$0xff]  ;;  %v17328_v21 = vld [vmem:[#allocation78_spill] sm:$0xff] }
 0x587   : > { %v9800_v5 = vrot.slane %v9799_v32, 4  ;;  %v9814_v28 = vrot.slane %v9813_v43, 4  ;;  %v9838_v39 = vrot.slane %v9837_v49, 4  ;;  %v17298_v13 = vcombine.low %v17296_v48, %v17297_v11  ;;  %v17309_v32 = vld [vmem:[#allocation61_spill] sm:$0xff]  ;;  %v17318_v45 = vld [vmem:[#allocation72_spill] sm:$0xff]  ;;  %v17321_v43 = vld [vmem:[#allocation74_spill] sm:$0xff] }
 0x588   : > { %v9848_v36 = vrot.slane %v9847_v16, 4  ;;  %v9852_v6 = vrot.slane %v9850_v61, 5  ;;  %v17307_v41 = vcombine.low %v17305_v20, %v17306_v38  ;;  %v17310_v9 = vcombine.low %v17308_v27, %v17309_v32 }
 0x589   : > { %12393 = vmatmul.mubr.msk.bf16.gmra.mrb[16].mxu1 %vm6549_vm3, %v11416_v58  ;;  %v9802_v58 = vshll.u32 %v13097_v15, 16  ;;  %v9819_v50 = vsel %vm13293_vm8, %v9814_v28, %v9818_v37  ;;  %v9843_v25 = vsel %vm13293_vm8, %v9838_v39, %v9842_v42  ;;  %v17299_v37 = vld [vmem:[#allocation48_spill] sm:$0xff]  ;;  %v17312_v15 = vld [vmem:[#allocation65_spill] sm:$0xff]  ;;  %v17316_v2 = vcombine.low %v17314_v59, %v17315_v46  ;;  %v17317_v42 = vld [vmem:[#allocation71_spill] sm:$0xff] }
 0x58a   : > { %12396 = vmatprep.mubr.msk.bf16.mxu1 %vm6549_vm3, %v11417_v26  ;;  %v9828_v26 = vrot.slane %v9826_v47, 5  ;;  %v9853_v40 = vsel %vm13293_vm8, %v9848_v36, %v9852_v6  ;;  %v17301_v0 = vcombine.low %v17299_v37, %v17300_v33  ;;  %v17322_v29 = vcombine.low %v17320_v19, %v17321_v43  ;;  %v17323_v47 = vld [vmem:[#allocation75_spill] sm:$0xff] }
 0x58b   : > { %v9804_v23 = vrot.slane %v9802_v58, 5  ;;  %v11422_v51 = vcombine.low %v9843_v25, %v9853_v40  ;;  %v17313_v58 = vcombine.low %v17311_v31, %v17312_v15  ;;  %v17329_v49 = vcombine.low %v16409_v60, %v17328_v21 }
 0x58c   : > { %v9829_v55 = vsel %vm13293_vm8, %v9824_v54, %v9828_v26 }
 0x58d   : > { %v9805_v8 = vsel %vm13293_vm8, %v9800_v5, %v9804_v23  ;;  %v11421_v24 = vcombine.low %v9819_v50, %v9829_v55  ;;  %v17325_v5 = vld [vmem:[#allocation76_spill] sm:$0xff]  ;;  %v17326_v23 = vld [vmem:[#allocation77_spill] sm:$0xff] }
 0x58e   : > { %v11420_v12 = vcombine.low %v9795_v30, %v9805_v8  ;;  %v17327_v54 = vcombine.low %v17325_v5, %v17326_v23 }
 0x591   : > { %12397 = vmatmul.mubr.msk.bf16.gmra.mrb[20].mxu1 %vm6549_vm3, %v11418_v52  ;;  %v17319_v52 = vcombine.low %v17317_v42, %v17318_v45 }
 0x592   : > { %12400 = vmatprep.mubr.msk.bf16.mxu1 %vm6549_vm3, %v11419_v53  ;;  %v17324_v53 = vcombine.low %v16377_v1, %v17323_v47 }
 0x599   : > { %12401 = vmatmul.mubr.msk.bf16.gmra.mrb[24].mxu1 %vm6549_vm3, %v11420_v12 }
 0x59a   : > { %12404 = vmatprep.mubr.msk.bf16.mxu1 %vm6549_vm3, %v11421_v24 }
 0x5a1   : > { %12405 = vmatmul.mubr.msk.bf16.gmra.mrb[28].mxu1 %vm6549_vm3, %v11422_v51 }
 0x5a2   : > { %12410 = vmatprep.mubr.msk.bf16.mxu1 %vm6549_vm3, %v17298_v13  ;;  %v17330_v13 = vmov 0  }
 0x5a9   : > { %12411 = vmatmul.mubr.msk.bf16.vlgmr.msra.gmra.mrb[0].mxu1 %vm6549_vm3, %v17301_v0 }
 0x5aa   : > { %12414 = vmatprep.mubr.msk.bf16.mxu1 %vm6549_vm3, %v17304_v35 }
 0x5b1   : > { %12415 = vmatmul.mubr.msk.bf16.gmra.mrb[4].mxu1 %vm6549_vm3, %v17307_v41 }
 0x5b2   : > { %12418 = vmatprep.mubr.msk.bf16.mxu1 %vm6549_vm3, %v17310_v9 }
 0x5b9   : > { %12419 = vmatmul.mubr.msk.bf16.gmra.mrb[8].mxu1 %vm6549_vm3, %v17313_v58 }
 0x5ba   : > { %12422 = vmatprep.mubr.msk.bf16.mxu1 %vm6549_vm3, %v17316_v2 }
 0x5c1   : > { %12423 = vmatmul.mubr.msk.bf16.gmra.mrb[12].mxu1 %vm6549_vm3, %v17319_v52 }
 0x5c2   : > { %12426 = vmatprep.mubr.msk.bf16.mxu1 %vm6549_vm3, %v17322_v29 }
 0x5c9   : > { %12427 = vmatmul.mubr.msk.bf16.gmra.mrb[16].mxu1 %vm6549_vm3, %v17324_v53  ;;  %v10686_v37 = vpop.permute.xlu1 %10685 }
 0x5ca   : > { %12430 = vmatprep.mubr.msk.bf16.mxu1 %vm6549_vm3, %v17327_v54 }
 0x5d1   : > { %12431 = vmatmul.mubr.msk.bf16.gmra.mrb[20].mxu1 %vm6549_vm3, %v17329_v49  ;;  %v10694_v22 = vpop.permute.xlu1 %10693 }
 0x5d2   : > { %12434 = vmatprep.mubr.msk.bf16.mxu1 %vm6549_vm3, %v11468_v4 }
 0x5d9   : > { %12435 = vmatmul.mubr.msk.bf16.gmra.mrb[24].mxu1 %vm6549_vm3, %v11469_v44 }
 0x5da   : > { %12438 = vmatprep.mubr.msk.bf16.mxu1 %vm6549_vm3, %v11470_v18 }
 0x5e1   : > { %12439 = vmatmul.mubr.msk.bf16.gmra.mrb[28].mxu1 %vm6549_vm3, %v11471_v56 }
 0x67c   : > { %v12412_v1 = vpop.f32.mrb[0].mxu1 }
 0x67d   : > { %v10459_v60 = vpop.f32.mrb[1].mxu1 }
 0x67e   : > { %10618 = vxpose.xlu0.b32.start [1/16] (narrow) %v10459_v60, 8  ;;  %v12413_v62 = vpop.f32.mrb[2].mxu1 }
 0x67f   : > { %v10462_v3 = vpop.f32.mrb[3].mxu1 }
 0x682   : > { %10619 = vxpose.xlu0.b32.cont [2/16] (narrow) %v10462_v3, 8 }
 0x684   : > { %v12416_v4 = vpop.f32.mrb[4].mxu1 }
 0x685   : > { %v10475_v17 = vpop.f32.mrb[5].mxu1 }
 0x686   : > { %10620 = vxpose.xlu0.b32.cont [3/16] (narrow) %v12412_v1, 8  ;;  %v12417_v7 = vpop.f32.mrb[6].mxu1 }
 0x687   : > { %v10478_v44 = vpop.f32.mrb[7].mxu1 }
 0x68a   : > { %10621 = vxpose.xlu0.b32.cont [4/16] (narrow) %v12413_v62, 8 }
 0x68c   : > { %v12420_v10 = vpop.f32.mrb[8].mxu1 }
 0x68d   : > { %v10491_v63 = vpop.f32.mrb[9].mxu1 }
 0x68e   : > { %10622 = vxpose.xlu0.b32.cont [5/16] (narrow) %v10475_v17, 8  ;;  %v12421_v18 = vpop.f32.mrb[10].mxu1 }
 0x68f   : > { %v10494_v16 = vpop.f32.mrb[11].mxu1 }
 0x692   : > { %10623 = vxpose.xlu0.b32.cont [6/16] (narrow) %v10478_v44, 8 }
 0x694   : > { %v12424_v34 = vpop.f32.mrb[12].mxu1 }
 0x695   : > { %v10507_v57 = vpop.f32.mrb[13].mxu1 }
 0x696   : > { %10624 = vxpose.xlu0.b32.cont [7/16] (narrow) %v12416_v4, 8  ;;  %v12425_v56 = vpop.f32.mrb[14].mxu1 }
 0x697   : > { %v10510_v61 = vpop.f32.mrb[15].mxu1 }
 0x69a   : > { %10625 = vxpose.xlu0.b32.cont [8/16] (narrow) %v12417_v7, 8 }
 0x69c   : > { %v12428_v28 = vpop.f32.mrb[16].mxu1 }
 0x69d   : > { %v10523_v26 = vpop.f32.mrb[17].mxu1 }
 0x69e   : > { %10626 = vxpose.xlu0.b32.cont [9/16] (narrow) %v10491_v63, 8  ;;  %10650 = vxpose.xlu1.b32.start [1/16] (narrow) %v10523_v26, 8  ;;  %v12429_v8 = vpop.f32.mrb[18].mxu1 }
 0x69f   : > { %v10526_v55 = vpop.f32.mrb[19].mxu1 }
 0x6a2   : > { %10627 = vxpose.xlu0.b32.cont [10/16] (narrow) %v10494_v16, 8  ;;  %10651 = vxpose.xlu1.b32.cont [2/16] (narrow) %v10526_v55, 8 }
 0x6a4   : > { %v12432_v30 = vpop.f32.mrb[20].mxu1 }
 0x6a5   : > { %v10539_v39 = vpop.f32.mrb[21].mxu1 }
 0x6a6   : > { %10628 = vxpose.xlu0.b32.cont [11/16] (narrow) %v12420_v10, 8  ;;  %10652 = vxpose.xlu1.b32.cont [3/16] (narrow) %v12428_v28, 8  ;;  %v12433_v36 = vpop.f32.mrb[22].mxu1 }
 0x6a7   : > { %v10542_v6 = vpop.f32.mrb[23].mxu1 }
 0x6aa   : > { %10629 = vxpose.xlu0.b32.cont [12/16] (narrow) %v12421_v18, 8  ;;  %10653 = vxpose.xlu1.b32.cont [4/16] (narrow) %v12429_v8, 8 }
 0x6ac   : > { %v12436_v12 = vpop.f32.mrb[24].mxu1 }
 0x6ad   : > { %v10555_v50 = vpop.f32.mrb[25].mxu1 }
 0x6ae   : > { %10630 = vxpose.xlu0.b32.cont [13/16] (narrow) %v10507_v57, 8  ;;  %10654 = vxpose.xlu1.b32.cont [5/16] (narrow) %v10539_v39, 8  ;;  %v12437_v24 = vpop.f32.mrb[26].mxu1 }
 0x6af   : > { %v10558_v25 = vpop.f32.mrb[27].mxu1 }
 0x6b2   : > { %10631 = vxpose.xlu0.b32.cont [14/16] (narrow) %v10510_v61, 8  ;;  %10655 = vxpose.xlu1.b32.cont [6/16] (narrow) %v10542_v6, 8 }
 0x6b4   : > { %v12440_v40 = vpop.f32.mrb[28].mxu1 }
 0x6b5   : > { %v10571_v51 = vpop.f32.mrb[29].mxu1 }
 0x6b6   : > { %10632 = vxpose.xlu0.b32.cont [15/16] (narrow) %v12424_v34, 8  ;;  %10656 = vxpose.xlu1.b32.cont [7/16] (narrow) %v12432_v30, 8  ;;  %v12441_v48 = vpop.f32.mrb[30].mxu1 }
 0x6b7   : > { %v10574_v11 = vpop.f32.mrb[31].mxu1 }
 0x6ba   : > { %10633 = vxpose.xlu0.b32.end [16/16] (narrow) %v12425_v56, 8  ;;  %10657 = vxpose.xlu1.b32.cont [8/16] (narrow) %v12433_v36, 8 }
 0x6be   : > { %10658 = vxpose.xlu1.b32.cont [9/16] (narrow) %v10555_v50, 8 }
 0x6c2   : > { %10659 = vxpose.xlu1.b32.cont [10/16] (narrow) %v10558_v25, 8 }
 0x6c6   : > { %10660 = vxpose.xlu1.b32.cont [11/16] (narrow) %v12436_v12, 8 }
 0x6ca   : > { %10661 = vxpose.xlu1.b32.cont [12/16] (narrow) %v12437_v24, 8 }
 0x6ce   : > { %10662 = vxpose.xlu1.b32.cont [13/16] (narrow) %v10571_v51, 8 }
 0x6d2   : > { %10663 = vxpose.xlu1.b32.cont [14/16] (narrow) %v10574_v11, 8 }
 0x6d6   : > { %10664 = vxpose.xlu1.b32.cont [15/16] (narrow) %v12440_v40, 8 }
 0x6da   : > { %10665 = vxpose.xlu1.b32.end [16/16] (narrow) %v12441_v48, 8 }
 0x6e3   : > { %12982 = vset.pattern.permute.xlu0 %v17330_v13 }
 0x6fe   : > { %v10634_v33 = vpop.trf.xlu0 }
 0x6ff   : > { %v10688_v0 = vmul.f32 %v10686_v37, %v10634_v33 }
 0x701   : > { %v10696_v14 = vadd.f32 %v10694_v22, %v10688_v0 }
 0x703   : > { %v10698_v35 = vmax.f32 %v10696_v14, 0.0 }
 0x705   : > { %10700 = vst [vmem:[%s278_s16] sm:$0xff] %v10698_v35 }
 0x71e   : > { %v10666_v20 = vpop.trf.xlu1 }
 0x71f   : > { %v10689_v38 = vmul.f32 %v10686_v37, %v10666_v20 }
 0x721   : > { %v10697_v41 = vadd.f32 %v10694_v22, %v10689_v38 }
 0x723   : > { %v10699_v27 = vmax.f32 %v10697_v41, 0.0 }
 0x725   : > { %10701 = vst [vmem:[%s278_s16 + $0x8] sm:$0xff] %v10699_v27 }
 0x726 PF: > { %s17_s24 = sadd.s32 1, %s13105_s24  }
 0x727   : > { %p14_p4 = scmp.ge.s32.totalorder %s17_s24, 4  }
 0x729   :  { %16 = sbr.rel (!%p14_p4) target bundleno = 1 (0x1), region = 98 }

</bundles_post_ra>
